<compile_context>
chip_gen: v6e
topology: v6e:2x2x1
jax: 0.10.0
libtpu: 0.0.40
codegen_flags: <defaults>
</compile_context>

<pallas_src>
import functools
import math

import jax
import jax.numpy as jnp
from jax.experimental import pallas as pl
from jax.experimental.pallas import tpu as pltpu


# ----------------------------------------------------------------------------
# Tiling helpers
# ----------------------------------------------------------------------------
def _round_up(x, m):
    return ((x + m - 1) // m) * m


def _pick_tile(dim, target, align):
    """Return (padded_dim, tile): tile | padded_dim, tile % align == 0, tile <= target
    (unless dim itself is small, in which case the whole padded dim is one tile)."""
    padded = _round_up(dim, align)
    if padded <= target:
        return padded, padded
    best = align
    t = align
    while t <= target:
        if padded % t == 0:
            best = t
        t += align
    return padded, best


# ----------------------------------------------------------------------------
# Pallas kernels
# ----------------------------------------------------------------------------
def _conv_matmul_kernel(*refs, apply_relu, has_res):
    """Tiled matmul with f32 accumulator and fused bias / residual / ReLU epilogue."""
    if has_res:
        a_ref, b_ref, bias_ref, res_ref, o_ref, acc_ref = refs
    else:
        a_ref, b_ref, bias_ref, o_ref, acc_ref = refs
        res_ref = None

    k = pl.program_id(2)

    @pl.when(k == 0)
    def _():
        acc_ref[...] = jnp.zeros_like(acc_ref)

    acc_ref[...] += jnp.dot(a_ref[...], b_ref[...],
                            preferred_element_type=jnp.float32)

    @pl.when(k == pl.num_programs(2) - 1)
    def _():
        out = acc_ref[...] + bias_ref[...]
        if res_ref is not None:
            out = out + res_ref[...].astype(jnp.float32)
        if apply_relu:
            out = jnp.maximum(out, 0.0)
        o_ref[...] = out.astype(o_ref.dtype)


def matmul_bias_act(a, b, bias, *, apply_relu, residual=None):
    """(M,K)@(K,N) + bias[N] (+ residual[M,N]) (+ ReLU) on the MXU, tiled & pipelined.

    a: (M, K) activations (any float dtype, cast to bf16)
    b: (K, N) weights
    bias: (N,) f32
    residual: optional (M, N) activations fused into the epilogue.
    Returns (M, N) bf16.
    """
    M, K = a.shape
    K2, N = b.shape
    assert K == K2 and bias.shape == (N,)

    Mp, tm = _pick_tile(M, 256, 8)
    Kp, tk = _pick_tile(K, 512, 128)
    tn = N if N <= 256 else 256
    assert N % tn == 0

    if Mp != M or Kp != K:
        a = jnp.pad(a, ((0, Mp - M), (0, Kp - K)))
    if Kp != K:
        b = jnp.pad(b, ((0, Kp - K), (0, 0)))
    a = a.astype(jnp.bfloat16)
    b = b.astype(jnp.bfloat16)
    bias2 = bias.reshape(1, N).astype(jnp.float32)

    inputs = [a, b, bias2]
    in_specs = [
        pl.BlockSpec((tm, tk), lambda i, j, k: (i, k)),
        pl.BlockSpec((tk, tn), lambda i, j, k: (k, j)),
        pl.BlockSpec((1, tn), lambda i, j, k: (0, j)),
    ]
    has_res = residual is not None
    if has_res:
        r = residual
        if Mp != M:
            r = jnp.pad(r, ((0, Mp - M), (0, 0)))
        inputs.append(r.astype(jnp.bfloat16))
        in_specs.append(pl.BlockSpec((tm, tn), lambda i, j, k: (i, j)))

    grid = (Mp // tm, N // tn, Kp // tk)
    kernel = functools.partial(_conv_matmul_kernel,
                               apply_relu=apply_relu, has_res=has_res)

    flops = 2 * Mp * N * Kp
    bytes_accessed = (Mp * Kp * 2 + Kp * N * 2 + N * 4 + Mp * N * 2
                      + (Mp * N * 2 if has_res else 0))

    out = pl.pallas_call(
        kernel,
        out_shape=jax.ShapeDtypeStruct((Mp, N), jnp.bfloat16),
        grid=grid,
        in_specs=in_specs,
        out_specs=pl.BlockSpec((tm, tn), lambda i, j, k: (i, j)),
        scratch_shapes=[pltpu.VMEM((tm, tn), jnp.float32)],
        compiler_params=pltpu.CompilerParams(
            dimension_semantics=("parallel", "parallel", "arbitrary")),
        cost_estimate=pl.CostEstimate(
            flops=flops, transcendentals=0, bytes_accessed=bytes_accessed),
    )(*inputs)
    return out[:M] if Mp != M else out


def _maxpool_kernel(p_ref, o_ref):
    # max over the 9 pooling taps (cross-sublane reduce -> XLU); f32 compare for
    # portability across generations.
    o_ref[...] = jnp.max(p_ref[...].astype(jnp.float32), axis=1).astype(o_ref.dtype)


def maxpool_patches(patches):
    """Max over the 9 pooling taps: patches (M, 9, C) -> (M, C), tiled over M."""
    M, KK, C = patches.shape
    Mp, tm = _pick_tile(M, 512, 8)
    if Mp != M:
        patches = jnp.pad(patches, ((0, Mp - M), (0, 0), (0, 0)))
    out = pl.pallas_call(
        _maxpool_kernel,
        out_shape=jax.ShapeDtypeStruct((Mp, C), patches.dtype),
        grid=(Mp // tm,),
        in_specs=[pl.BlockSpec((tm, KK, C), lambda i: (i, 0, 0))],
        out_specs=pl.BlockSpec((tm, C), lambda i: (i, 0)),
        compiler_params=pltpu.CompilerParams(dimension_semantics=("parallel",)),
    )(patches)
    return out[:M] if Mp != M else out


# ----------------------------------------------------------------------------
# JAX glue: im2col patch extraction (pure data movement)
# ----------------------------------------------------------------------------
def extract_patches(x, kh, kw, stride, pad, pad_value=0.0):
    """x: (N,H,W,C) NHWC -> patches (N*Ho*Wo, kh*kw*C) with K-order (dy, dx, c)."""
    N, H, W, C = x.shape
    xp = jnp.pad(
        x, ((0, 0), (pad, pad), (pad, pad), (0, 0)), constant_values=pad_value
    )
    Ho = (H + 2 * pad - kh) // stride + 1
    Wo = (W + 2 * pad - kw) // stride + 1
    cols = []
    for di in range(kh):
        for dj in range(kw):
            s = jax.lax.slice(
                xp,
                (0, di, dj, 0),
                (N, di + (Ho - 1) * stride + 1, dj + (Wo - 1) * stride + 1, C),
                (1, stride, stride, 1),
            )
            cols.append(s)
    patches = jnp.stack(cols, axis=-2)          # (N, Ho, Wo, kh*kw, C)
    return patches.reshape(N * Ho * Wo, kh * kw * C), (N, Ho, Wo)


def conv_bn_act(x, params, stride, pad, apply_relu, residual=None):
    """Conv + folded-BN (+residual) (+ReLU).  x NHWC bf16, W (kh,kw,Cin,Cout)."""
    W, bias = params
    kh, kw, cin, cout = W.shape
    a, (N, Ho, Wo) = extract_patches(x, kh, kw, stride, pad, 0.0)
    b = W.reshape(kh * kw * cin, cout)
    res = None if residual is None else residual.reshape(N * Ho * Wo, cout)
    out = matmul_bias_act(a, b, bias, apply_relu=apply_relu, residual=res)
    return out.reshape(N, Ho, Wo, cout)


def basic_block(x, blk, stride):
    identity = x
    out = conv_bn_act(x, blk["conv1"], stride, 1, apply_relu=True)
    if "down" in blk:
        identity = conv_bn_act(x, blk["down"], stride, 0, apply_relu=False)
    # conv2 with residual add + ReLU fused into the matmul epilogue.
    return conv_bn_act(out, blk["conv2"], 1, 1, apply_relu=True, residual=identity)


# ----------------------------------------------------------------------------
# Deterministic parameter construction (eval-mode BN folded into conv)
# ----------------------------------------------------------------------------
def make_conv_bn(key, kh, kw, cin, cout):
    k1, k2, k3, k4, k5 = jax.random.split(key, 5)
    fan_in = kh * kw * cin
    W = jax.random.normal(k1, (kh, kw, cin, cout), jnp.float32) * math.sqrt(2.0 / fan_in)
    gamma = 1.0 + 0.1 * jax.random.normal(k2, (cout,), jnp.float32)
    beta = 0.1 * jax.random.normal(k3, (cout,), jnp.float32)
    mean = 0.1 * jax.random.normal(k4, (cout,), jnp.float32)
    var = 1.0 + 0.1 * jax.random.uniform(k5, (cout,), jnp.float32)
    scale = gamma / jnp.sqrt(var + 1e-5)
    W_folded = (W * scale[None, None, None, :]).astype(jnp.bfloat16)
    bias = (beta - mean * scale).astype(jnp.float32)
    return (W_folded, bias)


def init_resnet18_params(key):
    keys = iter(jax.random.split(key, 64))
    params = {"stem": make_conv_bn(next(keys), 7, 7, 3, 64), "layers": []}
    cfgs = [(64, 64, 1), (64, 128, 2), (128, 256, 2), (256, 512, 2)]
    for cin, cout, stride in cfgs:
        blocks = []
        blk0 = {
            "conv1": make_conv_bn(next(keys), 3, 3, cin, cout),
            "conv2": make_conv_bn(next(keys), 3, 3, cout, cout),
        }
        if stride != 1 or cin != cout:
            blk0["down"] = make_conv_bn(next(keys), 1, 1, cin, cout)
        blocks.append((blk0, stride))
        blk1 = {
            "conv1": make_conv_bn(next(keys), 3, 3, cout, cout),
            "conv2": make_conv_bn(next(keys), 3, 3, cout, cout),
        }
        blocks.append((blk1, 1))
        params["layers"].append(blocks)
    return params


# ----------------------------------------------------------------------------
# FeatureExtractor.forward : ResNet18 children()[:-2]
#   conv1 -> bn1 -> relu -> maxpool -> layer1..layer4
# ----------------------------------------------------------------------------
def feature_extractor_forward(params, x_nchw):
    x = jnp.transpose(x_nchw, (0, 2, 3, 1)).astype(jnp.bfloat16)  # NCHW -> NHWC
    x = conv_bn_act(x, params["stem"], stride=2, pad=3, apply_relu=True)

    # maxpool 3x3 stride 2 pad 1 (input is post-ReLU, so 0-padding never wins the max)
    C = x.shape[-1]
    p, (N, Ho, Wo) = extract_patches(x, 3, 3, 2, 1, pad_value=0.0)
    x = maxpool_patches(p.reshape(N * Ho * Wo, 9, C)).reshape(N, Ho, Wo, C)

    for blocks in params["layers"]:
        for blk, stride in blocks:
            x = basic_block(x, blk, stride)

    return jnp.transpose(x, (0, 3, 1, 2)).astype(jnp.float32)     # NHWC -> NCHW


if __name__ == "__main__":
    key = jax.random.PRNGKey(0)
    kp, kx = jax.random.split(key)
    params = init_resnet18_params(kp)

    # Small input consistent with the module: NCHW, 3 channels (ResNet stem).
    x = jax.random.normal(kx, (2, 3, 32, 32), jnp.float32)

    fwd = jax.jit(lambda inp: feature_extractor_forward(params, inp))
    out = fwd(x)
    jax.block_until_ready(out)

    # ResNet18 feature map: stride-32 reduction, 512 channels.
    assert out.shape == (2, 512, 1, 1), out.shape
    assert out.dtype == jnp.float32
    print("KERNEL_OK")
</pallas_src>

<mosaic_0001>
module attributes {stable_mosaic.version = 11 : i64} {
  func.func @_conv_matmul_kernel(%arg0: i32, %arg1: i32, %arg2: i32, %arg3: memref<256x256xbf16, #tpu.memory_space<vmem>>, %arg4: memref<256x64xbf16, #tpu.memory_space<vmem>>, %arg5: memref<1x64xf32, #tpu.memory_space<vmem>>, %arg6: memref<256x64xbf16, #tpu.memory_space<vmem>>, %arg7: memref<256x64xf32, #tpu.memory_space<vmem>>) attributes {dimension_semantics = [#tpu.dimension_semantics<parallel>, #tpu.dimension_semantics<parallel>, #tpu.dimension_semantics<arbitrary>], iteration_bounds = array<i64: 2, 1, 1>, scalar_prefetch = 0 : i64, scratch_operands = 1 : i64, tpu.core_type = #tpu.core_type<tc>, window_params = [{transform_indices = @transform_0, window_bounds = array<i64: 256, 256>}, {transform_indices = @transform_1, window_bounds = array<i64: 256, 64>}, {transform_indices = @transform_2, window_bounds = array<i64: 1, 64>}, {transform_indices = @transform_3, window_bounds = array<i64: 256, 64>}]} {
    %c0_i32 = arith.constant 0 : i32
    %0 = arith.cmpi eq, %arg2, %c0_i32 : i32
    %1 = arith.extui %0 : i1 to i32
    %c0_i32_0 = arith.constant 0 : i32
    %2 = arith.cmpi ne, %1, %c0_i32_0 : i32
    scf.if %2 {
      %cst_10 = arith.constant 0.000000e+00 : f32
      %12 = vector.broadcast %cst_10 : f32 to vector<256x64xf32>
      %c0_11 = arith.constant 0 : index
      %c0_12 = arith.constant 0 : index
      %13 = vector.load %arg7[%c0_11, %c0_12] : memref<256x64xf32, #tpu.memory_space<vmem>>, vector<256x64xf32>
      tpu.vector_store %arg7[%c0_11, %c0_12], %12 {strides = array<i32>} : memref<256x64xf32, #tpu.memory_space<vmem>>, vector<256x64xf32>,
    } else {
    }
    %c0 = arith.constant 0 : index
    %c0_1 = arith.constant 0 : index
    %3 = vector.load %arg7[%c0, %c0_1] : memref<256x64xf32, #tpu.memory_space<vmem>>, vector<256x64xf32>
    %c0_2 = arith.constant 0 : index
    %c0_3 = arith.constant 0 : index
    %4 = vector.load %arg3[%c0_2, %c0_3] : memref<256x256xbf16, #tpu.memory_space<vmem>>, vector<256x256xbf16>
    %c0_4 = arith.constant 0 : index
    %c0_5 = arith.constant 0 : index
    %5 = vector.load %arg4[%c0_4, %c0_5] : memref<256x64xbf16, #tpu.memory_space<vmem>>, vector<256x64xbf16>
    %cst = arith.constant dense<0.000000e+00> : vector<256x64xf32>
    %6 = tpu.matmul %4, %5, %cst {dimension_numbers = #tpu.dot_dimension_numbers<[1], [0], [0], [1], [0, 0, 1, 1], [], []>} : vector<256x256xbf16>, vector<256x64xbf16>, vector<256x64xf32> -> vector<256x64xf32>
    %7 = arith.addf %3, %6 : vector<256x64xf32>
    %c0_6 = arith.constant 0 : index
    %c0_7 = arith.constant 0 : index
    %8 = vector.load %arg7[%c0_6, %c0_7] : memref<256x64xf32, #tpu.memory_space<vmem>>, vector<256x64xf32>
    tpu.vector_store %arg7[%c0_6, %c0_7], %7 {strides = array<i32>} : memref<256x64xf32, #tpu.memory_space<vmem>>, vector<256x64xf32>,
    %c0_i32_8 = arith.constant 0 : i32
    %9 = arith.cmpi eq, %arg2, %c0_i32_8 : i32
    %10 = arith.extui %9 : i1 to i32
    %c0_i32_9 = arith.constant 0 : i32
    %11 = arith.cmpi ne, %10, %c0_i32_9 : i32
    scf.if %11 {
      %c0_10 = arith.constant 0 : index
      %c0_11 = arith.constant 0 : index
      %12 = vector.load %arg7[%c0_10, %c0_11] : memref<256x64xf32, #tpu.memory_space<vmem>>, vector<256x64xf32>
      %c0_12 = arith.constant 0 : index
      %c0_13 = arith.constant 0 : index
      %13 = vector.load %arg5[%c0_12, %c0_13] : memref<1x64xf32, #tpu.memory_space<vmem>>, vector<1x64xf32>
      %14 = vector.broadcast %13 : vector<1x64xf32> to vector<256x64xf32>
      %15 = arith.addf %12, %14 : vector<256x64xf32>
      %cst_14 = arith.constant 0.000000e+00 : f32
      %16 = vector.broadcast %cst_14 : f32 to vector<256x64xf32>
      %17 = arith.maximumf %15, %16 : vector<256x64xf32>
      %18 = arith.truncf %17 : vector<256x64xf32> to vector<256x64xbf16>
      %c0_15 = arith.constant 0 : index
      %c0_16 = arith.constant 0 : index
      %19 = vector.load %arg6[%c0_15, %c0_16] : memref<256x64xbf16, #tpu.memory_space<vmem>>, vector<256x64xbf16>
      tpu.vector_store %arg6[%c0_15, %c0_16], %18 {strides = array<i32>} : memref<256x64xbf16, #tpu.memory_space<vmem>>, vector<256x64xbf16>,
    } else {
    }
    return
  }
  func.func @transform_0(%arg0: i32, %arg1: i32, %arg2: i32) -> (i32, i32) {
    %c0_i32 = arith.constant 0 : i32
    return %arg0, %arg2 : i32, i32
  }
  func.func @transform_1(%arg0: i32, %arg1: i32, %arg2: i32) -> (i32, i32) {
    %c0_i32 = arith.constant 0 : i32
    return %arg2, %arg1 : i32, i32
  }
  func.func @transform_2(%arg0: i32, %arg1: i32, %arg2: i32) -> (i32, i32) {
    %c0_i32 = arith.constant 0 : i32
    %c0_i32_0 = arith.constant 0 : i32
    return %c0_i32, %arg1 : i32, i32
  }
  func.func @transform_3(%arg0: i32, %arg1: i32, %arg2: i32) -> (i32, i32) {
    %c0_i32 = arith.constant 0 : i32
    return %arg0, %arg1 : i32, i32
  }
}

module attributes {stable_mosaic.version = 11 : i64} {
  func.func @_maxpool_kernel(%arg0: i32, %arg1: memref<128x9x64xbf16, #tpu.memory_space<vmem>>, %arg2: memref<128x64xbf16, #tpu.memory_space<vmem>>) attributes {dimension_semantics = [#tpu.dimension_semantics<parallel>], iteration_bounds = array<i64: 1>, scalar_prefetch = 0 : i64, scratch_operands = 0 : i64, tpu.core_type = #tpu.core_type<tc>, window_params = [{transform_indices = @transform_0, window_bounds = array<i64: 128, 9, 64>}, {transform_indices = @transform_1, window_bounds = array<i64: 128, 64>}]} {
    %c0 = arith.constant 0 : index
    %c0_0 = arith.constant 0 : index
    %c0_1 = arith.constant 0 : index
    %0 = vector.load %arg1[%c0, %c0_0, %c0_1] : memref<128x9x64xbf16, #tpu.memory_space<vmem>>, vector<128x9x64xbf16>
    %1 = arith.extf %0 : vector<128x9x64xbf16> to vector<128x9x64xf32>
    %cst = arith.constant dense<0xFF800000> : vector<128x64xf32>
    %2 = vector.multi_reduction <maximumf>, %1, %cst [1] : vector<128x9x64xf32> to vector<128x64xf32>
    %3 = arith.truncf %2 : vector<128x64xf32> to vector<128x64xbf16>
    %c0_2 = arith.constant 0 : index
    %c0_3 = arith.constant 0 : index
    %4 = vector.load %arg2[%c0_2, %c0_3] : memref<128x64xbf16, #tpu.memory_space<vmem>>, vector<128x64xbf16>
    tpu.vector_store %arg2[%c0_2, %c0_3], %3 {strides = array<i32>} : memref<128x64xbf16, #tpu.memory_space<vmem>>, vector<128x64xbf16>,
    return
  }
  func.func @transform_0(%arg0: i32) -> (i32, i32, i32) {
    %c0_i32 = arith.constant 0 : i32
    %c0_i32_0 = arith.constant 0 : i32
    %c0_i32_1 = arith.constant 0 : i32
    return %arg0, %c0_i32, %c0_i32_0 : i32, i32, i32
  }
  func.func @transform_1(%arg0: i32) -> (i32, i32) {
    %c0_i32 = arith.constant 0 : i32
    %c0_i32_0 = arith.constant 0 : i32
    return %arg0, %c0_i32 : i32, i32
  }
}

module attributes {stable_mosaic.version = 11 : i64} {
  func.func @_conv_matmul_kernel(%arg0: i32, %arg1: i32, %arg2: i32, %arg3: memref<128x128xbf16, #tpu.memory_space<vmem>>, %arg4: memref<128x64xbf16, #tpu.memory_space<vmem>>, %arg5: memref<1x64xf32, #tpu.memory_space<vmem>>, %arg6: memref<128x64xbf16, #tpu.memory_space<vmem>>, %arg7: memref<128x64xf32, #tpu.memory_space<vmem>>) attributes {dimension_semantics = [#tpu.dimension_semantics<parallel>, #tpu.dimension_semantics<parallel>, #tpu.dimension_semantics<arbitrary>], iteration_bounds = array<i64: 1, 1, 5>, scalar_prefetch = 0 : i64, scratch_operands = 1 : i64, tpu.core_type = #tpu.core_type<tc>, window_params = [{transform_indices = @transform_0, window_bounds = array<i64: 128, 128>}, {transform_indices = @transform_1, window_bounds = array<i64: 128, 64>}, {transform_indices = @transform_2, window_bounds = array<i64: 1, 64>}, {transform_indices = @transform_3, window_bounds = array<i64: 128, 64>}]} {
    %c0_i32 = arith.constant 0 : i32
    %0 = arith.cmpi eq, %arg2, %c0_i32 : i32
    %1 = arith.extui %0 : i1 to i32
    %c0_i32_0 = arith.constant 0 : i32
    %2 = arith.cmpi ne, %1, %c0_i32_0 : i32
    scf.if %2 {
      %cst_9 = arith.constant 0.000000e+00 : f32
      %12 = vector.broadcast %cst_9 : f32 to vector<128x64xf32>
      %c0_10 = arith.constant 0 : index
      %c0_11 = arith.constant 0 : index
      %13 = vector.load %arg7[%c0_10, %c0_11] : memref<128x64xf32, #tpu.memory_space<vmem>>, vector<128x64xf32>
      tpu.vector_store %arg7[%c0_10, %c0_11], %12 {strides = array<i32>} : memref<128x64xf32, #tpu.memory_space<vmem>>, vector<128x64xf32>,
    } else {
    }
    %c0 = arith.constant 0 : index
    %c0_1 = arith.constant 0 : index
    %3 = vector.load %arg7[%c0, %c0_1] : memref<128x64xf32, #tpu.memory_space<vmem>>, vector<128x64xf32>
    %c0_2 = arith.constant 0 : index
    %c0_3 = arith.constant 0 : index
    %4 = vector.load %arg3[%c0_2, %c0_3] : memref<128x128xbf16, #tpu.memory_space<vmem>>, vector<128x128xbf16>
    %c0_4 = arith.constant 0 : index
    %c0_5 = arith.constant 0 : index
    %5 = vector.load %arg4[%c0_4, %c0_5] : memref<128x64xbf16, #tpu.memory_space<vmem>>, vector<128x64xbf16>
    %cst = arith.constant dense<0.000000e+00> : vector<128x64xf32>
    %6 = tpu.matmul %4, %5, %cst {dimension_numbers = #tpu.dot_dimension_numbers<[1], [0], [0], [1], [0, 0, 1, 1], [], []>} : vector<128x128xbf16>, vector<128x64xbf16>, vector<128x64xf32> -> vector<128x64xf32>
    %7 = arith.addf %3, %6 : vector<128x64xf32>
    %c0_6 = arith.constant 0 : index
    %c0_7 = arith.constant 0 : index
    %8 = vector.load %arg7[%c0_6, %c0_7] : memref<128x64xf32, #tpu.memory_space<vmem>>, vector<128x64xf32>
    tpu.vector_store %arg7[%c0_6, %c0_7], %7 {strides = array<i32>} : memref<128x64xf32, #tpu.memory_space<vmem>>, vector<128x64xf32>,
    %c4_i32 = arith.constant 4 : i32
    %9 = arith.cmpi eq, %arg2, %c4_i32 : i32
    %10 = arith.extui %9 : i1 to i32
    %c0_i32_8 = arith.constant 0 : i32
    %11 = arith.cmpi ne, %10, %c0_i32_8 : i32
    scf.if %11 {
      %c0_9 = arith.constant 0 : index
      %c0_10 = arith.constant 0 : index
      %12 = vector.load %arg7[%c0_9, %c0_10] : memref<128x64xf32, #tpu.memory_space<vmem>>, vector<128x64xf32>
      %c0_11 = arith.constant 0 : index
      %c0_12 = arith.constant 0 : index
      %13 = vector.load %arg5[%c0_11, %c0_12] : memref<1x64xf32, #tpu.memory_space<vmem>>, vector<1x64xf32>
      %14 = vector.broadcast %13 : vector<1x64xf32> to vector<128x64xf32>
      %15 = arith.addf %12, %14 : vector<128x64xf32>
      %cst_13 = arith.constant 0.000000e+00 : f32
      %16 = vector.broadcast %cst_13 : f32 to vector<128x64xf32>
      %17 = arith.maximumf %15, %16 : vector<128x64xf32>
      %18 = arith.truncf %17 : vector<128x64xf32> to vector<128x64xbf16>
      %c0_14 = arith.constant 0 : index
      %c0_15 = arith.constant 0 : index
      %19 = vector.load %arg6[%c0_14, %c0_15] : memref<128x64xbf16, #tpu.memory_space<vmem>>, vector<128x64xbf16>
      tpu.vector_store %arg6[%c0_14, %c0_15], %18 {strides = array<i32>} : memref<128x64xbf16, #tpu.memory_space<vmem>>, vector<128x64xbf16>,
    } else {
    }
    return
  }
  func.func @transform_0(%arg0: i32, %arg1: i32, %arg2: i32) -> (i32, i32) {
    %c0_i32 = arith.constant 0 : i32
    return %arg0, %arg2 : i32, i32
  }
  func.func @transform_1(%arg0: i32, %arg1: i32, %arg2: i32) -> (i32, i32) {
    %c0_i32 = arith.constant 0 : i32
    return %arg2, %arg1 : i32, i32
  }
  func.func @transform_2(%arg0: i32, %arg1: i32, %arg2: i32) -> (i32, i32) {
    %c0_i32 = arith.constant 0 : i32
    %c0_i32_0 = arith.constant 0 : i32
    return %c0_i32, %arg1 : i32, i32
  }
  func.func @transform_3(%arg0: i32, %arg1: i32, %arg2: i32) -> (i32, i32) {
    %c0_i32 = arith.constant 0 : i32
    return %arg0, %arg1 : i32, i32
  }
}

module attributes {stable_mosaic.version = 11 : i64} {
  func.func @_conv_matmul_kernel(%arg0: i32, %arg1: i32, %arg2: i32, %arg3: memref<128x128xbf16, #tpu.memory_space<vmem>>, %arg4: memref<128x64xbf16, #tpu.memory_space<vmem>>, %arg5: memref<1x64xf32, #tpu.memory_space<vmem>>, %arg6: memref<128x64xbf16, #tpu.memory_space<vmem>>, %arg7: memref<128x64xbf16, #tpu.memory_space<vmem>>, %arg8: memref<128x64xf32, #tpu.memory_space<vmem>>) attributes {dimension_semantics = [#tpu.dimension_semantics<parallel>, #tpu.dimension_semantics<parallel>, #tpu.dimension_semantics<arbitrary>], iteration_bounds = array<i64: 1, 1, 5>, scalar_prefetch = 0 : i64, scratch_operands = 1 : i64, tpu.core_type = #tpu.core_type<tc>, window_params = [{transform_indices = @transform_0, window_bounds = array<i64: 128, 128>}, {transform_indices = @transform_1, window_bounds = array<i64: 128, 64>}, {transform_indices = @transform_2, window_bounds = array<i64: 1, 64>}, {transform_indices = @transform_3, window_bounds = array<i64: 128, 64>}, {transform_indices = @transform_4, window_bounds = array<i64: 128, 64>}]} {
    %c0_i32 = arith.constant 0 : i32
    %0 = arith.cmpi eq, %arg2, %c0_i32 : i32
    %1 = arith.extui %0 : i1 to i32
    %c0_i32_0 = arith.constant 0 : i32
    %2 = arith.cmpi ne, %1, %c0_i32_0 : i32
    scf.if %2 {
      %cst_9 = arith.constant 0.000000e+00 : f32
      %12 = vector.broadcast %cst_9 : f32 to vector<128x64xf32>
      %c0_10 = arith.constant 0 : index
      %c0_11 = arith.constant 0 : index
      %13 = vector.load %arg8[%c0_10, %c0_11] : memref<128x64xf32, #tpu.memory_space<vmem>>, vector<128x64xf32>
      tpu.vector_store %arg8[%c0_10, %c0_11], %12 {strides = array<i32>} : memref<128x64xf32, #tpu.memory_space<vmem>>, vector<128x64xf32>,
    } else {
    }
    %c0 = arith.constant 0 : index
    %c0_1 = arith.constant 0 : index
    %3 = vector.load %arg8[%c0, %c0_1] : memref<128x64xf32, #tpu.memory_space<vmem>>, vector<128x64xf32>
    %c0_2 = arith.constant 0 : index
    %c0_3 = arith.constant 0 : index
    %4 = vector.load %arg3[%c0_2, %c0_3] : memref<128x128xbf16, #tpu.memory_space<vmem>>, vector<128x128xbf16>
    %c0_4 = arith.constant 0 : index
    %c0_5 = arith.constant 0 : index
    %5 = vector.load %arg4[%c0_4, %c0_5] : memref<128x64xbf16, #tpu.memory_space<vmem>>, vector<128x64xbf16>
    %cst = arith.constant dense<0.000000e+00> : vector<128x64xf32>
    %6 = tpu.matmul %4, %5, %cst {dimension_numbers = #tpu.dot_dimension_numbers<[1], [0], [0], [1], [0, 0, 1, 1], [], []>} : vector<128x128xbf16>, vector<128x64xbf16>, vector<128x64xf32> -> vector<128x64xf32>
    %7 = arith.addf %3, %6 : vector<128x64xf32>
    %c0_6 = arith.constant 0 : index
    %c0_7 = arith.constant 0 : index
    %8 = vector.load %arg8[%c0_6, %c0_7] : memref<128x64xf32, #tpu.memory_space<vmem>>, vector<128x64xf32>
    tpu.vector_store %arg8[%c0_6, %c0_7], %7 {strides = array<i32>} : memref<128x64xf32, #tpu.memory_space<vmem>>, vector<128x64xf32>,
    %c4_i32 = arith.constant 4 : i32
    %9 = arith.cmpi eq, %arg2, %c4_i32 : i32
    %10 = arith.extui %9 : i1 to i32
    %c0_i32_8 = arith.constant 0 : i32
    %11 = arith.cmpi ne, %10, %c0_i32_8 : i32
    scf.if %11 {
      %c0_9 = arith.constant 0 : index
      %c0_10 = arith.constant 0 : index
      %12 = vector.load %arg8[%c0_9, %c0_10] : memref<128x64xf32, #tpu.memory_space<vmem>>, vector<128x64xf32>
      %c0_11 = arith.constant 0 : index
      %c0_12 = arith.constant 0 : index
      %13 = vector.load %arg5[%c0_11, %c0_12] : memref<1x64xf32, #tpu.memory_space<vmem>>, vector<1x64xf32>
      %14 = vector.broadcast %13 : vector<1x64xf32> to vector<128x64xf32>
      %15 = arith.addf %12, %14 : vector<128x64xf32>
      %c0_13 = arith.constant 0 : index
      %c0_14 = arith.constant 0 : index
      %16 = vector.load %arg6[%c0_13, %c0_14] : memref<128x64xbf16, #tpu.memory_space<vmem>>, vector<128x64xbf16>
      %17 = arith.extf %16 : vector<128x64xbf16> to vector<128x64xf32>
      %18 = arith.addf %15, %17 : vector<128x64xf32>
      %cst_15 = arith.constant 0.000000e+00 : f32
      %19 = vector.broadcast %cst_15 : f32 to vector<128x64xf32>
      %20 = arith.maximumf %18, %19 : vector<128x64xf32>
      %21 = arith.truncf %20 : vector<128x64xf32> to vector<128x64xbf16>
      %c0_16 = arith.constant 0 : index
      %c0_17 = arith.constant 0 : index
      %22 = vector.load %arg7[%c0_16, %c0_17] : memref<128x64xbf16, #tpu.memory_space<vmem>>, vector<128x64xbf16>
      tpu.vector_store %arg7[%c0_16, %c0_17], %21 {strides = array<i32>} : memref<128x64xbf16, #tpu.memory_space<vmem>>, vector<128x64xbf16>,
    } else {
    }
    return
  }
  func.func @transform_0(%arg0: i32, %arg1: i32, %arg2: i32) -> (i32, i32) {
    %c0_i32 = arith.constant 0 : i32
    return %arg0, %arg2 : i32, i32
  }
  func.func @transform_1(%arg0: i32, %arg1: i32, %arg2: i32) -> (i32, i32) {
    %c0_i32 = arith.constant 0 : i32
    return %arg2, %arg1 : i32, i32
  }
  func.func @transform_2(%arg0: i32, %arg1: i32, %arg2: i32) -> (i32, i32) {
    %c0_i32 = arith.constant 0 : i32
    %c0_i32_0 = arith.constant 0 : i32
    return %c0_i32, %arg1 : i32, i32
  }
  func.func @transform_3(%arg0: i32, %arg1: i32, %arg2: i32) -> (i32, i32) {
    %c0_i32 = arith.constant 0 : i32
    return %arg0, %arg1 : i32, i32
  }
  func.func @transform_4(%arg0: i32, %arg1: i32, %arg2: i32) -> (i32, i32) {
    %c0_i32 = arith.constant 0 : i32
    return %arg0, %arg1 : i32, i32
  }
}

module attributes {stable_mosaic.version = 11 : i64} {
  func.func @_conv_matmul_kernel(%arg0: i32, %arg1: i32, %arg2: i32, %arg3: memref<32x128xbf16, #tpu.memory_space<vmem>>, %arg4: memref<128x128xbf16, #tpu.memory_space<vmem>>, %arg5: memref<1x128xf32, #tpu.memory_space<vmem>>, %arg6: memref<32x128xbf16, #tpu.memory_space<vmem>>, %arg7: memref<32x128xf32, #tpu.memory_space<vmem>>) attributes {dimension_semantics = [#tpu.dimension_semantics<parallel>, #tpu.dimension_semantics<parallel>, #tpu.dimension_semantics<arbitrary>], iteration_bounds = array<i64: 1, 1, 5>, scalar_prefetch = 0 : i64, scratch_operands = 1 : i64, tpu.core_type = #tpu.core_type<tc>, window_params = [{transform_indices = @transform_0, window_bounds = array<i64: 32, 128>}, {transform_indices = @transform_1, window_bounds = array<i64: 128, 128>}, {transform_indices = @transform_2, window_bounds = array<i64: 1, 128>}, {transform_indices = @transform_3, window_bounds = array<i64: 32, 128>}]} {
    %c0_i32 = arith.constant 0 : i32
    %0 = arith.cmpi eq, %arg2, %c0_i32 : i32
    %1 = arith.extui %0 : i1 to i32
    %c0_i32_0 = arith.constant 0 : i32
    %2 = arith.cmpi ne, %1, %c0_i32_0 : i32
    scf.if %2 {
      %cst_9 = arith.constant 0.000000e+00 : f32
      %12 = vector.broadcast %cst_9 : f32 to vector<32x128xf32>
      %c0_10 = arith.constant 0 : index
      %c0_11 = arith.constant 0 : index
      %13 = vector.load %arg7[%c0_10, %c0_11] : memref<32x128xf32, #tpu.memory_space<vmem>>, vector<32x128xf32>
      tpu.vector_store %arg7[%c0_10, %c0_11], %12 {strides = array<i32>} : memref<32x128xf32, #tpu.memory_space<vmem>>, vector<32x128xf32>,
    } else {
    }
    %c0 = arith.constant 0 : index
    %c0_1 = arith.constant 0 : index
    %3 = vector.load %arg7[%c0, %c0_1] : memref<32x128xf32, #tpu.memory_space<vmem>>, vector<32x128xf32>
    %c0_2 = arith.constant 0 : index
    %c0_3 = arith.constant 0 : index
    %4 = vector.load %arg3[%c0_2, %c0_3] : memref<32x128xbf16, #tpu.memory_space<vmem>>, vector<32x128xbf16>
    %c0_4 = arith.constant 0 : index
    %c0_5 = arith.constant 0 : index
    %5 = vector.load %arg4[%c0_4, %c0_5] : memref<128x128xbf16, #tpu.memory_space<vmem>>, vector<128x128xbf16>
    %cst = arith.constant dense<0.000000e+00> : vector<32x128xf32>
    %6 = tpu.matmul %4, %5, %cst {dimension_numbers = #tpu.dot_dimension_numbers<[1], [0], [0], [1], [0, 0, 1, 1], [], []>} : vector<32x128xbf16>, vector<128x128xbf16>, vector<32x128xf32> -> vector<32x128xf32>
    %7 = arith.addf %3, %6 : vector<32x128xf32>
    %c0_6 = arith.constant 0 : index
    %c0_7 = arith.constant 0 : index
    %8 = vector.load %arg7[%c0_6, %c0_7] : memref<32x128xf32, #tpu.memory_space<vmem>>, vector<32x128xf32>
    tpu.vector_store %arg7[%c0_6, %c0_7], %7 {strides = array<i32>} : memref<32x128xf32, #tpu.memory_space<vmem>>, vector<32x128xf32>,
    %c4_i32 = arith.constant 4 : i32
    %9 = arith.cmpi eq, %arg2, %c4_i32 : i32
    %10 = arith.extui %9 : i1 to i32
    %c0_i32_8 = arith.constant 0 : i32
    %11 = arith.cmpi ne, %10, %c0_i32_8 : i32
    scf.if %11 {
      %c0_9 = arith.constant 0 : index
      %c0_10 = arith.constant 0 : index
      %12 = vector.load %arg7[%c0_9, %c0_10] : memref<32x128xf32, #tpu.memory_space<vmem>>, vector<32x128xf32>
      %c0_11 = arith.constant 0 : index
      %c0_12 = arith.constant 0 : index
      %13 = vector.load %arg5[%c0_11, %c0_12] : memref<1x128xf32, #tpu.memory_space<vmem>>, vector<1x128xf32>
      %14 = vector.broadcast %13 : vector<1x128xf32> to vector<32x128xf32>
      %15 = arith.addf %12, %14 : vector<32x128xf32>
      %cst_13 = arith.constant 0.000000e+00 : f32
      %16 = vector.broadcast %cst_13 : f32 to vector<32x128xf32>
      %17 = arith.maximumf %15, %16 : vector<32x128xf32>
      %18 = arith.truncf %17 : vector<32x128xf32> to vector<32x128xbf16>
      %c0_14 = arith.constant 0 : index
      %c0_15 = arith.constant 0 : index
      %19 = vector.load %arg6[%c0_14, %c0_15] : memref<32x128xbf16, #tpu.memory_space<vmem>>, vector<32x128xbf16>
      tpu.vector_store %arg6[%c0_14, %c0_15], %18 {strides = array<i32>} : memref<32x128xbf16, #tpu.memory_space<vmem>>, vector<32x128xbf16>,
    } else {
    }
    return
  }
  func.func @transform_0(%arg0: i32, %arg1: i32, %arg2: i32) -> (i32, i32) {
    %c0_i32 = arith.constant 0 : i32
    return %arg0, %arg2 : i32, i32
  }
  func.func @transform_1(%arg0: i32, %arg1: i32, %arg2: i32) -> (i32, i32) {
    %c0_i32 = arith.constant 0 : i32
    return %arg2, %arg1 : i32, i32
  }
  func.func @transform_2(%arg0: i32, %arg1: i32, %arg2: i32) -> (i32, i32) {
    %c0_i32 = arith.constant 0 : i32
    %c0_i32_0 = arith.constant 0 : i32
    return %c0_i32, %arg1 : i32, i32
  }
  func.func @transform_3(%arg0: i32, %arg1: i32, %arg2: i32) -> (i32, i32) {
    %c0_i32 = arith.constant 0 : i32
    return %arg0, %arg1 : i32, i32
  }
}

module attributes {stable_mosaic.version = 11 : i64} {
  func.func @_conv_matmul_kernel(%arg0: i32, %arg1: i32, %arg2: i32, %arg3: memref<32x384xbf16, #tpu.memory_space<vmem>>, %arg4: memref<384x128xbf16, #tpu.memory_space<vmem>>, %arg5: memref<1x128xf32, #tpu.memory_space<vmem>>, %arg6: memref<32x128xbf16, #tpu.memory_space<vmem>>, %arg7: memref<32x128xbf16, #tpu.memory_space<vmem>>, %arg8: memref<32x128xf32, #tpu.memory_space<vmem>>) attributes {dimension_semantics = [#tpu.dimension_semantics<parallel>, #tpu.dimension_semantics<parallel>, #tpu.dimension_semantics<arbitrary>], iteration_bounds = array<i64: 1, 1, 3>, scalar_prefetch = 0 : i64, scratch_operands = 1 : i64, tpu.core_type = #tpu.core_type<tc>, window_params = [{transform_indices = @transform_0, window_bounds = array<i64: 32, 384>}, {transform_indices = @transform_1, window_bounds = array<i64: 384, 128>}, {transform_indices = @transform_2, window_bounds = array<i64: 1, 128>}, {transform_indices = @transform_3, window_bounds = array<i64: 32, 128>}, {transform_indices = @transform_4, window_bounds = array<i64: 32, 128>}]} {
    %c0_i32 = arith.constant 0 : i32
    %0 = arith.cmpi eq, %arg2, %c0_i32 : i32
    %1 = arith.extui %0 : i1 to i32
    %c0_i32_0 = arith.constant 0 : i32
    %2 = arith.cmpi ne, %1, %c0_i32_0 : i32
    scf.if %2 {
      %cst_9 = arith.constant 0.000000e+00 : f32
      %12 = vector.broadcast %cst_9 : f32 to vector<32x128xf32>
      %c0_10 = arith.constant 0 : index
      %c0_11 = arith.constant 0 : index
      %13 = vector.load %arg8[%c0_10, %c0_11] : memref<32x128xf32, #tpu.memory_space<vmem>>, vector<32x128xf32>
      tpu.vector_store %arg8[%c0_10, %c0_11], %12 {strides = array<i32>} : memref<32x128xf32, #tpu.memory_space<vmem>>, vector<32x128xf32>,
    } else {
    }
    %c0 = arith.constant 0 : index
    %c0_1 = arith.constant 0 : index
    %3 = vector.load %arg8[%c0, %c0_1] : memref<32x128xf32, #tpu.memory_space<vmem>>, vector<32x128xf32>
    %c0_2 = arith.constant 0 : index
    %c0_3 = arith.constant 0 : index
    %4 = vector.load %arg3[%c0_2, %c0_3] : memref<32x384xbf16, #tpu.memory_space<vmem>>, vector<32x384xbf16>
    %c0_4 = arith.constant 0 : index
    %c0_5 = arith.constant 0 : index
    %5 = vector.load %arg4[%c0_4, %c0_5] : memref<384x128xbf16, #tpu.memory_space<vmem>>, vector<384x128xbf16>
    %cst = arith.constant dense<0.000000e+00> : vector<32x128xf32>
    %6 = tpu.matmul %4, %5, %cst {dimension_numbers = #tpu.dot_dimension_numbers<[1], [0], [0], [1], [0, 0, 1, 1], [], []>} : vector<32x384xbf16>, vector<384x128xbf16>, vector<32x128xf32> -> vector<32x128xf32>
    %7 = arith.addf %3, %6 : vector<32x128xf32>
    %c0_6 = arith.constant 0 : index
    %c0_7 = arith.constant 0 : index
    %8 = vector.load %arg8[%c0_6, %c0_7] : memref<32x128xf32, #tpu.memory_space<vmem>>, vector<32x128xf32>
    tpu.vector_store %arg8[%c0_6, %c0_7], %7 {strides = array<i32>} : memref<32x128xf32, #tpu.memory_space<vmem>>, vector<32x128xf32>,
    %c2_i32 = arith.constant 2 : i32
    %9 = arith.cmpi eq, %arg2, %c2_i32 : i32
    %10 = arith.extui %9 : i1 to i32
    %c0_i32_8 = arith.constant 0 : i32
    %11 = arith.cmpi ne, %10, %c0_i32_8 : i32
    scf.if %11 {
      %c0_9 = arith.constant 0 : index
      %c0_10 = arith.constant 0 : index
      %12 = vector.load %arg8[%c0_9, %c0_10] : memref<32x128xf32, #tpu.memory_space<vmem>>, vector<32x128xf32>
      %c0_11 = arith.constant 0 : index
      %c0_12 = arith.constant 0 : index
      %13 = vector.load %arg5[%c0_11, %c0_12] : memref<1x128xf32, #tpu.memory_space<vmem>>, vector<1x128xf32>
      %14 = vector.broadcast %13 : vector<1x128xf32> to vector<32x128xf32>
      %15 = arith.addf %12, %14 : vector<32x128xf32>
      %c0_13 = arith.constant 0 : index
      %c0_14 = arith.constant 0 : index
      %16 = vector.load %arg6[%c0_13, %c0_14] : memref<32x128xbf16, #tpu.memory_space<vmem>>, vector<32x128xbf16>
      %17 = arith.extf %16 : vector<32x128xbf16> to vector<32x128xf32>
      %18 = arith.addf %15, %17 : vector<32x128xf32>
      %cst_15 = arith.constant 0.000000e+00 : f32
      %19 = vector.broadcast %cst_15 : f32 to vector<32x128xf32>
      %20 = arith.maximumf %18, %19 : vector<32x128xf32>
      %21 = arith.truncf %20 : vector<32x128xf32> to vector<32x128xbf16>
      %c0_16 = arith.constant 0 : index
      %c0_17 = arith.constant 0 : index
      %22 = vector.load %arg7[%c0_16, %c0_17] : memref<32x128xbf16, #tpu.memory_space<vmem>>, vector<32x128xbf16>
      tpu.vector_store %arg7[%c0_16, %c0_17], %21 {strides = array<i32>} : memref<32x128xbf16, #tpu.memory_space<vmem>>, vector<32x128xbf16>,
    } else {
    }
    return
  }
  func.func @transform_0(%arg0: i32, %arg1: i32, %arg2: i32) -> (i32, i32) {
    %c0_i32 = arith.constant 0 : i32
    return %arg0, %arg2 : i32, i32
  }
  func.func @transform_1(%arg0: i32, %arg1: i32, %arg2: i32) -> (i32, i32) {
    %c0_i32 = arith.constant 0 : i32
    return %arg2, %arg1 : i32, i32
  }
  func.func @transform_2(%arg0: i32, %arg1: i32, %arg2: i32) -> (i32, i32) {
    %c0_i32 = arith.constant 0 : i32
    %c0_i32_0 = arith.constant 0 : i32
    return %c0_i32, %arg1 : i32, i32
  }
  func.func @transform_3(%arg0: i32, %arg1: i32, %arg2: i32) -> (i32, i32) {
    %c0_i32 = arith.constant 0 : i32
    return %arg0, %arg1 : i32, i32
  }
  func.func @transform_4(%arg0: i32, %arg1: i32, %arg2: i32) -> (i32, i32) {
    %c0_i32 = arith.constant 0 : i32
    return %arg0, %arg1 : i32, i32
  }
}

module attributes {stable_mosaic.version = 11 : i64} {
  func.func @_conv_matmul_kernel(%arg0: i32, %arg1: i32, %arg2: i32, %arg3: memref<32x128xbf16, #tpu.memory_space<vmem>>, %arg4: memref<128x128xbf16, #tpu.memory_space<vmem>>, %arg5: memref<1x128xf32, #tpu.memory_space<vmem>>, %arg6: memref<32x128xbf16, #tpu.memory_space<vmem>>, %arg7: memref<32x128xf32, #tpu.memory_space<vmem>>) attributes {dimension_semantics = [#tpu.dimension_semantics<parallel>, #tpu.dimension_semantics<parallel>, #tpu.dimension_semantics<arbitrary>], iteration_bounds = array<i64: 1, 1, 1>, scalar_prefetch = 0 : i64, scratch_operands = 1 : i64, tpu.core_type = #tpu.core_type<tc>, window_params = [{transform_indices = @transform_0, window_bounds = array<i64: 32, 128>}, {transform_indices = @transform_1, window_bounds = array<i64: 128, 128>}, {transform_indices = @transform_2, window_bounds = array<i64: 1, 128>}, {transform_indices = @transform_3, window_bounds = array<i64: 32, 128>}]} {
    %c0_i32 = arith.constant 0 : i32
    %0 = arith.cmpi eq, %arg2, %c0_i32 : i32
    %1 = arith.extui %0 : i1 to i32
    %c0_i32_0 = arith.constant 0 : i32
    %2 = arith.cmpi ne, %1, %c0_i32_0 : i32
    scf.if %2 {
      %cst_10 = arith.constant 0.000000e+00 : f32
      %12 = vector.broadcast %cst_10 : f32 to vector<32x128xf32>
      %c0_11 = arith.constant 0 : index
      %c0_12 = arith.constant 0 : index
      %13 = vector.load %arg7[%c0_11, %c0_12] : memref<32x128xf32, #tpu.memory_space<vmem>>, vector<32x128xf32>
      tpu.vector_store %arg7[%c0_11, %c0_12], %12 {strides = array<i32>} : memref<32x128xf32, #tpu.memory_space<vmem>>, vector<32x128xf32>,
    } else {
    }
    %c0 = arith.constant 0 : index
    %c0_1 = arith.constant 0 : index
    %3 = vector.load %arg7[%c0, %c0_1] : memref<32x128xf32, #tpu.memory_space<vmem>>, vector<32x128xf32>
    %c0_2 = arith.constant 0 : index
    %c0_3 = arith.constant 0 : index
    %4 = vector.load %arg3[%c0_2, %c0_3] : memref<32x128xbf16, #tpu.memory_space<vmem>>, vector<32x128xbf16>
    %c0_4 = arith.constant 0 : index
    %c0_5 = arith.constant 0 : index
    %5 = vector.load %arg4[%c0_4, %c0_5] : memref<128x128xbf16, #tpu.memory_space<vmem>>, vector<128x128xbf16>
    %cst = arith.constant dense<0.000000e+00> : vector<32x128xf32>
    %6 = tpu.matmul %4, %5, %cst {dimension_numbers = #tpu.dot_dimension_numbers<[1], [0], [0], [1], [0, 0, 1, 1], [], []>} : vector<32x128xbf16>, vector<128x128xbf16>, vector<32x128xf32> -> vector<32x128xf32>
    %7 = arith.addf %3, %6 : vector<32x128xf32>
    %c0_6 = arith.constant 0 : index
    %c0_7 = arith.constant 0 : index
    %8 = vector.load %arg7[%c0_6, %c0_7] : memref<32x128xf32, #tpu.memory_space<vmem>>, vector<32x128xf32>
    tpu.vector_store %arg7[%c0_6, %c0_7], %7 {strides = array<i32>} : memref<32x128xf32, #tpu.memory_space<vmem>>, vector<32x128xf32>,
    %c0_i32_8 = arith.constant 0 : i32
    %9 = arith.cmpi eq, %arg2, %c0_i32_8 : i32
    %10 = arith.extui %9 : i1 to i32
    %c0_i32_9 = arith.constant 0 : i32
    %11 = arith.cmpi ne, %10, %c0_i32_9 : i32
    scf.if %11 {
      %c0_10 = arith.constant 0 : index
      %c0_11 = arith.constant 0 : index
      %12 = vector.load %arg7[%c0_10, %c0_11] : memref<32x128xf32, #tpu.memory_space<vmem>>, vector<32x128xf32>
      %c0_12 = arith.constant 0 : index
      %c0_13 = arith.constant 0 : index
      %13 = vector.load %arg5[%c0_12, %c0_13] : memref<1x128xf32, #tpu.memory_space<vmem>>, vector<1x128xf32>
      %14 = vector.broadcast %13 : vector<1x128xf32> to vector<32x128xf32>
      %15 = arith.addf %12, %14 : vector<32x128xf32>
      %16 = arith.truncf %15 : vector<32x128xf32> to vector<32x128xbf16>
      %c0_14 = arith.constant 0 : index
      %c0_15 = arith.constant 0 : index
      %17 = vector.load %arg6[%c0_14, %c0_15] : memref<32x128xbf16, #tpu.memory_space<vmem>>, vector<32x128xbf16>
      tpu.vector_store %arg6[%c0_14, %c0_15], %16 {strides = array<i32>} : memref<32x128xbf16, #tpu.memory_space<vmem>>, vector<32x128xbf16>,
    } else {
    }
    return
  }
  func.func @transform_0(%arg0: i32, %arg1: i32, %arg2: i32) -> (i32, i32) {
    %c0_i32 = arith.constant 0 : i32
    return %arg0, %arg2 : i32, i32
  }
  func.func @transform_1(%arg0: i32, %arg1: i32, %arg2: i32) -> (i32, i32) {
    %c0_i32 = arith.constant 0 : i32
    return %arg2, %arg1 : i32, i32
  }
  func.func @transform_2(%arg0: i32, %arg1: i32, %arg2: i32) -> (i32, i32) {
    %c0_i32 = arith.constant 0 : i32
    %c0_i32_0 = arith.constant 0 : i32
    return %c0_i32, %arg1 : i32, i32
  }
  func.func @transform_3(%arg0: i32, %arg1: i32, %arg2: i32) -> (i32, i32) {
    %c0_i32 = arith.constant 0 : i32
    return %arg0, %arg1 : i32, i32
  }
}

module attributes {stable_mosaic.version = 11 : i64} {
  func.func @_conv_matmul_kernel(%arg0: i32, %arg1: i32, %arg2: i32, %arg3: memref<32x384xbf16, #tpu.memory_space<vmem>>, %arg4: memref<384x128xbf16, #tpu.memory_space<vmem>>, %arg5: memref<1x128xf32, #tpu.memory_space<vmem>>, %arg6: memref<32x128xbf16, #tpu.memory_space<vmem>>, %arg7: memref<32x128xf32, #tpu.memory_space<vmem>>) attributes {dimension_semantics = [#tpu.dimension_semantics<parallel>, #tpu.dimension_semantics<parallel>, #tpu.dimension_semantics<arbitrary>], iteration_bounds = array<i64: 1, 1, 3>, scalar_prefetch = 0 : i64, scratch_operands = 1 : i64, tpu.core_type = #tpu.core_type<tc>, window_params = [{transform_indices = @transform_0, window_bounds = array<i64: 32, 384>}, {transform_indices = @transform_1, window_bounds = array<i64: 384, 128>}, {transform_indices = @transform_2, window_bounds = array<i64: 1, 128>}, {transform_indices = @transform_3, window_bounds = array<i64: 32, 128>}]} {
    %c0_i32 = arith.constant 0 : i32
    %0 = arith.cmpi eq, %arg2, %c0_i32 : i32
    %1 = arith.extui %0 : i1 to i32
    %c0_i32_0 = arith.constant 0 : i32
    %2 = arith.cmpi ne, %1, %c0_i32_0 : i32
    scf.if %2 {
      %cst_9 = arith.constant 0.000000e+00 : f32
      %12 = vector.broadcast %cst_9 : f32 to vector<32x128xf32>
      %c0_10 = arith.constant 0 : index
      %c0_11 = arith.constant 0 : index
      %13 = vector.load %arg7[%c0_10, %c0_11] : memref<32x128xf32, #tpu.memory_space<vmem>>, vector<32x128xf32>
      tpu.vector_store %arg7[%c0_10, %c0_11], %12 {strides = array<i32>} : memref<32x128xf32, #tpu.memory_space<vmem>>, vector<32x128xf32>,
    } else {
    }
    %c0 = arith.constant 0 : index
    %c0_1 = arith.constant 0 : index
    %3 = vector.load %arg7[%c0, %c0_1] : memref<32x128xf32, #tpu.memory_space<vmem>>, vector<32x128xf32>
    %c0_2 = arith.constant 0 : index
    %c0_3 = arith.constant 0 : index
    %4 = vector.load %arg3[%c0_2, %c0_3] : memref<32x384xbf16, #tpu.memory_space<vmem>>, vector<32x384xbf16>
    %c0_4 = arith.constant 0 : index
    %c0_5 = arith.constant 0 : index
    %5 = vector.load %arg4[%c0_4, %c0_5] : memref<384x128xbf16, #tpu.memory_space<vmem>>, vector<384x128xbf16>
    %cst = arith.constant dense<0.000000e+00> : vector<32x128xf32>
    %6 = tpu.matmul %4, %5, %cst {dimension_numbers = #tpu.dot_dimension_numbers<[1], [0], [0], [1], [0, 0, 1, 1], [], []>} : vector<32x384xbf16>, vector<384x128xbf16>, vector<32x128xf32> -> vector<32x128xf32>
    %7 = arith.addf %3, %6 : vector<32x128xf32>
    %c0_6 = arith.constant 0 : index
    %c0_7 = arith.constant 0 : index
    %8 = vector.load %arg7[%c0_6, %c0_7] : memref<32x128xf32, #tpu.memory_space<vmem>>, vector<32x128xf32>
    tpu.vector_store %arg7[%c0_6, %c0_7], %7 {strides = array<i32>} : memref<32x128xf32, #tpu.memory_space<vmem>>, vector<32x128xf32>,
    %c2_i32 = arith.constant 2 : i32
    %9 = arith.cmpi eq, %arg2, %c2_i32 : i32
    %10 = arith.extui %9 : i1 to i32
    %c0_i32_8 = arith.constant 0 : i32
    %11 = arith.cmpi ne, %10, %c0_i32_8 : i32
    scf.if %11 {
      %c0_9 = arith.constant 0 : index
      %c0_10 = arith.constant 0 : index
      %12 = vector.load %arg7[%c0_9, %c0_10] : memref<32x128xf32, #tpu.memory_space<vmem>>, vector<32x128xf32>
      %c0_11 = arith.constant 0 : index
      %c0_12 = arith.constant 0 : index
      %13 = vector.load %arg5[%c0_11, %c0_12] : memref<1x128xf32, #tpu.memory_space<vmem>>, vector<1x128xf32>
      %14 = vector.broadcast %13 : vector<1x128xf32> to vector<32x128xf32>
      %15 = arith.addf %12, %14 : vector<32x128xf32>
      %cst_13 = arith.constant 0.000000e+00 : f32
      %16 = vector.broadcast %cst_13 : f32 to vector<32x128xf32>
      %17 = arith.maximumf %15, %16 : vector<32x128xf32>
      %18 = arith.truncf %17 : vector<32x128xf32> to vector<32x128xbf16>
      %c0_14 = arith.constant 0 : index
      %c0_15 = arith.constant 0 : index
      %19 = vector.load %arg6[%c0_14, %c0_15] : memref<32x128xbf16, #tpu.memory_space<vmem>>, vector<32x128xbf16>
      tpu.vector_store %arg6[%c0_14, %c0_15], %18 {strides = array<i32>} : memref<32x128xbf16, #tpu.memory_space<vmem>>, vector<32x128xbf16>,
    } else {
    }
    return
  }
  func.func @transform_0(%arg0: i32, %arg1: i32, %arg2: i32) -> (i32, i32) {
    %c0_i32 = arith.constant 0 : i32
    return %arg0, %arg2 : i32, i32
  }
  func.func @transform_1(%arg0: i32, %arg1: i32, %arg2: i32) -> (i32, i32) {
    %c0_i32 = arith.constant 0 : i32
    return %arg2, %arg1 : i32, i32
  }
  func.func @transform_2(%arg0: i32, %arg1: i32, %arg2: i32) -> (i32, i32) {
    %c0_i32 = arith.constant 0 : i32
    %c0_i32_0 = arith.constant 0 : i32
    return %c0_i32, %arg1 : i32, i32
  }
  func.func @transform_3(%arg0: i32, %arg1: i32, %arg2: i32) -> (i32, i32) {
    %c0_i32 = arith.constant 0 : i32
    return %arg0, %arg1 : i32, i32
  }
}

module attributes {stable_mosaic.version = 11 : i64} {
  func.func @_conv_matmul_kernel(%arg0: i32, %arg1: i32, %arg2: i32, %arg3: memref<8x384xbf16, #tpu.memory_space<vmem>>, %arg4: memref<384x256xbf16, #tpu.memory_space<vmem>>, %arg5: memref<1x256xf32, #tpu.memory_space<vmem>>, %arg6: memref<8x256xbf16, #tpu.memory_space<vmem>>, %arg7: memref<8x256xf32, #tpu.memory_space<vmem>>) attributes {dimension_semantics = [#tpu.dimension_semantics<parallel>, #tpu.dimension_semantics<parallel>, #tpu.dimension_semantics<arbitrary>], iteration_bounds = array<i64: 1, 1, 3>, scalar_prefetch = 0 : i64, scratch_operands = 1 : i64, tpu.core_type = #tpu.core_type<tc>, window_params = [{transform_indices = @transform_0, window_bounds = array<i64: 8, 384>}, {transform_indices = @transform_1, window_bounds = array<i64: 384, 256>}, {transform_indices = @transform_2, window_bounds = array<i64: 1, 256>}, {transform_indices = @transform_3, window_bounds = array<i64: 8, 256>}]} {
    %c0_i32 = arith.constant 0 : i32
    %0 = arith.cmpi eq, %arg2, %c0_i32 : i32
    %1 = arith.extui %0 : i1 to i32
    %c0_i32_0 = arith.constant 0 : i32
    %2 = arith.cmpi ne, %1, %c0_i32_0 : i32
    scf.if %2 {
      %cst_9 = arith.constant 0.000000e+00 : f32
      %12 = vector.broadcast %cst_9 : f32 to vector<8x256xf32>
      %c0_10 = arith.constant 0 : index
      %c0_11 = arith.constant 0 : index
      %13 = vector.load %arg7[%c0_10, %c0_11] : memref<8x256xf32, #tpu.memory_space<vmem>>, vector<8x256xf32>
      tpu.vector_store %arg7[%c0_10, %c0_11], %12 {strides = array<i32>} : memref<8x256xf32, #tpu.memory_space<vmem>>, vector<8x256xf32>,
    } else {
    }
    %c0 = arith.constant 0 : index
    %c0_1 = arith.constant 0 : index
    %3 = vector.load %arg7[%c0, %c0_1] : memref<8x256xf32, #tpu.memory_space<vmem>>, vector<8x256xf32>
    %c0_2 = arith.constant 0 : index
    %c0_3 = arith.constant 0 : index
    %4 = vector.load %arg3[%c0_2, %c0_3] : memref<8x384xbf16, #tpu.memory_space<vmem>>, vector<8x384xbf16>
    %c0_4 = arith.constant 0 : index
    %c0_5 = arith.constant 0 : index
    %5 = vector.load %arg4[%c0_4, %c0_5] : memref<384x256xbf16, #tpu.memory_space<vmem>>, vector<384x256xbf16>
    %cst = arith.constant dense<0.000000e+00> : vector<8x256xf32>
    %6 = tpu.matmul %4, %5, %cst {dimension_numbers = #tpu.dot_dimension_numbers<[1], [0], [0], [1], [0, 0, 1, 1], [], []>} : vector<8x384xbf16>, vector<384x256xbf16>, vector<8x256xf32> -> vector<8x256xf32>
    %7 = arith.addf %3, %6 : vector<8x256xf32>
    %c0_6 = arith.constant 0 : index
    %c0_7 = arith.constant 0 : index
    %8 = vector.load %arg7[%c0_6, %c0_7] : memref<8x256xf32, #tpu.memory_space<vmem>>, vector<8x256xf32>
    tpu.vector_store %arg7[%c0_6, %c0_7], %7 {strides = array<i32>} : memref<8x256xf32, #tpu.memory_space<vmem>>, vector<8x256xf32>,
    %c2_i32 = arith.constant 2 : i32
    %9 = arith.cmpi eq, %arg2, %c2_i32 : i32
    %10 = arith.extui %9 : i1 to i32
    %c0_i32_8 = arith.constant 0 : i32
    %11 = arith.cmpi ne, %10, %c0_i32_8 : i32
    scf.if %11 {
      %c0_9 = arith.constant 0 : index
      %c0_10 = arith.constant 0 : index
      %12 = vector.load %arg7[%c0_9, %c0_10] : memref<8x256xf32, #tpu.memory_space<vmem>>, vector<8x256xf32>
      %c0_11 = arith.constant 0 : index
      %c0_12 = arith.constant 0 : index
      %13 = vector.load %arg5[%c0_11, %c0_12] : memref<1x256xf32, #tpu.memory_space<vmem>>, vector<1x256xf32>
      %14 = vector.broadcast %13 : vector<1x256xf32> to vector<8x256xf32>
      %15 = arith.addf %12, %14 : vector<8x256xf32>
      %cst_13 = arith.constant 0.000000e+00 : f32
      %16 = vector.broadcast %cst_13 : f32 to vector<8x256xf32>
      %17 = arith.maximumf %15, %16 : vector<8x256xf32>
      %18 = arith.truncf %17 : vector<8x256xf32> to vector<8x256xbf16>
      %c0_14 = arith.constant 0 : index
      %c0_15 = arith.constant 0 : index
      %19 = vector.load %arg6[%c0_14, %c0_15] : memref<8x256xbf16, #tpu.memory_space<vmem>>, vector<8x256xbf16>
      tpu.vector_store %arg6[%c0_14, %c0_15], %18 {strides = array<i32>} : memref<8x256xbf16, #tpu.memory_space<vmem>>, vector<8x256xbf16>,
    } else {
    }
    return
  }
  func.func @transform_0(%arg0: i32, %arg1: i32, %arg2: i32) -> (i32, i32) {
    %c0_i32 = arith.constant 0 : i32
    return %arg0, %arg2 : i32, i32
  }
  func.func @transform_1(%arg0: i32, %arg1: i32, %arg2: i32) -> (i32, i32) {
    %c0_i32 = arith.constant 0 : i32
    return %arg2, %arg1 : i32, i32
  }
  func.func @transform_2(%arg0: i32, %arg1: i32, %arg2: i32) -> (i32, i32) {
    %c0_i32 = arith.constant 0 : i32
    %c0_i32_0 = arith.constant 0 : i32
    return %c0_i32, %arg1 : i32, i32
  }
  func.func @transform_3(%arg0: i32, %arg1: i32, %arg2: i32) -> (i32, i32) {
    %c0_i32 = arith.constant 0 : i32
    return %arg0, %arg1 : i32, i32
  }
}

module attributes {stable_mosaic.version = 11 : i64} {
  func.func @_conv_matmul_kernel(%arg0: i32, %arg1: i32, %arg2: i32, %arg3: memref<8x128xbf16, #tpu.memory_space<vmem>>, %arg4: memref<128x256xbf16, #tpu.memory_space<vmem>>, %arg5: memref<1x256xf32, #tpu.memory_space<vmem>>, %arg6: memref<8x256xbf16, #tpu.memory_space<vmem>>, %arg7: memref<8x256xf32, #tpu.memory_space<vmem>>) attributes {dimension_semantics = [#tpu.dimension_semantics<parallel>, #tpu.dimension_semantics<parallel>, #tpu.dimension_semantics<arbitrary>], iteration_bounds = array<i64: 1, 1, 1>, scalar_prefetch = 0 : i64, scratch_operands = 1 : i64, tpu.core_type = #tpu.core_type<tc>, window_params = [{transform_indices = @transform_0, window_bounds = array<i64: 8, 128>}, {transform_indices = @transform_1, window_bounds = array<i64: 128, 256>}, {transform_indices = @transform_2, window_bounds = array<i64: 1, 256>}, {transform_indices = @transform_3, window_bounds = array<i64: 8, 256>}]} {
    %c0_i32 = arith.constant 0 : i32
    %0 = arith.cmpi eq, %arg2, %c0_i32 : i32
    %1 = arith.extui %0 : i1 to i32
    %c0_i32_0 = arith.constant 0 : i32
    %2 = arith.cmpi ne, %1, %c0_i32_0 : i32
    scf.if %2 {
      %cst_10 = arith.constant 0.000000e+00 : f32
      %12 = vector.broadcast %cst_10 : f32 to vector<8x256xf32>
      %c0_11 = arith.constant 0 : index
      %c0_12 = arith.constant 0 : index
      %13 = vector.load %arg7[%c0_11, %c0_12] : memref<8x256xf32, #tpu.memory_space<vmem>>, vector<8x256xf32>
      tpu.vector_store %arg7[%c0_11, %c0_12], %12 {strides = array<i32>} : memref<8x256xf32, #tpu.memory_space<vmem>>, vector<8x256xf32>,
    } else {
    }
    %c0 = arith.constant 0 : index
    %c0_1 = arith.constant 0 : index
    %3 = vector.load %arg7[%c0, %c0_1] : memref<8x256xf32, #tpu.memory_space<vmem>>, vector<8x256xf32>
    %c0_2 = arith.constant 0 : index
    %c0_3 = arith.constant 0 : index
    %4 = vector.load %arg3[%c0_2, %c0_3] : memref<8x128xbf16, #tpu.memory_space<vmem>>, vector<8x128xbf16>
    %c0_4 = arith.constant 0 : index
    %c0_5 = arith.constant 0 : index
    %5 = vector.load %arg4[%c0_4, %c0_5] : memref<128x256xbf16, #tpu.memory_space<vmem>>, vector<128x256xbf16>
    %cst = arith.constant dense<0.000000e+00> : vector<8x256xf32>
    %6 = tpu.matmul %4, %5, %cst {dimension_numbers = #tpu.dot_dimension_numbers<[1], [0], [0], [1], [0, 0, 1, 1], [], []>} : vector<8x128xbf16>, vector<128x256xbf16>, vector<8x256xf32> -> vector<8x256xf32>
    %7 = arith.addf %3, %6 : vector<8x256xf32>
    %c0_6 = arith.constant 0 : index
    %c0_7 = arith.constant 0 : index
    %8 = vector.load %arg7[%c0_6, %c0_7] : memref<8x256xf32, #tpu.memory_space<vmem>>, vector<8x256xf32>
    tpu.vector_store %arg7[%c0_6, %c0_7], %7 {strides = array<i32>} : memref<8x256xf32, #tpu.memory_space<vmem>>, vector<8x256xf32>,
    %c0_i32_8 = arith.constant 0 : i32
    %9 = arith.cmpi eq, %arg2, %c0_i32_8 : i32
    %10 = arith.extui %9 : i1 to i32
    %c0_i32_9 = arith.constant 0 : i32
    %11 = arith.cmpi ne, %10, %c0_i32_9 : i32
    scf.if %11 {
      %c0_10 = arith.constant 0 : index
      %c0_11 = arith.constant 0 : index
      %12 = vector.load %arg7[%c0_10, %c0_11] : memref<8x256xf32, #tpu.memory_space<vmem>>, vector<8x256xf32>
      %c0_12 = arith.constant 0 : index
      %c0_13 = arith.constant 0 : index
      %13 = vector.load %arg5[%c0_12, %c0_13] : memref<1x256xf32, #tpu.memory_space<vmem>>, vector<1x256xf32>
      %14 = vector.broadcast %13 : vector<1x256xf32> to vector<8x256xf32>
      %15 = arith.addf %12, %14 : vector<8x256xf32>
      %16 = arith.truncf %15 : vector<8x256xf32> to vector<8x256xbf16>
      %c0_14 = arith.constant 0 : index
      %c0_15 = arith.constant 0 : index
      %17 = vector.load %arg6[%c0_14, %c0_15] : memref<8x256xbf16, #tpu.memory_space<vmem>>, vector<8x256xbf16>
      tpu.vector_store %arg6[%c0_14, %c0_15], %16 {strides = array<i32>} : memref<8x256xbf16, #tpu.memory_space<vmem>>, vector<8x256xbf16>,
    } else {
    }
    return
  }
  func.func @transform_0(%arg0: i32, %arg1: i32, %arg2: i32) -> (i32, i32) {
    %c0_i32 = arith.constant 0 : i32
    return %arg0, %arg2 : i32, i32
  }
  func.func @transform_1(%arg0: i32, %arg1: i32, %arg2: i32) -> (i32, i32) {
    %c0_i32 = arith.constant 0 : i32
    return %arg2, %arg1 : i32, i32
  }
  func.func @transform_2(%arg0: i32, %arg1: i32, %arg2: i32) -> (i32, i32) {
    %c0_i32 = arith.constant 0 : i32
    %c0_i32_0 = arith.constant 0 : i32
    return %c0_i32, %arg1 : i32, i32
  }
  func.func @transform_3(%arg0: i32, %arg1: i32, %arg2: i32) -> (i32, i32) {
    %c0_i32 = arith.constant 0 : i32
    return %arg0, %arg1 : i32, i32
  }
}

module attributes {stable_mosaic.version = 11 : i64} {
  func.func @_conv_matmul_kernel(%arg0: i32, %arg1: i32, %arg2: i32, %arg3: memref<8x384xbf16, #tpu.memory_space<vmem>>, %arg4: memref<384x256xbf16, #tpu.memory_space<vmem>>, %arg5: memref<1x256xf32, #tpu.memory_space<vmem>>, %arg6: memref<8x256xbf16, #tpu.memory_space<vmem>>, %arg7: memref<8x256xf32, #tpu.memory_space<vmem>>) attributes {dimension_semantics = [#tpu.dimension_semantics<parallel>, #tpu.dimension_semantics<parallel>, #tpu.dimension_semantics<arbitrary>], iteration_bounds = array<i64: 1, 1, 6>, scalar_prefetch = 0 : i64, scratch_operands = 1 : i64, tpu.core_type = #tpu.core_type<tc>, window_params = [{transform_indices = @transform_0, window_bounds = array<i64: 8, 384>}, {transform_indices = @transform_1, window_bounds = array<i64: 384, 256>}, {transform_indices = @transform_2, window_bounds = array<i64: 1, 256>}, {transform_indices = @transform_3, window_bounds = array<i64: 8, 256>}]} {
    %c0_i32 = arith.constant 0 : i32
    %0 = arith.cmpi eq, %arg2, %c0_i32 : i32
    %1 = arith.extui %0 : i1 to i32
    %c0_i32_0 = arith.constant 0 : i32
    %2 = arith.cmpi ne, %1, %c0_i32_0 : i32
    scf.if %2 {
      %cst_9 = arith.constant 0.000000e+00 : f32
      %12 = vector.broadcast %cst_9 : f32 to vector<8x256xf32>
      %c0_10 = arith.constant 0 : index
      %c0_11 = arith.constant 0 : index
      %13 = vector.load %arg7[%c0_10, %c0_11] : memref<8x256xf32, #tpu.memory_space<vmem>>, vector<8x256xf32>
      tpu.vector_store %arg7[%c0_10, %c0_11], %12 {strides = array<i32>} : memref<8x256xf32, #tpu.memory_space<vmem>>, vector<8x256xf32>,
    } else {
    }
    %c0 = arith.constant 0 : index
    %c0_1 = arith.constant 0 : index
    %3 = vector.load %arg7[%c0, %c0_1] : memref<8x256xf32, #tpu.memory_space<vmem>>, vector<8x256xf32>
    %c0_2 = arith.constant 0 : index
    %c0_3 = arith.constant 0 : index
    %4 = vector.load %arg3[%c0_2, %c0_3] : memref<8x384xbf16, #tpu.memory_space<vmem>>, vector<8x384xbf16>
    %c0_4 = arith.constant 0 : index
    %c0_5 = arith.constant 0 : index
    %5 = vector.load %arg4[%c0_4, %c0_5] : memref<384x256xbf16, #tpu.memory_space<vmem>>, vector<384x256xbf16>
    %cst = arith.constant dense<0.000000e+00> : vector<8x256xf32>
    %6 = tpu.matmul %4, %5, %cst {dimension_numbers = #tpu.dot_dimension_numbers<[1], [0], [0], [1], [0, 0, 1, 1], [], []>} : vector<8x384xbf16>, vector<384x256xbf16>, vector<8x256xf32> -> vector<8x256xf32>
    %7 = arith.addf %3, %6 : vector<8x256xf32>
    %c0_6 = arith.constant 0 : index
    %c0_7 = arith.constant 0 : index
    %8 = vector.load %arg7[%c0_6, %c0_7] : memref<8x256xf32, #tpu.memory_space<vmem>>, vector<8x256xf32>
    tpu.vector_store %arg7[%c0_6, %c0_7], %7 {strides = array<i32>} : memref<8x256xf32, #tpu.memory_space<vmem>>, vector<8x256xf32>,
    %c5_i32 = arith.constant 5 : i32
    %9 = arith.cmpi eq, %arg2, %c5_i32 : i32
    %10 = arith.extui %9 : i1 to i32
    %c0_i32_8 = arith.constant 0 : i32
    %11 = arith.cmpi ne, %10, %c0_i32_8 : i32
    scf.if %11 {
      %c0_9 = arith.constant 0 : index
      %c0_10 = arith.constant 0 : index
      %12 = vector.load %arg7[%c0_9, %c0_10] : memref<8x256xf32, #tpu.memory_space<vmem>>, vector<8x256xf32>
      %c0_11 = arith.constant 0 : index
      %c0_12 = arith.constant 0 : index
      %13 = vector.load %arg5[%c0_11, %c0_12] : memref<1x256xf32, #tpu.memory_space<vmem>>, vector<1x256xf32>
      %14 = vector.broadcast %13 : vector<1x256xf32> to vector<8x256xf32>
      %15 = arith.addf %12, %14 : vector<8x256xf32>
      %cst_13 = arith.constant 0.000000e+00 : f32
      %16 = vector.broadcast %cst_13 : f32 to vector<8x256xf32>
      %17 = arith.maximumf %15, %16 : vector<8x256xf32>
      %18 = arith.truncf %17 : vector<8x256xf32> to vector<8x256xbf16>
      %c0_14 = arith.constant 0 : index
      %c0_15 = arith.constant 0 : index
      %19 = vector.load %arg6[%c0_14, %c0_15] : memref<8x256xbf16, #tpu.memory_space<vmem>>, vector<8x256xbf16>
      tpu.vector_store %arg6[%c0_14, %c0_15], %18 {strides = array<i32>} : memref<8x256xbf16, #tpu.memory_space<vmem>>, vector<8x256xbf16>,
    } else {
    }
    return
  }
  func.func @transform_0(%arg0: i32, %arg1: i32, %arg2: i32) -> (i32, i32) {
    %c0_i32 = arith.constant 0 : i32
    return %arg0, %arg2 : i32, i32
  }
  func.func @transform_1(%arg0: i32, %arg1: i32, %arg2: i32) -> (i32, i32) {
    %c0_i32 = arith.constant 0 : i32
    return %arg2, %arg1 : i32, i32
  }
  func.func @transform_2(%arg0: i32, %arg1: i32, %arg2: i32) -> (i32, i32) {
    %c0_i32 = arith.constant 0 : i32
    %c0_i32_0 = arith.constant 0 : i32
    return %c0_i32, %arg1 : i32, i32
  }
  func.func @transform_3(%arg0: i32, %arg1: i32, %arg2: i32) -> (i32, i32) {
    %c0_i32 = arith.constant 0 : i32
    return %arg0, %arg1 : i32, i32
  }
}

module attributes {stable_mosaic.version = 11 : i64} {
  func.func @_conv_matmul_kernel(%arg0: i32, %arg1: i32, %arg2: i32, %arg3: memref<8x384xbf16, #tpu.memory_space<vmem>>, %arg4: memref<384x256xbf16, #tpu.memory_space<vmem>>, %arg5: memref<1x256xf32, #tpu.memory_space<vmem>>, %arg6: memref<8x256xbf16, #tpu.memory_space<vmem>>, %arg7: memref<8x256xbf16, #tpu.memory_space<vmem>>, %arg8: memref<8x256xf32, #tpu.memory_space<vmem>>) attributes {dimension_semantics = [#tpu.dimension_semantics<parallel>, #tpu.dimension_semantics<parallel>, #tpu.dimension_semantics<arbitrary>], iteration_bounds = array<i64: 1, 1, 6>, scalar_prefetch = 0 : i64, scratch_operands = 1 : i64, tpu.core_type = #tpu.core_type<tc>, window_params = [{transform_indices = @transform_0, window_bounds = array<i64: 8, 384>}, {transform_indices = @transform_1, window_bounds = array<i64: 384, 256>}, {transform_indices = @transform_2, window_bounds = array<i64: 1, 256>}, {transform_indices = @transform_3, window_bounds = array<i64: 8, 256>}, {transform_indices = @transform_4, window_bounds = array<i64: 8, 256>}]} {
    %c0_i32 = arith.constant 0 : i32
    %0 = arith.cmpi eq, %arg2, %c0_i32 : i32
    %1 = arith.extui %0 : i1 to i32
    %c0_i32_0 = arith.constant 0 : i32
    %2 = arith.cmpi ne, %1, %c0_i32_0 : i32
    scf.if %2 {
      %cst_9 = arith.constant 0.000000e+00 : f32
      %12 = vector.broadcast %cst_9 : f32 to vector<8x256xf32>
      %c0_10 = arith.constant 0 : index
      %c0_11 = arith.constant 0 : index
      %13 = vector.load %arg8[%c0_10, %c0_11] : memref<8x256xf32, #tpu.memory_space<vmem>>, vector<8x256xf32>
      tpu.vector_store %arg8[%c0_10, %c0_11], %12 {strides = array<i32>} : memref<8x256xf32, #tpu.memory_space<vmem>>, vector<8x256xf32>,
    } else {
    }
    %c0 = arith.constant 0 : index
    %c0_1 = arith.constant 0 : index
    %3 = vector.load %arg8[%c0, %c0_1] : memref<8x256xf32, #tpu.memory_space<vmem>>, vector<8x256xf32>
    %c0_2 = arith.constant 0 : index
    %c0_3 = arith.constant 0 : index
    %4 = vector.load %arg3[%c0_2, %c0_3] : memref<8x384xbf16, #tpu.memory_space<vmem>>, vector<8x384xbf16>
    %c0_4 = arith.constant 0 : index
    %c0_5 = arith.constant 0 : index
    %5 = vector.load %arg4[%c0_4, %c0_5] : memref<384x256xbf16, #tpu.memory_space<vmem>>, vector<384x256xbf16>
    %cst = arith.constant dense<0.000000e+00> : vector<8x256xf32>
    %6 = tpu.matmul %4, %5, %cst {dimension_numbers = #tpu.dot_dimension_numbers<[1], [0], [0], [1], [0, 0, 1, 1], [], []>} : vector<8x384xbf16>, vector<384x256xbf16>, vector<8x256xf32> -> vector<8x256xf32>
    %7 = arith.addf %3, %6 : vector<8x256xf32>
    %c0_6 = arith.constant 0 : index
    %c0_7 = arith.constant 0 : index
    %8 = vector.load %arg8[%c0_6, %c0_7] : memref<8x256xf32, #tpu.memory_space<vmem>>, vector<8x256xf32>
    tpu.vector_store %arg8[%c0_6, %c0_7], %7 {strides = array<i32>} : memref<8x256xf32, #tpu.memory_space<vmem>>, vector<8x256xf32>,
    %c5_i32 = arith.constant 5 : i32
    %9 = arith.cmpi eq, %arg2, %c5_i32 : i32
    %10 = arith.extui %9 : i1 to i32
    %c0_i32_8 = arith.constant 0 : i32
    %11 = arith.cmpi ne, %10, %c0_i32_8 : i32
    scf.if %11 {
      %c0_9 = arith.constant 0 : index
      %c0_10 = arith.constant 0 : index
      %12 = vector.load %arg8[%c0_9, %c0_10] : memref<8x256xf32, #tpu.memory_space<vmem>>, vector<8x256xf32>
      %c0_11 = arith.constant 0 : index
      %c0_12 = arith.constant 0 : index
      %13 = vector.load %arg5[%c0_11, %c0_12] : memref<1x256xf32, #tpu.memory_space<vmem>>, vector<1x256xf32>
      %14 = vector.broadcast %13 : vector<1x256xf32> to vector<8x256xf32>
      %15 = arith.addf %12, %14 : vector<8x256xf32>
      %c0_13 = arith.constant 0 : index
      %c0_14 = arith.constant 0 : index
      %16 = vector.load %arg6[%c0_13, %c0_14] : memref<8x256xbf16, #tpu.memory_space<vmem>>, vector<8x256xbf16>
      %17 = arith.extf %16 : vector<8x256xbf16> to vector<8x256xf32>
      %18 = arith.addf %15, %17 : vector<8x256xf32>
      %cst_15 = arith.constant 0.000000e+00 : f32
      %19 = vector.broadcast %cst_15 : f32 to vector<8x256xf32>
      %20 = arith.maximumf %18, %19 : vector<8x256xf32>
      %21 = arith.truncf %20 : vector<8x256xf32> to vector<8x256xbf16>
      %c0_16 = arith.constant 0 : index
      %c0_17 = arith.constant 0 : index
      %22 = vector.load %arg7[%c0_16, %c0_17] : memref<8x256xbf16, #tpu.memory_space<vmem>>, vector<8x256xbf16>
      tpu.vector_store %arg7[%c0_16, %c0_17], %21 {strides = array<i32>} : memref<8x256xbf16, #tpu.memory_space<vmem>>, vector<8x256xbf16>,
    } else {
    }
    return
  }
  func.func @transform_0(%arg0: i32, %arg1: i32, %arg2: i32) -> (i32, i32) {
    %c0_i32 = arith.constant 0 : i32
    return %arg0, %arg2 : i32, i32
  }
  func.func @transform_1(%arg0: i32, %arg1: i32, %arg2: i32) -> (i32, i32) {
    %c0_i32 = arith.constant 0 : i32
    return %arg2, %arg1 : i32, i32
  }
  func.func @transform_2(%arg0: i32, %arg1: i32, %arg2: i32) -> (i32, i32) {
    %c0_i32 = arith.constant 0 : i32
    %c0_i32_0 = arith.constant 0 : i32
    return %c0_i32, %arg1 : i32, i32
  }
  func.func @transform_3(%arg0: i32, %arg1: i32, %arg2: i32) -> (i32, i32) {
    %c0_i32 = arith.constant 0 : i32
    return %arg0, %arg1 : i32, i32
  }
  func.func @transform_4(%arg0: i32, %arg1: i32, %arg2: i32) -> (i32, i32) {
    %c0_i32 = arith.constant 0 : i32
    return %arg0, %arg1 : i32, i32
  }
}

module attributes {stable_mosaic.version = 11 : i64} {
  func.func @_conv_matmul_kernel(%arg0: i32, %arg1: i32, %arg2: i32, %arg3: memref<8x384xbf16, #tpu.memory_space<vmem>>, %arg4: memref<384x256xbf16, #tpu.memory_space<vmem>>, %arg5: memref<1x256xf32, #tpu.memory_space<vmem>>, %arg6: memref<8x256xbf16, #tpu.memory_space<vmem>>, %arg7: memref<8x256xf32, #tpu.memory_space<vmem>>) attributes {dimension_semantics = [#tpu.dimension_semantics<parallel>, #tpu.dimension_semantics<parallel>, #tpu.dimension_semantics<arbitrary>], iteration_bounds = array<i64: 1, 2, 6>, scalar_prefetch = 0 : i64, scratch_operands = 1 : i64, tpu.core_type = #tpu.core_type<tc>, window_params = [{transform_indices = @transform_0, window_bounds = array<i64: 8, 384>}, {transform_indices = @transform_1, window_bounds = array<i64: 384, 256>}, {transform_indices = @transform_2, window_bounds = array<i64: 1, 256>}, {transform_indices = @transform_3, window_bounds = array<i64: 8, 256>}]} {
    %c0_i32 = arith.constant 0 : i32
    %0 = arith.cmpi eq, %arg2, %c0_i32 : i32
    %1 = arith.extui %0 : i1 to i32
    %c0_i32_0 = arith.constant 0 : i32
    %2 = arith.cmpi ne, %1, %c0_i32_0 : i32
    scf.if %2 {
      %cst_9 = arith.constant 0.000000e+00 : f32
      %12 = vector.broadcast %cst_9 : f32 to vector<8x256xf32>
      %c0_10 = arith.constant 0 : index
      %c0_11 = arith.constant 0 : index
      %13 = vector.load %arg7[%c0_10, %c0_11] : memref<8x256xf32, #tpu.memory_space<vmem>>, vector<8x256xf32>
      tpu.vector_store %arg7[%c0_10, %c0_11], %12 {strides = array<i32>} : memref<8x256xf32, #tpu.memory_space<vmem>>, vector<8x256xf32>,
    } else {
    }
    %c0 = arith.constant 0 : index
    %c0_1 = arith.constant 0 : index
    %3 = vector.load %arg7[%c0, %c0_1] : memref<8x256xf32, #tpu.memory_space<vmem>>, vector<8x256xf32>
    %c0_2 = arith.constant 0 : index
    %c0_3 = arith.constant 0 : index
    %4 = vector.load %arg3[%c0_2, %c0_3] : memref<8x384xbf16, #tpu.memory_space<vmem>>, vector<8x384xbf16>
    %c0_4 = arith.constant 0 : index
    %c0_5 = arith.constant 0 : index
    %5 = vector.load %arg4[%c0_4, %c0_5] : memref<384x256xbf16, #tpu.memory_space<vmem>>, vector<384x256xbf16>
    %cst = arith.constant dense<0.000000e+00> : vector<8x256xf32>
    %6 = tpu.matmul %4, %5, %cst {dimension_numbers = #tpu.dot_dimension_numbers<[1], [0], [0], [1], [0, 0, 1, 1], [], []>} : vector<8x384xbf16>, vector<384x256xbf16>, vector<8x256xf32> -> vector<8x256xf32>
    %7 = arith.addf %3, %6 : vector<8x256xf32>
    %c0_6 = arith.constant 0 : index
    %c0_7 = arith.constant 0 : index
    %8 = vector.load %arg7[%c0_6, %c0_7] : memref<8x256xf32, #tpu.memory_space<vmem>>, vector<8x256xf32>
    tpu.vector_store %arg7[%c0_6, %c0_7], %7 {strides = array<i32>} : memref<8x256xf32, #tpu.memory_space<vmem>>, vector<8x256xf32>,
    %c5_i32 = arith.constant 5 : i32
    %9 = arith.cmpi eq, %arg2, %c5_i32 : i32
    %10 = arith.extui %9 : i1 to i32
    %c0_i32_8 = arith.constant 0 : i32
    %11 = arith.cmpi ne, %10, %c0_i32_8 : i32
    scf.if %11 {
      %c0_9 = arith.constant 0 : index
      %c0_10 = arith.constant 0 : index
      %12 = vector.load %arg7[%c0_9, %c0_10] : memref<8x256xf32, #tpu.memory_space<vmem>>, vector<8x256xf32>
      %c0_11 = arith.constant 0 : index
      %c0_12 = arith.constant 0 : index
      %13 = vector.load %arg5[%c0_11, %c0_12] : memref<1x256xf32, #tpu.memory_space<vmem>>, vector<1x256xf32>
      %14 = vector.broadcast %13 : vector<1x256xf32> to vector<8x256xf32>
      %15 = arith.addf %12, %14 : vector<8x256xf32>
      %cst_13 = arith.constant 0.000000e+00 : f32
      %16 = vector.broadcast %cst_13 : f32 to vector<8x256xf32>
      %17 = arith.maximumf %15, %16 : vector<8x256xf32>
      %18 = arith.truncf %17 : vector<8x256xf32> to vector<8x256xbf16>
      %c0_14 = arith.constant 0 : index
      %c0_15 = arith.constant 0 : index
      %19 = vector.load %arg6[%c0_14, %c0_15] : memref<8x256xbf16, #tpu.memory_space<vmem>>, vector<8x256xbf16>
      tpu.vector_store %arg6[%c0_14, %c0_15], %18 {strides = array<i32>} : memref<8x256xbf16, #tpu.memory_space<vmem>>, vector<8x256xbf16>,
    } else {
    }
    return
  }
  func.func @transform_0(%arg0: i32, %arg1: i32, %arg2: i32) -> (i32, i32) {
    %c0_i32 = arith.constant 0 : i32
    return %arg0, %arg2 : i32, i32
  }
  func.func @transform_1(%arg0: i32, %arg1: i32, %arg2: i32) -> (i32, i32) {
    %c0_i32 = arith.constant 0 : i32
    return %arg2, %arg1 : i32, i32
  }
  func.func @transform_2(%arg0: i32, %arg1: i32, %arg2: i32) -> (i32, i32) {
    %c0_i32 = arith.constant 0 : i32
    %c0_i32_0 = arith.constant 0 : i32
    return %c0_i32, %arg1 : i32, i32
  }
  func.func @transform_3(%arg0: i32, %arg1: i32, %arg2: i32) -> (i32, i32) {
    %c0_i32 = arith.constant 0 : i32
    return %arg0, %arg1 : i32, i32
  }
}

module attributes {stable_mosaic.version = 11 : i64} {
  func.func @_conv_matmul_kernel(%arg0: i32, %arg1: i32, %arg2: i32, %arg3: memref<8x256xbf16, #tpu.memory_space<vmem>>, %arg4: memref<256x256xbf16, #tpu.memory_space<vmem>>, %arg5: memref<1x256xf32, #tpu.memory_space<vmem>>, %arg6: memref<8x256xbf16, #tpu.memory_space<vmem>>, %arg7: memref<8x256xf32, #tpu.memory_space<vmem>>) attributes {dimension_semantics = [#tpu.dimension_semantics<parallel>, #tpu.dimension_semantics<parallel>, #tpu.dimension_semantics<arbitrary>], iteration_bounds = array<i64: 1, 2, 1>, scalar_prefetch = 0 : i64, scratch_operands = 1 : i64, tpu.core_type = #tpu.core_type<tc>, window_params = [{transform_indices = @transform_0, window_bounds = array<i64: 8, 256>}, {transform_indices = @transform_1, window_bounds = array<i64: 256, 256>}, {transform_indices = @transform_2, window_bounds = array<i64: 1, 256>}, {transform_indices = @transform_3, window_bounds = array<i64: 8, 256>}]} {
    %c0_i32 = arith.constant 0 : i32
    %0 = arith.cmpi eq, %arg2, %c0_i32 : i32
    %1 = arith.extui %0 : i1 to i32
    %c0_i32_0 = arith.constant 0 : i32
    %2 = arith.cmpi ne, %1, %c0_i32_0 : i32
    scf.if %2 {
      %cst_10 = arith.constant 0.000000e+00 : f32
      %12 = vector.broadcast %cst_10 : f32 to vector<8x256xf32>
      %c0_11 = arith.constant 0 : index
      %c0_12 = arith.constant 0 : index
      %13 = vector.load %arg7[%c0_11, %c0_12] : memref<8x256xf32, #tpu.memory_space<vmem>>, vector<8x256xf32>
      tpu.vector_store %arg7[%c0_11, %c0_12], %12 {strides = array<i32>} : memref<8x256xf32, #tpu.memory_space<vmem>>, vector<8x256xf32>,
    } else {
    }
    %c0 = arith.constant 0 : index
    %c0_1 = arith.constant 0 : index
    %3 = vector.load %arg7[%c0, %c0_1] : memref<8x256xf32, #tpu.memory_space<vmem>>, vector<8x256xf32>
    %c0_2 = arith.constant 0 : index
    %c0_3 = arith.constant 0 : index
    %4 = vector.load %arg3[%c0_2, %c0_3] : memref<8x256xbf16, #tpu.memory_space<vmem>>, vector<8x256xbf16>
    %c0_4 = arith.constant 0 : index
    %c0_5 = arith.constant 0 : index
    %5 = vector.load %arg4[%c0_4, %c0_5] : memref<256x256xbf16, #tpu.memory_space<vmem>>, vector<256x256xbf16>
    %cst = arith.constant dense<0.000000e+00> : vector<8x256xf32>
    %6 = tpu.matmul %4, %5, %cst {dimension_numbers = #tpu.dot_dimension_numbers<[1], [0], [0], [1], [0, 0, 1, 1], [], []>} : vector<8x256xbf16>, vector<256x256xbf16>, vector<8x256xf32> -> vector<8x256xf32>
    %7 = arith.addf %3, %6 : vector<8x256xf32>
    %c0_6 = arith.constant 0 : index
    %c0_7 = arith.constant 0 : index
    %8 = vector.load %arg7[%c0_6, %c0_7] : memref<8x256xf32, #tpu.memory_space<vmem>>, vector<8x256xf32>
    tpu.vector_store %arg7[%c0_6, %c0_7], %7 {strides = array<i32>} : memref<8x256xf32, #tpu.memory_space<vmem>>, vector<8x256xf32>,
    %c0_i32_8 = arith.constant 0 : i32
    %9 = arith.cmpi eq, %arg2, %c0_i32_8 : i32
    %10 = arith.extui %9 : i1 to i32
    %c0_i32_9 = arith.constant 0 : i32
    %11 = arith.cmpi ne, %10, %c0_i32_9 : i32
    scf.if %11 {
      %c0_10 = arith.constant 0 : index
      %c0_11 = arith.constant 0 : index
      %12 = vector.load %arg7[%c0_10, %c0_11] : memref<8x256xf32, #tpu.memory_space<vmem>>, vector<8x256xf32>
      %c0_12 = arith.constant 0 : index
      %c0_13 = arith.constant 0 : index
      %13 = vector.load %arg5[%c0_12, %c0_13] : memref<1x256xf32, #tpu.memory_space<vmem>>, vector<1x256xf32>
      %14 = vector.broadcast %13 : vector<1x256xf32> to vector<8x256xf32>
      %15 = arith.addf %12, %14 : vector<8x256xf32>
      %16 = arith.truncf %15 : vector<8x256xf32> to vector<8x256xbf16>
      %c0_14 = arith.constant 0 : index
      %c0_15 = arith.constant 0 : index
      %17 = vector.load %arg6[%c0_14, %c0_15] : memref<8x256xbf16, #tpu.memory_space<vmem>>, vector<8x256xbf16>
      tpu.vector_store %arg6[%c0_14, %c0_15], %16 {strides = array<i32>} : memref<8x256xbf16, #tpu.memory_space<vmem>>, vector<8x256xbf16>,
    } else {
    }
    return
  }
  func.func @transform_0(%arg0: i32, %arg1: i32, %arg2: i32) -> (i32, i32) {
    %c0_i32 = arith.constant 0 : i32
    return %arg0, %arg2 : i32, i32
  }
  func.func @transform_1(%arg0: i32, %arg1: i32, %arg2: i32) -> (i32, i32) {
    %c0_i32 = arith.constant 0 : i32
    return %arg2, %arg1 : i32, i32
  }
  func.func @transform_2(%arg0: i32, %arg1: i32, %arg2: i32) -> (i32, i32) {
    %c0_i32 = arith.constant 0 : i32
    %c0_i32_0 = arith.constant 0 : i32
    return %c0_i32, %arg1 : i32, i32
  }
  func.func @transform_3(%arg0: i32, %arg1: i32, %arg2: i32) -> (i32, i32) {
    %c0_i32 = arith.constant 0 : i32
    return %arg0, %arg1 : i32, i32
  }
}

module attributes {stable_mosaic.version = 11 : i64} {
  func.func @_conv_matmul_kernel(%arg0: i32, %arg1: i32, %arg2: i32, %arg3: memref<8x512xbf16, #tpu.memory_space<vmem>>, %arg4: memref<512x256xbf16, #tpu.memory_space<vmem>>, %arg5: memref<1x256xf32, #tpu.memory_space<vmem>>, %arg6: memref<8x256xbf16, #tpu.memory_space<vmem>>, %arg7: memref<8x256xbf16, #tpu.memory_space<vmem>>, %arg8: memref<8x256xf32, #tpu.memory_space<vmem>>) attributes {dimension_semantics = [#tpu.dimension_semantics<parallel>, #tpu.dimension_semantics<parallel>, #tpu.dimension_semantics<arbitrary>], iteration_bounds = array<i64: 1, 2, 9>, scalar_prefetch = 0 : i64, scratch_operands = 1 : i64, tpu.core_type = #tpu.core_type<tc>, window_params = [{transform_indices = @transform_0, window_bounds = array<i64: 8, 512>}, {transform_indices = @transform_1, window_bounds = array<i64: 512, 256>}, {transform_indices = @transform_2, window_bounds = array<i64: 1, 256>}, {transform_indices = @transform_3, window_bounds = array<i64: 8, 256>}, {transform_indices = @transform_4, window_bounds = array<i64: 8, 256>}]} {
    %c0_i32 = arith.constant 0 : i32
    %0 = arith.cmpi eq, %arg2, %c0_i32 : i32
    %1 = arith.extui %0 : i1 to i32
    %c0_i32_0 = arith.constant 0 : i32
    %2 = arith.cmpi ne, %1, %c0_i32_0 : i32
    scf.if %2 {
      %cst_9 = arith.constant 0.000000e+00 : f32
      %12 = vector.broadcast %cst_9 : f32 to vector<8x256xf32>
      %c0_10 = arith.constant 0 : index
      %c0_11 = arith.constant 0 : index
      %13 = vector.load %arg8[%c0_10, %c0_11] : memref<8x256xf32, #tpu.memory_space<vmem>>, vector<8x256xf32>
      tpu.vector_store %arg8[%c0_10, %c0_11], %12 {strides = array<i32>} : memref<8x256xf32, #tpu.memory_space<vmem>>, vector<8x256xf32>,
    } else {
    }
    %c0 = arith.constant 0 : index
    %c0_1 = arith.constant 0 : index
    %3 = vector.load %arg8[%c0, %c0_1] : memref<8x256xf32, #tpu.memory_space<vmem>>, vector<8x256xf32>
    %c0_2 = arith.constant 0 : index
    %c0_3 = arith.constant 0 : index
    %4 = vector.load %arg3[%c0_2, %c0_3] : memref<8x512xbf16, #tpu.memory_space<vmem>>, vector<8x512xbf16>
    %c0_4 = arith.constant 0 : index
    %c0_5 = arith.constant 0 : index
    %5 = vector.load %arg4[%c0_4, %c0_5] : memref<512x256xbf16, #tpu.memory_space<vmem>>, vector<512x256xbf16>
    %cst = arith.constant dense<0.000000e+00> : vector<8x256xf32>
    %6 = tpu.matmul %4, %5, %cst {dimension_numbers = #tpu.dot_dimension_numbers<[1], [0], [0], [1], [0, 0, 1, 1], [], []>} : vector<8x512xbf16>, vector<512x256xbf16>, vector<8x256xf32> -> vector<8x256xf32>
    %7 = arith.addf %3, %6 : vector<8x256xf32>
    %c0_6 = arith.constant 0 : index
    %c0_7 = arith.constant 0 : index
    %8 = vector.load %arg8[%c0_6, %c0_7] : memref<8x256xf32, #tpu.memory_space<vmem>>, vector<8x256xf32>
    tpu.vector_store %arg8[%c0_6, %c0_7], %7 {strides = array<i32>} : memref<8x256xf32, #tpu.memory_space<vmem>>, vector<8x256xf32>,
    %c8_i32 = arith.constant 8 : i32
    %9 = arith.cmpi eq, %arg2, %c8_i32 : i32
    %10 = arith.extui %9 : i1 to i32
    %c0_i32_8 = arith.constant 0 : i32
    %11 = arith.cmpi ne, %10, %c0_i32_8 : i32
    scf.if %11 {
      %c0_9 = arith.constant 0 : index
      %c0_10 = arith.constant 0 : index
      %12 = vector.load %arg8[%c0_9, %c0_10] : memref<8x256xf32, #tpu.memory_space<vmem>>, vector<8x256xf32>
      %c0_11 = arith.constant 0 : index
      %c0_12 = arith.constant 0 : index
      %13 = vector.load %arg5[%c0_11, %c0_12] : memref<1x256xf32, #tpu.memory_space<vmem>>, vector<1x256xf32>
      %14 = vector.broadcast %13 : vector<1x256xf32> to vector<8x256xf32>
      %15 = arith.addf %12, %14 : vector<8x256xf32>
      %c0_13 = arith.constant 0 : index
      %c0_14 = arith.constant 0 : index
      %16 = vector.load %arg6[%c0_13, %c0_14] : memref<8x256xbf16, #tpu.memory_space<vmem>>, vector<8x256xbf16>
      %17 = arith.extf %16 : vector<8x256xbf16> to vector<8x256xf32>
      %18 = arith.addf %15, %17 : vector<8x256xf32>
      %cst_15 = arith.constant 0.000000e+00 : f32
      %19 = vector.broadcast %cst_15 : f32 to vector<8x256xf32>
      %20 = arith.maximumf %18, %19 : vector<8x256xf32>
      %21 = arith.truncf %20 : vector<8x256xf32> to vector<8x256xbf16>
      %c0_16 = arith.constant 0 : index
      %c0_17 = arith.constant 0 : index
      %22 = vector.load %arg7[%c0_16, %c0_17] : memref<8x256xbf16, #tpu.memory_space<vmem>>, vector<8x256xbf16>
      tpu.vector_store %arg7[%c0_16, %c0_17], %21 {strides = array<i32>} : memref<8x256xbf16, #tpu.memory_space<vmem>>, vector<8x256xbf16>,
    } else {
    }
    return
  }
  func.func @transform_0(%arg0: i32, %arg1: i32, %arg2: i32) -> (i32, i32) {
    %c0_i32 = arith.constant 0 : i32
    return %arg0, %arg2 : i32, i32
  }
  func.func @transform_1(%arg0: i32, %arg1: i32, %arg2: i32) -> (i32, i32) {
    %c0_i32 = arith.constant 0 : i32
    return %arg2, %arg1 : i32, i32
  }
  func.func @transform_2(%arg0: i32, %arg1: i32, %arg2: i32) -> (i32, i32) {
    %c0_i32 = arith.constant 0 : i32
    %c0_i32_0 = arith.constant 0 : i32
    return %c0_i32, %arg1 : i32, i32
  }
  func.func @transform_3(%arg0: i32, %arg1: i32, %arg2: i32) -> (i32, i32) {
    %c0_i32 = arith.constant 0 : i32
    return %arg0, %arg1 : i32, i32
  }
  func.func @transform_4(%arg0: i32, %arg1: i32, %arg2: i32) -> (i32, i32) {
    %c0_i32 = arith.constant 0 : i32
    return %arg0, %arg1 : i32, i32
  }
}

module attributes {stable_mosaic.version = 11 : i64} {
  func.func @_conv_matmul_kernel(%arg0: i32, %arg1: i32, %arg2: i32, %arg3: memref<8x512xbf16, #tpu.memory_space<vmem>>, %arg4: memref<512x256xbf16, #tpu.memory_space<vmem>>, %arg5: memref<1x256xf32, #tpu.memory_space<vmem>>, %arg6: memref<8x256xbf16, #tpu.memory_space<vmem>>, %arg7: memref<8x256xf32, #tpu.memory_space<vmem>>) attributes {dimension_semantics = [#tpu.dimension_semantics<parallel>, #tpu.dimension_semantics<parallel>, #tpu.dimension_semantics<arbitrary>], iteration_bounds = array<i64: 1, 2, 9>, scalar_prefetch = 0 : i64, scratch_operands = 1 : i64, tpu.core_type = #tpu.core_type<tc>, window_params = [{transform_indices = @transform_0, window_bounds = array<i64: 8, 512>}, {transform_indices = @transform_1, window_bounds = array<i64: 512, 256>}, {transform_indices = @transform_2, window_bounds = array<i64: 1, 256>}, {transform_indices = @transform_3, window_bounds = array<i64: 8, 256>}]} {
    %c0_i32 = arith.constant 0 : i32
    %0 = arith.cmpi eq, %arg2, %c0_i32 : i32
    %1 = arith.extui %0 : i1 to i32
    %c0_i32_0 = arith.constant 0 : i32
    %2 = arith.cmpi ne, %1, %c0_i32_0 : i32
    scf.if %2 {
      %cst_9 = arith.constant 0.000000e+00 : f32
      %12 = vector.broadcast %cst_9 : f32 to vector<8x256xf32>
      %c0_10 = arith.constant 0 : index
      %c0_11 = arith.constant 0 : index
      %13 = vector.load %arg7[%c0_10, %c0_11] : memref<8x256xf32, #tpu.memory_space<vmem>>, vector<8x256xf32>
      tpu.vector_store %arg7[%c0_10, %c0_11], %12 {strides = array<i32>} : memref<8x256xf32, #tpu.memory_space<vmem>>, vector<8x256xf32>,
    } else {
    }
    %c0 = arith.constant 0 : index
    %c0_1 = arith.constant 0 : index
    %3 = vector.load %arg7[%c0, %c0_1] : memref<8x256xf32, #tpu.memory_space<vmem>>, vector<8x256xf32>
    %c0_2 = arith.constant 0 : index
    %c0_3 = arith.constant 0 : index
    %4 = vector.load %arg3[%c0_2, %c0_3] : memref<8x512xbf16, #tpu.memory_space<vmem>>, vector<8x512xbf16>
    %c0_4 = arith.constant 0 : index
    %c0_5 = arith.constant 0 : index
    %5 = vector.load %arg4[%c0_4, %c0_5] : memref<512x256xbf16, #tpu.memory_space<vmem>>, vector<512x256xbf16>
    %cst = arith.constant dense<0.000000e+00> : vector<8x256xf32>
    %6 = tpu.matmul %4, %5, %cst {dimension_numbers = #tpu.dot_dimension_numbers<[1], [0], [0], [1], [0, 0, 1, 1], [], []>} : vector<8x512xbf16>, vector<512x256xbf16>, vector<8x256xf32> -> vector<8x256xf32>
    %7 = arith.addf %3, %6 : vector<8x256xf32>
    %c0_6 = arith.constant 0 : index
    %c0_7 = arith.constant 0 : index
    %8 = vector.load %arg7[%c0_6, %c0_7] : memref<8x256xf32, #tpu.memory_space<vmem>>, vector<8x256xf32>
    tpu.vector_store %arg7[%c0_6, %c0_7], %7 {strides = array<i32>} : memref<8x256xf32, #tpu.memory_space<vmem>>, vector<8x256xf32>,
    %c8_i32 = arith.constant 8 : i32
    %9 = arith.cmpi eq, %arg2, %c8_i32 : i32
    %10 = arith.extui %9 : i1 to i32
    %c0_i32_8 = arith.constant 0 : i32
    %11 = arith.cmpi ne, %10, %c0_i32_8 : i32
    scf.if %11 {
      %c0_9 = arith.constant 0 : index
      %c0_10 = arith.constant 0 : index
      %12 = vector.load %arg7[%c0_9, %c0_10] : memref<8x256xf32, #tpu.memory_space<vmem>>, vector<8x256xf32>
      %c0_11 = arith.constant 0 : index
      %c0_12 = arith.constant 0 : index
      %13 = vector.load %arg5[%c0_11, %c0_12] : memref<1x256xf32, #tpu.memory_space<vmem>>, vector<1x256xf32>
      %14 = vector.broadcast %13 : vector<1x256xf32> to vector<8x256xf32>
      %15 = arith.addf %12, %14 : vector<8x256xf32>
      %cst_13 = arith.constant 0.000000e+00 : f32
      %16 = vector.broadcast %cst_13 : f32 to vector<8x256xf32>
      %17 = arith.maximumf %15, %16 : vector<8x256xf32>
      %18 = arith.truncf %17 : vector<8x256xf32> to vector<8x256xbf16>
      %c0_14 = arith.constant 0 : index
      %c0_15 = arith.constant 0 : index
      %19 = vector.load %arg6[%c0_14, %c0_15] : memref<8x256xbf16, #tpu.memory_space<vmem>>, vector<8x256xbf16>
      tpu.vector_store %arg6[%c0_14, %c0_15], %18 {strides = array<i32>} : memref<8x256xbf16, #tpu.memory_space<vmem>>, vector<8x256xbf16>,
    } else {
    }
    return
  }
  func.func @transform_0(%arg0: i32, %arg1: i32, %arg2: i32) -> (i32, i32) {
    %c0_i32 = arith.constant 0 : i32
    return %arg0, %arg2 : i32, i32
  }
  func.func @transform_1(%arg0: i32, %arg1: i32, %arg2: i32) -> (i32, i32) {
    %c0_i32 = arith.constant 0 : i32
    return %arg2, %arg1 : i32, i32
  }
  func.func @transform_2(%arg0: i32, %arg1: i32, %arg2: i32) -> (i32, i32) {
    %c0_i32 = arith.constant 0 : i32
    %c0_i32_0 = arith.constant 0 : i32
    return %c0_i32, %arg1 : i32, i32
  }
  func.func @transform_3(%arg0: i32, %arg1: i32, %arg2: i32) -> (i32, i32) {
    %c0_i32 = arith.constant 0 : i32
    return %arg0, %arg1 : i32, i32
  }
}

</mosaic_0001>

<bundles_post_ra>
// kernel: _lambda_.21
= control target key start
LH: loop header
LB: loop body
LE: loop exit
PB: predicated region body
PF: predicated region fallthrough
CT: control target
= control target key end

     0   :  { %s1654_s12 = smov 0   ;;  %s1656_s13 = smov 0   ;;  %s1940_s0 = inlined_call_operand.vmem [shape: bf16[512,256], index: 0, kind: input, shape index: {}]   ;;  %s1941_s1 = inlined_call_operand.vmem [shape: bf16[256,64], index: 1, kind: input, shape index: {}]   ;;  %s1942_s2 = inlined_call_operand.vmem [shape: f32[1,64], index: 2, kind: input, shape index: {}]   ;;  %s1943_s3 = inlined_call_operand.vmem [shape: bf16[512,64], index: 3, kind: output, shape index: {}]  }
   0x1   :  { %s1658_s14 = smov 0  }
   0x2 LB: > { %s32_s15 = sadd.s32 1, %s1627_s13  ;;  %p1270_p0 = scmp.ge.s32.totalorder %s1631_s14, 1  ;;  %s1631_s14 = sphi %s1658_s14, %s13_s14   ;;  %s1627_s13 = sphi %s1656_s13, %s1945_s13   ;;  %s1623_s12 = sphi %s1654_s12, %s1944_s12  }
   0x3   : > { %p34_p1 = scmp.ge.s32.totalorder %s32_s15, 2  ;;  %p191_p2 = scmp.lt.s32.totalorder %s1631_s14, 3 }
   0x5   : > { %s1947_s15 = smov (%p34_p1, %s32_s15), 0  ;;  %p192_p3 = pnand %p1270_p0, %p191_p2 }
   0x6   : > { %s1271_s18 = sshll.u32 (!%p192_p3), %s1623_s12, 5 }
   0x7   : > { %195 = sbr.rel (%p192_p3) target bundleno = 320 (0x140), region = 32  ;;  %p236_p4 = scmp.lt.s32.totalorder (!%p192_p3), %s1271_s18, 63 }
   0xc   : > { %v1545_v0 = vld [vmem:[%s1941_s1 + $0x78] sm:$0xff]   ;;  %v1547_v2 = vld [vmem:[%s1941_s1 + $0x70] sm:$0xff]   ;;  %v1549_v4 = vld [vmem:[%s1941_s1 + $0x68] sm:$0xff]   ;;  %s1949_s18 = smov (!%p236_p4, %s1271_s18), 63  ;;  %vm272_vm0 = vcmask 523264   ;;  %v1633_v48 = vmov 0.0  }
   0xd   : > { %v1546_v1 = vld [vmem:[%s1941_s1 + $0x38] sm:$0xff]   ;;  %1392 = vmatprep.subr.bf16.mxu0 %v1545_v0  ;;  %1504 = vmatprep.subr.bf16.mxu1 %v1545_v0  ;;  %v1548_v3 = vld [vmem:[%s1941_s1 + $0x30] sm:$0xff]   ;;  %v1550_v5 = vld [vmem:[%s1941_s1 + $0x28] sm:$0xff]   ;;  %s1359_s6 = sshll.u32 %s1949_s18, 3  ;;  %273 = vst.msk [vmem:[#allocation2] sm:$0xff] %vm272_vm0, %v1633_v48  ;;  %s1275_s5 = sshll.u32 %s1949_s18, 2 }
   0xe   : > { %1393 = vmatpush3.bf16.msra.mxu0 %v1546_v1  ;;  %1512 = vmatpush3.bf16.msra.mxu1 %v1546_v1  ;;  %v1551_v6 = vld [vmem:[%s1941_s1 + $0x60] sm:$0xff]   ;;  %v1553_v8 = vld [vmem:[%s1941_s1 + $0x58] sm:$0xff]   ;;  %s1705_s11 = scalar_lea.vmem %s1940_s0, %s1359_s6  ;;  %v1555_v10 = vld [vmem:[%s1941_s1 + $0x50] sm:$0xff]   ;;  %274 = vst.msk [vmem:[#allocation2 + $0x8] sm:$0xff] %vm272_vm0, %v1633_v48  ;;  %s1809_s18 = scalar_lea.vmem %s1943_s3, %s1275_s5  ;;  %vm1117_vm1 = vcmask 519168  }
   0xf   : > { %1394 = vmatprep.subr.bf16.mxu0 %v1547_v2  ;;  %1505 = vmatprep.subr.bf16.mxu1 %v1547_v2  ;;  %v1552_v7 = vld [vmem:[%s1941_s1 + $0x20] sm:$0xff]   ;;  %v1554_v9 = vld [vmem:[%s1941_s1 + $0x18] sm:$0xff]   ;;  %v1556_v13 = vld [vmem:[%s1941_s1 + $0x10] sm:$0xff]   ;;  %275 = vst.msk [vmem:[#allocation2 + $0x10] sm:$0xff] %vm272_vm0, %v1633_v48 }
  0x10   : > { %v1563_v11 = vld [vmem:[%s1705_s11 + $0x4] ss:$8 sps:$4 sm:$0xff]   ;;  %v1561_v18 = vld [vmem:[%s1705_s11] ss:$8 sps:$4 sm:$0xff]   ;;  %v1567_v20 = vld [vmem:[%s1705_s11 + $0x14] ss:$8 sps:$4 sm:$0xff]  }
  0x11   : > { %v1566_v12 = vld [vmem:[%s1705_s11 + $0x84] ss:$8 sps:$4 sm:$0xff]   ;;  %689 = vmatprep.mubr.bf16.mxu0 %v1563_v11  ;;  %v1564_v19 = vld [vmem:[%s1705_s11 + $0x80] ss:$8 sps:$4 sm:$0xff]   ;;  %v1569_v21 = vld [vmem:[%s1705_s11 + $0x94] ss:$8 sps:$4 sm:$0xff]  }
  0x12   : > { %1395 = vmatpush3.bf16.msra.mxu0 %v1548_v3  ;;  %1513 = vmatpush3.bf16.msra.mxu1 %v1548_v3  ;;  %v1557_v14 = vld [vmem:[%s1941_s1 + $0x48] sm:$0xff]   ;;  %v1559_v16 = vld [vmem:[%s1941_s1 + $0x40] sm:$0xff]   ;;  %v1571_v22 = vld [vmem:[%s1705_s11 + $0x10] ss:$8 sps:$4 sm:$0xff]   ;;  %276 = vst.msk [vmem:[#allocation2 + $0x18] sm:$0xff] %vm272_vm0, %v1633_v48 }
  0x13   : > { %1396 = vmatprep.subr.bf16.mxu0 %v1549_v4  ;;  %1506 = vmatprep.subr.bf16.mxu1 %v1549_v4  ;;  %v1558_v15 = vld [vmem:[%s1941_s1 + $0x8] sm:$0xff]   ;;  %v1560_v17 = vld [vmem:[%s1941_s1] sm:$0xff]   ;;  %v1572_v23 = vld [vmem:[%s1705_s11 + $0x90] ss:$8 sps:$4 sm:$0xff]   ;;  %277 = vst.msk [vmem:[#allocation2 + $0x20] sm:$0xff] %vm272_vm0, %v1633_v48 }
  0x14   : > { %753 = vmatprep.mubr.bf16.mxu1 %v1566_v12  ;;  %v1573_v24 = vld [vmem:[%s1705_s11 + $0x24] ss:$8 sps:$4 sm:$0xff]   ;;  %v1577_v26 = vld [vmem:[%s1705_s11 + $0x20] ss:$8 sps:$4 sm:$0xff]   ;;  %v1579_v28 = vld [vmem:[%s1705_s11 + $0x34] ss:$8 sps:$4 sm:$0xff]  }
  0x15   : > { %v1575_v25 = vld [vmem:[%s1705_s11 + $0xa4] ss:$8 sps:$4 sm:$0xff]   ;;  %v1578_v27 = vld [vmem:[%s1705_s11 + $0xa0] ss:$8 sps:$4 sm:$0xff]   ;;  %v1581_v29 = vld [vmem:[%s1705_s11 + $0xb4] ss:$8 sps:$4 sm:$0xff]  }
  0x16   : > { %1397 = vmatpush3.bf16.msra.mxu0 %v1550_v5  ;;  %1514 = vmatpush3.bf16.msra.mxu1 %v1550_v5  ;;  %v1583_v30 = vld [vmem:[%s1705_s11 + $0x30] ss:$8 sps:$4 sm:$0xff]   ;;  %v1585_v32 = vld [vmem:[%s1705_s11 + $0x44] ss:$8 sps:$4 sm:$0xff]   ;;  %v1589_v34 = vld [vmem:[%s1705_s11 + $0x40] ss:$8 sps:$4 sm:$0xff]  }
  0x17   : > { %1398 = vmatprep.subr.bf16.mxu0 %v1551_v6  ;;  %1507 = vmatprep.subr.bf16.mxu1 %v1551_v6  ;;  %v1584_v31 = vld [vmem:[%s1705_s11 + $0xb0] ss:$8 sps:$4 sm:$0xff]   ;;  %v1587_v33 = vld [vmem:[%s1705_s11 + $0xc4] ss:$8 sps:$4 sm:$0xff]   ;;  %v1590_v35 = vld [vmem:[%s1705_s11 + $0xc0] ss:$8 sps:$4 sm:$0xff]  }
  0x18   : > { %v1591_v36 = vld [vmem:[%s1705_s11 + $0x54] ss:$8 sps:$4 sm:$0xff]   ;;  %v1595_v38 = vld [vmem:[%s1705_s11 + $0x50] ss:$8 sps:$4 sm:$0xff]   ;;  %v1597_v40 = vld [vmem:[%s1705_s11 + $0x64] ss:$8 sps:$4 sm:$0xff]  }
  0x19   : > { %v1593_v37 = vld [vmem:[%s1705_s11 + $0xd4] ss:$8 sps:$4 sm:$0xff]   ;;  %v1596_v39 = vld [vmem:[%s1705_s11 + $0xd0] ss:$8 sps:$4 sm:$0xff]   ;;  %v1599_v41 = vld [vmem:[%s1705_s11 + $0xe4] ss:$8 sps:$4 sm:$0xff]  }
  0x1a   : > { %1399 = vmatpush3.bf16.msra.mxu0 %v1552_v7  ;;  %1515 = vmatpush3.bf16.msra.mxu1 %v1552_v7  ;;  %v1601_v42 = vld [vmem:[%s1705_s11 + $0x60] ss:$8 sps:$4 sm:$0xff]   ;;  %v1603_v44 = vld [vmem:[%s1705_s11 + $0x74] ss:$8 sps:$4 sm:$0xff]   ;;  %v1607_v46 = vld [vmem:[%s1705_s11 + $0x70] ss:$8 sps:$4 sm:$0xff]  }
  0x1b   : > { %1400 = vmatprep.subr.bf16.mxu0 %v1553_v8  ;;  %1508 = vmatprep.subr.bf16.mxu1 %v1553_v8  ;;  %v1602_v43 = vld [vmem:[%s1705_s11 + $0xe0] ss:$8 sps:$4 sm:$0xff]   ;;  %v1605_v45 = vld [vmem:[%s1705_s11 + $0xf4] ss:$8 sps:$4 sm:$0xff]   ;;  %v1608_v47 = vld [vmem:[%s1705_s11 + $0xf0] ss:$8 sps:$4 sm:$0xff]  }
  0x1c   : > { %278 = vst.msk [vmem:[#allocation2 + $0x28] sm:$0xff] %vm272_vm0, %v1633_v48  ;;  %279 = vst.msk [vmem:[#allocation2 + $0x30] sm:$0xff] %vm272_vm0, %v1633_v48  ;;  %v305_v51 = vld [vmem:[#allocation2] sm:$0xff]  ;;  %v306_v61 = vld [vmem:[#allocation2 + $0x8] sm:$0xff] }
  0x1d   : > { %280 = vst.msk [vmem:[#allocation2 + $0x38] sm:$0xff] %vm272_vm0, %v1633_v48  ;;  %281 = vst.msk [vmem:[#allocation2 + $0x40] sm:$0xff] %vm272_vm0, %v1633_v48  ;;  %v307_v7 = vld [vmem:[#allocation2 + $0x10] sm:$0xff] }
  0x1e   : > { %1401 = vmatpush3.bf16.msra.mxu0 %v1554_v9  ;;  %1516 = vmatpush3.bf16.msra.mxu1 %v1554_v9  ;;  %282 = vst.msk [vmem:[#allocation2 + $0x48] sm:$0xff] %vm272_vm0, %v1633_v48  ;;  %283 = vst.msk [vmem:[#allocation2 + $0x50] sm:$0xff] %vm272_vm0, %v1633_v48 }
  0x1f   : > { %1402 = vmatprep.subr.bf16.mxu0 %v1555_v10  ;;  %1509 = vmatprep.subr.bf16.mxu1 %v1555_v10  ;;  %284 = vst.msk [vmem:[#allocation2 + $0x58] sm:$0xff] %vm272_vm0, %v1633_v48  ;;  %285 = vst.msk [vmem:[#allocation2 + $0x60] sm:$0xff] %vm272_vm0, %v1633_v48 }
  0x20   : > { %286 = vst.msk [vmem:[#allocation2 + $0x68] sm:$0xff] %vm272_vm0, %v1633_v48  ;;  %287 = vst.msk [vmem:[#allocation2 + $0x70] sm:$0xff] %vm272_vm0, %v1633_v48 }
  0x21   : > { %288 = vst.msk [vmem:[#allocation2 + $0x78] sm:$0xff] %vm272_vm0, %v1633_v48  ;;  %289 = vst.msk [vmem:[#allocation2 + $0x80] sm:$0xff] %vm272_vm0, %v1633_v48 }
  0x22   : > { %1403 = vmatpush3.bf16.msra.mxu0 %v1556_v13  ;;  %1517 = vmatpush3.bf16.msra.mxu1 %v1556_v13  ;;  %290 = vst.msk [vmem:[#allocation2 + $0x88] sm:$0xff] %vm272_vm0, %v1633_v48  ;;  %291 = vst.msk [vmem:[#allocation2 + $0x90] sm:$0xff] %vm272_vm0, %v1633_v48  ;;  %v1799_v13 = vld [vmem:[%s1942_s2] ss:$0 sm:$0xff] }
  0x23   : > { %1404 = vmatprep.subr.bf16.mxu0 %v1557_v14  ;;  %1510 = vmatprep.subr.bf16.mxu1 %v1557_v14  ;;  %292 = vst.msk [vmem:[#allocation2 + $0x98] sm:$0xff] %vm272_vm0, %v1633_v48  ;;  %293 = vst.msk [vmem:[#allocation2 + $0xa0] sm:$0xff] %vm272_vm0, %v1633_v48 }
  0x24   : > { %294 = vst.msk [vmem:[#allocation2 + $0xa8] sm:$0xff] %vm272_vm0, %v1633_v48  ;;  %295 = vst.msk [vmem:[#allocation2 + $0xb0] sm:$0xff] %vm272_vm0, %v1633_v48 }
  0x25   : > { %296 = vst.msk [vmem:[#allocation2 + $0xb8] sm:$0xff] %vm272_vm0, %v1633_v48  ;;  %297 = vst.msk [vmem:[#allocation2 + $0xc0] sm:$0xff] %vm272_vm0, %v1633_v48 }
  0x26   : > { %1405 = vmatpush3.bf16.msra.mxu0 %v1558_v15  ;;  %1518 = vmatpush3.bf16.msra.mxu1 %v1558_v15  ;;  %298 = vst.msk [vmem:[#allocation2 + $0xc8] sm:$0xff] %vm272_vm0, %v1633_v48  ;;  %299 = vst.msk [vmem:[#allocation2 + $0xd0] sm:$0xff] %vm272_vm0, %v1633_v48 }
  0x27   : > { %1406 = vmatprep.subr.bf16.mxu0 %v1559_v16  ;;  %1511 = vmatprep.subr.bf16.mxu1 %v1559_v16  ;;  %300 = vst.msk [vmem:[#allocation2 + $0xd8] sm:$0xff] %vm272_vm0, %v1633_v48  ;;  %301 = vst.msk [vmem:[#allocation2 + $0xe0] sm:$0xff] %vm272_vm0, %v1633_v48 }
  0x28   : > { %302 = vst.msk [vmem:[#allocation2 + $0xe8] sm:$0xff] %vm272_vm0, %v1633_v48  ;;  %303 = vst.msk [vmem:[#allocation2 + $0xf0] sm:$0xff] %vm272_vm0, %v1633_v48  ;;  %v321_v53 = vld [vmem:[#allocation2 + $0x80] sm:$0xff] }
  0x29   : > { %304 = vst.msk [vmem:[#allocation2 + $0xf8] sm:$0xff] %vm272_vm0, %v1633_v48  ;;  %v322_v63 = vld [vmem:[#allocation2 + $0x88] sm:$0xff]  ;;  %v323_v9 = vld [vmem:[#allocation2 + $0x90] sm:$0xff] }
  0x2a   : > { %1407 = vmatpush3.bf16.msra.mxu0 %v1560_v17  ;;  %1519 = vmatpush3.bf16.msra.mxu1 %v1560_v17 }
  0x2d   : > { %690 = vmatmul.mubr.bf16.vlgmr.msra.gmra.mxu0 %v1561_v18  ;;  %754 = vmatmul.mubr.bf16.vlgmr.msra.gmra.mxu1 %v1564_v19  ;;  %v308_v18 = vld [vmem:[#allocation2 + $0x18] sm:$0xff] }
  0x2e   : > { %697 = vmatprep.mubr.bf16.mxu0 %v1567_v20  ;;  %761 = vmatprep.mubr.bf16.mxu1 %v1569_v21 }
  0x35   : > { %698 = vmatmul.mubr.bf16.gmra.mxu0 %v1571_v22  ;;  %762 = vmatmul.mubr.bf16.gmra.mxu1 %v1572_v23  ;;  %v324_v22 = vld [vmem:[#allocation2 + $0x98] sm:$0xff] }
  0x36   : > { %705 = vmatprep.mubr.bf16.mxu0 %v1573_v24  ;;  %769 = vmatprep.mubr.bf16.mxu1 %v1575_v25 }
  0x3d   : > { %706 = vmatmul.mubr.bf16.gmra.mxu0 %v1577_v26  ;;  %770 = vmatmul.mubr.bf16.gmra.mxu1 %v1578_v27 }
  0x3e   : > { %713 = vmatprep.mubr.bf16.mxu0 %v1579_v28  ;;  %777 = vmatprep.mubr.bf16.mxu1 %v1581_v29 }
  0x45   : > { %714 = vmatmul.mubr.bf16.gmra.mxu0 %v1583_v30  ;;  %778 = vmatmul.mubr.bf16.gmra.mxu1 %v1584_v31 }
  0x46   : > { %721 = vmatprep.mubr.bf16.mxu0 %v1585_v32  ;;  %785 = vmatprep.mubr.bf16.mxu1 %v1587_v33 }
  0x4d   : > { %722 = vmatmul.mubr.bf16.gmra.mxu0 %v1589_v34  ;;  %786 = vmatmul.mubr.bf16.gmra.mxu1 %v1590_v35 }
  0x4e   : > { %729 = vmatprep.mubr.bf16.mxu0 %v1591_v36  ;;  %793 = vmatprep.mubr.bf16.mxu1 %v1593_v37 }
  0x55   : > { %730 = vmatmul.mubr.bf16.gmra.mxu0 %v1595_v38  ;;  %794 = vmatmul.mubr.bf16.gmra.mxu1 %v1596_v39 }
  0x56   : > { %737 = vmatprep.mubr.bf16.mxu0 %v1597_v40  ;;  %801 = vmatprep.mubr.bf16.mxu1 %v1599_v41 }
  0x5d   : > { %738 = vmatmul.mubr.bf16.gmra.mxu0 %v1601_v42  ;;  %802 = vmatmul.mubr.bf16.gmra.mxu1 %v1602_v43  ;;  %v309_v42 = vld [vmem:[#allocation2 + $0x20] sm:$0xff] }
  0x5e   : > { %745 = vmatprep.mubr.bf16.mxu0 %v1603_v44  ;;  %809 = vmatprep.mubr.bf16.mxu1 %v1605_v45  ;;  %v325_v43 = vld [vmem:[#allocation2 + $0xa0] sm:$0xff] }
  0x65   : > { %746 = vmatmul.mubr.bf16.gmra.mxu0 %v1607_v46  ;;  %810 = vmatmul.mubr.bf16.gmra.mxu1 %v1608_v47 }
  0xed   : > { %v1408_v49 = vpop.f32.mrf.mxu0  ;;  %v1456_v50 = vpop.f32.mrf.mxu1 }
  0xef   : > { %v1409_v52 = vpop.f32.mrf.mxu0  ;;  %v1457_v54 = vpop.f32.mrf.mxu1 }
  0xf0   : > { %v1410_v55 = vadd.f32 %v1409_v52, %v1408_v49  ;;  %v1458_v56 = vadd.f32 %v1457_v54, %v1456_v50 }
  0xf1   : > { %v1411_v57 = vpop.f32.mrf.mxu0  ;;  %v1459_v58 = vpop.f32.mrf.mxu1 }
  0xf2   : > { %v818_v59 = vadd.f32 %v1410_v55, %v305_v51  ;;  %v834_v60 = vadd.f32 %v1458_v56, %v321_v53 }
  0xf3   : > { %v1412_v62 = vpop.f32.mrf.mxu0  ;;  %v1460_v0 = vpop.f32.mrf.mxu1 }
  0xf4   : > { %851 = vst.msk [vmem:[#allocation2] sm:$0xff] %vm272_vm0, %v818_v59  ;;  %867 = vst.msk [vmem:[#allocation2 + $0x80] sm:$0xff] %vm272_vm0, %v834_v60  ;;  %v1413_v1 = vadd.f32 %v1412_v62, %v1411_v57  ;;  %v1461_v2 = vadd.f32 %v1460_v0, %v1459_v58  ;;  %v310_v60 = vld [vmem:[#allocation2 + $0x28] sm:$0xff] }
  0xf5   : > { %v1414_v3 = vpop.f32.mrf.mxu0  ;;  %v1462_v4 = vpop.f32.mrf.mxu1 }
  0xf6   : > { %v819_v5 = vadd.f32 %v1413_v1, %v306_v61  ;;  %v835_v6 = vadd.f32 %v1461_v2, %v322_v63  ;;  %v326_v61 = vld [vmem:[#allocation2 + $0xa8] sm:$0xff] }
  0xf7   : > { %v1415_v8 = vpop.f32.mrf.mxu0  ;;  %v1463_v10 = vpop.f32.mrf.mxu1 }
  0xf8   : > { %852 = vst.msk [vmem:[#allocation2 + $0x8] sm:$0xff] %vm272_vm0, %v819_v5  ;;  %868 = vst.msk [vmem:[#allocation2 + $0x88] sm:$0xff] %vm272_vm0, %v835_v6  ;;  %v1416_v11 = vadd.f32 %v1415_v8, %v1414_v3  ;;  %v1464_v12 = vadd.f32 %v1463_v10, %v1462_v4 }
  0xf9   : > { %v1417_v14 = vpop.f32.mrf.mxu0  ;;  %v1465_v15 = vpop.f32.mrf.mxu1 }
  0xfa   : > { %v820_v16 = vadd.f32 %v1416_v11, %v307_v7  ;;  %v836_v17 = vadd.f32 %v1464_v12, %v323_v9 }
  0xfb   : > { %v886_v19 = vld [vmem:[#allocation2] sm:$0xff]  ;;  %v1418_v21 = vpop.f32.mrf.mxu0  ;;  %v1466_v23 = vpop.f32.mrf.mxu1 }
  0xfc   : > { %v902_v20 = vld [vmem:[#allocation2 + $0x80] sm:$0xff]  ;;  %v925_v24 = vadd.f32 %v1799_v13, %v886_v19  ;;  %853 = vst.msk [vmem:[#allocation2 + $0x10] sm:$0xff] %vm272_vm0, %v820_v16  ;;  %869 = vst.msk [vmem:[#allocation2 + $0x90] sm:$0xff] %vm272_vm0, %v836_v17  ;;  %v1419_v26 = vadd.f32 %v1418_v21, %v1417_v14  ;;  %v1467_v27 = vadd.f32 %v1466_v23, %v1465_v15  ;;  %v311_v15 = vld [vmem:[#allocation2 + $0x30] sm:$0xff] }
  0xfd   : > { %v941_v25 = vadd.f32 %v1799_v13, %v902_v20  ;;  %v1420_v28 = vpop.f32.mrf.mxu0  ;;  %v1468_v29 = vpop.f32.mrf.mxu1  ;;  %v327_v16 = vld [vmem:[#allocation2 + $0xb0] sm:$0xff] }
  0xfe   : > { %v957_v30 = vmax.f32 %v925_v24, 0.0  ;;  %v821_v32 = vadd.f32 %v1419_v26, %v308_v18  ;;  %v837_v33 = vadd.f32 %v1467_v27, %v324_v22  ;;  %v328_v27 = vld [vmem:[#allocation2 + $0xb8] sm:$0xff] }
  0xff   : > { %v973_v31 = vmax.f32 %v941_v25, 0.0  ;;  %v887_v34 = vld [vmem:[#allocation2 + $0x8] sm:$0xff]  ;;  %v1421_v36 = vpop.f32.mrf.mxu0  ;;  %v1469_v37 = vpop.f32.mrf.mxu1  ;;  %v312_v25 = vld [vmem:[#allocation2 + $0x38] sm:$0xff] }
 0x100   : > { %v903_v35 = vld [vmem:[#allocation2 + $0x88] sm:$0xff]  ;;  %v1360_v38 = vpack.c.bf16 %v957_v30, %v957_v30  ;;  %v926_v40 = vadd.f32 %v1799_v13, %v887_v34  ;;  %854 = vst.msk [vmem:[#allocation2 + $0x18] sm:$0xff] %vm272_vm0, %v821_v32  ;;  %870 = vst.msk [vmem:[#allocation2 + $0x98] sm:$0xff] %vm272_vm0, %v837_v33  ;;  %v1422_v44 = vadd.f32 %v1421_v36, %v1420_v28 }
 0x101   : > { %v1376_v39 = vpack.c.bf16 %v973_v31, %v973_v31  ;;  %v942_v41 = vadd.f32 %v1799_v13, %v903_v35  ;;  %v1470_v45 = vadd.f32 %v1469_v37, %v1468_v29  ;;  %v1423_v46 = vpop.f32.mrf.mxu0  ;;  %v1471_v47 = vpop.f32.mrf.mxu1 }
 0x102   : > { %1118 = vst.msk [vmem:[%s1809_s18] sm:$0xf] %vm1117_vm1, %v1360_v38  ;;  %v958_v48 = vmax.f32 %v926_v40, 0.0  ;;  %v822_v52 = vadd.f32 %v1422_v44, %v309_v42 }
 0x103   : > { %1134 = vst.msk [vmem:[%s1809_s18 + $0x40] sm:$0xf] %vm1117_vm1, %v1376_v39  ;;  %v974_v49 = vmax.f32 %v942_v41, 0.0  ;;  %v888_v50 = vld [vmem:[#allocation2 + $0x10] sm:$0xff]  ;;  %v838_v53 = vadd.f32 %v1470_v45, %v325_v43  ;;  %v1424_v54 = vpop.f32.mrf.mxu0  ;;  %v1472_v55 = vpop.f32.mrf.mxu1  ;;  %v313_v43 = vld [vmem:[#allocation2 + $0x40] sm:$0xff] }
 0x104   : > { %v904_v51 = vld [vmem:[#allocation2 + $0x90] sm:$0xff]  ;;  %v1361_v56 = vpack.c.bf16 %v958_v48, %v958_v48  ;;  %v927_v58 = vadd.f32 %v1799_v13, %v888_v50  ;;  %855 = vst.msk [vmem:[#allocation2 + $0x20] sm:$0xff] %vm272_vm0, %v822_v52  ;;  %v1425_v62 = vadd.f32 %v1424_v54, %v1423_v46  ;;  %v1473_v63 = vadd.f32 %v1472_v55, %v1471_v47  ;;  %v329_v45 = vld [vmem:[#allocation2 + $0xc0] sm:$0xff] }
 0x105   : > { %v1377_v57 = vpack.c.bf16 %v974_v49, %v974_v49  ;;  %v943_v59 = vadd.f32 %v1799_v13, %v904_v51  ;;  %871 = vst.msk [vmem:[#allocation2 + $0xa0] sm:$0xff] %vm272_vm0, %v838_v53  ;;  %v1426_v0 = vpop.f32.mrf.mxu0  ;;  %v1474_v1 = vpop.f32.mrf.mxu1 }
 0x106   : > { %1119 = vst.msk [vmem:[%s1809_s18 + $0x4] sm:$0xf] %vm1117_vm1, %v1361_v56  ;;  %v959_v2 = vmax.f32 %v927_v58, 0.0  ;;  %v823_v6 = vadd.f32 %v1425_v62, %v310_v60  ;;  %v839_v7 = vadd.f32 %v1473_v63, %v326_v61  ;;  %v314_v61 = vld [vmem:[#allocation2 + $0x48] sm:$0xff] }
 0x107   : > { %1135 = vst.msk [vmem:[%s1809_s18 + $0x44] sm:$0xf] %vm1117_vm1, %v1377_v57  ;;  %v975_v3 = vmax.f32 %v943_v59, 0.0  ;;  %v889_v4 = vld [vmem:[#allocation2 + $0x18] sm:$0xff]  ;;  %v1427_v8 = vpop.f32.mrf.mxu0  ;;  %v1475_v9 = vpop.f32.mrf.mxu1  ;;  %v330_v63 = vld [vmem:[#allocation2 + $0xc8] sm:$0xff] }
 0x108   : > { %v905_v5 = vld [vmem:[#allocation2 + $0x98] sm:$0xff]  ;;  %v1362_v10 = vpack.c.bf16 %v959_v2, %v959_v2  ;;  %v928_v12 = vadd.f32 %v1799_v13, %v889_v4  ;;  %856 = vst.msk [vmem:[#allocation2 + $0x28] sm:$0xff] %vm272_vm0, %v823_v6  ;;  %872 = vst.msk [vmem:[#allocation2 + $0xa8] sm:$0xff] %vm272_vm0, %v839_v7  ;;  %v1428_v17 = vadd.f32 %v1427_v8, %v1426_v0 }
 0x109   : > { %v1378_v11 = vpack.c.bf16 %v975_v3, %v975_v3  ;;  %v944_v14 = vadd.f32 %v1799_v13, %v905_v5  ;;  %v1476_v18 = vadd.f32 %v1475_v9, %v1474_v1  ;;  %v1429_v19 = vpop.f32.mrf.mxu0  ;;  %v1477_v20 = vpop.f32.mrf.mxu1 }
 0x10a   : > { %1120 = vst.msk [vmem:[%s1809_s18 + $0x8] sm:$0xf] %vm1117_vm1, %v1362_v10  ;;  %v960_v21 = vmax.f32 %v928_v12, 0.0  ;;  %v824_v23 = vadd.f32 %v1428_v17, %v311_v15 }
 0x10b   : > { %1136 = vst.msk [vmem:[%s1809_s18 + $0x48] sm:$0xf] %vm1117_vm1, %v1378_v11  ;;  %v976_v22 = vmax.f32 %v944_v14, 0.0  ;;  %v840_v24 = vadd.f32 %v1476_v18, %v327_v16  ;;  %v1430_v26 = vpop.f32.mrf.mxu0  ;;  %v1478_v28 = vpop.f32.mrf.mxu1  ;;  %v890_v31 = vld [vmem:[#allocation2 + $0x20] sm:$0xff]  ;;  %v315_v14 = vld [vmem:[#allocation2 + $0x50] sm:$0xff] }
 0x10c   : > { %v1363_v29 = vpack.c.bf16 %v960_v21, %v960_v21  ;;  %v906_v32 = vld [vmem:[#allocation2 + $0xa0] sm:$0xff]  ;;  %v1431_v33 = vadd.f32 %v1430_v26, %v1429_v19  ;;  %v1479_v34 = vadd.f32 %v1478_v28, %v1477_v20  ;;  %v929_v35 = vadd.f32 %v1799_v13, %v890_v31  ;;  %857 = vst.msk [vmem:[#allocation2 + $0x30] sm:$0xff] %vm272_vm0, %v824_v23  ;;  %v331_v20 = vld [vmem:[#allocation2 + $0xd0] sm:$0xff] }
 0x10d   : > { %v1379_v30 = vpack.c.bf16 %v976_v22, %v976_v22  ;;  %v945_v36 = vadd.f32 %v1799_v13, %v906_v32  ;;  %873 = vst.msk [vmem:[#allocation2 + $0xb0] sm:$0xff] %vm272_vm0, %v840_v24  ;;  %v1432_v37 = vpop.f32.mrf.mxu0  ;;  %v1480_v38 = vpop.f32.mrf.mxu1 }
 0x10e   : > { %1121 = vst.msk [vmem:[%s1809_s18 + $0xc] sm:$0xf] %vm1117_vm1, %v1363_v29  ;;  %v825_v39 = vadd.f32 %v1431_v33, %v312_v25  ;;  %v841_v40 = vadd.f32 %v1479_v34, %v328_v27  ;;  %v961_v41 = vmax.f32 %v929_v35, 0.0 }
 0x10f   : > { %1137 = vst.msk [vmem:[%s1809_s18 + $0x4c] sm:$0xf] %vm1117_vm1, %v1379_v30  ;;  %v977_v42 = vmax.f32 %v945_v36, 0.0  ;;  %v1433_v44 = vpop.f32.mrf.mxu0  ;;  %v1481_v46 = vpop.f32.mrf.mxu1  ;;  %v891_v47 = vld [vmem:[#allocation2 + $0x28] sm:$0xff] }
 0x110   : > { %v907_v48 = vld [vmem:[#allocation2 + $0xa8] sm:$0xff]  ;;  %858 = vst.msk [vmem:[#allocation2 + $0x38] sm:$0xff] %vm272_vm0, %v825_v39  ;;  %874 = vst.msk [vmem:[#allocation2 + $0xb8] sm:$0xff] %vm272_vm0, %v841_v40  ;;  %v1434_v49 = vadd.f32 %v1433_v44, %v1432_v37  ;;  %v1482_v50 = vadd.f32 %v1481_v46, %v1480_v38  ;;  %v1364_v51 = vpack.c.bf16 %v961_v41, %v961_v41 }
 0x111   : > { %v1380_v52 = vpack.c.bf16 %v977_v42, %v977_v42  ;;  %v930_v53 = vadd.f32 %v1799_v13, %v891_v47  ;;  %v946_v54 = vadd.f32 %v1799_v13, %v907_v48  ;;  %v1435_v55 = vpop.f32.mrf.mxu0  ;;  %v1483_v56 = vpop.f32.mrf.mxu1  ;;  %v316_v42 = vld [vmem:[#allocation2 + $0x58] sm:$0xff] }
 0x112   : > { %v826_v57 = vadd.f32 %v1434_v49, %v313_v43  ;;  %v842_v58 = vadd.f32 %v1482_v50, %v329_v45  ;;  %1122 = vst.msk [vmem:[%s1809_s18 + $0x10] sm:$0xf] %vm1117_vm1, %v1364_v51  ;;  %v332_v43 = vld [vmem:[#allocation2 + $0xd8] sm:$0xff] }
 0x113   : > { %1138 = vst.msk [vmem:[%s1809_s18 + $0x50] sm:$0xf] %vm1117_vm1, %v1380_v52  ;;  %v962_v59 = vmax.f32 %v930_v53, 0.0  ;;  %v978_v60 = vmax.f32 %v946_v54, 0.0  ;;  %v1436_v62 = vpop.f32.mrf.mxu0  ;;  %v1484_v0 = vpop.f32.mrf.mxu1  ;;  %v892_v1 = vld [vmem:[#allocation2 + $0x30] sm:$0xff] }
 0x114   : > { %v908_v2 = vld [vmem:[#allocation2 + $0xb0] sm:$0xff]  ;;  %859 = vst.msk [vmem:[#allocation2 + $0x40] sm:$0xff] %vm272_vm0, %v826_v57  ;;  %875 = vst.msk [vmem:[#allocation2 + $0xc0] sm:$0xff] %vm272_vm0, %v842_v58  ;;  %v1437_v3 = vadd.f32 %v1436_v62, %v1435_v55  ;;  %v1485_v4 = vadd.f32 %v1484_v0, %v1483_v56  ;;  %v931_v7 = vadd.f32 %v1799_v13, %v892_v1 }
 0x115   : > { %v1365_v5 = vpack.c.bf16 %v962_v59, %v962_v59  ;;  %v1381_v6 = vpack.c.bf16 %v978_v60, %v978_v60  ;;  %v947_v8 = vadd.f32 %v1799_v13, %v908_v2  ;;  %v1438_v9 = vpop.f32.mrf.mxu0  ;;  %v1486_v10 = vpop.f32.mrf.mxu1  ;;  %v317_v60 = vld [vmem:[#allocation2 + $0x60] sm:$0xff] }
 0x116   : > { %v827_v11 = vadd.f32 %v1437_v3, %v314_v61  ;;  %v843_v12 = vadd.f32 %v1485_v4, %v330_v63  ;;  %v963_v15 = vmax.f32 %v931_v7, 0.0  ;;  %v333_v61 = vld [vmem:[#allocation2 + $0xe0] sm:$0xff] }
 0x117   : > { %1123 = vst.msk [vmem:[%s1809_s18 + $0x14] sm:$0xf] %vm1117_vm1, %v1365_v5  ;;  %1139 = vst.msk [vmem:[%s1809_s18 + $0x54] sm:$0xf] %vm1117_vm1, %v1381_v6  ;;  %v979_v16 = vmax.f32 %v947_v8, 0.0  ;;  %v893_v17 = vld [vmem:[#allocation2 + $0x38] sm:$0xff]  ;;  %v1439_v19 = vpop.f32.mrf.mxu0  ;;  %v1487_v21 = vpop.f32.mrf.mxu1 }
 0x118   : > { %v909_v18 = vld [vmem:[#allocation2 + $0xb8] sm:$0xff]  ;;  %v932_v22 = vadd.f32 %v1799_v13, %v893_v17  ;;  %860 = vst.msk [vmem:[#allocation2 + $0x48] sm:$0xff] %vm272_vm0, %v827_v11  ;;  %876 = vst.msk [vmem:[#allocation2 + $0xc8] sm:$0xff] %vm272_vm0, %v843_v12  ;;  %v1440_v24 = vadd.f32 %v1439_v19, %v1438_v9  ;;  %v1488_v25 = vadd.f32 %v1487_v21, %v1486_v10 }
 0x119   : > { %v948_v23 = vadd.f32 %v1799_v13, %v909_v18  ;;  %v1366_v26 = vpack.c.bf16 %v963_v15, %v963_v15  ;;  %v1382_v27 = vpack.c.bf16 %v979_v16, %v979_v16  ;;  %v1441_v28 = vpop.f32.mrf.mxu0  ;;  %v1489_v29 = vpop.f32.mrf.mxu1  ;;  %v318_v15 = vld [vmem:[#allocation2 + $0x68] sm:$0xff] }
 0x11a   : > { %v964_v30 = vmax.f32 %v932_v22, 0.0  ;;  %v828_v32 = vadd.f32 %v1440_v24, %v315_v14  ;;  %v844_v33 = vadd.f32 %v1488_v25, %v331_v20  ;;  %v334_v16 = vld [vmem:[#allocation2 + $0xe8] sm:$0xff]  ;;  %v319_v25 = vld [vmem:[#allocation2 + $0x70] sm:$0xff] }
 0x11b   : > { %v980_v31 = vmax.f32 %v948_v23, 0.0  ;;  %1124 = vst.msk [vmem:[%s1809_s18 + $0x18] sm:$0xf] %vm1117_vm1, %v1366_v26  ;;  %1140 = vst.msk [vmem:[%s1809_s18 + $0x58] sm:$0xf] %vm1117_vm1, %v1382_v27  ;;  %v894_v34 = vld [vmem:[#allocation2 + $0x40] sm:$0xff]  ;;  %v1442_v36 = vpop.f32.mrf.mxu0  ;;  %v1490_v37 = vpop.f32.mrf.mxu1 }
 0x11c   : > { %v910_v35 = vld [vmem:[#allocation2 + $0xc0] sm:$0xff]  ;;  %v1367_v38 = vpack.c.bf16 %v964_v30, %v964_v30  ;;  %v933_v40 = vadd.f32 %v1799_v13, %v894_v34  ;;  %861 = vst.msk [vmem:[#allocation2 + $0x50] sm:$0xff] %vm272_vm0, %v828_v32  ;;  %877 = vst.msk [vmem:[#allocation2 + $0xd0] sm:$0xff] %vm272_vm0, %v844_v33  ;;  %v1443_v44 = vadd.f32 %v1442_v36, %v1441_v28  ;;  %v335_v27 = vld [vmem:[#allocation2 + $0xf0] sm:$0xff] }
 0x11d   : > { %v1383_v39 = vpack.c.bf16 %v980_v31, %v980_v31  ;;  %v949_v41 = vadd.f32 %v1799_v13, %v910_v35  ;;  %v1491_v45 = vadd.f32 %v1490_v37, %v1489_v29  ;;  %v1444_v46 = vpop.f32.mrf.mxu0  ;;  %v1492_v47 = vpop.f32.mrf.mxu1 }
 0x11e   : > { %1125 = vst.msk [vmem:[%s1809_s18 + $0x1c] sm:$0xf] %vm1117_vm1, %v1367_v38  ;;  %v965_v48 = vmax.f32 %v933_v40, 0.0  ;;  %v829_v52 = vadd.f32 %v1443_v44, %v316_v42 }
 0x11f   : > { %1141 = vst.msk [vmem:[%s1809_s18 + $0x5c] sm:$0xf] %vm1117_vm1, %v1383_v39  ;;  %v981_v49 = vmax.f32 %v949_v41, 0.0  ;;  %v895_v50 = vld [vmem:[#allocation2 + $0x48] sm:$0xff]  ;;  %v845_v53 = vadd.f32 %v1491_v45, %v332_v43  ;;  %v1445_v54 = vpop.f32.mrf.mxu0  ;;  %v1493_v55 = vpop.f32.mrf.mxu1  ;;  %v320_v43 = vld [vmem:[#allocation2 + $0x78] sm:$0xff] }
 0x120   : > { %v911_v51 = vld [vmem:[#allocation2 + $0xc8] sm:$0xff]  ;;  %v1368_v56 = vpack.c.bf16 %v965_v48, %v965_v48  ;;  %v934_v58 = vadd.f32 %v1799_v13, %v895_v50  ;;  %862 = vst.msk [vmem:[#allocation2 + $0x58] sm:$0xff] %vm272_vm0, %v829_v52  ;;  %v1446_v62 = vadd.f32 %v1445_v54, %v1444_v46  ;;  %v1494_v63 = vadd.f32 %v1493_v55, %v1492_v47  ;;  %v336_v45 = vld [vmem:[#allocation2 + $0xf8] sm:$0xff] }
 0x121   : > { %v1384_v57 = vpack.c.bf16 %v981_v49, %v981_v49  ;;  %v950_v59 = vadd.f32 %v1799_v13, %v911_v51  ;;  %878 = vst.msk [vmem:[#allocation2 + $0xd8] sm:$0xff] %vm272_vm0, %v845_v53  ;;  %v1447_v0 = vpop.f32.mrf.mxu0  ;;  %v1495_v1 = vpop.f32.mrf.mxu1 }
 0x122   : > { %1126 = vst.msk [vmem:[%s1809_s18 + $0x20] sm:$0xf] %vm1117_vm1, %v1368_v56  ;;  %v966_v2 = vmax.f32 %v934_v58, 0.0  ;;  %v830_v6 = vadd.f32 %v1446_v62, %v317_v60  ;;  %v846_v7 = vadd.f32 %v1494_v63, %v333_v61 }
 0x123   : > { %1142 = vst.msk [vmem:[%s1809_s18 + $0x60] sm:$0xf] %vm1117_vm1, %v1384_v57  ;;  %v982_v3 = vmax.f32 %v950_v59, 0.0  ;;  %v896_v4 = vld [vmem:[#allocation2 + $0x50] sm:$0xff]  ;;  %v1448_v8 = vpop.f32.mrf.mxu0  ;;  %v1496_v9 = vpop.f32.mrf.mxu1 }
 0x124   : > { %v912_v5 = vld [vmem:[#allocation2 + $0xd0] sm:$0xff]  ;;  %v1369_v10 = vpack.c.bf16 %v966_v2, %v966_v2  ;;  %v935_v12 = vadd.f32 %v1799_v13, %v896_v4  ;;  %863 = vst.msk [vmem:[#allocation2 + $0x60] sm:$0xff] %vm272_vm0, %v830_v6  ;;  %879 = vst.msk [vmem:[#allocation2 + $0xe0] sm:$0xff] %vm272_vm0, %v846_v7  ;;  %v1449_v17 = vadd.f32 %v1448_v8, %v1447_v0 }
 0x125   : > { %v1385_v11 = vpack.c.bf16 %v982_v3, %v982_v3  ;;  %v951_v14 = vadd.f32 %v1799_v13, %v912_v5  ;;  %v1497_v18 = vadd.f32 %v1496_v9, %v1495_v1  ;;  %v1450_v19 = vpop.f32.mrf.mxu0  ;;  %v1498_v20 = vpop.f32.mrf.mxu1 }
 0x126   : > { %1127 = vst.msk [vmem:[%s1809_s18 + $0x24] sm:$0xf] %vm1117_vm1, %v1369_v10  ;;  %v967_v21 = vmax.f32 %v935_v12, 0.0  ;;  %v831_v23 = vadd.f32 %v1449_v17, %v318_v15 }
 0x127   : > { %1143 = vst.msk [vmem:[%s1809_s18 + $0x64] sm:$0xf] %vm1117_vm1, %v1385_v11  ;;  %v983_v22 = vmax.f32 %v951_v14, 0.0  ;;  %v847_v24 = vadd.f32 %v1497_v18, %v334_v16  ;;  %v1451_v26 = vpop.f32.mrf.mxu0  ;;  %v1499_v28 = vpop.f32.mrf.mxu1  ;;  %v897_v31 = vld [vmem:[#allocation2 + $0x58] sm:$0xff] }
 0x128   : > { %v1370_v29 = vpack.c.bf16 %v967_v21, %v967_v21  ;;  %v913_v32 = vld [vmem:[#allocation2 + $0xd8] sm:$0xff]  ;;  %v1452_v33 = vadd.f32 %v1451_v26, %v1450_v19  ;;  %v1500_v34 = vadd.f32 %v1499_v28, %v1498_v20  ;;  %v936_v35 = vadd.f32 %v1799_v13, %v897_v31  ;;  %864 = vst.msk [vmem:[#allocation2 + $0x68] sm:$0xff] %vm272_vm0, %v831_v23 }
 0x129   : > { %v1386_v30 = vpack.c.bf16 %v983_v22, %v983_v22  ;;  %v952_v36 = vadd.f32 %v1799_v13, %v913_v32  ;;  %880 = vst.msk [vmem:[#allocation2 + $0xe8] sm:$0xff] %vm272_vm0, %v847_v24  ;;  %v1453_v37 = vpop.f32.mrf.mxu0  ;;  %v1501_v38 = vpop.f32.mrf.mxu1 }
 0x12a   : > { %1128 = vst.msk [vmem:[%s1809_s18 + $0x28] sm:$0xf] %vm1117_vm1, %v1370_v29  ;;  %v832_v39 = vadd.f32 %v1452_v33, %v319_v25  ;;  %v848_v40 = vadd.f32 %v1500_v34, %v335_v27  ;;  %v968_v41 = vmax.f32 %v936_v35, 0.0 }
 0x12b   : > { %1144 = vst.msk [vmem:[%s1809_s18 + $0x68] sm:$0xf] %vm1117_vm1, %v1386_v30  ;;  %v984_v42 = vmax.f32 %v952_v36, 0.0  ;;  %v1454_v44 = vpop.f32.mrf.mxu0  ;;  %v1502_v46 = vpop.f32.mrf.mxu1  ;;  %v898_v47 = vld [vmem:[#allocation2 + $0x60] sm:$0xff] }
 0x12c   : > { %v914_v48 = vld [vmem:[#allocation2 + $0xe0] sm:$0xff]  ;;  %865 = vst.msk [vmem:[#allocation2 + $0x70] sm:$0xff] %vm272_vm0, %v832_v39  ;;  %881 = vst.msk [vmem:[#allocation2 + $0xf0] sm:$0xff] %vm272_vm0, %v848_v40  ;;  %v1455_v49 = vadd.f32 %v1454_v44, %v1453_v37  ;;  %v1503_v50 = vadd.f32 %v1502_v46, %v1501_v38  ;;  %v1371_v51 = vpack.c.bf16 %v968_v41, %v968_v41 }
 0x12d   : > { %v1387_v52 = vpack.c.bf16 %v984_v42, %v984_v42  ;;  %v937_v53 = vadd.f32 %v1799_v13, %v898_v47  ;;  %v953_v54 = vadd.f32 %v1799_v13, %v914_v48 }
 0x12e   : > { %v833_v55 = vadd.f32 %v1455_v49, %v320_v43  ;;  %v849_v56 = vadd.f32 %v1503_v50, %v336_v45  ;;  %1129 = vst.msk [vmem:[%s1809_s18 + $0x2c] sm:$0xf] %vm1117_vm1, %v1371_v51 }
 0x12f   : > { %1145 = vst.msk [vmem:[%s1809_s18 + $0x6c] sm:$0xf] %vm1117_vm1, %v1387_v52  ;;  %v969_v57 = vmax.f32 %v937_v53, 0.0  ;;  %v985_v58 = vmax.f32 %v953_v54, 0.0  ;;  %v899_v59 = vld [vmem:[#allocation2 + $0x68] sm:$0xff] }
 0x130   : > { %v915_v60 = vld [vmem:[#allocation2 + $0xe8] sm:$0xff]  ;;  %866 = vst.msk [vmem:[#allocation2 + $0x78] sm:$0xff] %vm272_vm0, %v833_v55  ;;  %882 = vst.msk [vmem:[#allocation2 + $0xf8] sm:$0xff] %vm272_vm0, %v849_v56  ;;  %v938_v63 = vadd.f32 %v1799_v13, %v899_v59 }
 0x131   : > { %v1372_v61 = vpack.c.bf16 %v969_v57, %v969_v57  ;;  %v1388_v62 = vpack.c.bf16 %v985_v58, %v985_v58  ;;  %v954_v0 = vadd.f32 %v1799_v13, %v915_v60 }
 0x132   : > { %v970_v1 = vmax.f32 %v938_v63, 0.0 }
 0x133   : > { %1130 = vst.msk [vmem:[%s1809_s18 + $0x30] sm:$0xf] %vm1117_vm1, %v1372_v61  ;;  %1146 = vst.msk [vmem:[%s1809_s18 + $0x70] sm:$0xf] %vm1117_vm1, %v1388_v62  ;;  %v986_v2 = vmax.f32 %v954_v0, 0.0  ;;  %v900_v3 = vld [vmem:[#allocation2 + $0x70] sm:$0xff] }
 0x134   : > { %v916_v4 = vld [vmem:[#allocation2 + $0xf0] sm:$0xff]  ;;  %v939_v5 = vadd.f32 %v1799_v13, %v900_v3  ;;  %v1373_v7 = vpack.c.bf16 %v970_v1, %v970_v1 }
 0x135   : > { %v955_v6 = vadd.f32 %v1799_v13, %v916_v4  ;;  %v1389_v8 = vpack.c.bf16 %v986_v2, %v986_v2 }
 0x136   : > { %v971_v9 = vmax.f32 %v939_v5, 0.0  ;;  %1131 = vst.msk [vmem:[%s1809_s18 + $0x34] sm:$0xf] %vm1117_vm1, %v1373_v7 }
 0x137   : > { %v987_v10 = vmax.f32 %v955_v6, 0.0  ;;  %1147 = vst.msk [vmem:[%s1809_s18 + $0x74] sm:$0xf] %vm1117_vm1, %v1389_v8  ;;  %v901_v11 = vld [vmem:[#allocation2 + $0x78] sm:$0xff] }
 0x138   : > { %v917_v12 = vld [vmem:[#allocation2 + $0xf8] sm:$0xff]  ;;  %v1374_v14 = vpack.c.bf16 %v971_v9, %v971_v9  ;;  %v940_v16 = vadd.f32 %v1799_v13, %v901_v11 }
 0x139   : > { %v1390_v15 = vpack.c.bf16 %v987_v10, %v987_v10  ;;  %v956_v17 = vadd.f32 %v1799_v13, %v917_v12 }
 0x13a   : > { %1132 = vst.msk [vmem:[%s1809_s18 + $0x38] sm:$0xf] %vm1117_vm1, %v1374_v14  ;;  %v972_v18 = vmax.f32 %v940_v16, 0.0 }
 0x13b   : > { %1148 = vst.msk [vmem:[%s1809_s18 + $0x78] sm:$0xf] %vm1117_vm1, %v1390_v15  ;;  %v988_v19 = vmax.f32 %v956_v17, 0.0 }
 0x13c   : > { %v1375_v20 = vpack.c.bf16 %v972_v18, %v972_v18 }
 0x13d   : > { %v1391_v21 = vpack.c.bf16 %v988_v19, %v988_v19 }
 0x13e   : > { %1133 = vst.msk [vmem:[%s1809_s18 + $0x3c] sm:$0xf] %vm1117_vm1, %v1375_v20 }
 0x13f   : > { %1149 = vst.msk [vmem:[%s1809_s18 + $0x7c] sm:$0xf] %vm1117_vm1, %v1391_v21 }
 0x140 PF: > { %s13_s14 = sadd.s32 1, %s1631_s14   ;;  %s1944_s12 = smov %s1627_s13 }
 0x141   : > { %p10_p5 = scmp.ge.s32.totalorder %s13_s14, 4   ;;  %s1945_s13 = smov %s1947_s15 }
 0x143   :  { %12 = sbr.rel (!%p10_p5) target bundleno = 2 (0x2), region = 76 }

// kernel: _lambda_.22
= control target key start
LH: loop header
LB: loop body
LE: loop exit
PB: predicated region body
PF: predicated region fallthrough
CT: control target
= control target key end

     0   :  { %vm520_vm0 = vcmask 523264   ;;  %vm522_vm1 = vcmask 516096   ;;  %vm2314_vm2 = vcmask 1041409   ;;  %vm2316_vm3 = vcmask 1042434   ;;  %s6224_s0 = inlined_call_operand.vmem [shape: bf16[128,9,64], index: 0, kind: input, shape index: {}]   ;;  %s6225_s1 = inlined_call_operand.vmem [shape: bf16[128,64], index: 1, kind: output, shape index: {}]  }
   0x1   :  { %v2755_v0 = vld [vmem:[%s6224_s0] ss:$8 sps:$4 sm:$0xff]   ;;  %v2760_v1 = vld [vmem:[%s6224_s0 + $0x4] sm:$0x1]  ;;  %v2765_v2 = vld [vmem:[%s6224_s0 + $0xc] sm:$0x1] }
   0x2   :  { %v2770_v3 = vld [vmem:[%s6224_s0 + $0x10] ss:$8 sps:$4 sm:$0xff]   ;;  %v2775_v4 = vld [vmem:[%s6224_s0 + $0x14] sm:$0x1]  ;;  %v2780_v5 = vld [vmem:[%s6224_s0 + $0x1c] sm:$0x1] }
   0x3   :  { %v2789_v10 = vld [vmem:[%s6224_s0 + $0x20] ss:$8 sps:$4 sm:$0xff]   ;;  %v2794_v11 = vld [vmem:[%s6224_s0 + $0x24] sm:$0x1]  ;;  %v2799_v12 = vld [vmem:[%s6224_s0 + $0x2c] sm:$0x1] }
   0x4   :  { %v2808_v17 = vld [vmem:[%s6224_s0 + $0x30] ss:$8 sps:$4 sm:$0xff]   ;;  %v2813_v18 = vld [vmem:[%s6224_s0 + $0x34] sm:$0x1]  ;;  %v2818_v19 = vld [vmem:[%s6224_s0 + $0x3c] sm:$0x1] }
   0x5   :  { %v2827_v24 = vld [vmem:[%s6224_s0 + $0x40] ss:$8 sps:$4 sm:$0xff]   ;;  %v2832_v25 = vld [vmem:[%s6224_s0 + $0x44] sm:$0x1]  ;;  %v2837_v26 = vld [vmem:[%s6224_s0 + $0x4c] sm:$0x1] }
   0x6   :  { %v2846_v31 = vld [vmem:[%s6224_s0 + $0x50] ss:$8 sps:$4 sm:$0xff]   ;;  %v2851_v32 = vld [vmem:[%s6224_s0 + $0x54] sm:$0x1]  ;;  %v2856_v33 = vld [vmem:[%s6224_s0 + $0x5c] sm:$0x1] }
   0x7   :  { %v2865_v38 = vld [vmem:[%s6224_s0 + $0x60] ss:$8 sps:$4 sm:$0xff]   ;;  %v2870_v39 = vld [vmem:[%s6224_s0 + $0x64] sm:$0x1]  ;;  %v2875_v40 = vld [vmem:[%s6224_s0 + $0x6c] sm:$0x1] }
   0x8   :  { %v2884_v45 = vld [vmem:[%s6224_s0 + $0x70] ss:$8 sps:$4 sm:$0xff]   ;;  %v2889_v46 = vld [vmem:[%s6224_s0 + $0x74] sm:$0x1]  ;;  %v2894_v47 = vld [vmem:[%s6224_s0 + $0x7c] sm:$0x1] }
   0x9   :  { %v2903_v52 = vld [vmem:[%s6224_s0 + $0x80] ss:$8 sps:$4 sm:$0xff]   ;;  %v2908_v53 = vld [vmem:[%s6224_s0 + $0x84] sm:$0x1]  ;;  %v2913_v54 = vld [vmem:[%s6224_s0 + $0x8c] sm:$0x1] }
   0xa   :  { %v2922_v59 = vld [vmem:[%s6224_s0 + $0x90] ss:$8 sps:$4 sm:$0xff]   ;;  %v2927_v60 = vld [vmem:[%s6224_s0 + $0x94] sm:$0x1]  ;;  %v2932_v61 = vld [vmem:[%s6224_s0 + $0x9c] sm:$0x1] }
   0xb   :  { %v2941_v56 = vld [vmem:[%s6224_s0 + $0xa0] ss:$8 sps:$4 sm:$0xff]   ;;  %v2946_v55 = vld [vmem:[%s6224_s0 + $0xa4] sm:$0x1]  ;;  %v2951_v62 = vld [vmem:[%s6224_s0 + $0xac] sm:$0x1] }
   0xc   :  { %v2960_v50 = vld [vmem:[%s6224_s0 + $0xb0] ss:$8 sps:$4 sm:$0xff]   ;;  %v2965_v49 = vld [vmem:[%s6224_s0 + $0xb4] sm:$0x1]  ;;  %v2970_v63 = vld [vmem:[%s6224_s0 + $0xbc] sm:$0x1] }
   0xd   :  { %v2979_v44 = vld [vmem:[%s6224_s0 + $0xc0] ss:$8 sps:$4 sm:$0xff]   ;;  %v2984_v43 = vld [vmem:[%s6224_s0 + $0xc4] sm:$0x1]  ;;  %v2989_v58 = vld [vmem:[%s6224_s0 + $0xcc] sm:$0x1] }
   0xe   :  { %v2998_v41 = vld [vmem:[%s6224_s0 + $0xd0] ss:$8 sps:$4 sm:$0xff]   ;;  %v3003_v37 = vld [vmem:[%s6224_s0 + $0xd4] sm:$0x1]  ;;  %v3008_v57 = vld [vmem:[%s6224_s0 + $0xdc] sm:$0x1] }
   0xf   :  { %v3017_v35 = vld [vmem:[%s6224_s0 + $0xe0] ss:$8 sps:$4 sm:$0xff]   ;;  %v3022_v34 = vld [vmem:[%s6224_s0 + $0xe4] sm:$0x1]  ;;  %v3027_v51 = vld [vmem:[%s6224_s0 + $0xec] sm:$0x1] }
  0x10   :  { %v3036_v29 = vld [vmem:[%s6224_s0 + $0xf0] ss:$8 sps:$4 sm:$0xff]   ;;  %v3041_v28 = vld [vmem:[%s6224_s0 + $0xf4] sm:$0x1]  ;;  %v3046_v48 = vld [vmem:[%s6224_s0 + $0xfc] sm:$0x1] }
  0x11   :  { %6510 = vst [vmem:[#allocation2_spill] sm:$0xff] %v3036_v29  ;;  %6511 = vst [vmem:[#allocation3_spill] sm:$0xff] %v3041_v28  ;;  %v3055_v23 = vld [vmem:[%s6224_s0 + $0x100] ss:$8 sps:$4 sm:$0xff]   ;;  %v3060_v22 = vld [vmem:[%s6224_s0 + $0x104] sm:$0x1] }
  0x12   :  { %6512 = vst [vmem:[#allocation4_spill] sm:$0xff] %v3046_v48  ;;  %6513 = vst [vmem:[#allocation5_spill] sm:$0xff] %v3055_v23  ;;  %v3065_v42 = vld [vmem:[%s6224_s0 + $0x10c] sm:$0x1]  ;;  %v3074_v20 = vld [vmem:[%s6224_s0 + $0x110] ss:$8 sps:$4 sm:$0xff]  }
  0x13   :  { %6514 = vst [vmem:[#allocation6_spill] sm:$0xff] %v3060_v22  ;;  %6515 = vst [vmem:[#allocation7_spill] sm:$0xff] %v3065_v42  ;;  %v3079_v16 = vld [vmem:[%s6224_s0 + $0x114] sm:$0x1]  ;;  %v3084_v36 = vld [vmem:[%s6224_s0 + $0x11c] sm:$0x1]  ;;  %v6657_v22 = vunpack.c.l.bf16 %v2755_v0  ;;  %v6661_v42 = vunpack.c.l.bf16 %v2770_v3 }
  0x14   :  { %6516 = vst [vmem:[#allocation8_spill] sm:$0xff] %v3074_v20  ;;  %6517 = vst [vmem:[#allocation9_spill] sm:$0xff] %v3079_v16  ;;  %v3093_v14 = vld [vmem:[%s6224_s0 + $0x120] ss:$8 sps:$4 sm:$0xff]   ;;  %v3098_v13 = vld [vmem:[%s6224_s0 + $0x124] sm:$0x1] }
  0x15   :  { %6518 = vst [vmem:[#allocation10_spill] sm:$0xff] %v3084_v36  ;;  %6519 = vst [vmem:[#allocation11_spill] sm:$0xff] %v3093_v14  ;;  %v3103_v30 = vld [vmem:[%s6224_s0 + $0x12c] sm:$0x1]  ;;  %v3112_v8 = vld [vmem:[%s6224_s0 + $0x130] ss:$8 sps:$4 sm:$0xff]  }
  0x16   :  { %6520 = vst [vmem:[#allocation12_spill] sm:$0xff] %v3098_v13  ;;  %6521 = vst [vmem:[#allocation13_spill] sm:$0xff] %v3103_v30  ;;  %v3117_v7 = vld [vmem:[%s6224_s0 + $0x134] sm:$0x1]  ;;  %v3122_v27 = vld [vmem:[%s6224_s0 + $0x13c] sm:$0x1] }
  0x17   :  { %6522 = vst [vmem:[#allocation14_spill] sm:$0xff] %v3112_v8  ;;  %6523 = vst [vmem:[#allocation15_spill] sm:$0xff] %v3117_v7  ;;  %v3131_v36 = vld [vmem:[%s6224_s0 + $0x140] ss:$8 sps:$4 sm:$0xff]   ;;  %v3136_v16 = vld [vmem:[%s6224_s0 + $0x144] sm:$0x1] }
  0x18   :  { %6524 = vst [vmem:[#allocation16_spill] sm:$0xff] %v3122_v27  ;;  %6525 = vst [vmem:[#allocation17_spill] sm:$0xff] %v3131_v36  ;;  %v3141_v21 = vld [vmem:[%s6224_s0 + $0x14c] sm:$0x1]  ;;  %v3150_v13 = vld [vmem:[%s6224_s0 + $0x150] ss:$8 sps:$4 sm:$0xff]  }
  0x19   :  { %6526 = vst [vmem:[#allocation18_spill] sm:$0xff] %v3136_v16  ;;  %6527 = vst [vmem:[#allocation19_spill] sm:$0xff] %v3141_v21  ;;  %v3155_v14 = vld [vmem:[%s6224_s0 + $0x154] sm:$0x1]  ;;  %v3160_v15 = vld [vmem:[%s6224_s0 + $0x15c] sm:$0x1] }
  0x1a   :  { %6528 = vst [vmem:[#allocation20_spill] sm:$0xff] %v3150_v13  ;;  %6529 = vst [vmem:[#allocation21_spill] sm:$0xff] %v3155_v14  ;;  %v3169_v7 = vld [vmem:[%s6224_s0 + $0x160] ss:$8 sps:$4 sm:$0xff]   ;;  %v3174_v8 = vld [vmem:[%s6224_s0 + $0x164] sm:$0x1] }
  0x1b   :  { %6530 = vst [vmem:[#allocation22_spill] sm:$0xff] %v3160_v15  ;;  %6531 = vst [vmem:[#allocation23_spill] sm:$0xff] %v3169_v7  ;;  %v3179_v9 = vld [vmem:[%s6224_s0 + $0x16c] sm:$0x1]  ;;  %v3188_v16 = vld [vmem:[%s6224_s0 + $0x170] ss:$8 sps:$4 sm:$0xff]  }
  0x1c   :  { %6532 = vst [vmem:[#allocation24_spill] sm:$0xff] %v3174_v8  ;;  %6533 = vst [vmem:[#allocation25_spill] sm:$0xff] %v3179_v9  ;;  %v3193_v36 = vld [vmem:[%s6224_s0 + $0x174] sm:$0x1]  ;;  %v3198_v6 = vld [vmem:[%s6224_s0 + $0x17c] sm:$0x1] }
  0x1d   :  { %6534 = vst [vmem:[#allocation26_spill] sm:$0xff] %v3188_v16  ;;  %6535 = vst [vmem:[#allocation27_spill] sm:$0xff] %v3193_v36  ;;  %v3207_v14 = vld [vmem:[%s6224_s0 + $0x180] ss:$8 sps:$4 sm:$0xff]   ;;  %v3212_v13 = vld [vmem:[%s6224_s0 + $0x184] sm:$0x1] }
  0x1e   :  { %6536 = vst [vmem:[#allocation28_spill] sm:$0xff] %v3198_v6  ;;  %6537 = vst [vmem:[#allocation29_spill] sm:$0xff] %v3207_v14  ;;  %v3217_v30 = vld [vmem:[%s6224_s0 + $0x18c] sm:$0x1]  ;;  %v3226_v8 = vld [vmem:[%s6224_s0 + $0x190] ss:$8 sps:$4 sm:$0xff]  }
  0x1f   :  { %6538 = vst [vmem:[#allocation30_spill] sm:$0xff] %v3212_v13  ;;  %6539 = vst [vmem:[#allocation31_spill] sm:$0xff] %v3217_v30  ;;  %v3231_v7 = vld [vmem:[%s6224_s0 + $0x194] sm:$0x1]  ;;  %v3236_v27 = vld [vmem:[%s6224_s0 + $0x19c] sm:$0x1] }
  0x20   :  { %6540 = vst [vmem:[#allocation32_spill] sm:$0xff] %v3226_v8  ;;  %6541 = vst [vmem:[#allocation33_spill] sm:$0xff] %v3231_v7  ;;  %v3245_v36 = vld [vmem:[%s6224_s0 + $0x1a0] ss:$8 sps:$4 sm:$0xff]   ;;  %v3250_v16 = vld [vmem:[%s6224_s0 + $0x1a4] sm:$0x1] }
  0x21   :  { %6542 = vst [vmem:[#allocation34_spill] sm:$0xff] %v3236_v27  ;;  %6543 = vst [vmem:[#allocation35_spill] sm:$0xff] %v3245_v36  ;;  %v3255_v21 = vld [vmem:[%s6224_s0 + $0x1ac] sm:$0x1]  ;;  %v3264_v13 = vld [vmem:[%s6224_s0 + $0x1b0] ss:$8 sps:$4 sm:$0xff]  }
  0x22   :  { %6544 = vst [vmem:[#allocation36_spill] sm:$0xff] %v3250_v16  ;;  %6545 = vst [vmem:[#allocation37_spill] sm:$0xff] %v3255_v21  ;;  %v3269_v14 = vld [vmem:[%s6224_s0 + $0x1b4] sm:$0x1]  ;;  %v3274_v15 = vld [vmem:[%s6224_s0 + $0x1bc] sm:$0x1] }
  0x23   :  { %6546 = vst [vmem:[#allocation38_spill] sm:$0xff] %v3264_v13  ;;  %6547 = vst [vmem:[#allocation39_spill] sm:$0xff] %v3269_v14  ;;  %v3283_v7 = vld [vmem:[%s6224_s0 + $0x1c0] ss:$8 sps:$4 sm:$0xff]   ;;  %v3288_v8 = vld [vmem:[%s6224_s0 + $0x1c4] sm:$0x1] }
  0x24   :  { %6548 = vst [vmem:[#allocation40_spill] sm:$0xff] %v3274_v15  ;;  %6549 = vst [vmem:[#allocation41_spill] sm:$0xff] %v3283_v7  ;;  %v3293_v9 = vld [vmem:[%s6224_s0 + $0x1cc] sm:$0x1]  ;;  %v3302_v16 = vld [vmem:[%s6224_s0 + $0x1d0] ss:$8 sps:$4 sm:$0xff]  }
  0x25   :  { %6550 = vst [vmem:[#allocation42_spill] sm:$0xff] %v3288_v8  ;;  %6551 = vst [vmem:[#allocation43_spill] sm:$0xff] %v3293_v9  ;;  %v3307_v36 = vld [vmem:[%s6224_s0 + $0x1d4] sm:$0x1]  ;;  %v3312_v6 = vld [vmem:[%s6224_s0 + $0x1dc] sm:$0x1] }
  0x26   :  { %6552 = vst [vmem:[#allocation44_spill] sm:$0xff] %v3302_v16  ;;  %6553 = vst [vmem:[#allocation45_spill] sm:$0xff] %v3307_v36  ;;  %v3321_v14 = vld [vmem:[%s6224_s0 + $0x1e0] ss:$8 sps:$4 sm:$0xff]   ;;  %v3326_v13 = vld [vmem:[%s6224_s0 + $0x1e4] sm:$0x1] }
  0x27   :  { %6554 = vst [vmem:[#allocation46_spill] sm:$0xff] %v3312_v6  ;;  %6555 = vst [vmem:[#allocation47_spill] sm:$0xff] %v3321_v14  ;;  %v3331_v30 = vld [vmem:[%s6224_s0 + $0x1ec] sm:$0x1]  ;;  %v3340_v8 = vld [vmem:[%s6224_s0 + $0x1f0] ss:$8 sps:$4 sm:$0xff]  }
  0x28   :  { %6556 = vst [vmem:[#allocation48_spill] sm:$0xff] %v3326_v13  ;;  %6557 = vst [vmem:[#allocation49_spill] sm:$0xff] %v3331_v30  ;;  %v3345_v7 = vld [vmem:[%s6224_s0 + $0x1f4] sm:$0x1]  ;;  %v3350_v27 = vld [vmem:[%s6224_s0 + $0x1fc] sm:$0x1] }
  0x29   :  { %6558 = vst [vmem:[#allocation50_spill] sm:$0xff] %v3340_v8  ;;  %6559 = vst [vmem:[#allocation51_spill] sm:$0xff] %v3345_v7  ;;  %v3359_v36 = vld [vmem:[%s6224_s0 + $0x200] ss:$8 sps:$4 sm:$0xff]   ;;  %v3364_v16 = vld [vmem:[%s6224_s0 + $0x204] sm:$0x1] }
  0x2a   :  { %6560 = vst [vmem:[#allocation52_spill] sm:$0xff] %v3350_v27  ;;  %6561 = vst [vmem:[#allocation53_spill] sm:$0xff] %v3359_v36  ;;  %v3369_v21 = vld [vmem:[%s6224_s0 + $0x20c] sm:$0x1]  ;;  %v3378_v13 = vld [vmem:[%s6224_s0 + $0x210] ss:$8 sps:$4 sm:$0xff]  }
  0x2b   :  { %6562 = vst [vmem:[#allocation54_spill] sm:$0xff] %v3364_v16  ;;  %6563 = vst [vmem:[#allocation55_spill] sm:$0xff] %v3369_v21  ;;  %v3383_v14 = vld [vmem:[%s6224_s0 + $0x214] sm:$0x1]  ;;  %v3388_v15 = vld [vmem:[%s6224_s0 + $0x21c] sm:$0x1] }
  0x2c   :  { %6564 = vst [vmem:[#allocation56_spill] sm:$0xff] %v3378_v13  ;;  %6565 = vst [vmem:[#allocation57_spill] sm:$0xff] %v3383_v14  ;;  %v3397_v7 = vld [vmem:[%s6224_s0 + $0x220] ss:$8 sps:$4 sm:$0xff]   ;;  %v3402_v8 = vld [vmem:[%s6224_s0 + $0x224] sm:$0x1] }
  0x2d   :  { %6566 = vst [vmem:[#allocation58_spill] sm:$0xff] %v3388_v15  ;;  %6567 = vst [vmem:[#allocation59_spill] sm:$0xff] %v3397_v7  ;;  %v3407_v9 = vld [vmem:[%s6224_s0 + $0x22c] sm:$0x1]  ;;  %v3416_v16 = vld [vmem:[%s6224_s0 + $0x230] ss:$8 sps:$4 sm:$0xff]  }
  0x2e   :  { %6568 = vst [vmem:[#allocation60_spill] sm:$0xff] %v3402_v8  ;;  %6569 = vst [vmem:[#allocation61_spill] sm:$0xff] %v3407_v9  ;;  %v3421_v36 = vld [vmem:[%s6224_s0 + $0x234] sm:$0x1]  ;;  %v3426_v6 = vld [vmem:[%s6224_s0 + $0x23c] sm:$0x1] }
  0x2f   :  { %6570 = vst [vmem:[#allocation62_spill] sm:$0xff] %v3416_v16  ;;  %6571 = vst [vmem:[#allocation63_spill] sm:$0xff] %v3421_v36  ;;  %v3435_v14 = vld [vmem:[%s6224_s0 + $0x240] ss:$8 sps:$4 sm:$0xff]   ;;  %v3440_v13 = vld [vmem:[%s6224_s0 + $0x244] sm:$0x1] }
  0x30   :  { %6572 = vst [vmem:[#allocation64_spill] sm:$0xff] %v3426_v6  ;;  %6573 = vst [vmem:[#allocation65_spill] sm:$0xff] %v3435_v14  ;;  %v3445_v30 = vld [vmem:[%s6224_s0 + $0x24c] sm:$0x1]  ;;  %v3454_v8 = vld [vmem:[%s6224_s0 + $0x250] ss:$8 sps:$4 sm:$0xff]  }
  0x31   :  { %6574 = vst [vmem:[#allocation66_spill] sm:$0xff] %v3440_v13  ;;  %6575 = vst [vmem:[#allocation67_spill] sm:$0xff] %v3445_v30  ;;  %v3459_v7 = vld [vmem:[%s6224_s0 + $0x254] sm:$0x1]  ;;  %v3464_v27 = vld [vmem:[%s6224_s0 + $0x25c] sm:$0x1] }
  0x32   :  { %6576 = vst [vmem:[#allocation68_spill] sm:$0xff] %v3454_v8  ;;  %6577 = vst [vmem:[#allocation69_spill] sm:$0xff] %v3459_v7  ;;  %v3473_v36 = vld [vmem:[%s6224_s0 + $0x260] ss:$8 sps:$4 sm:$0xff]   ;;  %v3478_v16 = vld [vmem:[%s6224_s0 + $0x264] sm:$0x1] }
  0x33   :  { %6578 = vst [vmem:[#allocation70_spill] sm:$0xff] %v3464_v27  ;;  %6579 = vst [vmem:[#allocation71_spill] sm:$0xff] %v3473_v36  ;;  %v3483_v21 = vld [vmem:[%s6224_s0 + $0x26c] sm:$0x1]  ;;  %v3492_v13 = vld [vmem:[%s6224_s0 + $0x270] ss:$8 sps:$4 sm:$0xff]  }
  0x34   :  { %6580 = vst [vmem:[#allocation72_spill] sm:$0xff] %v3478_v16  ;;  %6581 = vst [vmem:[#allocation73_spill] sm:$0xff] %v3483_v21  ;;  %v3497_v14 = vld [vmem:[%s6224_s0 + $0x274] sm:$0x1]  ;;  %v3502_v15 = vld [vmem:[%s6224_s0 + $0x27c] sm:$0x1] }
  0x35   :  { %6582 = vst [vmem:[#allocation74_spill] sm:$0xff] %v3492_v13  ;;  %6583 = vst [vmem:[#allocation75_spill] sm:$0xff] %v3497_v14  ;;  %v3511_v7 = vld [vmem:[%s6224_s0 + $0x280] ss:$8 sps:$4 sm:$0xff]   ;;  %v3516_v8 = vld [vmem:[%s6224_s0 + $0x284] sm:$0x1] }
  0x36   :  { %6584 = vst [vmem:[#allocation76_spill] sm:$0xff] %v3502_v15  ;;  %6585 = vst [vmem:[#allocation77_spill] sm:$0xff] %v3511_v7  ;;  %v3521_v9 = vld [vmem:[%s6224_s0 + $0x28c] sm:$0x1]  ;;  %v3530_v16 = vld [vmem:[%s6224_s0 + $0x290] ss:$8 sps:$4 sm:$0xff]  }
  0x37   :  { %6586 = vst [vmem:[#allocation78_spill] sm:$0xff] %v3516_v8  ;;  %6587 = vst [vmem:[#allocation79_spill] sm:$0xff] %v3521_v9  ;;  %v3535_v36 = vld [vmem:[%s6224_s0 + $0x294] sm:$0x1]  ;;  %v3540_v6 = vld [vmem:[%s6224_s0 + $0x29c] sm:$0x1] }
  0x38   :  { %6588 = vst [vmem:[#allocation80_spill] sm:$0xff] %v3530_v16  ;;  %6589 = vst [vmem:[#allocation81_spill] sm:$0xff] %v3535_v36  ;;  %v3549_v14 = vld [vmem:[%s6224_s0 + $0x2a0] ss:$8 sps:$4 sm:$0xff]   ;;  %v3554_v13 = vld [vmem:[%s6224_s0 + $0x2a4] sm:$0x1] }
  0x39   :  { %6590 = vst [vmem:[#allocation82_spill] sm:$0xff] %v3540_v6  ;;  %6591 = vst [vmem:[#allocation83_spill] sm:$0xff] %v3549_v14  ;;  %v3559_v30 = vld [vmem:[%s6224_s0 + $0x2ac] sm:$0x1]  ;;  %v3568_v8 = vld [vmem:[%s6224_s0 + $0x2b0] ss:$8 sps:$4 sm:$0xff]  }
  0x3a   :  { %6592 = vst [vmem:[#allocation84_spill] sm:$0xff] %v3554_v13  ;;  %6593 = vst [vmem:[#allocation85_spill] sm:$0xff] %v3559_v30  ;;  %v3573_v7 = vld [vmem:[%s6224_s0 + $0x2b4] sm:$0x1]  ;;  %v3578_v27 = vld [vmem:[%s6224_s0 + $0x2bc] sm:$0x1] }
  0x3b   :  { %6594 = vst [vmem:[#allocation86_spill] sm:$0xff] %v3568_v8  ;;  %6595 = vst [vmem:[#allocation87_spill] sm:$0xff] %v3573_v7  ;;  %v3587_v36 = vld [vmem:[%s6224_s0 + $0x2c0] ss:$8 sps:$4 sm:$0xff]   ;;  %v3592_v16 = vld [vmem:[%s6224_s0 + $0x2c4] sm:$0x1] }
  0x3c   :  { %6596 = vst [vmem:[#allocation88_spill] sm:$0xff] %v3578_v27  ;;  %6597 = vst [vmem:[#allocation89_spill] sm:$0xff] %v3587_v36  ;;  %v3597_v21 = vld [vmem:[%s6224_s0 + $0x2cc] sm:$0x1]  ;;  %v3606_v13 = vld [vmem:[%s6224_s0 + $0x2d0] ss:$8 sps:$4 sm:$0xff]  }
  0x3d   :  { %6598 = vst [vmem:[#allocation90_spill] sm:$0xff] %v3592_v16  ;;  %6599 = vst [vmem:[#allocation91_spill] sm:$0xff] %v3597_v21  ;;  %v3611_v14 = vld [vmem:[%s6224_s0 + $0x2d4] sm:$0x1]  ;;  %v3616_v15 = vld [vmem:[%s6224_s0 + $0x2dc] sm:$0x1] }
  0x3e   :  { %6600 = vst [vmem:[#allocation92_spill] sm:$0xff] %v3606_v13  ;;  %6601 = vst [vmem:[#allocation93_spill] sm:$0xff] %v3611_v14  ;;  %v3625_v7 = vld [vmem:[%s6224_s0 + $0x2e0] ss:$8 sps:$4 sm:$0xff]   ;;  %v3630_v8 = vld [vmem:[%s6224_s0 + $0x2e4] sm:$0x1] }
  0x3f   :  { %6602 = vst [vmem:[#allocation94_spill] sm:$0xff] %v3616_v15  ;;  %6603 = vst [vmem:[#allocation95_spill] sm:$0xff] %v3625_v7  ;;  %v3635_v9 = vld [vmem:[%s6224_s0 + $0x2ec] sm:$0x1]  ;;  %v3644_v16 = vld [vmem:[%s6224_s0 + $0x2f0] ss:$8 sps:$4 sm:$0xff]  }
  0x40   :  { %6604 = vst [vmem:[#allocation96_spill] sm:$0xff] %v3630_v8  ;;  %6605 = vst [vmem:[#allocation97_spill] sm:$0xff] %v3635_v9  ;;  %v3649_v36 = vld [vmem:[%s6224_s0 + $0x2f4] sm:$0x1]  ;;  %v3654_v6 = vld [vmem:[%s6224_s0 + $0x2fc] sm:$0x1] }
  0x41   :  { %6606 = vst [vmem:[#allocation98_spill] sm:$0xff] %v3644_v16  ;;  %6607 = vst [vmem:[#allocation99_spill] sm:$0xff] %v3649_v36  ;;  %v3663_v14 = vld [vmem:[%s6224_s0 + $0x300] ss:$8 sps:$4 sm:$0xff]   ;;  %v3668_v13 = vld [vmem:[%s6224_s0 + $0x304] sm:$0x1] }
  0x42   :  { %6608 = vst [vmem:[#allocation100_spill] sm:$0xff] %v3654_v6  ;;  %6609 = vst [vmem:[#allocation101_spill] sm:$0xff] %v3663_v14  ;;  %v3673_v30 = vld [vmem:[%s6224_s0 + $0x30c] sm:$0x1]  ;;  %v3682_v8 = vld [vmem:[%s6224_s0 + $0x310] ss:$8 sps:$4 sm:$0xff]  }
  0x43   :  { %6610 = vst [vmem:[#allocation102_spill] sm:$0xff] %v3668_v13  ;;  %6611 = vst [vmem:[#allocation103_spill] sm:$0xff] %v3673_v30  ;;  %v3687_v7 = vld [vmem:[%s6224_s0 + $0x314] sm:$0x1]  ;;  %v3692_v27 = vld [vmem:[%s6224_s0 + $0x31c] sm:$0x1] }
  0x44   :  { %6612 = vst [vmem:[#allocation104_spill] sm:$0xff] %v3682_v8  ;;  %6613 = vst [vmem:[#allocation105_spill] sm:$0xff] %v3687_v7  ;;  %v3701_v36 = vld [vmem:[%s6224_s0 + $0x320] ss:$8 sps:$4 sm:$0xff]   ;;  %v3706_v16 = vld [vmem:[%s6224_s0 + $0x324] sm:$0x1] }
  0x45   :  { %6614 = vst [vmem:[#allocation106_spill] sm:$0xff] %v3692_v27  ;;  %6615 = vst [vmem:[#allocation107_spill] sm:$0xff] %v3701_v36  ;;  %v3711_v21 = vld [vmem:[%s6224_s0 + $0x32c] sm:$0x1]  ;;  %v3720_v13 = vld [vmem:[%s6224_s0 + $0x330] ss:$8 sps:$4 sm:$0xff]  }
  0x46   :  { %6616 = vst [vmem:[#allocation108_spill] sm:$0xff] %v3706_v16  ;;  %6617 = vst [vmem:[#allocation109_spill] sm:$0xff] %v3711_v21  ;;  %v3725_v14 = vld [vmem:[%s6224_s0 + $0x334] sm:$0x1]  ;;  %v3730_v15 = vld [vmem:[%s6224_s0 + $0x33c] sm:$0x1] }
  0x47   :  { %6618 = vst [vmem:[#allocation110_spill] sm:$0xff] %v3720_v13  ;;  %6619 = vst [vmem:[#allocation111_spill] sm:$0xff] %v3725_v14  ;;  %v3739_v7 = vld [vmem:[%s6224_s0 + $0x340] ss:$8 sps:$4 sm:$0xff]   ;;  %v3744_v8 = vld [vmem:[%s6224_s0 + $0x344] sm:$0x1] }
  0x48   :  { %6620 = vst [vmem:[#allocation112_spill] sm:$0xff] %v3730_v15  ;;  %6621 = vst [vmem:[#allocation113_spill] sm:$0xff] %v3739_v7  ;;  %v3749_v9 = vld [vmem:[%s6224_s0 + $0x34c] sm:$0x1]  ;;  %v3758_v16 = vld [vmem:[%s6224_s0 + $0x350] ss:$8 sps:$4 sm:$0xff]  }
  0x49   :  { %6622 = vst [vmem:[#allocation114_spill] sm:$0xff] %v3744_v8  ;;  %6623 = vst [vmem:[#allocation115_spill] sm:$0xff] %v3749_v9  ;;  %v3763_v36 = vld [vmem:[%s6224_s0 + $0x354] sm:$0x1]  ;;  %v3768_v6 = vld [vmem:[%s6224_s0 + $0x35c] sm:$0x1] }
  0x4a   :  { %6624 = vst [vmem:[#allocation116_spill] sm:$0xff] %v3758_v16  ;;  %6625 = vst [vmem:[#allocation117_spill] sm:$0xff] %v3763_v36  ;;  %v3777_v14 = vld [vmem:[%s6224_s0 + $0x360] ss:$8 sps:$4 sm:$0xff]   ;;  %v3782_v13 = vld [vmem:[%s6224_s0 + $0x364] sm:$0x1] }
  0x4b   :  { %6626 = vst [vmem:[#allocation118_spill] sm:$0xff] %v3768_v6  ;;  %6627 = vst [vmem:[#allocation119_spill] sm:$0xff] %v3777_v14  ;;  %v3787_v30 = vld [vmem:[%s6224_s0 + $0x36c] sm:$0x1]  ;;  %v3796_v8 = vld [vmem:[%s6224_s0 + $0x370] ss:$8 sps:$4 sm:$0xff]  }
  0x4c   :  { %6628 = vst [vmem:[#allocation120_spill] sm:$0xff] %v3782_v13  ;;  %6629 = vst [vmem:[#allocation121_spill] sm:$0xff] %v3787_v30  ;;  %v3801_v7 = vld [vmem:[%s6224_s0 + $0x374] sm:$0x1]  ;;  %v3806_v21 = vld [vmem:[%s6224_s0 + $0x37c] sm:$0x1] }
  0x4d   :  { %6630 = vst [vmem:[#allocation122_spill] sm:$0xff] %v3796_v8  ;;  %6631 = vst [vmem:[#allocation123_spill] sm:$0xff] %v3801_v7  ;;  %v3815_v36 = vld [vmem:[%s6224_s0 + $0x380] ss:$8 sps:$4 sm:$0xff]   ;;  %v3820_v16 = vld [vmem:[%s6224_s0 + $0x384] sm:$0x1] }
  0x4e   :  { %6632 = vst [vmem:[#allocation124_spill] sm:$0xff] %v3806_v21  ;;  %6633 = vst [vmem:[#allocation125_spill] sm:$0xff] %v3815_v36  ;;  %v3825_v15 = vld [vmem:[%s6224_s0 + $0x38c] sm:$0x1]  ;;  %v3834_v13 = vld [vmem:[%s6224_s0 + $0x390] ss:$8 sps:$4 sm:$0xff]  }
  0x4f   :  { %6634 = vst [vmem:[#allocation126_spill] sm:$0xff] %v3820_v16  ;;  %6635 = vst [vmem:[#allocation127_spill] sm:$0xff] %v3825_v15  ;;  %v3839_v14 = vld [vmem:[%s6224_s0 + $0x394] sm:$0x1]  ;;  %v3844_v9 = vld [vmem:[%s6224_s0 + $0x39c] sm:$0x1] }
  0x50   :  { %6636 = vst [vmem:[#allocation128_spill] sm:$0xff] %v3834_v13  ;;  %6637 = vst [vmem:[#allocation129_spill] sm:$0xff] %v3839_v14  ;;  %v3853_v7 = vld [vmem:[%s6224_s0 + $0x3a0] ss:$8 sps:$4 sm:$0xff]   ;;  %v3858_v8 = vld [vmem:[%s6224_s0 + $0x3a4] sm:$0x1] }
  0x51   :  { %6638 = vst [vmem:[#allocation130_spill] sm:$0xff] %v3844_v9  ;;  %6639 = vst [vmem:[#allocation131_spill] sm:$0xff] %v3853_v7  ;;  %v3863_v27 = vld [vmem:[%s6224_s0 + $0x3ac] sm:$0x1]  ;;  %v3872_v16 = vld [vmem:[%s6224_s0 + $0x3b0] ss:$8 sps:$4 sm:$0xff]  }
  0x52   :  { %6640 = vst [vmem:[#allocation132_spill] sm:$0xff] %v3858_v8  ;;  %6641 = vst [vmem:[#allocation133_spill] sm:$0xff] %v3863_v27  ;;  %v3877_v36 = vld [vmem:[%s6224_s0 + $0x3b4] sm:$0x1]  ;;  %v3882_v6 = vld [vmem:[%s6224_s0 + $0x3bc] sm:$0x1]  ;;  %v6658_v27 = vunpack.c.l.bf16 %v2760_v1 }
  0x53   :  { %6642 = vst [vmem:[#allocation134_spill] sm:$0xff] %v3872_v16  ;;  %6643 = vst [vmem:[#allocation135_spill] sm:$0xff] %v3877_v36  ;;  %v3891_v14 = vld [vmem:[%s6224_s0 + $0x3c0] ss:$8 sps:$4 sm:$0xff]   ;;  %v3896_v13 = vld [vmem:[%s6224_s0 + $0x3c4] sm:$0x1] }
  0x54   :  { %6644 = vst [vmem:[#allocation136_spill] sm:$0xff] %v3882_v6  ;;  %6645 = vst [vmem:[#allocation137_spill] sm:$0xff] %v3891_v14  ;;  %v3901_v30 = vld [vmem:[%s6224_s0 + $0x3cc] sm:$0x1]  ;;  %v3910_v8 = vld [vmem:[%s6224_s0 + $0x3d0] ss:$8 sps:$4 sm:$0xff]  }
  0x55   :  { %6646 = vst [vmem:[#allocation138_spill] sm:$0xff] %v3896_v13  ;;  %6647 = vst [vmem:[#allocation139_spill] sm:$0xff] %v3901_v30  ;;  %v3915_v7 = vld [vmem:[%s6224_s0 + $0x3d4] sm:$0x1]  ;;  %v3920_v21 = vld [vmem:[%s6224_s0 + $0x3dc] sm:$0x1]  ;;  %v6659_v30 = vunpack.c.h.bf16 %v2755_v0 }
  0x56   :  { %6648 = vst [vmem:[#allocation140_spill] sm:$0xff] %v3910_v8  ;;  %6649 = vst [vmem:[#allocation141_spill] sm:$0xff] %v3915_v7  ;;  %v3929_v36 = vld [vmem:[%s6224_s0 + $0x3e0] ss:$8 sps:$4 sm:$0xff]   ;;  %v3934_v16 = vld [vmem:[%s6224_s0 + $0x3e4] sm:$0x1]  ;;  %v6660_v7 = vunpack.c.l.bf16 %v2765_v2 }
  0x57   :  { %6650 = vst [vmem:[#allocation142_spill] sm:$0xff] %v3920_v21  ;;  %6651 = vst [vmem:[#allocation143_spill] sm:$0xff] %v3929_v36  ;;  %v3939_v15 = vld [vmem:[%s6224_s0 + $0x3ec] sm:$0x1]  ;;  %v3948_v13 = vld [vmem:[%s6224_s0 + $0x3f0] ss:$8 sps:$4 sm:$0xff]  }
  0x58   :  { %6652 = vst [vmem:[#allocation144_spill] sm:$0xff] %v3934_v16  ;;  %6653 = vst [vmem:[#allocation145_spill] sm:$0xff] %v3939_v15  ;;  %v3953_v14 = vld [vmem:[%s6224_s0 + $0x3f4] sm:$0x1]  ;;  %v3958_v9 = vld [vmem:[%s6224_s0 + $0x3fc] sm:$0x1] }
  0x59   :  { %6654 = vst [vmem:[#allocation146_spill] sm:$0xff] %v3948_v13  ;;  %6655 = vst [vmem:[#allocation147_spill] sm:$0xff] %v3953_v14  ;;  %v521_v23 = vsel %vm520_vm0, %v6657_v22, -inf  ;;  %v523_v6 = vsel %vm522_vm1, %v6658_v27, -inf  ;;  %v531_v21 = vsel %vm520_vm0, %v6659_v30, -inf  ;;  %v532_v8 = vsel %vm522_vm1, %v6660_v7, -inf }
  0x5a   :  { %6656 = vst [vmem:[#allocation148_spill] sm:$0xff] %v3958_v9  ;;  %v524_v14 = vmax.f32 %v521_v23, %v523_v6  ;;  %v533_v20 = vmax.f32 %v531_v21, %v532_v8  ;;  %v540_v9 = vsel %vm520_vm0, %v6661_v42, -inf  ;;  %v6662_v22 = vunpack.c.l.bf16 %v2775_v4 }
  0x5b   :  { %v6663_v27 = vunpack.c.h.bf16 %v2770_v3  ;;  %v6664_v30 = vunpack.c.l.bf16 %v2780_v5  ;;  %v6665_v6 = vunpack.c.l.bf16 %v2789_v10  ;;  %v6666_v4 = vunpack.c.l.bf16 %v2794_v11 }
  0x5c   :  { %v541_v1 = vsel %vm522_vm1, %v6662_v22, -inf  ;;  %v525_v8 = vrot.slane %v524_v14, 4  ;;  %v534_v21 = vrot.slane %v533_v20, 4  ;;  %v6667_v3 = vunpack.c.h.bf16 %v2789_v10 }
  0x5d   :  { %v542_v13 = vmax.f32 %v540_v9, %v541_v1  ;;  %v549_v0 = vsel %vm520_vm0, %v6663_v27, -inf  ;;  %v550_v2 = vsel %vm522_vm1, %v6664_v30, -inf  ;;  %v558_v7 = vsel %vm520_vm0, %v6665_v6, -inf }
  0x5e   :  { %v551_v23 = vmax.f32 %v549_v0, %v550_v2  ;;  %v559_v42 = vsel %vm522_vm1, %v6666_v4, -inf  ;;  %v567_v1 = vsel %vm520_vm0, %v6667_v3, -inf  ;;  %v6668_v5 = vunpack.c.l.bf16 %v2799_v12 }
  0x5f   :  { %v543_v9 = vrot.slane %v542_v13, 4  ;;  %v560_v22 = vmax.f32 %v558_v7, %v559_v42  ;;  %v526_v30 = vmax.f32 %v524_v14, %v525_v8  ;;  %v535_v15 = vmax.f32 %v533_v20, %v534_v21 }
  0x60   :  { %v568_v27 = vsel %vm522_vm1, %v6668_v5, -inf  ;;  %v552_v6 = vrot.slane %v551_v23, 4  ;;  %v6669_v11 = vunpack.c.l.bf16 %v2808_v17  ;;  %v6670_v7 = vunpack.c.l.bf16 %v2813_v18 }
  0x61   :  { %v569_v16 = vmax.f32 %v567_v1, %v568_v27  ;;  %v544_v36 = vmax.f32 %v542_v13, %v543_v9  ;;  %v561_v0 = vrot.slane %v560_v22, 4  ;;  %v527_v4 = vrot.slane %v526_v30, 2 }
  0x62   :  { %v576_v2 = vsel %vm520_vm0, %v6669_v11, -inf  ;;  %v577_v10 = vsel %vm522_vm1, %v6670_v7, -inf  ;;  %v536_v42 = vrot.slane %v535_v15, 2  ;;  %v553_v3 = vmax.f32 %v551_v23, %v552_v6 }
  0x63   :  { %v570_v12 = vrot.slane %v569_v16, 4  ;;  %v545_v48 = vrot.slane %v544_v36, 2  ;;  %v562_v5 = vmax.f32 %v560_v22, %v561_v0  ;;  %v578_v14 = vmax.f32 %v576_v2, %v577_v10 }
  0x64   :  { %v6671_v20 = vunpack.c.h.bf16 %v2808_v17  ;;  %v528_v8 = vmax.f32 %v526_v30, %v527_v4  ;;  %v537_v21 = vmax.f32 %v535_v15, %v536_v42  ;;  %v554_v9 = vrot.slane %v553_v3, 2 }
  0x65   :  { %v571_v1 = vmax.f32 %v569_v16, %v570_v12  ;;  %v546_v27 = vmax.f32 %v544_v36, %v545_v48  ;;  %v563_v11 = vrot.slane %v562_v5, 2  ;;  %v579_v18 = vrot.slane %v578_v14, 4 }
  0x66   :  { %v585_v13 = vsel %vm520_vm0, %v6671_v20, -inf  ;;  %v6672_v7 = vunpack.c.l.bf16 %v2818_v19  ;;  %v529_v23 = vrot.slane %v528_v8, 1  ;;  %v538_v6 = vrot.slane %v537_v21, 1 }
  0x67   :  { %v555_v29 = vmax.f32 %v553_v3, %v554_v9  ;;  %v572_v22 = vrot.slane %v571_v1, 2  ;;  %v547_v0 = vrot.slane %v546_v27, 1  ;;  %v564_v2 = vmax.f32 %v562_v5, %v563_v11 }
  0x68   :  { %v586_v28 = vsel %vm522_vm1, %v6672_v7, -inf  ;;  %v580_v17 = vmax.f32 %v578_v14, %v579_v18  ;;  %v4016_v20 = vmax.f32 %v528_v8, %v529_v23  ;;  %v4018_v15 = vmax.f32 %v537_v21, %v538_v6 }
  0x69   :  { %v587_v10 = vmax.f32 %v585_v13, %v586_v28  ;;  %v556_v16 = vrot.slane %v555_v29, 1  ;;  %v573_v36 = vmax.f32 %v571_v1, %v572_v22  ;;  %v4020_v48 = vmax.f32 %v546_v27, %v547_v0 }
  0x6a   :  { %v565_v30 = vrot.slane %v564_v2, 1  ;;  %v581_v19 = vrot.slane %v580_v17, 2  ;;  %v6673_v3 = vunpack.c.l.bf16 %v2827_v24  ;;  %v6674_v28 = vunpack.c.l.bf16 %v2832_v25 }
  0x6b   :  { %v588_v4 = vrot.slane %v587_v10, 4  ;;  %v4022_v42 = vmax.f32 %v555_v29, %v556_v16  ;;  %v574_v12 = vrot.slane %v573_v36, 1  ;;  %v6675_v27 = vunpack.c.h.bf16 %v2827_v24 }
  0x6c   :  { %v594_v5 = vsel %vm520_vm0, %v6673_v3, -inf  ;;  %v595_v14 = vsel %vm522_vm1, %v6674_v28, -inf  ;;  %v4030_v13 = vmax.f32 %v564_v2, %v565_v30  ;;  %v582_v8 = vmax.f32 %v580_v17, %v581_v19 }
  0x6d   :  { %v589_v21 = vmax.f32 %v587_v10, %v588_v4  ;;  %v596_v9 = vmax.f32 %v594_v5, %v595_v14  ;;  %v4032_v1 = vmax.f32 %v573_v36, %v574_v12  ;;  %v603_v29 = vsel %vm520_vm0, %v6675_v27, -inf }
  0x6e   :  { %v6676_v11 = vunpack.c.l.bf16 %v2837_v26  ;;  %v6677_v7 = vunpack.c.l.bf16 %v2846_v31  ;;  %v583_v23 = vrot.slane %v582_v8, 1  ;;  %v6678_v2 = vunpack.c.l.bf16 %v2851_v32 }
  0x6f   :  { %v590_v6 = vrot.slane %v589_v21, 2  ;;  %v597_v22 = vrot.slane %v596_v9, 4  ;;  %v6679_v24 = vunpack.c.h.bf16 %v2846_v31  ;;  %v6680_v26 = vunpack.c.l.bf16 %v2856_v33 }
  0x70   :  { %v604_v18 = vsel %vm522_vm1, %v6676_v11, -inf  ;;  %v612_v25 = vsel %vm520_vm0, %v6677_v7, -inf  ;;  %v613_v17 = vsel %vm522_vm1, %v6678_v2, -inf  ;;  %v6681_v36 = vunpack.c.l.bf16 %v2865_v38 }
  0x71   :  { %v605_v0 = vmax.f32 %v603_v29, %v604_v18  ;;  %v621_v10 = vsel %vm520_vm0, %v6679_v24, -inf  ;;  %v622_v16 = vsel %vm522_vm1, %v6680_v26, -inf  ;;  %v4055_v19 = vmax.f32 %v582_v8, %v583_v23 }
  0x72   :  { %v630_v30 = vsel %vm520_vm0, %v6681_v36, -inf  ;;  %v591_v4 = vmax.f32 %v589_v21, %v590_v6  ;;  %v598_v12 = vmax.f32 %v596_v9, %v597_v22  ;;  %v614_v32 = vmax.f32 %v612_v25, %v613_v17 }
  0x73   :  { %v606_v3 = vrot.slane %v605_v0, 4  ;;  %v623_v5 = vmax.f32 %v621_v10, %v622_v16  ;;  %v6682_v28 = vunpack.c.l.bf16 %v2870_v39  ;;  %v6683_v14 = vunpack.c.h.bf16 %v2865_v38 }
  0x74   :  { %v592_v27 = vrot.slane %v591_v4, 1  ;;  %v599_v29 = vrot.slane %v598_v12, 2  ;;  %v615_v7 = vrot.slane %v614_v32, 4  ;;  %v6684_v21 = vunpack.c.l.bf16 %v2875_v40 }
  0x75   :  { %v631_v31 = vsel %vm522_vm1, %v6682_v28, -inf  ;;  %v639_v33 = vsel %vm520_vm0, %v6683_v14, -inf  ;;  %v607_v11 = vmax.f32 %v605_v0, %v606_v3  ;;  %v624_v8 = vrot.slane %v623_v5, 4 }
  0x76   :  { %v632_v18 = vmax.f32 %v630_v30, %v631_v31  ;;  %v640_v9 = vsel %vm522_vm1, %v6684_v21, -inf  ;;  %v6685_v25 = vunpack.c.l.bf16 %v2884_v45  ;;  %v4069_v23 = vmax.f32 %v591_v4, %v592_v27 }
  0x77   :  { %v600_v6 = vmax.f32 %v598_v12, %v599_v29  ;;  %v608_v38 = vrot.slane %v607_v11, 2  ;;  %v616_v2 = vmax.f32 %v614_v32, %v615_v7  ;;  %v625_v17 = vmax.f32 %v623_v5, %v624_v8 }
  0x78   :  { %v648_v39 = vsel %vm520_vm0, %v6685_v25, -inf  ;;  %v633_v22 = vrot.slane %v632_v18, 4  ;;  %v641_v24 = vmax.f32 %v639_v33, %v640_v9  ;;  %v6686_v0 = vunpack.c.l.bf16 %v2889_v46 }
  0x79   :  { %v601_v26 = vrot.slane %v600_v6, 1  ;;  %v609_v40 = vmax.f32 %v607_v11, %v608_v38  ;;  %v617_v30 = vrot.slane %v616_v2, 2  ;;  %v626_v3 = vrot.slane %v625_v17, 2 }
  0x7a   :  { %v649_v10 = vsel %vm522_vm1, %v6686_v0, -inf  ;;  %v634_v16 = vmax.f32 %v632_v18, %v633_v22  ;;  %v642_v28 = vrot.slane %v641_v24, 4  ;;  %v6687_v4 = vunpack.c.h.bf16 %v2884_v45 }
  0x7b   :  { %v650_v36 = vmax.f32 %v648_v39, %v649_v10  ;;  %v4077_v31 = vmax.f32 %v600_v6, %v601_v26  ;;  %v610_v32 = vrot.slane %v609_v40, 1  ;;  %v618_v33 = vmax.f32 %v616_v2, %v617_v30 }
  0x7c   :  { %v657_v12 = vsel %vm520_vm0, %v6687_v4, -inf  ;;  %v635_v5 = vrot.slane %v634_v16, 2  ;;  %v627_v46 = vmax.f32 %v625_v17, %v626_v3  ;;  %v643_v27 = vmax.f32 %v641_v24, %v642_v28 }
  0x7d   :  { %v651_v14 = vrot.slane %v650_v36, 4  ;;  %v6688_v29 = vunpack.c.l.bf16 %v2894_v47  ;;  %v4082_v18 = vmax.f32 %v609_v40, %v610_v32  ;;  %v619_v45 = vrot.slane %v618_v33, 1 }
  0x7e   :  { %v636_v7 = vmax.f32 %v634_v16, %v635_v5  ;;  %v628_v9 = vrot.slane %v627_v46, 1  ;;  %v644_v25 = vrot.slane %v643_v27, 2  ;;  %v6689_v39 = vunpack.c.l.bf16 %v2903_v52 }
  0x7f   :  { %v658_v11 = vsel %vm522_vm1, %v6688_v29, -inf  ;;  %v652_v8 = vmax.f32 %v650_v36, %v651_v14  ;;  %v6690_v17 = vunpack.c.l.bf16 %v2908_v53  ;;  %v4090_v24 = vmax.f32 %v618_v33, %v619_v45 }
  0x80   :  { %v659_v21 = vmax.f32 %v657_v12, %v658_v11  ;;  %v666_v6 = vsel %vm520_vm0, %v6689_v39, -inf  ;;  %v637_v38 = vrot.slane %v636_v7, 1  ;;  %v4092_v0 = vmax.f32 %v627_v46, %v628_v9 }
  0x81   :  { %v653_v22 = vrot.slane %v652_v8, 2  ;;  %v667_v47 = vsel %vm522_vm1, %v6690_v17, -inf  ;;  %v645_v10 = vmax.f32 %v643_v27, %v644_v25  ;;  %v6691_v30 = vunpack.c.h.bf16 %v2903_v52 }
  0x82   :  { %v660_v2 = vrot.slane %v659_v21, 4  ;;  %v668_v26 = vmax.f32 %v666_v6, %v667_v47  ;;  %v4094_v40 = vmax.f32 %v636_v7, %v637_v38  ;;  %v6692_v53 = vunpack.c.l.bf16 %v2913_v54 }
  0x83   :  { %v654_v16 = vmax.f32 %v652_v8, %v653_v22  ;;  %v675_v3 = vsel %vm520_vm0, %v6691_v30, -inf  ;;  %v646_v28 = vrot.slane %v645_v10, 1  ;;  %v6693_v32 = vunpack.c.l.bf16 %v2922_v59 }
  0x84   :  { %v661_v36 = vmax.f32 %v659_v21, %v660_v2  ;;  %v669_v4 = vrot.slane %v668_v26, 4  ;;  %v676_v12 = vsel %vm522_vm1, %v6692_v53, -inf  ;;  %v6694_v27 = vunpack.c.l.bf16 %v2927_v60 }
  0x85   :  { %v684_v5 = vsel %vm520_vm0, %v6693_v32, -inf  ;;  %v655_v14 = vrot.slane %v654_v16, 1  ;;  %v677_v46 = vmax.f32 %v675_v3, %v676_v12  ;;  %v4108_v52 = vmax.f32 %v645_v10, %v646_v28 }
  0x86   :  { %v662_v33 = vrot.slane %v661_v36, 2  ;;  %v685_v29 = vsel %vm522_vm1, %v6694_v27, -inf  ;;  %v670_v11 = vmax.f32 %v668_v26, %v669_v4  ;;  %v6695_v8 = vunpack.c.h.bf16 %v2922_v59 }
  0x87   :  { %v686_v7 = vmax.f32 %v684_v5, %v685_v29  ;;  %v4113_v21 = vmax.f32 %v654_v16, %v655_v14  ;;  %v678_v9 = vrot.slane %v677_v46, 4  ;;  %v6696_v25 = vunpack.c.l.bf16 %v2932_v61 }
  0x88   :  { %v693_v54 = vsel %vm520_vm0, %v6695_v8, -inf  ;;  %v663_v45 = vmax.f32 %v661_v36, %v662_v33  ;;  %v671_v6 = vrot.slane %v670_v11, 2  ;;  %v6697_v22 = vunpack.c.l.bf16 %v2941_v56 }
  0x89   :  { %v694_v39 = vsel %vm522_vm1, %v6696_v25, -inf  ;;  %v687_v60 = vrot.slane %v686_v7, 4  ;;  %v679_v47 = vmax.f32 %v677_v46, %v678_v9  ;;  %v6698_v59 = vunpack.c.l.bf16 %v2946_v55 }
  0x8a   :  { %v695_v38 = vmax.f32 %v693_v54, %v694_v39  ;;  %v702_v2 = vsel %vm520_vm0, %v6697_v22, -inf  ;;  %v664_v17 = vrot.slane %v663_v45, 1  ;;  %v6699_v26 = vunpack.c.h.bf16 %v2941_v56 }
  0x8b   :  { %v703_v10 = vsel %vm522_vm1, %v6698_v59, -inf  ;;  %v672_v61 = vmax.f32 %v670_v11, %v671_v6  ;;  %v688_v36 = vmax.f32 %v686_v7, %v687_v60  ;;  %v680_v4 = vrot.slane %v679_v47, 2 }
  0x8c   :  { %v711_v16 = vsel %vm520_vm0, %v6699_v26, -inf  ;;  %v696_v30 = vrot.slane %v695_v38, 4  ;;  %v704_v3 = vmax.f32 %v702_v2, %v703_v10  ;;  %v4127_v28 = vmax.f32 %v663_v45, %v664_v17 }
  0x8d   :  { %v6700_v53 = vunpack.c.l.bf16 %v2951_v62  ;;  %v6701_v32 = vunpack.c.l.bf16 %v2960_v50  ;;  %v673_v5 = vrot.slane %v672_v61, 1  ;;  %v689_v14 = vrot.slane %v688_v36, 2 }
  0x8e   :  { %v697_v56 = vmax.f32 %v695_v38, %v696_v30  ;;  %v705_v33 = vrot.slane %v704_v3, 4  ;;  %v681_v46 = vmax.f32 %v679_v47, %v680_v4  ;;  %v6702_v29 = vunpack.c.l.bf16 %v2965_v49 }
  0x8f   :  { %v712_v12 = vsel %vm522_vm1, %v6700_v53, -inf  ;;  %v720_v55 = vsel %vm520_vm0, %v6701_v32, -inf  ;;  %v6703_v7 = vunpack.c.h.bf16 %v2960_v50  ;;  %v4141_v8 = vmax.f32 %v672_v61, %v673_v5 }
  0x90   :  { %v713_v27 = vmax.f32 %v711_v16, %v712_v12  ;;  %v721_v11 = vsel %vm522_vm1, %v6702_v29, -inf  ;;  %v690_v54 = vmax.f32 %v688_v36, %v689_v14  ;;  %v698_v45 = vrot.slane %v697_v56, 2 }
  0x91   :  { %v729_v62 = vsel %vm520_vm0, %v6703_v7, -inf  ;;  %v706_v9 = vmax.f32 %v704_v3, %v705_v33  ;;  %v682_v25 = vrot.slane %v681_v46, 1  ;;  %v722_v6 = vmax.f32 %v720_v55, %v721_v11 }
  0x92   :  { %v714_v39 = vrot.slane %v713_v27, 4  ;;  %v6704_v60 = vunpack.c.l.bf16 %v2970_v63  ;;  %v691_v22 = vrot.slane %v690_v54, 1  ;;  %v699_v49 = vmax.f32 %v697_v56, %v698_v45 }
  0x93   :  { %v707_v2 = vrot.slane %v706_v9, 2  ;;  %v4146_v47 = vmax.f32 %v681_v46, %v682_v25  ;;  %v723_v59 = vrot.slane %v722_v6, 4  ;;  %v6705_v10 = vunpack.c.l.bf16 %v2979_v44 }
  0x94   :  { %v730_v38 = vsel %vm522_vm1, %v6704_v60, -inf  ;;  %v715_v50 = vmax.f32 %v713_v27, %v714_v39  ;;  %v4151_v16 = vmax.f32 %v690_v54, %v691_v22  ;;  %v700_v61 = vrot.slane %v699_v49, 1 }
  0x95   :  { %v731_v17 = vmax.f32 %v729_v62, %v730_v38  ;;  %v738_v26 = vsel %vm520_vm0, %v6705_v10, -inf  ;;  %v708_v36 = vmax.f32 %v706_v9, %v707_v2  ;;  %v724_v3 = vmax.f32 %v722_v6, %v723_v59 }
  0x96   :  { %v716_v63 = vrot.slane %v715_v50, 2  ;;  %v6706_v4 = vunpack.c.l.bf16 %v2984_v43  ;;  %v6707_v12 = vunpack.c.h.bf16 %v2979_v44  ;;  %v4159_v55 = vmax.f32 %v699_v49, %v700_v61 }
  0x97   :  { %v732_v30 = vrot.slane %v731_v17, 4  ;;  %v709_v5 = vrot.slane %v708_v36, 1  ;;  %v725_v46 = vrot.slane %v724_v3, 2  ;;  %v6708_v27 = vunpack.c.l.bf16 %v2989_v58 }
  0x98   :  { %v739_v53 = vsel %vm522_vm1, %v6706_v4, -inf  ;;  %v747_v32 = vsel %vm520_vm0, %v6707_v12, -inf  ;;  %v717_v33 = vmax.f32 %v715_v50, %v716_v63  ;;  %v6709_v11 = vunpack.c.l.bf16 %v2998_v41 }
  0x99   :  { %v733_v14 = vmax.f32 %v731_v17, %v732_v30  ;;  %v740_v56 = vmax.f32 %v738_v26, %v739_v53  ;;  %v748_v29 = vsel %vm522_vm1, %v6708_v27, -inf  ;;  %v4167_v7 = vmax.f32 %v708_v36, %v709_v5 }
  0x9a   :  { %v756_v43 = vsel %vm520_vm0, %v6709_v11, -inf  ;;  %v749_v54 = vmax.f32 %v747_v32, %v748_v29  ;;  %v718_v45 = vrot.slane %v717_v33, 1  ;;  %v726_v9 = vmax.f32 %v724_v3, %v725_v46  ;;  %v6717_v29 = vld [vmem:[#allocation2_spill] sm:$0xff] }
  0x9b   :  { %v734_v44 = vrot.slane %v733_v14, 2  ;;  %v741_v62 = vrot.slane %v740_v56, 4  ;;  %v6710_v25 = vunpack.c.l.bf16 %v3003_v37  ;;  %v6711_v6 = vunpack.c.h.bf16 %v2998_v41 }
  0x9c   :  { %v750_v22 = vrot.slane %v749_v54, 4  ;;  %v4175_v2 = vmax.f32 %v717_v33, %v718_v45  ;;  %v727_v17 = vrot.slane %v726_v9, 1  ;;  %v6712_v50 = vunpack.c.l.bf16 %v3008_v57 }
  0x9d   :  { %v757_v39 = vsel %vm522_vm1, %v6710_v25, -inf  ;;  %v765_v58 = vsel %vm520_vm0, %v6711_v6, -inf  ;;  %v735_v60 = vmax.f32 %v733_v14, %v734_v44  ;;  %v742_v38 = vmax.f32 %v740_v56, %v741_v62 }
  0x9e   :  { %v758_v49 = vmax.f32 %v756_v43, %v757_v39  ;;  %v766_v59 = vsel %vm522_vm1, %v6712_v50, -inf  ;;  %v6713_v10 = vunpack.c.l.bf16 %v3017_v35  ;;  %v751_v41 = vmax.f32 %v749_v54, %v750_v22 }
  0x9f   :  { %v736_v26 = vrot.slane %v735_v60, 1  ;;  %v743_v61 = vrot.slane %v742_v38, 2  ;;  %v4183_v30 = vmax.f32 %v726_v9, %v727_v17  ;;  %v767_v63 = vmax.f32 %v765_v58, %v766_v59  ;;  %v6719_v9 = vld [vmem:[#allocation3_spill] sm:$0xff]  ;;  %v6722_v59 = vld [vmem:[#allocation4_spill] sm:$0xff] }
  0xa0   :  { %v774_v37 = vsel %vm520_vm0, %v6713_v10, -inf  ;;  %v759_v36 = vrot.slane %v758_v49, 4  ;;  %v6714_v3 = vunpack.c.l.bf16 %v3022_v34  ;;  %v6715_v53 = vunpack.c.h.bf16 %v3017_v35 }
  0xa1   :  { %v4191_v12 = vmax.f32 %v735_v60, %v736_v26  ;;  %v744_v32 = vmax.f32 %v742_v38, %v743_v61  ;;  %v752_v5 = vrot.slane %v751_v41, 2  ;;  %v768_v56 = vrot.slane %v767_v63, 4 }
  0xa2   :  { %v775_v4 = vsel %vm522_vm1, %v6714_v3, -inf  ;;  %v783_v57 = vsel %vm520_vm0, %v6715_v53, -inf  ;;  %v760_v14 = vmax.f32 %v758_v49, %v759_v36  ;;  %v6716_v46 = vunpack.c.l.bf16 %v3027_v51  ;;  %v6724_v53 = vld [vmem:[#allocation5_spill] sm:$0xff] }
  0xa3   :  { %v776_v33 = vmax.f32 %v774_v37, %v775_v4  ;;  %v6718_v11 = vunpack.c.l.bf16 %v6717_v29  ;;  %v745_v43 = vrot.slane %v744_v32, 1  ;;  %v753_v44 = vmax.f32 %v751_v41, %v752_v5 }
  0xa4   :  { %v784_v27 = vsel %vm522_vm1, %v6716_v46, -inf  ;;  %v761_v35 = vrot.slane %v760_v14, 2  ;;  %v769_v54 = vmax.f32 %v767_v63, %v768_v56  ;;  %v6720_v25 = vunpack.c.l.bf16 %v6719_v9 }
  0xa5   :  { %v792_v34 = vsel %vm520_vm0, %v6718_v11, -inf  ;;  %v785_v62 = vmax.f32 %v783_v57, %v784_v27  ;;  %v777_v45 = vrot.slane %v776_v33, 4  ;;  %v6721_v6 = vunpack.c.h.bf16 %v6717_v29 }
  0xa6   :  { %v793_v39 = vsel %vm522_vm1, %v6720_v25, -inf  ;;  %v4205_v58 = vmax.f32 %v744_v32, %v745_v43  ;;  %v754_v60 = vrot.slane %v753_v44, 1  ;;  %v762_v38 = vmax.f32 %v760_v14, %v761_v35 }
  0xa7   :  { %v801_v51 = vsel %vm520_vm0, %v6721_v6, -inf  ;;  %v786_v22 = vrot.slane %v785_v62, 4  ;;  %v770_v49 = vrot.slane %v769_v54, 2  ;;  %v778_v17 = vmax.f32 %v776_v33, %v777_v45  ;;  %v6726_v33 = vld [vmem:[#allocation6_spill] sm:$0xff]  ;;  %v6729_v45 = vld [vmem:[#allocation7_spill] sm:$0xff] }
  0xa8   :  { %v794_v50 = vmax.f32 %v792_v34, %v793_v39  ;;  %v6723_v10 = vunpack.c.l.bf16 %v6722_v59  ;;  %v4210_v26 = vmax.f32 %v753_v44, %v754_v60  ;;  %v763_v61 = vrot.slane %v762_v38, 1 }
  0xa9   :  { %v787_v41 = vmax.f32 %v785_v62, %v786_v22  ;;  %v771_v63 = vmax.f32 %v769_v54, %v770_v49  ;;  %v779_v3 = vrot.slane %v778_v17, 2  ;;  %v6725_v57 = vunpack.c.l.bf16 %v6724_v53 }
  0xaa   :  { %v802_v37 = vsel %vm522_vm1, %v6723_v10, -inf  ;;  %v795_v4 = vrot.slane %v794_v50, 4  ;;  %v4215_v5 = vmax.f32 %v762_v38, %v763_v61  ;;  %v6727_v46 = vunpack.c.l.bf16 %v6726_v33 }
  0xab   :  { %v803_v36 = vmax.f32 %v801_v51, %v802_v37  ;;  %v810_v32 = vsel %vm520_vm0, %v6725_v57, -inf  ;;  %v788_v14 = vrot.slane %v787_v41, 2  ;;  %v772_v29 = vrot.slane %v771_v63, 1 }
  0xac   :  { %v811_v27 = vsel %vm522_vm1, %v6727_v46, -inf  ;;  %v780_v11 = vmax.f32 %v778_v17, %v779_v3  ;;  %v796_v34 = vmax.f32 %v794_v50, %v795_v4  ;;  %v6728_v62 = vunpack.c.h.bf16 %v6724_v53  ;;  %v6731_v17 = vld [vmem:[#allocation8_spill] sm:$0xff]  ;;  %v6736_v46 = vld [vmem:[#allocation10_spill] sm:$0xff] }
  0xad   :  { %v804_v56 = vrot.slane %v803_v36, 4  ;;  %v812_v43 = vmax.f32 %v810_v32, %v811_v27  ;;  %v789_v44 = vmax.f32 %v787_v41, %v788_v14  ;;  %v6730_v9 = vunpack.c.l.bf16 %v6729_v45  ;;  %v6733_v41 = vld [vmem:[#allocation9_spill] sm:$0xff] }
  0xae   :  { %v819_v54 = vsel %vm520_vm0, %v6728_v62, -inf  ;;  %v4226_v39 = vmax.f32 %v771_v63, %v772_v29  ;;  %v781_v6 = vrot.slane %v780_v11, 1  ;;  %v797_v51 = vrot.slane %v796_v34, 2 }
  0xaf   :  { %v805_v35 = vmax.f32 %v803_v36, %v804_v56  ;;  %v820_v25 = vsel %vm522_vm1, %v6730_v9, -inf  ;;  %v813_v60 = vrot.slane %v812_v43, 4  ;;  %v790_v38 = vrot.slane %v789_v44, 1 }
  0xb0   :  { %v821_v49 = vmax.f32 %v819_v54, %v820_v25  ;;  %v6732_v50 = vunpack.c.l.bf16 %v6731_v17  ;;  %v4231_v10 = vmax.f32 %v780_v11, %v781_v6  ;;  %v798_v37 = vmax.f32 %v796_v34, %v797_v51  ;;  %v6740_v25 = vld [vmem:[#allocation12_spill] sm:$0xff] }
  0xb1   :  { %v806_v22 = vrot.slane %v805_v35, 2  ;;  %v814_v61 = vmax.f32 %v812_v43, %v813_v60  ;;  %v6734_v36 = vunpack.c.l.bf16 %v6733_v41  ;;  %v4236_v63 = vmax.f32 %v789_v44, %v790_v38 }
  0xb2   :  { %v828_v59 = vsel %vm520_vm0, %v6732_v50, -inf  ;;  %v822_v53 = vrot.slane %v821_v49, 4  ;;  %v799_v32 = vrot.slane %v798_v37, 1  ;;  %v6735_v56 = vunpack.c.h.bf16 %v6731_v17 }
  0xb3   :  { %v829_v3 = vsel %vm522_vm1, %v6734_v36, -inf  ;;  %v807_v4 = vmax.f32 %v805_v35, %v806_v22  ;;  %v815_v14 = vrot.slane %v814_v61, 2  ;;  %v6737_v27 = vunpack.c.l.bf16 %v6736_v46  ;;  %v6738_v35 = vld [vmem:[#allocation11_spill] sm:$0xff] }
  0xb4   :  { %v830_v57 = vmax.f32 %v828_v59, %v829_v3  ;;  %v837_v33 = vsel %vm520_vm0, %v6735_v56, -inf  ;;  %v823_v34 = vmax.f32 %v821_v49, %v822_v53  ;;  %v4244_v54 = vmax.f32 %v798_v37, %v799_v32 }
  0xb5   :  { %v838_v29 = vsel %vm522_vm1, %v6737_v27, -inf  ;;  %v808_v11 = vrot.slane %v807_v4, 1  ;;  %v816_v44 = vmax.f32 %v814_v61, %v815_v14  ;;  %v6739_v45 = vunpack.c.l.bf16 %v6738_v35  ;;  %v6743_v61 = vld [vmem:[#allocation13_spill] sm:$0xff]  ;;  %v6747_v27 = vld [vmem:[#allocation15_spill] sm:$0xff] }
  0xb6   :  { %v831_v43 = vrot.slane %v830_v57, 4  ;;  %v839_v62 = vmax.f32 %v837_v33, %v838_v29  ;;  %v6741_v6 = vunpack.c.l.bf16 %v6740_v25  ;;  %v824_v38 = vrot.slane %v823_v34, 2  ;;  %v6745_v33 = vld [vmem:[#allocation14_spill] sm:$0xff] }
  0xb7   :  { %v846_v9 = vsel %vm520_vm0, %v6739_v45, -inf  ;;  %v4252_v60 = vmax.f32 %v807_v4, %v808_v11  ;;  %v817_v50 = vrot.slane %v816_v44, 1  ;;  %v6742_v59 = vunpack.c.h.bf16 %v6738_v35 }
  0xb8   :  { %v847_v51 = vsel %vm522_vm1, %v6741_v6, -inf  ;;  %v832_v22 = vmax.f32 %v830_v57, %v831_v43  ;;  %v840_v17 = vrot.slane %v839_v62, 4  ;;  %v6744_v41 = vunpack.c.l.bf16 %v6743_v61  ;;  %v6750_v6 = vld [vmem:[#allocation16_spill] sm:$0xff] }
  0xb9   :  { %v848_v49 = vmax.f32 %v846_v9, %v847_v51  ;;  %v855_v37 = vsel %vm520_vm0, %v6742_v59, -inf  ;;  %v825_v3 = vmax.f32 %v823_v34, %v824_v38  ;;  %v4260_v56 = vmax.f32 %v816_v44, %v817_v50 }
  0xba   :  { %v856_v36 = vsel %vm522_vm1, %v6744_v41, -inf  ;;  %v833_v53 = vrot.slane %v832_v22, 2  ;;  %v841_v32 = vmax.f32 %v839_v62, %v840_v17  ;;  %v6746_v57 = vunpack.c.l.bf16 %v6745_v33 }
  0xbb   :  { %v857_v14 = vmax.f32 %v855_v37, %v856_v36  ;;  %v849_v4 = vrot.slane %v848_v49, 4  ;;  %v6748_v29 = vunpack.c.l.bf16 %v6747_v27  ;;  %v826_v43 = vrot.slane %v825_v3, 1  ;;  %v6752_v36 = vld [vmem:[#allocation17_spill] sm:$0xff] }
  0xbc   :  { %v864_v46 = vsel %vm520_vm0, %v6746_v57, -inf  ;;  %v834_v35 = vmax.f32 %v832_v22, %v833_v53  ;;  %v842_v45 = vrot.slane %v841_v32, 2  ;;  %v6749_v62 = vunpack.c.h.bf16 %v6745_v33 }
  0xbd   :  { %v865_v11 = vsel %vm522_vm1, %v6748_v29, -inf  ;;  %v858_v9 = vrot.slane %v857_v14, 4  ;;  %v850_v25 = vmax.f32 %v848_v49, %v849_v4  ;;  %v6751_v51 = vunpack.c.l.bf16 %v6750_v6 }
  0xbe   :  { %v866_v34 = vmax.f32 %v864_v46, %v865_v11  ;;  %v873_v44 = vsel %vm520_vm0, %v6749_v62, -inf  ;;  %v4274_v17 = vmax.f32 %v825_v3, %v826_v43  ;;  %v835_v50 = vrot.slane %v834_v35, 1  ;;  %v6754_v46 = vld [vmem:[#allocation18_spill] sm:$0xff] }
  0xbf   :  { %v874_v38 = vsel %vm522_vm1, %v6751_v51, -inf  ;;  %v843_v59 = vmax.f32 %v841_v32, %v842_v45  ;;  %v859_v37 = vmax.f32 %v857_v14, %v858_v9  ;;  %v851_v61 = vrot.slane %v850_v25, 2 }
  0xc0   :  { %v867_v41 = vrot.slane %v866_v34, 4  ;;  %v875_v22 = vmax.f32 %v873_v44, %v874_v38  ;;  %v6753_v53 = vunpack.c.l.bf16 %v6752_v36  ;;  %v4279_v4 = vmax.f32 %v834_v35, %v835_v50  ;;  %v6757_v44 = vld [vmem:[#allocation19_spill] sm:$0xff] }
  0xc1   :  { %v844_v33 = vrot.slane %v843_v59, 1  ;;  %v860_v57 = vrot.slane %v859_v37, 2  ;;  %v6755_v27 = vunpack.c.l.bf16 %v6754_v46  ;;  %v852_v3 = vmax.f32 %v850_v25, %v851_v61 }
  0xc2   :  { %v882_v49 = vsel %vm520_vm0, %v6753_v53, -inf  ;;  %v868_v11 = vmax.f32 %v866_v34, %v867_v41  ;;  %v876_v43 = vrot.slane %v875_v22, 4  ;;  %v6756_v9 = vunpack.c.h.bf16 %v6752_v36  ;;  %v6759_v34 = vld [vmem:[#allocation20_spill] sm:$0xff]  ;;  %v6761_v41 = vld [vmem:[#allocation21_spill] sm:$0xff] }
  0xc3   :  { %v883_v29 = vsel %vm522_vm1, %v6755_v27, -inf  ;;  %v4284_v14 = vmax.f32 %v843_v59, %v844_v33  ;;  %v861_v45 = vmax.f32 %v859_v37, %v860_v57  ;;  %v6758_v35 = vunpack.c.l.bf16 %v6757_v44 }
  0xc4   :  { %v884_v32 = vmax.f32 %v882_v49, %v883_v29  ;;  %v891_v62 = vsel %vm520_vm0, %v6756_v9, -inf  ;;  %v853_v51 = vrot.slane %v852_v3, 1  ;;  %v869_v38 = vrot.slane %v868_v11, 2 }
  0xc5   :  { %v892_v6 = vsel %vm522_vm1, %v6758_v35, -inf  ;;  %v877_v50 = vmax.f32 %v875_v22, %v876_v43  ;;  %v862_v46 = vrot.slane %v861_v45, 1  ;;  %v6760_v61 = vunpack.c.l.bf16 %v6759_v34 }
  0xc6   :  { %v885_v53 = vrot.slane %v884_v32, 4  ;;  %v893_v25 = vmax.f32 %v891_v62, %v892_v6  ;;  %v6762_v37 = vunpack.c.l.bf16 %v6761_v41  ;;  %v4298_v49 = vmax.f32 %v852_v3, %v853_v51 }
  0xc7   :  { %v900_v59 = vsel %vm520_vm0, %v6760_v61, -inf  ;;  %v870_v33 = vmax.f32 %v868_v11, %v869_v38  ;;  %v878_v57 = vrot.slane %v877_v50, 2  ;;  %v4300_v29 = vmax.f32 %v861_v45, %v862_v46  ;;  %v6765_v61 = vld [vmem:[#allocation22_spill] sm:$0xff]  ;;  %v6767_v38 = vld [vmem:[#allocation23_spill] sm:$0xff] }
  0xc8   :  { %v901_v36 = vsel %vm522_vm1, %v6762_v37, -inf  ;;  %v886_v27 = vmax.f32 %v884_v32, %v885_v53  ;;  %v894_v9 = vrot.slane %v893_v25, 4  ;;  %v6764_v43 = vunpack.c.h.bf16 %v6759_v34 }
  0xc9   :  { %6763 = vst [vmem:[#allocation2_spill] sm:$0xff] %v4300_v29  ;;  %v902_v22 = vmax.f32 %v900_v59, %v901_v36  ;;  %v871_v44 = vrot.slane %v870_v33, 1  ;;  %v879_v35 = vmax.f32 %v877_v50, %v878_v57  ;;  %v6766_v41 = vunpack.c.l.bf16 %v6765_v61  ;;  %v6770_v59 = vld [vmem:[#allocation24_spill] sm:$0xff] }
  0xca   :  { %v909_v62 = vsel %vm520_vm0, %v6764_v43, -inf  ;;  %v887_v6 = vrot.slane %v886_v27, 2  ;;  %v895_v3 = vmax.f32 %v893_v25, %v894_v9  ;;  %v6768_v32 = vunpack.c.l.bf16 %v6767_v38 }
  0xcb   :  { %v910_v37 = vsel %vm522_vm1, %v6766_v41, -inf  ;;  %v903_v51 = vrot.slane %v902_v22, 4  ;;  %v4311_v53 = vmax.f32 %v870_v33, %v871_v44  ;;  %v880_v46 = vrot.slane %v879_v35, 1 }
  0xcc   :  { %v911_v11 = vmax.f32 %v909_v62, %v910_v37  ;;  %v918_v45 = vsel %vm520_vm0, %v6768_v32, -inf  ;;  %v888_v34 = vmax.f32 %v886_v27, %v887_v6  ;;  %v6771_v36 = vunpack.c.l.bf16 %v6770_v59  ;;  %v6774_v37 = vld [vmem:[#allocation25_spill] sm:$0xff] }
  0xcd   :  { %6769 = vst [vmem:[#allocation3_spill] sm:$0xff] %v4311_v53  ;;  %v896_v57 = vrot.slane %v895_v3, 2  ;;  %v904_v43 = vmax.f32 %v902_v22, %v903_v51  ;;  %v4316_v41 = vmax.f32 %v879_v35, %v880_v46  ;;  %v6773_v9 = vunpack.c.h.bf16 %v6767_v38  ;;  %v6777_v51 = vld [vmem:[#allocation26_spill] sm:$0xff]  ;;  %v6779_v46 = vld [vmem:[#allocation27_spill] sm:$0xff] }
  0xce   :  { %v919_v50 = vsel %vm522_vm1, %v6771_v36, -inf  ;;  %v912_v61 = vrot.slane %v911_v11, 4  ;;  %v889_v25 = vrot.slane %v888_v34, 1  ;;  %v6775_v33 = vunpack.c.l.bf16 %v6774_v37 }
  0xcf   :  { %v920_v29 = vmax.f32 %v918_v45, %v919_v50  ;;  %6772 = vst [vmem:[#allocation4_spill] sm:$0xff] %v4316_v41  ;;  %v927_v62 = vsel %vm520_vm0, %v6773_v9, -inf  ;;  %v897_v27 = vmax.f32 %v895_v3, %v896_v57  ;;  %v905_v6 = vrot.slane %v904_v43, 2  ;;  %v6782_v57 = vld [vmem:[#allocation28_spill] sm:$0xff] }
  0xd0   :  { %v928_v44 = vsel %vm522_vm1, %v6775_v33, -inf  ;;  %v913_v32 = vmax.f32 %v911_v11, %v912_v61  ;;  %v4324_v36 = vmax.f32 %v888_v34, %v889_v25  ;;  %v6778_v45 = vunpack.c.l.bf16 %v6777_v51 }
  0xd1   :  { %v921_v59 = vrot.slane %v920_v29, 4  ;;  %v929_v22 = vmax.f32 %v927_v62, %v928_v44  ;;  %v6780_v50 = vunpack.c.l.bf16 %v6779_v46  ;;  %v898_v9 = vrot.slane %v897_v27, 1 }
  0xd2   :  { %6776 = vst [vmem:[#allocation5_spill] sm:$0xff] %v4324_v36  ;;  %v936_v35 = vsel %vm520_vm0, %v6778_v45, -inf  ;;  %v906_v41 = vmax.f32 %v904_v43, %v905_v6  ;;  %v914_v37 = vrot.slane %v913_v32, 2  ;;  %v6781_v11 = vunpack.c.h.bf16 %v6777_v51  ;;  %v6785_v6 = vld [vmem:[#allocation29_spill] sm:$0xff] }
  0xd3   :  { %v937_v38 = vsel %vm522_vm1, %v6780_v50, -inf  ;;  %v922_v53 = vmax.f32 %v920_v29, %v921_v59  ;;  %v930_v33 = vrot.slane %v929_v22, 4  ;;  %v6783_v61 = vunpack.c.l.bf16 %v6782_v57 }
  0xd4   :  { %v938_v3 = vmax.f32 %v936_v35, %v937_v38  ;;  %v945_v34 = vsel %vm520_vm0, %v6781_v11, -inf  ;;  %v4338_v62 = vmax.f32 %v897_v27, %v898_v9  ;;  %v907_v44 = vrot.slane %v906_v41, 1  ;;  %v6788_v11 = vld [vmem:[#allocation30_spill] sm:$0xff] }
  0xd5   :  { %v946_v25 = vsel %vm522_vm1, %v6783_v61, -inf  ;;  %v915_v45 = vmax.f32 %v913_v32, %v914_v37  ;;  %v923_v46 = vrot.slane %v922_v53, 2  ;;  %v931_v50 = vmax.f32 %v929_v22, %v930_v33 }
  0xd6   :  { %6784 = vst [vmem:[#allocation6_spill] sm:$0xff] %v4338_v62  ;;  %v939_v36 = vrot.slane %v938_v3, 4  ;;  %v947_v43 = vmax.f32 %v945_v34, %v946_v25  ;;  %v6786_v29 = vunpack.c.l.bf16 %v6785_v6  ;;  %v4343_v35 = vmax.f32 %v906_v41, %v907_v44  ;;  %v6792_v25 = vld [vmem:[#allocation31_spill] sm:$0xff] }
  0xd7   :  { %v916_v51 = vrot.slane %v915_v45, 1  ;;  %v924_v38 = vmax.f32 %v922_v53, %v923_v46  ;;  %v6789_v57 = vunpack.c.l.bf16 %v6788_v11  ;;  %v932_v27 = vrot.slane %v931_v50, 2 }
  0xd8   :  { %v954_v59 = vsel %vm520_vm0, %v6786_v29, -inf  ;;  %6787 = vst [vmem:[#allocation7_spill] sm:$0xff] %v4343_v35  ;;  %v940_v9 = vmax.f32 %v938_v3, %v939_v36  ;;  %v948_v62 = vrot.slane %v947_v43, 4  ;;  %v6791_v33 = vunpack.c.h.bf16 %v6785_v6  ;;  %v6795_v3 = vld [vmem:[#allocation32_spill] sm:$0xff] }
  0xd9   :  { %v955_v61 = vsel %vm522_vm1, %v6789_v57, -inf  ;;  %v4348_v37 = vmax.f32 %v915_v45, %v916_v51  ;;  %v925_v22 = vrot.slane %v924_v38, 1  ;;  %v6793_v41 = vunpack.c.l.bf16 %v6792_v25  ;;  %v6797_v51 = vld [vmem:[#allocation33_spill] sm:$0xff] }
  0xda   :  { %v956_v32 = vmax.f32 %v954_v59, %v955_v61  ;;  %v963_v34 = vsel %vm520_vm0, %v6791_v33, -inf  ;;  %v933_v53 = vmax.f32 %v931_v50, %v932_v27  ;;  %v941_v46 = vrot.slane %v940_v9, 2 }
  0xdb   :  { %6790 = vst [vmem:[#allocation8_spill] sm:$0xff] %v4348_v37  ;;  %v964_v44 = vsel %vm522_vm1, %v6793_v41, -inf  ;;  %v949_v29 = vmax.f32 %v947_v43, %v948_v62  ;;  %v4356_v57 = vmax.f32 %v924_v38, %v925_v22  ;;  %v6796_v59 = vunpack.c.l.bf16 %v6795_v3  ;;  %v6800_v38 = vld [vmem:[#allocation34_spill] sm:$0xff] }
  0xdc   :  { %v957_v11 = vrot.slane %v956_v32, 4  ;;  %v965_v36 = vmax.f32 %v963_v34, %v964_v44  ;;  %v6798_v61 = vunpack.c.l.bf16 %v6797_v51  ;;  %v934_v33 = vrot.slane %v933_v53, 1 }
  0xdd   :  { %6794 = vst [vmem:[#allocation9_spill] sm:$0xff] %v4356_v57  ;;  %v972_v45 = vsel %vm520_vm0, %v6796_v59, -inf  ;;  %v942_v37 = vmax.f32 %v940_v9, %v941_v46  ;;  %v950_v25 = vrot.slane %v949_v29, 2  ;;  %v6799_v62 = vunpack.c.h.bf16 %v6795_v3  ;;  %v6803_v46 = vld [vmem:[#allocation35_spill] sm:$0xff] }
  0xde   :  { %v973_v6 = vsel %vm522_vm1, %v6798_v61, -inf  ;;  %v958_v35 = vmax.f32 %v956_v32, %v957_v11  ;;  %v966_v41 = vrot.slane %v965_v36, 4  ;;  %v6801_v27 = vunpack.c.l.bf16 %v6800_v38 }
  0xdf   :  { %v974_v50 = vmax.f32 %v972_v45, %v973_v6  ;;  %v981_v43 = vsel %vm520_vm0, %v6799_v62, -inf  ;;  %v4370_v34 = vmax.f32 %v933_v53, %v934_v33  ;;  %v943_v44 = vrot.slane %v942_v37, 1  ;;  %v6806_v62 = vld [vmem:[#allocation36_spill] sm:$0xff] }
  0xe0   :  { %v982_v22 = vsel %vm522_vm1, %v6801_v27, -inf  ;;  %v951_v59 = vmax.f32 %v949_v29, %v950_v25  ;;  %v959_v51 = vrot.slane %v958_v35, 2  ;;  %v967_v61 = vmax.f32 %v965_v36, %v966_v41 }
  0xe1   :  { %6802 = vst [vmem:[#allocation10_spill] sm:$0xff] %v4370_v34  ;;  %v975_v57 = vrot.slane %v974_v50, 4  ;;  %v983_v9 = vmax.f32 %v981_v43, %v982_v22  ;;  %v6804_v32 = vunpack.c.l.bf16 %v6803_v46  ;;  %v4375_v45 = vmax.f32 %v942_v37, %v943_v44  ;;  %v6810_v22 = vld [vmem:[#allocation37_spill] sm:$0xff] }
  0xe2   :  { %v952_v3 = vrot.slane %v951_v59, 1  ;;  %v960_v6 = vmax.f32 %v958_v35, %v959_v51  ;;  %v6807_v38 = vunpack.c.l.bf16 %v6806_v62  ;;  %v968_v53 = vrot.slane %v967_v61, 2 }
  0xe3   :  { %v990_v11 = vsel %vm520_vm0, %v6804_v32, -inf  ;;  %6805 = vst [vmem:[#allocation11_spill] sm:$0xff] %v4375_v45  ;;  %v976_v33 = vmax.f32 %v974_v50, %v975_v57  ;;  %v984_v34 = vrot.slane %v983_v9, 4  ;;  %v6809_v41 = vunpack.c.h.bf16 %v6803_v46  ;;  %v6813_v50 = vld [vmem:[#allocation38_spill] sm:$0xff] }
  0xe4   :  { %v991_v27 = vsel %vm522_vm1, %v6807_v38, -inf  ;;  %v4380_v25 = vmax.f32 %v951_v59, %v952_v3  ;;  %v961_v36 = vrot.slane %v960_v6, 1  ;;  %v6811_v37 = vunpack.c.l.bf16 %v6810_v22  ;;  %v6815_v3 = vld [vmem:[#allocation39_spill] sm:$0xff] }
  0xe5   :  { %v992_v29 = vmax.f32 %v990_v11, %v991_v27  ;;  %v999_v43 = vsel %vm520_vm0, %v6809_v41, -inf  ;;  %v969_v35 = vmax.f32 %v967_v61, %v968_v53  ;;  %v977_v51 = vrot.slane %v976_v33, 2 }
  0xe6   :  { %6808 = vst [vmem:[#allocation12_spill] sm:$0xff] %v4380_v25  ;;  %v1000_v44 = vsel %vm522_vm1, %v6811_v37, -inf  ;;  %v985_v32 = vmax.f32 %v983_v9, %v984_v34  ;;  %v4388_v38 = vmax.f32 %v960_v6, %v961_v36  ;;  %v6814_v11 = vunpack.c.l.bf16 %v6813_v50  ;;  %v6818_v6 = vld [vmem:[#allocation40_spill] sm:$0xff] }
  0xe7   :  { %v993_v62 = vrot.slane %v992_v29, 4  ;;  %v1001_v57 = vmax.f32 %v999_v43, %v1000_v44  ;;  %v6816_v27 = vunpack.c.l.bf16 %v6815_v3  ;;  %v970_v41 = vrot.slane %v969_v35, 1 }
  0xe8   :  { %6812 = vst [vmem:[#allocation13_spill] sm:$0xff] %v4388_v38  ;;  %v1008_v59 = vsel %vm520_vm0, %v6814_v11, -inf  ;;  %v978_v25 = vmax.f32 %v976_v33, %v977_v51  ;;  %v986_v22 = vrot.slane %v985_v32, 2  ;;  %v6817_v34 = vunpack.c.h.bf16 %v6813_v50  ;;  %v6821_v51 = vld [vmem:[#allocation41_spill] sm:$0xff] }
  0xe9   :  { %v1009_v46 = vsel %vm522_vm1, %v6816_v27, -inf  ;;  %v994_v45 = vmax.f32 %v992_v29, %v993_v62  ;;  %v1002_v37 = vrot.slane %v1001_v57, 4  ;;  %v6819_v53 = vunpack.c.l.bf16 %v6818_v6 }
  0xea   :  { %v1010_v61 = vmax.f32 %v1008_v59, %v1009_v46  ;;  %v1017_v9 = vsel %vm520_vm0, %v6817_v34, -inf  ;;  %v4402_v43 = vmax.f32 %v969_v35, %v970_v41  ;;  %v979_v44 = vrot.slane %v978_v25, 1  ;;  %v6824_v34 = vld [vmem:[#allocation42_spill] sm:$0xff] }
  0xeb   :  { %v1018_v36 = vsel %vm522_vm1, %v6819_v53, -inf  ;;  %v987_v11 = vmax.f32 %v985_v32, %v986_v22  ;;  %v995_v3 = vrot.slane %v994_v45, 2  ;;  %v1003_v27 = vmax.f32 %v1001_v57, %v1002_v37 }
  0xec   :  { %6820 = vst [vmem:[#allocation14_spill] sm:$0xff] %v4402_v43  ;;  %v1011_v38 = vrot.slane %v1010_v61, 4  ;;  %v1019_v33 = vmax.f32 %v1017_v9, %v1018_v36  ;;  %v6822_v29 = vunpack.c.l.bf16 %v6821_v51  ;;  %v4407_v59 = vmax.f32 %v978_v25, %v979_v44  ;;  %v6828_v36 = vld [vmem:[#allocation43_spill] sm:$0xff] }
  0xed   :  { %v988_v50 = vrot.slane %v987_v11, 1  ;;  %v996_v46 = vmax.f32 %v994_v45, %v995_v3  ;;  %v6825_v6 = vunpack.c.l.bf16 %v6824_v34  ;;  %v1004_v35 = vrot.slane %v1003_v27, 2 }
  0xee   :  { %v1026_v62 = vsel %vm520_vm0, %v6822_v29, -inf  ;;  %6823 = vst [vmem:[#allocation15_spill] sm:$0xff] %v4407_v59  ;;  %v1012_v41 = vmax.f32 %v1010_v61, %v1011_v38  ;;  %v1020_v43 = vrot.slane %v1019_v33, 4  ;;  %v6827_v37 = vunpack.c.h.bf16 %v6821_v51  ;;  %v6831_v61 = vld [vmem:[#allocation44_spill] sm:$0xff] }
  0xef   :  { %v1027_v53 = vsel %vm522_vm1, %v6825_v6, -inf  ;;  %v4412_v22 = vmax.f32 %v987_v11, %v988_v50  ;;  %v997_v57 = vrot.slane %v996_v46, 1  ;;  %v6829_v25 = vunpack.c.l.bf16 %v6828_v36  ;;  %v6833_v50 = vld [vmem:[#allocation45_spill] sm:$0xff] }
  0xf0   :  { %v1028_v32 = vmax.f32 %v1026_v62, %v1027_v53  ;;  %v1035_v9 = vsel %vm520_vm0, %v6827_v37, -inf  ;;  %v1005_v45 = vmax.f32 %v1003_v27, %v1004_v35  ;;  %v1013_v3 = vrot.slane %v1012_v41, 2 }
  0xf1   :  { %6826 = vst [vmem:[#allocation16_spill] sm:$0xff] %v4412_v22  ;;  %v1036_v44 = vsel %vm522_vm1, %v6829_v25, -inf  ;;  %v1021_v29 = vmax.f32 %v1019_v33, %v1020_v43  ;;  %v4420_v6 = vmax.f32 %v996_v46, %v997_v57  ;;  %v6832_v62 = vunpack.c.l.bf16 %v6831_v61  ;;  %v6836_v46 = vld [vmem:[#allocation46_spill] sm:$0xff] }
  0xf2   :  { %v1029_v34 = vrot.slane %v1028_v32, 4  ;;  %v1037_v38 = vmax.f32 %v1035_v9, %v1036_v44  ;;  %v6834_v53 = vunpack.c.l.bf16 %v6833_v50  ;;  %v1006_v37 = vrot.slane %v1005_v45, 1 }
  0xf3   :  { %6830 = vst [vmem:[#allocation17_spill] sm:$0xff] %v4420_v6  ;;  %v1044_v11 = vsel %vm520_vm0, %v6832_v62, -inf  ;;  %v1014_v22 = vmax.f32 %v1012_v41, %v1013_v3  ;;  %v1022_v36 = vrot.slane %v1021_v29, 2  ;;  %v6835_v43 = vunpack.c.h.bf16 %v6831_v61  ;;  %v6839_v3 = vld [vmem:[#allocation47_spill] sm:$0xff] }
  0xf4   :  { %v1045_v51 = vsel %vm522_vm1, %v6834_v53, -inf  ;;  %v1030_v59 = vmax.f32 %v1028_v32, %v1029_v34  ;;  %v1038_v25 = vrot.slane %v1037_v38, 4  ;;  %v6837_v35 = vunpack.c.l.bf16 %v6836_v46 }
  0xf5   :  { %v1046_v27 = vmax.f32 %v1044_v11, %v1045_v51  ;;  %v1053_v33 = vsel %vm520_vm0, %v6835_v43, -inf  ;;  %v4434_v9 = vmax.f32 %v1005_v45, %v1006_v37  ;;  %v1015_v44 = vrot.slane %v1014_v22, 1  ;;  %v6842_v43 = vld [vmem:[#allocation48_spill] sm:$0xff] }
  0xf6   :  { %v1054_v57 = vsel %vm522_vm1, %v6837_v35, -inf  ;;  %v1023_v62 = vmax.f32 %v1021_v29, %v1022_v36  ;;  %v1031_v50 = vrot.slane %v1030_v59, 2  ;;  %v1039_v53 = vmax.f32 %v1037_v38, %v1038_v25 }
  0xf7   :  { %6838 = vst [vmem:[#allocation18_spill] sm:$0xff] %v4434_v9  ;;  %v1047_v6 = vrot.slane %v1046_v27, 4  ;;  %v1055_v41 = vmax.f32 %v1053_v33, %v1054_v57  ;;  %v6840_v32 = vunpack.c.l.bf16 %v6839_v3  ;;  %v4439_v11 = vmax.f32 %v1014_v22, %v1015_v44  ;;  %v6846_v57 = vld [vmem:[#allocation49_spill] sm:$0xff] }
  0xf8   :  { %v1024_v61 = vrot.slane %v1023_v62, 1  ;;  %v1032_v51 = vmax.f32 %v1030_v59, %v1031_v50  ;;  %v6843_v46 = vunpack.c.l.bf16 %v6842_v43  ;;  %v1040_v45 = vrot.slane %v1039_v53, 2 }
  0xf9   :  { %v1062_v34 = vsel %vm520_vm0, %v6840_v32, -inf  ;;  %6841 = vst [vmem:[#allocation19_spill] sm:$0xff] %v4439_v11  ;;  %v1048_v37 = vmax.f32 %v1046_v27, %v1047_v6  ;;  %v1056_v9 = vrot.slane %v1055_v41, 4  ;;  %v6845_v25 = vunpack.c.h.bf16 %v6839_v3  ;;  %v6849_v27 = vld [vmem:[#allocation50_spill] sm:$0xff] }
  0xfa   :  { %v1063_v35 = vsel %vm522_vm1, %v6843_v46, -inf  ;;  %v4444_v36 = vmax.f32 %v1023_v62, %v1024_v61  ;;  %v1033_v38 = vrot.slane %v1032_v51, 1  ;;  %v6847_v22 = vunpack.c.l.bf16 %v6846_v57  ;;  %v6851_v61 = vld [vmem:[#allocation51_spill] sm:$0xff] }
  0xfb   :  { %v1064_v29 = vmax.f32 %v1062_v34, %v1063_v35  ;;  %v1071_v33 = vsel %vm520_vm0, %v6845_v25, -inf  ;;  %v1041_v59 = vmax.f32 %v1039_v53, %v1040_v45  ;;  %v1049_v50 = vrot.slane %v1048_v37, 2 }
  0xfc   :  { %6844 = vst [vmem:[#allocation20_spill] sm:$0xff] %v4444_v36  ;;  %v1072_v44 = vsel %vm522_vm1, %v6847_v22, -inf  ;;  %v1057_v32 = vmax.f32 %v1055_v41, %v1056_v9  ;;  %v4452_v46 = vmax.f32 %v1032_v51, %v1033_v38  ;;  %v6850_v34 = vunpack.c.l.bf16 %v6849_v27  ;;  %v6854_v51 = vld [vmem:[#allocation52_spill] sm:$0xff] }
  0xfd   :  { %v1065_v43 = vrot.slane %v1064_v29, 4  ;;  %v1073_v6 = vmax.f32 %v1071_v33, %v1072_v44  ;;  %v6852_v35 = vunpack.c.l.bf16 %v6851_v61  ;;  %v1042_v25 = vrot.slane %v1041_v59, 1 }
  0xfe   :  { %6848 = vst [vmem:[#allocation21_spill] sm:$0xff] %v4452_v46  ;;  %v1080_v62 = vsel %vm520_vm0, %v6850_v34, -inf  ;;  %v1050_v36 = vmax.f32 %v1048_v37, %v1049_v50  ;;  %v1058_v57 = vrot.slane %v1057_v32, 2  ;;  %v6853_v9 = vunpack.c.h.bf16 %v6849_v27  ;;  %v6857_v50 = vld [vmem:[#allocation53_spill] sm:$0xff] }
  0xff   :  { %v1081_v3 = vsel %vm522_vm1, %v6852_v35, -inf  ;;  %v1066_v11 = vmax.f32 %v1064_v29, %v1065_v43  ;;  %v1074_v22 = vrot.slane %v1073_v6, 4  ;;  %v6855_v45 = vunpack.c.l.bf16 %v6854_v51 }
 0x100   :  { %v1082_v53 = vmax.f32 %v1080_v62, %v1081_v3  ;;  %v1089_v41 = vsel %vm520_vm0, %v6853_v9, -inf  ;;  %v4466_v33 = vmax.f32 %v1041_v59, %v1042_v25  ;;  %v1051_v44 = vrot.slane %v1050_v36, 1  ;;  %v6860_v9 = vld [vmem:[#allocation54_spill] sm:$0xff] }
 0x101   :  { %v1090_v38 = vsel %vm522_vm1, %v6855_v45, -inf  ;;  %v1059_v34 = vmax.f32 %v1057_v32, %v1058_v57  ;;  %v1067_v61 = vrot.slane %v1066_v11, 2  ;;  %v1075_v35 = vmax.f32 %v1073_v6, %v1074_v22 }
 0x102   :  { %6856 = vst [vmem:[#allocation22_spill] sm:$0xff] %v4466_v33  ;;  %v1083_v46 = vrot.slane %v1082_v53, 4  ;;  %v1091_v37 = vmax.f32 %v1089_v41, %v1090_v38  ;;  %v6858_v29 = vunpack.c.l.bf16 %v6857_v50  ;;  %v4471_v62 = vmax.f32 %v1050_v36, %v1051_v44  ;;  %v6864_v38 = vld [vmem:[#allocation55_spill] sm:$0xff] }
 0x103   :  { %v1060_v27 = vrot.slane %v1059_v34, 1  ;;  %v1068_v3 = vmax.f32 %v1066_v11, %v1067_v61  ;;  %v6861_v51 = vunpack.c.l.bf16 %v6860_v9  ;;  %v1076_v59 = vrot.slane %v1075_v35, 2 }
 0x104   :  { %v1098_v43 = vsel %vm520_vm0, %v6858_v29, -inf  ;;  %6859 = vst [vmem:[#allocation23_spill] sm:$0xff] %v4471_v62  ;;  %v1084_v25 = vmax.f32 %v1082_v53, %v1083_v46  ;;  %v1092_v33 = vrot.slane %v1091_v37, 4  ;;  %v6863_v22 = vunpack.c.h.bf16 %v6857_v50  ;;  %v6867_v53 = vld [vmem:[#allocation56_spill] sm:$0xff] }
 0x105   :  { %v1099_v45 = vsel %vm522_vm1, %v6861_v51, -inf  ;;  %v4476_v57 = vmax.f32 %v1059_v34, %v1060_v27  ;;  %v1069_v6 = vrot.slane %v1068_v3, 1  ;;  %v6865_v36 = vunpack.c.l.bf16 %v6864_v38  ;;  %v6869_v27 = vld [vmem:[#allocation57_spill] sm:$0xff] }
 0x106   :  { %v1100_v32 = vmax.f32 %v1098_v43, %v1099_v45  ;;  %v1107_v41 = vsel %vm520_vm0, %v6863_v22, -inf  ;;  %v1077_v11 = vmax.f32 %v1075_v35, %v1076_v59  ;;  %v1085_v61 = vrot.slane %v1084_v25, 2 }
 0x107   :  { %6862 = vst [vmem:[#allocation24_spill] sm:$0xff] %v4476_v57  ;;  %v1108_v44 = vsel %vm522_vm1, %v6865_v36, -inf  ;;  %v1093_v29 = vmax.f32 %v1091_v37, %v1092_v33  ;;  %v4484_v51 = vmax.f32 %v1068_v3, %v1069_v6  ;;  %v6868_v43 = vunpack.c.l.bf16 %v6867_v53  ;;  %v6872_v3 = vld [vmem:[#allocation58_spill] sm:$0xff] }
 0x108   :  { %v1101_v9 = vrot.slane %v1100_v32, 4  ;;  %v1109_v46 = vmax.f32 %v1107_v41, %v1108_v44  ;;  %v6870_v45 = vunpack.c.l.bf16 %v6869_v27  ;;  %v1078_v22 = vrot.slane %v1077_v11, 1 }
 0x109   :  { %6866 = vst [vmem:[#allocation25_spill] sm:$0xff] %v4484_v51  ;;  %v1116_v34 = vsel %vm520_vm0, %v6868_v43, -inf  ;;  %v1086_v57 = vmax.f32 %v1084_v25, %v1085_v61  ;;  %v1094_v38 = vrot.slane %v1093_v29, 2  ;;  %v6871_v33 = vunpack.c.h.bf16 %v6867_v53  ;;  %v6875_v61 = vld [vmem:[#allocation59_spill] sm:$0xff] }
 0x10a   :  { %v1117_v50 = vsel %vm522_vm1, %v6870_v45, -inf  ;;  %v1102_v62 = vmax.f32 %v1100_v32, %v1101_v9  ;;  %v1110_v36 = vrot.slane %v1109_v46, 4  ;;  %v6873_v59 = vunpack.c.l.bf16 %v6872_v3 }
 0x10b   :  { %v1118_v35 = vmax.f32 %v1116_v34, %v1117_v50  ;;  %v1125_v37 = vsel %vm520_vm0, %v6871_v33, -inf  ;;  %v4498_v41 = vmax.f32 %v1077_v11, %v1078_v22  ;;  %v1087_v44 = vrot.slane %v1086_v57, 1  ;;  %v6878_v33 = vld [vmem:[#allocation60_spill] sm:$0xff] }
 0x10c   :  { %v1126_v6 = vsel %vm522_vm1, %v6873_v59, -inf  ;;  %v1095_v43 = vmax.f32 %v1093_v29, %v1094_v38  ;;  %v1103_v27 = vrot.slane %v1102_v62, 2  ;;  %v1111_v45 = vmax.f32 %v1109_v46, %v1110_v36 }
 0x10d   :  { %6874 = vst [vmem:[#allocation26_spill] sm:$0xff] %v4498_v41  ;;  %v1119_v51 = vrot.slane %v1118_v35, 4  ;;  %v1127_v25 = vmax.f32 %v1125_v37, %v1126_v6  ;;  %v6876_v32 = vunpack.c.l.bf16 %v6875_v61  ;;  %v4503_v34 = vmax.f32 %v1086_v57, %v1087_v44  ;;  %v6882_v6 = vld [vmem:[#allocation61_spill] sm:$0xff] }
 0x10e   :  { %v1096_v53 = vrot.slane %v1095_v43, 1  ;;  %v1104_v50 = vmax.f32 %v1102_v62, %v1103_v27  ;;  %v6879_v3 = vunpack.c.l.bf16 %v6878_v33  ;;  %v1112_v11 = vrot.slane %v1111_v45, 2 }
 0x10f   :  { %v1134_v9 = vsel %vm520_vm0, %v6876_v32, -inf  ;;  %6877 = vst [vmem:[#allocation27_spill] sm:$0xff] %v4503_v34  ;;  %v1120_v22 = vmax.f32 %v1118_v35, %v1119_v51  ;;  %v1128_v41 = vrot.slane %v1127_v25, 4  ;;  %v6881_v36 = vunpack.c.h.bf16 %v6875_v61  ;;  %v6885_v35 = vld [vmem:[#allocation62_spill] sm:$0xff] }
 0x110   :  { %v1135_v59 = vsel %vm522_vm1, %v6879_v3, -inf  ;;  %v4508_v38 = vmax.f32 %v1095_v43, %v1096_v53  ;;  %v1105_v46 = vrot.slane %v1104_v50, 1  ;;  %v6883_v57 = vunpack.c.l.bf16 %v6882_v6  ;;  %v6887_v53 = vld [vmem:[#allocation63_spill] sm:$0xff] }
 0x111   :  { %v1136_v29 = vmax.f32 %v1134_v9, %v1135_v59  ;;  %v1143_v37 = vsel %vm520_vm0, %v6881_v36, -inf  ;;  %v1113_v62 = vmax.f32 %v1111_v45, %v1112_v11  ;;  %v1121_v27 = vrot.slane %v1120_v22, 2 }
 0x112   :  { %6880 = vst [vmem:[#allocation28_spill] sm:$0xff] %v4508_v38  ;;  %v1144_v44 = vsel %vm522_vm1, %v6883_v57, -inf  ;;  %v1129_v32 = vmax.f32 %v1127_v25, %v1128_v41  ;;  %v4516_v3 = vmax.f32 %v1104_v50, %v1105_v46  ;;  %v6886_v9 = vunpack.c.l.bf16 %v6885_v35  ;;  %v6890_v50 = vld [vmem:[#allocation64_spill] sm:$0xff] }
 0x113   :  { %v1137_v33 = vrot.slane %v1136_v29, 4  ;;  %v1145_v51 = vmax.f32 %v1143_v37, %v1144_v44  ;;  %v6888_v59 = vunpack.c.l.bf16 %v6887_v53  ;;  %v1114_v36 = vrot.slane %v1113_v62, 1 }
 0x114   :  { %6884 = vst [vmem:[#allocation29_spill] sm:$0xff] %v4516_v3  ;;  %v1152_v43 = vsel %vm520_vm0, %v6886_v9, -inf  ;;  %v1122_v38 = vmax.f32 %v1120_v22, %v1121_v27  ;;  %v1130_v6 = vrot.slane %v1129_v32, 2  ;;  %v6889_v41 = vunpack.c.h.bf16 %v6885_v35  ;;  %v6893_v27 = vld [vmem:[#allocation65_spill] sm:$0xff] }
 0x115   :  { %v1153_v61 = vsel %vm522_vm1, %v6888_v59, -inf  ;;  %v1138_v34 = vmax.f32 %v1136_v29, %v1137_v33  ;;  %v1146_v57 = vrot.slane %v1145_v51, 4  ;;  %v6891_v11 = vunpack.c.l.bf16 %v6890_v50 }
 0x116   :  { %v1154_v45 = vmax.f32 %v1152_v43, %v1153_v61  ;;  %v1161_v25 = vsel %vm520_vm0, %v6889_v41, -inf  ;;  %v4530_v37 = vmax.f32 %v1113_v62, %v1114_v36  ;;  %v1123_v44 = vrot.slane %v1122_v38, 1  ;;  %v6896_v41 = vld [vmem:[#allocation66_spill] sm:$0xff] }
 0x117   :  { %v1162_v46 = vsel %vm522_vm1, %v6891_v11, -inf  ;;  %v1131_v9 = vmax.f32 %v1129_v32, %v1130_v6  ;;  %v1139_v53 = vrot.slane %v1138_v34, 2  ;;  %v1147_v59 = vmax.f32 %v1145_v51, %v1146_v57 }
 0x118   :  { %6892 = vst [vmem:[#allocation30_spill] sm:$0xff] %v4530_v37  ;;  %v1155_v3 = vrot.slane %v1154_v45, 4  ;;  %v1163_v22 = vmax.f32 %v1161_v25, %v1162_v46  ;;  %v6894_v29 = vunpack.c.l.bf16 %v6893_v27  ;;  %v4535_v43 = vmax.f32 %v1122_v38, %v1123_v44  ;;  %v6900_v46 = vld [vmem:[#allocation67_spill] sm:$0xff] }
 0x119   :  { %v1132_v35 = vrot.slane %v1131_v9, 1  ;;  %v1140_v61 = vmax.f32 %v1138_v34, %v1139_v53  ;;  %v6897_v50 = vunpack.c.l.bf16 %v6896_v41  ;;  %v1148_v62 = vrot.slane %v1147_v59, 2 }
 0x11a   :  { %v1170_v33 = vsel %vm520_vm0, %v6894_v29, -inf  ;;  %6895 = vst [vmem:[#allocation31_spill] sm:$0xff] %v4535_v43  ;;  %v1156_v36 = vmax.f32 %v1154_v45, %v1155_v3  ;;  %v1164_v37 = vrot.slane %v1163_v22, 4  ;;  %v6899_v57 = vunpack.c.h.bf16 %v6893_v27  ;;  %v6903_v45 = vld [vmem:[#allocation68_spill] sm:$0xff] }
 0x11b   :  { %v1171_v11 = vsel %vm522_vm1, %v6897_v50, -inf  ;;  %v4540_v6 = vmax.f32 %v1131_v9, %v1132_v35  ;;  %v1141_v51 = vrot.slane %v1140_v61, 1  ;;  %v6901_v38 = vunpack.c.l.bf16 %v6900_v46  ;;  %v6905_v35 = vld [vmem:[#allocation69_spill] sm:$0xff] }
 0x11c   :  { %v1172_v32 = vmax.f32 %v1170_v33, %v1171_v11  ;;  %v1179_v25 = vsel %vm520_vm0, %v6899_v57, -inf  ;;  %v1149_v34 = vmax.f32 %v1147_v59, %v1148_v62  ;;  %v1157_v53 = vrot.slane %v1156_v36, 2 }
 0x11d   :  { %6898 = vst [vmem:[#allocation32_spill] sm:$0xff] %v4540_v6  ;;  %v1180_v44 = vsel %vm522_vm1, %v6901_v38, -inf  ;;  %v1165_v29 = vmax.f32 %v1163_v22, %v1164_v37  ;;  %v4548_v50 = vmax.f32 %v1140_v61, %v1141_v51  ;;  %v6904_v33 = vunpack.c.l.bf16 %v6903_v45  ;;  %v6908_v61 = vld [vmem:[#allocation70_spill] sm:$0xff] }
 0x11e   :  { %v1173_v41 = vrot.slane %v1172_v32, 4  ;;  %v1181_v3 = vmax.f32 %v1179_v25, %v1180_v44  ;;  %v6906_v11 = vunpack.c.l.bf16 %v6905_v35  ;;  %v1150_v57 = vrot.slane %v1149_v34, 1 }
 0x11f   :  { %6902 = vst [vmem:[#allocation33_spill] sm:$0xff] %v4548_v50  ;;  %v1188_v9 = vsel %vm520_vm0, %v6904_v33, -inf  ;;  %v1158_v6 = vmax.f32 %v1156_v36, %v1157_v53  ;;  %v1166_v46 = vrot.slane %v1165_v29, 2  ;;  %v6907_v37 = vunpack.c.h.bf16 %v6903_v45  ;;  %v6911_v53 = vld [vmem:[#allocation71_spill] sm:$0xff] }
 0x120   :  { %v1189_v27 = vsel %vm522_vm1, %v6906_v11, -inf  ;;  %v1174_v43 = vmax.f32 %v1172_v32, %v1173_v41  ;;  %v1182_v38 = vrot.slane %v1181_v3, 4  ;;  %v6909_v62 = vunpack.c.l.bf16 %v6908_v61 }
 0x121   :  { %v1190_v59 = vmax.f32 %v1188_v9, %v1189_v27  ;;  %v1197_v22 = vsel %vm520_vm0, %v6907_v37, -inf  ;;  %v4562_v25 = vmax.f32 %v1149_v34, %v1150_v57  ;;  %v1159_v44 = vrot.slane %v1158_v6, 1  ;;  %v6914_v37 = vld [vmem:[#allocation72_spill] sm:$0xff] }
 0x122   :  { %v1198_v51 = vsel %vm522_vm1, %v6909_v62, -inf  ;;  %v1167_v33 = vmax.f32 %v1165_v29, %v1166_v46  ;;  %v1175_v35 = vrot.slane %v1174_v43, 2  ;;  %v1183_v11 = vmax.f32 %v1181_v3, %v1182_v38 }
 0x123   :  { %6910 = vst [vmem:[#allocation34_spill] sm:$0xff] %v4562_v25  ;;  %v1191_v50 = vrot.slane %v1190_v59, 4  ;;  %v1199_v36 = vmax.f32 %v1197_v22, %v1198_v51  ;;  %v6912_v32 = vunpack.c.l.bf16 %v6911_v53  ;;  %v4567_v9 = vmax.f32 %v1158_v6, %v1159_v44  ;;  %v6918_v51 = vld [vmem:[#allocation73_spill] sm:$0xff] }
 0x124   :  { %v1168_v45 = vrot.slane %v1167_v33, 1  ;;  %v1176_v27 = vmax.f32 %v1174_v43, %v1175_v35  ;;  %v6915_v61 = vunpack.c.l.bf16 %v6914_v37  ;;  %v1184_v34 = vrot.slane %v1183_v11, 2 }
 0x125   :  { %v1206_v41 = vsel %vm520_vm0, %v6912_v32, -inf  ;;  %6913 = vst [vmem:[#allocation35_spill] sm:$0xff] %v4567_v9  ;;  %v1192_v57 = vmax.f32 %v1190_v59, %v1191_v50  ;;  %v1200_v25 = vrot.slane %v1199_v36, 4  ;;  %v6917_v38 = vunpack.c.h.bf16 %v6911_v53  ;;  %v6921_v59 = vld [vmem:[#allocation74_spill] sm:$0xff] }
 0x126   :  { %v1207_v62 = vsel %vm522_vm1, %v6915_v61, -inf  ;;  %v4572_v46 = vmax.f32 %v1167_v33, %v1168_v45  ;;  %v1177_v3 = vrot.slane %v1176_v27, 1  ;;  %v6919_v6 = vunpack.c.l.bf16 %v6918_v51  ;;  %v6923_v45 = vld [vmem:[#allocation75_spill] sm:$0xff] }
 0x127   :  { %v1208_v29 = vmax.f32 %v1206_v41, %v1207_v62  ;;  %v1215_v22 = vsel %vm520_vm0, %v6917_v38, -inf  ;;  %v1185_v43 = vmax.f32 %v1183_v11, %v1184_v34  ;;  %v1193_v35 = vrot.slane %v1192_v57, 2 }
 0x128   :  { %6916 = vst [vmem:[#allocation36_spill] sm:$0xff] %v4572_v46  ;;  %v1216_v44 = vsel %vm522_vm1, %v6919_v6, -inf  ;;  %v1201_v32 = vmax.f32 %v1199_v36, %v1200_v25  ;;  %v4580_v61 = vmax.f32 %v1176_v27, %v1177_v3  ;;  %v6922_v41 = vunpack.c.l.bf16 %v6921_v59  ;;  %v6926_v27 = vld [vmem:[#allocation76_spill] sm:$0xff] }
 0x129   :  { %v1209_v37 = vrot.slane %v1208_v29, 4  ;;  %v1217_v50 = vmax.f32 %v1215_v22, %v1216_v44  ;;  %v6924_v62 = vunpack.c.l.bf16 %v6923_v45  ;;  %v1186_v38 = vrot.slane %v1185_v43, 1 }
 0x12a   :  { %6920 = vst [vmem:[#allocation37_spill] sm:$0xff] %v4580_v61  ;;  %v1224_v33 = vsel %vm520_vm0, %v6922_v41, -inf  ;;  %v1194_v46 = vmax.f32 %v1192_v57, %v1193_v35  ;;  %v1202_v51 = vrot.slane %v1201_v32, 2  ;;  %v6925_v25 = vunpack.c.h.bf16 %v6921_v59  ;;  %v6929_v35 = vld [vmem:[#allocation77_spill] sm:$0xff] }
 0x12b   :  { %v1225_v53 = vsel %vm522_vm1, %v6924_v62, -inf  ;;  %v1210_v9 = vmax.f32 %v1208_v29, %v1209_v37  ;;  %v1218_v6 = vrot.slane %v1217_v50, 4  ;;  %v6927_v34 = vunpack.c.l.bf16 %v6926_v27 }
 0x12c   :  { %v1226_v11 = vmax.f32 %v1224_v33, %v1225_v53  ;;  %v1233_v36 = vsel %vm520_vm0, %v6925_v25, -inf  ;;  %v4594_v22 = vmax.f32 %v1185_v43, %v1186_v38  ;;  %v1195_v44 = vrot.slane %v1194_v46, 1  ;;  %v6932_v25 = vld [vmem:[#allocation78_spill] sm:$0xff] }
 0x12d   :  { %v1234_v3 = vsel %vm522_vm1, %v6927_v34, -inf  ;;  %v1203_v41 = vmax.f32 %v1201_v32, %v1202_v51  ;;  %v1211_v45 = vrot.slane %v1210_v9, 2  ;;  %v1219_v62 = vmax.f32 %v1217_v50, %v1218_v6 }
 0x12e   :  { %6928 = vst [vmem:[#allocation38_spill] sm:$0xff] %v4594_v22  ;;  %v1227_v61 = vrot.slane %v1226_v11, 4  ;;  %v1235_v57 = vmax.f32 %v1233_v36, %v1234_v3  ;;  %v6930_v29 = vunpack.c.l.bf16 %v6929_v35  ;;  %v4599_v33 = vmax.f32 %v1194_v46, %v1195_v44  ;;  %v6936_v3 = vld [vmem:[#allocation79_spill] sm:$0xff] }
 0x12f   :  { %v1204_v59 = vrot.slane %v1203_v41, 1  ;;  %v1212_v53 = vmax.f32 %v1210_v9, %v1211_v45  ;;  %v6933_v27 = vunpack.c.l.bf16 %v6932_v25  ;;  %v1220_v43 = vrot.slane %v1219_v62, 2 }
 0x130   :  { %v1242_v37 = vsel %vm520_vm0, %v6930_v29, -inf  ;;  %6931 = vst [vmem:[#allocation39_spill] sm:$0xff] %v4599_v33  ;;  %v1228_v38 = vmax.f32 %v1226_v11, %v1227_v61  ;;  %v1236_v22 = vrot.slane %v1235_v57, 4  ;;  %v6935_v6 = vunpack.c.h.bf16 %v6929_v35  ;;  %v6939_v11 = vld [vmem:[#allocation80_spill] sm:$0xff] }
 0x131   :  { %v1243_v34 = vsel %vm522_vm1, %v6933_v27, -inf  ;;  %v4604_v51 = vmax.f32 %v1203_v41, %v1204_v59  ;;  %v1213_v50 = vrot.slane %v1212_v53, 1  ;;  %v6937_v46 = vunpack.c.l.bf16 %v6936_v3  ;;  %v6941_v59 = vld [vmem:[#allocation81_spill] sm:$0xff] }
 0x132   :  { %v1244_v32 = vmax.f32 %v1242_v37, %v1243_v34  ;;  %v1251_v36 = vsel %vm520_vm0, %v6935_v6, -inf  ;;  %v1221_v9 = vmax.f32 %v1219_v62, %v1220_v43  ;;  %v1229_v45 = vrot.slane %v1228_v38, 2 }
 0x133   :  { %6934 = vst [vmem:[#allocation40_spill] sm:$0xff] %v4604_v51  ;;  %v1252_v44 = vsel %vm522_vm1, %v6937_v46, -inf  ;;  %v1237_v29 = vmax.f32 %v1235_v57, %v1236_v22  ;;  %v4612_v27 = vmax.f32 %v1212_v53, %v1213_v50  ;;  %v6940_v37 = vunpack.c.l.bf16 %v6939_v11  ;;  %v6944_v53 = vld [vmem:[#allocation82_spill] sm:$0xff] }
 0x134   :  { %v1245_v25 = vrot.slane %v1244_v32, 4  ;;  %v1253_v61 = vmax.f32 %v1251_v36, %v1252_v44  ;;  %v6942_v34 = vunpack.c.l.bf16 %v6941_v59  ;;  %v1222_v6 = vrot.slane %v1221_v9, 1 }
 0x135   :  { %6938 = vst [vmem:[#allocation41_spill] sm:$0xff] %v4612_v27  ;;  %v1260_v41 = vsel %vm520_vm0, %v6940_v37, -inf  ;;  %v1230_v51 = vmax.f32 %v1228_v38, %v1229_v45  ;;  %v1238_v3 = vrot.slane %v1237_v29, 2  ;;  %v6943_v22 = vunpack.c.h.bf16 %v6939_v11  ;;  %v6947_v45 = vld [vmem:[#allocation83_spill] sm:$0xff] }
 0x136   :  { %v1261_v35 = vsel %vm522_vm1, %v6942_v34, -inf  ;;  %v1246_v33 = vmax.f32 %v1244_v32, %v1245_v25  ;;  %v1254_v46 = vrot.slane %v1253_v61, 4  ;;  %v6945_v43 = vunpack.c.l.bf16 %v6944_v53 }
 0x137   :  { %v1262_v62 = vmax.f32 %v1260_v41, %v1261_v35  ;;  %v1269_v57 = vsel %vm520_vm0, %v6943_v22, -inf  ;;  %v4626_v36 = vmax.f32 %v1221_v9, %v1222_v6  ;;  %v1231_v44 = vrot.slane %v1230_v51, 1  ;;  %v6950_v22 = vld [vmem:[#allocation84_spill] sm:$0xff] }
 0x138   :  { %v1270_v50 = vsel %vm522_vm1, %v6945_v43, -inf  ;;  %v1239_v37 = vmax.f32 %v1237_v29, %v1238_v3  ;;  %v1247_v59 = vrot.slane %v1246_v33, 2  ;;  %v1255_v34 = vmax.f32 %v1253_v61, %v1254_v46 }
 0x139   :  { %6946 = vst [vmem:[#allocation42_spill] sm:$0xff] %v4626_v36  ;;  %v1263_v27 = vrot.slane %v1262_v62, 4  ;;  %v1271_v38 = vmax.f32 %v1269_v57, %v1270_v50  ;;  %v6948_v32 = vunpack.c.l.bf16 %v6947_v45  ;;  %v4631_v41 = vmax.f32 %v1230_v51, %v1231_v44  ;;  %v6954_v50 = vld [vmem:[#allocation85_spill] sm:$0xff] }
 0x13a   :  { %v1240_v11 = vrot.slane %v1239_v37, 1  ;;  %v1248_v35 = vmax.f32 %v1246_v33, %v1247_v59  ;;  %v6951_v53 = vunpack.c.l.bf16 %v6950_v22  ;;  %v1256_v9 = vrot.slane %v1255_v34, 2 }
 0x13b   :  { %v1278_v25 = vsel %vm520_vm0, %v6948_v32, -inf  ;;  %6949 = vst [vmem:[#allocation43_spill] sm:$0xff] %v4631_v41  ;;  %v1264_v6 = vmax.f32 %v1262_v62, %v1263_v27  ;;  %v1272_v36 = vrot.slane %v1271_v38, 4  ;;  %v6953_v46 = vunpack.c.h.bf16 %v6947_v45  ;;  %v6957_v62 = vld [vmem:[#allocation86_spill] sm:$0xff] }
 0x13c   :  { %v1279_v43 = vsel %vm522_vm1, %v6951_v53, -inf  ;;  %v4636_v3 = vmax.f32 %v1239_v37, %v1240_v11  ;;  %v1249_v61 = vrot.slane %v1248_v35, 1  ;;  %v6955_v51 = vunpack.c.l.bf16 %v6954_v50  ;;  %v6959_v11 = vld [vmem:[#allocation87_spill] sm:$0xff] }
 0x13d   :  { %v1280_v29 = vmax.f32 %v1278_v25, %v1279_v43  ;;  %v1287_v57 = vsel %vm520_vm0, %v6953_v46, -inf  ;;  %v1257_v33 = vmax.f32 %v1255_v34, %v1256_v9  ;;  %v1265_v59 = vrot.slane %v1264_v6, 2 }
 0x13e   :  { %6952 = vst [vmem:[#allocation44_spill] sm:$0xff] %v4636_v3  ;;  %v1288_v44 = vsel %vm522_vm1, %v6955_v51, -inf  ;;  %v1273_v32 = vmax.f32 %v1271_v38, %v1272_v36  ;;  %v4644_v53 = vmax.f32 %v1248_v35, %v1249_v61  ;;  %v6958_v25 = vunpack.c.l.bf16 %v6957_v62  ;;  %v6962_v35 = vld [vmem:[#allocation88_spill] sm:$0xff] }
 0x13f   :  { %v1281_v22 = vrot.slane %v1280_v29, 4  ;;  %v1289_v27 = vmax.f32 %v1287_v57, %v1288_v44  ;;  %v6960_v43 = vunpack.c.l.bf16 %v6959_v11  ;;  %v1258_v46 = vrot.slane %v1257_v33, 1 }
 0x140   :  { %6956 = vst [vmem:[#allocation45_spill] sm:$0xff] %v4644_v53  ;;  %v1296_v37 = vsel %vm520_vm0, %v6958_v25, -inf  ;;  %v1266_v3 = vmax.f32 %v1264_v6, %v1265_v59  ;;  %v1274_v50 = vrot.slane %v1273_v32, 2  ;;  %v6961_v36 = vunpack.c.h.bf16 %v6957_v62  ;;  %v6965_v59 = vld [vmem:[#allocation89_spill] sm:$0xff] }
 0x141   :  { %v1297_v45 = vsel %vm522_vm1, %v6960_v43, -inf  ;;  %v1282_v41 = vmax.f32 %v1280_v29, %v1281_v22  ;;  %v1290_v51 = vrot.slane %v1289_v27, 4  ;;  %v6963_v9 = vunpack.c.l.bf16 %v6962_v35 }
 0x142   :  { %v1298_v34 = vmax.f32 %v1296_v37, %v1297_v45  ;;  %v1305_v38 = vsel %vm520_vm0, %v6961_v36, -inf  ;;  %v4658_v57 = vmax.f32 %v1257_v33, %v1258_v46  ;;  %v1267_v44 = vrot.slane %v1266_v3, 1  ;;  %v6968_v36 = vld [vmem:[#allocation90_spill] sm:$0xff] }
 0x143   :  { %v1306_v61 = vsel %vm522_vm1, %v6963_v9, -inf  ;;  %v1275_v25 = vmax.f32 %v1273_v32, %v1274_v50  ;;  %v1283_v11 = vrot.slane %v1282_v41, 2  ;;  %v1291_v43 = vmax.f32 %v1289_v27, %v1290_v51 }
 0x144   :  { %6964 = vst [vmem:[#allocation46_spill] sm:$0xff] %v4658_v57  ;;  %v1299_v53 = vrot.slane %v1298_v34, 4  ;;  %v1307_v6 = vmax.f32 %v1305_v38, %v1306_v61  ;;  %v6966_v29 = vunpack.c.l.bf16 %v6965_v59  ;;  %v4663_v37 = vmax.f32 %v1266_v3, %v1267_v44  ;;  %v6972_v61 = vld [vmem:[#allocation91_spill] sm:$0xff] }
 0x145   :  { %v1276_v62 = vrot.slane %v1275_v25, 1  ;;  %v1284_v45 = vmax.f32 %v1282_v41, %v1283_v11  ;;  %v6969_v35 = vunpack.c.l.bf16 %v6968_v36  ;;  %v1292_v33 = vrot.slane %v1291_v43, 2 }
 0x146   :  { %v1314_v22 = vsel %vm520_vm0, %v6966_v29, -inf  ;;  %6967 = vst [vmem:[#allocation47_spill] sm:$0xff] %v4663_v37  ;;  %v1300_v46 = vmax.f32 %v1298_v34, %v1299_v53  ;;  %v1308_v57 = vrot.slane %v1307_v6, 4  ;;  %v6971_v51 = vunpack.c.h.bf16 %v6965_v59  ;;  %v6975_v34 = vld [vmem:[#allocation92_spill] sm:$0xff] }
 0x147   :  { %v1315_v9 = vsel %vm522_vm1, %v6969_v35, -inf  ;;  %v4668_v50 = vmax.f32 %v1275_v25, %v1276_v62  ;;  %v1285_v27 = vrot.slane %v1284_v45, 1  ;;  %v6973_v3 = vunpack.c.l.bf16 %v6972_v61  ;;  %v6977_v62 = vld [vmem:[#allocation93_spill] sm:$0xff] }
 0x148   :  { %v1316_v32 = vmax.f32 %v1314_v22, %v1315_v9  ;;  %v1323_v38 = vsel %vm520_vm0, %v6971_v51, -inf  ;;  %v1293_v41 = vmax.f32 %v1291_v43, %v1292_v33  ;;  %v1301_v11 = vrot.slane %v1300_v46, 2 }
 0x149   :  { %6970 = vst [vmem:[#allocation48_spill] sm:$0xff] %v4668_v50  ;;  %v1324_v44 = vsel %vm522_vm1, %v6973_v3, -inf  ;;  %v1309_v29 = vmax.f32 %v1307_v6, %v1308_v57  ;;  %v4676_v35 = vmax.f32 %v1284_v45, %v1285_v27  ;;  %v6976_v22 = vunpack.c.l.bf16 %v6975_v34  ;;  %v6980_v45 = vld [vmem:[#allocation94_spill] sm:$0xff] }
 0x14a   :  { %v1317_v36 = vrot.slane %v1316_v32, 4  ;;  %v1325_v53 = vmax.f32 %v1323_v38, %v1324_v44  ;;  %v6978_v9 = vunpack.c.l.bf16 %v6977_v62  ;;  %v1294_v51 = vrot.slane %v1293_v41, 1 }
 0x14b   :  { %6974 = vst [vmem:[#allocation49_spill] sm:$0xff] %v4676_v35  ;;  %v1332_v25 = vsel %vm520_vm0, %v6976_v22, -inf  ;;  %v1302_v50 = vmax.f32 %v1300_v46, %v1301_v11  ;;  %v1310_v61 = vrot.slane %v1309_v29, 2  ;;  %v6979_v57 = vunpack.c.h.bf16 %v6975_v34  ;;  %v6983_v11 = vld [vmem:[#allocation95_spill] sm:$0xff] }
 0x14c   :  { %v1333_v59 = vsel %vm522_vm1, %v6978_v9, -inf  ;;  %v1318_v37 = vmax.f32 %v1316_v32, %v1317_v36  ;;  %v1326_v3 = vrot.slane %v1325_v53, 4  ;;  %v6981_v33 = vunpack.c.l.bf16 %v6980_v45 }
 0x14d   :  { %v1334_v43 = vmax.f32 %v1332_v25, %v1333_v59  ;;  %v1341_v6 = vsel %vm520_vm0, %v6979_v57, -inf  ;;  %v4690_v38 = vmax.f32 %v1293_v41, %v1294_v51  ;;  %v1303_v44 = vrot.slane %v1302_v50, 1  ;;  %v6986_v57 = vld [vmem:[#allocation96_spill] sm:$0xff] }
 0x14e   :  { %v1342_v27 = vsel %vm522_vm1, %v6981_v33, -inf  ;;  %v1311_v22 = vmax.f32 %v1309_v29, %v1310_v61  ;;  %v1319_v62 = vrot.slane %v1318_v37, 2  ;;  %v1327_v9 = vmax.f32 %v1325_v53, %v1326_v3 }
 0x14f   :  { %6982 = vst [vmem:[#allocation50_spill] sm:$0xff] %v4690_v38  ;;  %v1335_v35 = vrot.slane %v1334_v43, 4  ;;  %v1343_v46 = vmax.f32 %v1341_v6, %v1342_v27  ;;  %v6984_v32 = vunpack.c.l.bf16 %v6983_v11  ;;  %v4695_v25 = vmax.f32 %v1302_v50, %v1303_v44  ;;  %v6990_v27 = vld [vmem:[#allocation97_spill] sm:$0xff] }
 0x150   :  { %v1312_v34 = vrot.slane %v1311_v22, 1  ;;  %v1320_v59 = vmax.f32 %v1318_v37, %v1319_v62  ;;  %v6987_v45 = vunpack.c.l.bf16 %v6986_v57  ;;  %v1328_v41 = vrot.slane %v1327_v9, 2 }
 0x151   :  { %v1350_v36 = vsel %vm520_vm0, %v6984_v32, -inf  ;;  %6985 = vst [vmem:[#allocation51_spill] sm:$0xff] %v4695_v25  ;;  %v1336_v51 = vmax.f32 %v1334_v43, %v1335_v35  ;;  %v1344_v38 = vrot.slane %v1343_v46, 4  ;;  %v6989_v3 = vunpack.c.h.bf16 %v6983_v11  ;;  %v6993_v43 = vld [vmem:[#allocation98_spill] sm:$0xff] }
 0x152   :  { %v1351_v33 = vsel %vm522_vm1, %v6987_v45, -inf  ;;  %v4700_v61 = vmax.f32 %v1311_v22, %v1312_v34  ;;  %v1321_v53 = vrot.slane %v1320_v59, 1  ;;  %v6991_v50 = vunpack.c.l.bf16 %v6990_v27  ;;  %v6995_v34 = vld [vmem:[#allocation99_spill] sm:$0xff] }
 0x153   :  { %v1352_v29 = vmax.f32 %v1350_v36, %v1351_v33  ;;  %v1359_v6 = vsel %vm520_vm0, %v6989_v3, -inf  ;;  %v1329_v37 = vmax.f32 %v1327_v9, %v1328_v41  ;;  %v1337_v62 = vrot.slane %v1336_v51, 2 }
 0x154   :  { %6988 = vst [vmem:[#allocation52_spill] sm:$0xff] %v4700_v61  ;;  %v1360_v44 = vsel %vm522_vm1, %v6991_v50, -inf  ;;  %v1345_v32 = vmax.f32 %v1343_v46, %v1344_v38  ;;  %v4708_v45 = vmax.f32 %v1320_v59, %v1321_v53  ;;  %v6994_v36 = vunpack.c.l.bf16 %v6993_v43  ;;  %v6998_v59 = vld [vmem:[#allocation100_spill] sm:$0xff] }
 0x155   :  { %v1353_v57 = vrot.slane %v1352_v29, 4  ;;  %v1361_v35 = vmax.f32 %v1359_v6, %v1360_v44  ;;  %v6996_v33 = vunpack.c.l.bf16 %v6995_v34  ;;  %v1330_v3 = vrot.slane %v1329_v37, 1 }
 0x156   :  { %6992 = vst [vmem:[#allocation53_spill] sm:$0xff] %v4708_v45  ;;  %v1368_v22 = vsel %vm520_vm0, %v6994_v36, -inf  ;;  %v1338_v61 = vmax.f32 %v1336_v51, %v1337_v62  ;;  %v1346_v27 = vrot.slane %v1345_v32, 2  ;;  %v6997_v38 = vunpack.c.h.bf16 %v6993_v43  ;;  %v7001_v62 = vld [vmem:[#allocation101_spill] sm:$0xff] }
 0x157   :  { %v1369_v11 = vsel %vm522_vm1, %v6996_v33, -inf  ;;  %v1354_v25 = vmax.f32 %v1352_v29, %v1353_v57  ;;  %v1362_v50 = vrot.slane %v1361_v35, 4  ;;  %v6999_v41 = vunpack.c.l.bf16 %v6998_v59 }
 0x158   :  { %v1370_v9 = vmax.f32 %v1368_v22, %v1369_v11  ;;  %v1377_v46 = vsel %vm520_vm0, %v6997_v38, -inf  ;;  %v4722_v6 = vmax.f32 %v1329_v37, %v1330_v3  ;;  %v1339_v44 = vrot.slane %v1338_v61, 1  ;;  %v7004_v38 = vld [vmem:[#allocation102_spill] sm:$0xff] }
 0x159   :  { %v1378_v53 = vsel %vm522_vm1, %v6999_v41, -inf  ;;  %v1347_v36 = vmax.f32 %v1345_v32, %v1346_v27  ;;  %v1355_v34 = vrot.slane %v1354_v25, 2  ;;  %v1363_v33 = vmax.f32 %v1361_v35, %v1362_v50 }
 0x15a   :  { %7000 = vst [vmem:[#allocation54_spill] sm:$0xff] %v4722_v6  ;;  %v1371_v45 = vrot.slane %v1370_v9, 4  ;;  %v1379_v51 = vmax.f32 %v1377_v46, %v1378_v53  ;;  %v7002_v29 = vunpack.c.l.bf16 %v7001_v62  ;;  %v4727_v22 = vmax.f32 %v1338_v61, %v1339_v44  ;;  %v7008_v53 = vld [vmem:[#allocation103_spill] sm:$0xff] }
 0x15b   :  { %v1348_v43 = vrot.slane %v1347_v36, 1  ;;  %v1356_v11 = vmax.f32 %v1354_v25, %v1355_v34  ;;  %v7005_v59 = vunpack.c.l.bf16 %v7004_v38  ;;  %v1364_v37 = vrot.slane %v1363_v33, 2 }
 0x15c   :  { %v1386_v57 = vsel %vm520_vm0, %v7002_v29, -inf  ;;  %7003 = vst [vmem:[#allocation55_spill] sm:$0xff] %v4727_v22  ;;  %v1372_v3 = vmax.f32 %v1370_v9, %v1371_v45  ;;  %v1380_v6 = vrot.slane %v1379_v51, 4  ;;  %v7007_v50 = vunpack.c.h.bf16 %v7001_v62  ;;  %v7011_v9 = vld [vmem:[#allocation104_spill] sm:$0xff] }
 0x15d   :  { %v1387_v41 = vsel %vm522_vm1, %v7005_v59, -inf  ;;  %v4732_v27 = vmax.f32 %v1347_v36, %v1348_v43  ;;  %v1357_v35 = vrot.slane %v1356_v11, 1  ;;  %v7009_v61 = vunpack.c.l.bf16 %v7008_v53  ;;  %v7013_v43 = vld [vmem:[#allocation105_spill] sm:$0xff] }
 0x15e   :  { %v1388_v32 = vmax.f32 %v1386_v57, %v1387_v41  ;;  %v1395_v46 = vsel %vm520_vm0, %v7007_v50, -inf  ;;  %v1365_v25 = vmax.f32 %v1363_v33, %v1364_v37  ;;  %v1373_v34 = vrot.slane %v1372_v3, 2 }
 0x15f   :  { %7006 = vst [vmem:[#allocation56_spill] sm:$0xff] %v4732_v27  ;;  %v1396_v44 = vsel %vm522_vm1, %v7009_v61, -inf  ;;  %v1381_v29 = vmax.f32 %v1379_v51, %v1380_v6  ;;  %v4740_v59 = vmax.f32 %v1356_v11, %v1357_v35  ;;  %v7012_v57 = vunpack.c.l.bf16 %v7011_v9  ;;  %v7016_v11 = vld [vmem:[#allocation106_spill] sm:$0xff] }
 0x160   :  { %v1389_v38 = vrot.slane %v1388_v32, 4  ;;  %v1397_v45 = vmax.f32 %v1395_v46, %v1396_v44  ;;  %v7014_v41 = vunpack.c.l.bf16 %v7013_v43  ;;  %v1366_v50 = vrot.slane %v1365_v25, 1 }
 0x161   :  { %7010 = vst [vmem:[#allocation57_spill] sm:$0xff] %v4740_v59  ;;  %v1404_v36 = vsel %vm520_vm0, %v7012_v57, -inf  ;;  %v1374_v27 = vmax.f32 %v1372_v3, %v1373_v34  ;;  %v1382_v53 = vrot.slane %v1381_v29, 2  ;;  %v7015_v6 = vunpack.c.h.bf16 %v7011_v9  ;;  %v7019_v34 = vld [vmem:[#allocation107_spill] sm:$0xff] }
 0x162   :  { %v1405_v62 = vsel %vm522_vm1, %v7014_v41, -inf  ;;  %v1390_v22 = vmax.f32 %v1388_v32, %v1389_v38  ;;  %v1398_v61 = vrot.slane %v1397_v45, 4  ;;  %v7017_v37 = vunpack.c.l.bf16 %v7016_v11 }
 0x163   :  { %v1406_v33 = vmax.f32 %v1404_v36, %v1405_v62  ;;  %v1413_v51 = vsel %vm520_vm0, %v7015_v6, -inf  ;;  %v4754_v46 = vmax.f32 %v1365_v25, %v1366_v50  ;;  %v1375_v44 = vrot.slane %v1374_v27, 1  ;;  %v7022_v6 = vld [vmem:[#allocation108_spill] sm:$0xff] }
 0x164   :  { %v1414_v35 = vsel %vm522_vm1, %v7017_v37, -inf  ;;  %v1383_v57 = vmax.f32 %v1381_v29, %v1382_v53  ;;  %v1391_v43 = vrot.slane %v1390_v22, 2  ;;  %v1399_v41 = vmax.f32 %v1397_v45, %v1398_v61 }
 0x165   :  { %7018 = vst [vmem:[#allocation58_spill] sm:$0xff] %v4754_v46  ;;  %v1407_v59 = vrot.slane %v1406_v33, 4  ;;  %v1415_v3 = vmax.f32 %v1413_v51, %v1414_v35  ;;  %v7020_v32 = vunpack.c.l.bf16 %v7019_v34  ;;  %v4759_v36 = vmax.f32 %v1374_v27, %v1375_v44  ;;  %v7026_v35 = vld [vmem:[#allocation109_spill] sm:$0xff] }
 0x166   :  { %v1384_v9 = vrot.slane %v1383_v57, 1  ;;  %v1392_v62 = vmax.f32 %v1390_v22, %v1391_v43  ;;  %v7023_v11 = vunpack.c.l.bf16 %v7022_v6  ;;  %v1400_v25 = vrot.slane %v1399_v41, 2 }
 0x167   :  { %v1422_v38 = vsel %vm520_vm0, %v7020_v32, -inf  ;;  %7021 = vst [vmem:[#allocation59_spill] sm:$0xff] %v4759_v36  ;;  %v1408_v50 = vmax.f32 %v1406_v33, %v1407_v59  ;;  %v1416_v46 = vrot.slane %v1415_v3, 4  ;;  %v7025_v61 = vunpack.c.h.bf16 %v7019_v34  ;;  %v7029_v33 = vld [vmem:[#allocation110_spill] sm:$0xff] }
 0x168   :  { %v1423_v37 = vsel %vm522_vm1, %v7023_v11, -inf  ;;  %v4764_v53 = vmax.f32 %v1383_v57, %v1384_v9  ;;  %v1393_v45 = vrot.slane %v1392_v62, 1  ;;  %v7027_v27 = vunpack.c.l.bf16 %v7026_v35  ;;  %v7031_v9 = vld [vmem:[#allocation111_spill] sm:$0xff] }
 0x169   :  { %v1424_v29 = vmax.f32 %v1422_v38, %v1423_v37  ;;  %v1431_v51 = vsel %vm520_vm0, %v7025_v61, -inf  ;;  %v1401_v22 = vmax.f32 %v1399_v41, %v1400_v25  ;;  %v1409_v43 = vrot.slane %v1408_v50, 2 }
 0x16a   :  { %7024 = vst [vmem:[#allocation60_spill] sm:$0xff] %v4764_v53  ;;  %v1432_v44 = vsel %vm522_vm1, %v7027_v27, -inf  ;;  %v1417_v32 = vmax.f32 %v1415_v3, %v1416_v46  ;;  %v4772_v11 = vmax.f32 %v1392_v62, %v1393_v45  ;;  %v7030_v38 = vunpack.c.l.bf16 %v7029_v33  ;;  %v7034_v62 = vld [vmem:[#allocation112_spill] sm:$0xff] }
 0x16b   :  { %v1425_v6 = vrot.slane %v1424_v29, 4  ;;  %v1433_v59 = vmax.f32 %v1431_v51, %v1432_v44  ;;  %v7032_v37 = vunpack.c.l.bf16 %v7031_v9  ;;  %v1402_v61 = vrot.slane %v1401_v22, 1 }
 0x16c   :  { %7028 = vst [vmem:[#allocation61_spill] sm:$0xff] %v4772_v11  ;;  %v1440_v57 = vsel %vm520_vm0, %v7030_v38, -inf  ;;  %v1410_v53 = vmax.f32 %v1408_v50, %v1409_v43  ;;  %v1418_v35 = vrot.slane %v1417_v32, 2  ;;  %v7033_v46 = vunpack.c.h.bf16 %v7029_v33  ;;  %v7037_v43 = vld [vmem:[#allocation113_spill] sm:$0xff] }
 0x16d   :  { %v1441_v34 = vsel %vm522_vm1, %v7032_v37, -inf  ;;  %v1426_v36 = vmax.f32 %v1424_v29, %v1425_v6  ;;  %v1434_v27 = vrot.slane %v1433_v59, 4  ;;  %v7035_v25 = vunpack.c.l.bf16 %v7034_v62 }
 0x16e   :  { %v1442_v41 = vmax.f32 %v1440_v57, %v1441_v34  ;;  %v1449_v3 = vsel %vm520_vm0, %v7033_v46, -inf  ;;  %v4786_v51 = vmax.f32 %v1401_v22, %v1402_v61  ;;  %v1411_v44 = vrot.slane %v1410_v53, 1  ;;  %v7040_v46 = vld [vmem:[#allocation114_spill] sm:$0xff] }
 0x16f   :  { %v1450_v45 = vsel %vm522_vm1, %v7035_v25, -inf  ;;  %v1419_v38 = vmax.f32 %v1417_v32, %v1418_v35  ;;  %v1427_v9 = vrot.slane %v1426_v36, 2  ;;  %v1435_v37 = vmax.f32 %v1433_v59, %v1434_v27 }
 0x170   :  { %7036 = vst [vmem:[#allocation62_spill] sm:$0xff] %v4786_v51  ;;  %v1443_v11 = vrot.slane %v1442_v41, 4  ;;  %v1451_v50 = vmax.f32 %v1449_v3, %v1450_v45  ;;  %v7038_v29 = vunpack.c.l.bf16 %v7037_v43  ;;  %v4791_v57 = vmax.f32 %v1410_v53, %v1411_v44  ;;  %v7044_v45 = vld [vmem:[#allocation115_spill] sm:$0xff] }
 0x171   :  { %v1420_v33 = vrot.slane %v1419_v38, 1  ;;  %v1428_v34 = vmax.f32 %v1426_v36, %v1427_v9  ;;  %v7041_v62 = vunpack.c.l.bf16 %v7040_v46  ;;  %v1436_v22 = vrot.slane %v1435_v37, 2 }
 0x172   :  { %v1458_v6 = vsel %vm520_vm0, %v7038_v29, -inf  ;;  %7039 = vst [vmem:[#allocation63_spill] sm:$0xff] %v4791_v57  ;;  %v1444_v61 = vmax.f32 %v1442_v41, %v1443_v11  ;;  %v1452_v51 = vrot.slane %v1451_v50, 4  ;;  %v7043_v27 = vunpack.c.h.bf16 %v7037_v43  ;;  %v7047_v41 = vld [vmem:[#allocation116_spill] sm:$0xff] }
 0x173   :  { %v1459_v25 = vsel %vm522_vm1, %v7041_v62, -inf  ;;  %v4796_v35 = vmax.f32 %v1419_v38, %v1420_v33  ;;  %v1429_v59 = vrot.slane %v1428_v34, 1  ;;  %v7045_v53 = vunpack.c.l.bf16 %v7044_v45  ;;  %v7049_v33 = vld [vmem:[#allocation117_spill] sm:$0xff] }
 0x174   :  { %v1460_v32 = vmax.f32 %v1458_v6, %v1459_v25  ;;  %v1467_v3 = vsel %vm520_vm0, %v7043_v27, -inf  ;;  %v1437_v36 = vmax.f32 %v1435_v37, %v1436_v22  ;;  %v1445_v9 = vrot.slane %v1444_v61, 2 }
 0x175   :  { %7042 = vst [vmem:[#allocation64_spill] sm:$0xff] %v4796_v35  ;;  %v1468_v44 = vsel %vm522_vm1, %v7045_v53, -inf  ;;  %v1453_v29 = vmax.f32 %v1451_v50, %v1452_v51  ;;  %v4804_v62 = vmax.f32 %v1428_v34, %v1429_v59  ;;  %v7048_v6 = vunpack.c.l.bf16 %v7047_v41  ;;  %v7052_v34 = vld [vmem:[#allocation118_spill] sm:$0xff] }
 0x176   :  { %v1461_v46 = vrot.slane %v1460_v32, 4  ;;  %v1469_v11 = vmax.f32 %v1467_v3, %v1468_v44  ;;  %v7050_v25 = vunpack.c.l.bf16 %v7049_v33  ;;  %v1438_v27 = vrot.slane %v1437_v36, 1 }
 0x177   :  { %7046 = vst [vmem:[#allocation65_spill] sm:$0xff] %v4804_v62  ;;  %v1476_v38 = vsel %vm520_vm0, %v7048_v6, -inf  ;;  %v1446_v35 = vmax.f32 %v1444_v61, %v1445_v9  ;;  %v1454_v45 = vrot.slane %v1453_v29, 2  ;;  %v7051_v51 = vunpack.c.h.bf16 %v7047_v41  ;;  %v7055_v9 = vld [vmem:[#allocation119_spill] sm:$0xff] }
 0x178   :  { %v1477_v43 = vsel %vm522_vm1, %v7050_v25, -inf  ;;  %v1462_v57 = vmax.f32 %v1460_v32, %v1461_v46  ;;  %v1470_v53 = vrot.slane %v1469_v11, 4  ;;  %v7053_v22 = vunpack.c.l.bf16 %v7052_v34 }
 0x179   :  { %v1478_v37 = vmax.f32 %v1476_v38, %v1477_v43  ;;  %v1485_v50 = vsel %vm520_vm0, %v7051_v51, -inf  ;;  %v4818_v3 = vmax.f32 %v1437_v36, %v1438_v27  ;;  %v1447_v44 = vrot.slane %v1446_v35, 1  ;;  %v7058_v51 = vld [vmem:[#allocation120_spill] sm:$0xff] }
 0x17a   :  { %v1486_v59 = vsel %vm522_vm1, %v7053_v22, -inf  ;;  %v1455_v6 = vmax.f32 %v1453_v29, %v1454_v45  ;;  %v1463_v33 = vrot.slane %v1462_v57, 2  ;;  %v1471_v25 = vmax.f32 %v1469_v11, %v1470_v53 }
 0x17b   :  { %7054 = vst [vmem:[#allocation66_spill] sm:$0xff] %v4818_v3  ;;  %v1479_v62 = vrot.slane %v1478_v37, 4  ;;  %v1487_v61 = vmax.f32 %v1485_v50, %v1486_v59  ;;  %v7056_v32 = vunpack.c.l.bf16 %v7055_v9  ;;  %v4823_v38 = vmax.f32 %v1446_v35, %v1447_v44  ;;  %v7062_v59 = vld [vmem:[#allocation121_spill] sm:$0xff] }
 0x17c   :  { %v1456_v41 = vrot.slane %v1455_v6, 1  ;;  %v1464_v43 = vmax.f32 %v1462_v57, %v1463_v33  ;;  %v7059_v34 = vunpack.c.l.bf16 %v7058_v51  ;;  %v1472_v36 = vrot.slane %v1471_v25, 2 }
 0x17d   :  { %v1494_v46 = vsel %vm520_vm0, %v7056_v32, -inf  ;;  %7057 = vst [vmem:[#allocation67_spill] sm:$0xff] %v4823_v38  ;;  %v1480_v27 = vmax.f32 %v1478_v37, %v1479_v62  ;;  %v1488_v3 = vrot.slane %v1487_v61, 4  ;;  %v7061_v53 = vunpack.c.h.bf16 %v7055_v9  ;;  %v7065_v37 = vld [vmem:[#allocation122_spill] sm:$0xff] }
 0x17e   :  { %v1495_v22 = vsel %vm522_vm1, %v7059_v34, -inf  ;;  %v4828_v45 = vmax.f32 %v1455_v6, %v1456_v41  ;;  %v1465_v11 = vrot.slane %v1464_v43, 1  ;;  %v7063_v35 = vunpack.c.l.bf16 %v7062_v59  ;;  %v7067_v41 = vld [vmem:[#allocation123_spill] sm:$0xff] }
 0x17f   :  { %v1496_v29 = vmax.f32 %v1494_v46, %v1495_v22  ;;  %v1503_v50 = vsel %vm520_vm0, %v7061_v53, -inf  ;;  %v1473_v57 = vmax.f32 %v1471_v25, %v1472_v36  ;;  %v1481_v33 = vrot.slane %v1480_v27, 2 }
 0x180   :  { %7060 = vst [vmem:[#allocation68_spill] sm:$0xff] %v4828_v45  ;;  %v1504_v44 = vsel %vm522_vm1, %v7063_v35, -inf  ;;  %v1489_v32 = vmax.f32 %v1487_v61, %v1488_v3  ;;  %v4836_v34 = vmax.f32 %v1464_v43, %v1465_v11  ;;  %v7066_v46 = vunpack.c.l.bf16 %v7065_v37  ;;  %v7070_v43 = vld [vmem:[#allocation124_spill] sm:$0xff] }
 0x181   :  { %v1497_v51 = vrot.slane %v1496_v29, 4  ;;  %v1505_v62 = vmax.f32 %v1503_v50, %v1504_v44  ;;  %v7068_v22 = vunpack.c.l.bf16 %v7067_v41  ;;  %v1474_v53 = vrot.slane %v1473_v57, 1 }
 0x182   :  { %7064 = vst [vmem:[#allocation69_spill] sm:$0xff] %v4836_v34  ;;  %v1512_v6 = vsel %vm520_vm0, %v7066_v46, -inf  ;;  %v1482_v45 = vmax.f32 %v1480_v27, %v1481_v33  ;;  %v1490_v59 = vrot.slane %v1489_v32, 2  ;;  %v7069_v3 = vunpack.c.h.bf16 %v7065_v37  ;;  %v7073_v33 = vld [vmem:[#allocation125_spill] sm:$0xff] }
 0x183   :  { %v1513_v9 = vsel %vm522_vm1, %v7068_v22, -inf  ;;  %v1498_v38 = vmax.f32 %v1496_v29, %v1497_v51  ;;  %v1506_v35 = vrot.slane %v1505_v62, 4  ;;  %v7071_v36 = vunpack.c.l.bf16 %v7070_v43 }
 0x184   :  { %v1514_v25 = vmax.f32 %v1512_v6, %v1513_v9  ;;  %v1521_v61 = vsel %vm520_vm0, %v7069_v3, -inf  ;;  %v4850_v50 = vmax.f32 %v1473_v57, %v1474_v53  ;;  %v1483_v44 = vrot.slane %v1482_v45, 1  ;;  %v7076_v3 = vld [vmem:[#allocation126_spill] sm:$0xff] }
 0x185   :  { %v1522_v11 = vsel %vm522_vm1, %v7071_v36, -inf  ;;  %v1491_v46 = vmax.f32 %v1489_v32, %v1490_v59  ;;  %v1499_v41 = vrot.slane %v1498_v38, 2  ;;  %v1507_v22 = vmax.f32 %v1505_v62, %v1506_v35 }
 0x186   :  { %7072 = vst [vmem:[#allocation70_spill] sm:$0xff] %v4850_v50  ;;  %v1515_v34 = vrot.slane %v1514_v25, 4  ;;  %v1523_v27 = vmax.f32 %v1521_v61, %v1522_v11  ;;  %v7074_v29 = vunpack.c.l.bf16 %v7073_v33  ;;  %v4855_v6 = vmax.f32 %v1482_v45, %v1483_v44  ;;  %v7080_v11 = vld [vmem:[#allocation127_spill] sm:$0xff] }
 0x187   :  { %v1492_v37 = vrot.slane %v1491_v46, 1  ;;  %v1500_v9 = vmax.f32 %v1498_v38, %v1499_v41  ;;  %v7077_v43 = vunpack.c.l.bf16 %v7076_v3  ;;  %v1508_v57 = vrot.slane %v1507_v22, 2 }
 0x188   :  { %v1530_v51 = vsel %vm520_vm0, %v7074_v29, -inf  ;;  %7075 = vst [vmem:[#allocation71_spill] sm:$0xff] %v4855_v6  ;;  %v1516_v53 = vmax.f32 %v1514_v25, %v1515_v34  ;;  %v1524_v50 = vrot.slane %v1523_v27, 4  ;;  %v7079_v35 = vunpack.c.h.bf16 %v7073_v33  ;;  %v7083_v25 = vld [vmem:[#allocation128_spill] sm:$0xff] }
 0x189   :  { %v1531_v36 = vsel %vm522_vm1, %v7077_v43, -inf  ;;  %v4860_v59 = vmax.f32 %v1491_v46, %v1492_v37  ;;  %v1501_v62 = vrot.slane %v1500_v9, 1  ;;  %v7081_v45 = vunpack.c.l.bf16 %v7080_v11  ;;  %v7085_v37 = vld [vmem:[#allocation129_spill] sm:$0xff] }
 0x18a   :  { %v1532_v32 = vmax.f32 %v1530_v51, %v1531_v36  ;;  %v1539_v61 = vsel %vm520_vm0, %v7079_v35, -inf  ;;  %v1509_v38 = vmax.f32 %v1507_v22, %v1508_v57  ;;  %v1517_v41 = vrot.slane %v1516_v53, 2 }
 0x18b   :  { %7078 = vst [vmem:[#allocation72_spill] sm:$0xff] %v4860_v59  ;;  %v1540_v44 = vsel %vm522_vm1, %v7081_v45, -inf  ;;  %v1525_v29 = vmax.f32 %v1523_v27, %v1524_v50  ;;  %v4868_v43 = vmax.f32 %v1500_v9, %v1501_v62  ;;  %v7084_v51 = vunpack.c.l.bf16 %v7083_v25  ;;  %v7088_v9 = vld [vmem:[#allocation130_spill] sm:$0xff] }
 0x18c   :  { %v1533_v3 = vrot.slane %v1532_v32, 4  ;;  %v1541_v34 = vmax.f32 %v1539_v61, %v1540_v44  ;;  %v7086_v36 = vunpack.c.l.bf16 %v7085_v37  ;;  %v1510_v35 = vrot.slane %v1509_v38, 1 }
 0x18d   :  { %7082 = vst [vmem:[#allocation73_spill] sm:$0xff] %v4868_v43  ;;  %v1548_v46 = vsel %vm520_vm0, %v7084_v51, -inf  ;;  %v1518_v59 = vmax.f32 %v1516_v53, %v1517_v41  ;;  %v1526_v11 = vrot.slane %v1525_v29, 2  ;;  %v7087_v50 = vunpack.c.h.bf16 %v7083_v25  ;;  %v7091_v41 = vld [vmem:[#allocation131_spill] sm:$0xff] }
 0x18e   :  { %v1549_v33 = vsel %vm522_vm1, %v7086_v36, -inf  ;;  %v1534_v6 = vmax.f32 %v1532_v32, %v1533_v3  ;;  %v1542_v45 = vrot.slane %v1541_v34, 4  ;;  %v7089_v57 = vunpack.c.l.bf16 %v7088_v9 }
 0x18f   :  { %v1550_v22 = vmax.f32 %v1548_v46, %v1549_v33  ;;  %v1557_v27 = vsel %vm520_vm0, %v7087_v50, -inf  ;;  %v4882_v61 = vmax.f32 %v1509_v38, %v1510_v35  ;;  %v1519_v44 = vrot.slane %v1518_v59, 1  ;;  %v7094_v50 = vld [vmem:[#allocation132_spill] sm:$0xff] }
 0x190   :  { %v1558_v62 = vsel %vm522_vm1, %v7089_v57, -inf  ;;  %v1527_v51 = vmax.f32 %v1525_v29, %v1526_v11  ;;  %v1535_v37 = vrot.slane %v1534_v6, 2  ;;  %v1543_v36 = vmax.f32 %v1541_v34, %v1542_v45 }
 0x191   :  { %7090 = vst [vmem:[#allocation74_spill] sm:$0xff] %v4882_v61  ;;  %v1551_v43 = vrot.slane %v1550_v22, 4  ;;  %v1559_v53 = vmax.f32 %v1557_v27, %v1558_v62  ;;  %v7092_v32 = vunpack.c.l.bf16 %v7091_v41  ;;  %v4887_v46 = vmax.f32 %v1518_v59, %v1519_v44  ;;  %v7098_v62 = vld [vmem:[#allocation133_spill] sm:$0xff] }
 0x192   :  { %v1528_v25 = vrot.slane %v1527_v51, 1  ;;  %v1536_v33 = vmax.f32 %v1534_v6, %v1535_v37  ;;  %v7095_v9 = vunpack.c.l.bf16 %v7094_v50  ;;  %v1544_v38 = vrot.slane %v1543_v36, 2 }
 0x193   :  { %v1566_v3 = vsel %vm520_vm0, %v7092_v32, -inf  ;;  %7093 = vst [vmem:[#allocation75_spill] sm:$0xff] %v4887_v46  ;;  %v1552_v35 = vmax.f32 %v1550_v22, %v1551_v43  ;;  %v1560_v61 = vrot.slane %v1559_v53, 4  ;;  %v7097_v45 = vunpack.c.h.bf16 %v7091_v41  ;;  %v7101_v22 = vld [vmem:[#allocation134_spill] sm:$0xff] }
 0x194   :  { %v1567_v57 = vsel %vm522_vm1, %v7095_v9, -inf  ;;  %v4892_v11 = vmax.f32 %v1527_v51, %v1528_v25  ;;  %v1537_v34 = vrot.slane %v1536_v33, 1  ;;  %v7099_v59 = vunpack.c.l.bf16 %v7098_v62  ;;  %v7103_v25 = vld [vmem:[#allocation135_spill] sm:$0xff] }
 0x195   :  { %v1568_v29 = vmax.f32 %v1566_v3, %v1567_v57  ;;  %v1575_v27 = vsel %vm520_vm0, %v7097_v45, -inf  ;;  %v1545_v6 = vmax.f32 %v1543_v36, %v1544_v38  ;;  %v1553_v37 = vrot.slane %v1552_v35, 2 }
 0x196   :  { %7096 = vst [vmem:[#allocation76_spill] sm:$0xff] %v4892_v11  ;;  %v1576_v44 = vsel %vm522_vm1, %v7099_v59, -inf  ;;  %v1561_v32 = vmax.f32 %v1559_v53, %v1560_v61  ;;  %v4900_v9 = vmax.f32 %v1536_v33, %v1537_v34  ;;  %v7102_v3 = vunpack.c.l.bf16 %v7101_v22  ;;  %v7106_v33 = vld [vmem:[#allocation136_spill] sm:$0xff] }
 0x197   :  { %v1569_v50 = vrot.slane %v1568_v29, 4  ;;  %v1577_v43 = vmax.f32 %v1575_v27, %v1576_v44  ;;  %v7104_v57 = vunpack.c.l.bf16 %v7103_v25  ;;  %v1546_v45 = vrot.slane %v1545_v6, 1 }
 0x198   :  { %7100 = vst [vmem:[#allocation77_spill] sm:$0xff] %v4900_v9  ;;  %v1584_v51 = vsel %vm520_vm0, %v7102_v3, -inf  ;;  %v1554_v11 = vmax.f32 %v1552_v35, %v1553_v37  ;;  %v1562_v62 = vrot.slane %v1561_v32, 2  ;;  %v7105_v61 = vunpack.c.h.bf16 %v7101_v22  ;;  %v7109_v37 = vld [vmem:[#allocation137_spill] sm:$0xff] }
 0x199   :  { %v1585_v41 = vsel %vm522_vm1, %v7104_v57, -inf  ;;  %v1570_v46 = vmax.f32 %v1568_v29, %v1569_v50  ;;  %v1578_v59 = vrot.slane %v1577_v43, 4  ;;  %v7107_v38 = vunpack.c.l.bf16 %v7106_v33 }
 0x19a   :  { %v1586_v36 = vmax.f32 %v1584_v51, %v1585_v41  ;;  %v1593_v53 = vsel %vm520_vm0, %v7105_v61, -inf  ;;  %v4914_v27 = vmax.f32 %v1545_v6, %v1546_v45  ;;  %v1555_v44 = vrot.slane %v1554_v11, 1  ;;  %v7112_v61 = vld [vmem:[#allocation138_spill] sm:$0xff] }
 0x19b   :  { %v1594_v34 = vsel %vm522_vm1, %v7107_v38, -inf  ;;  %v1563_v3 = vmax.f32 %v1561_v32, %v1562_v62  ;;  %v1571_v25 = vrot.slane %v1570_v46, 2  ;;  %v1579_v57 = vmax.f32 %v1577_v43, %v1578_v59 }
 0x19c   :  { %7108 = vst [vmem:[#allocation78_spill] sm:$0xff] %v4914_v27  ;;  %v1587_v9 = vrot.slane %v1586_v36, 4  ;;  %v1595_v35 = vmax.f32 %v1593_v53, %v1594_v34  ;;  %v7110_v29 = vunpack.c.l.bf16 %v7109_v37  ;;  %v4919_v51 = vmax.f32 %v1554_v11, %v1555_v44  ;;  %v7116_v34 = vld [vmem:[#allocation139_spill] sm:$0xff] }
 0x19d   :  { %v1564_v22 = vrot.slane %v1563_v3, 1  ;;  %v1572_v41 = vmax.f32 %v1570_v46, %v1571_v25  ;;  %v7113_v33 = vunpack.c.l.bf16 %v7112_v61  ;;  %v1580_v6 = vrot.slane %v1579_v57, 2 }
 0x19e   :  { %v1602_v50 = vsel %vm520_vm0, %v7110_v29, -inf  ;;  %7111 = vst [vmem:[#allocation79_spill] sm:$0xff] %v4919_v51  ;;  %v1588_v45 = vmax.f32 %v1586_v36, %v1587_v9  ;;  %v1596_v27 = vrot.slane %v1595_v35, 4  ;;  %v7115_v59 = vunpack.c.h.bf16 %v7109_v37  ;;  %v7119_v36 = vld [vmem:[#allocation140_spill] sm:$0xff] }
 0x19f   :  { %v1603_v38 = vsel %vm522_vm1, %v7113_v33, -inf  ;;  %v4924_v62 = vmax.f32 %v1563_v3, %v1564_v22  ;;  %v1573_v43 = vrot.slane %v1572_v41, 1  ;;  %v7117_v11 = vunpack.c.l.bf16 %v7116_v34  ;;  %v7121_v22 = vld [vmem:[#allocation141_spill] sm:$0xff] }
 0x1a0   :  { %v1604_v32 = vmax.f32 %v1602_v50, %v1603_v38  ;;  %v1611_v53 = vsel %vm520_vm0, %v7115_v59, -inf  ;;  %v1581_v46 = vmax.f32 %v1579_v57, %v1580_v6  ;;  %v1589_v25 = vrot.slane %v1588_v45, 2 }
 0x1a1   :  { %7114 = vst [vmem:[#allocation80_spill] sm:$0xff] %v4924_v62  ;;  %v1612_v44 = vsel %vm522_vm1, %v7117_v11, -inf  ;;  %v1597_v29 = vmax.f32 %v1595_v35, %v1596_v27  ;;  %v4932_v33 = vmax.f32 %v1572_v41, %v1573_v43  ;;  %v7120_v50 = vunpack.c.l.bf16 %v7119_v36  ;;  %v7124_v41 = vld [vmem:[#allocation142_spill] sm:$0xff] }
 0x1a2   :  { %v1605_v61 = vrot.slane %v1604_v32, 4  ;;  %v1613_v9 = vmax.f32 %v1611_v53, %v1612_v44  ;;  %v7122_v38 = vunpack.c.l.bf16 %v7121_v22  ;;  %v1582_v59 = vrot.slane %v1581_v46, 1 }
 0x1a3   :  { %7118 = vst [vmem:[#allocation81_spill] sm:$0xff] %v4932_v33  ;;  %v1620_v3 = vsel %vm520_vm0, %v7120_v50, -inf  ;;  %v1590_v62 = vmax.f32 %v1588_v45, %v1589_v25  ;;  %v1598_v34 = vrot.slane %v1597_v29, 2  ;;  %v7123_v27 = vunpack.c.h.bf16 %v7119_v36  ;;  %v7127_v25 = vld [vmem:[#allocation143_spill] sm:$0xff] }
 0x1a4   :  { %v1621_v37 = vsel %vm522_vm1, %v7122_v38, -inf  ;;  %v1606_v51 = vmax.f32 %v1604_v32, %v1605_v61  ;;  %v1614_v11 = vrot.slane %v1613_v9, 4  ;;  %v7125_v6 = vunpack.c.l.bf16 %v7124_v41 }
 0x1a5   :  { %v1622_v57 = vmax.f32 %v1620_v3, %v1621_v37  ;;  %v1629_v35 = vsel %vm520_vm0, %v7123_v27, -inf  ;;  %v4946_v53 = vmax.f32 %v1581_v46, %v1582_v59  ;;  %v1591_v44 = vrot.slane %v1590_v62, 1  ;;  %v7130_v27 = vld [vmem:[#allocation144_spill] sm:$0xff] }
 0x1a6   :  { %v1630_v43 = vsel %vm522_vm1, %v7125_v6, -inf  ;;  %v1599_v50 = vmax.f32 %v1597_v29, %v1598_v34  ;;  %v1607_v22 = vrot.slane %v1606_v51, 2  ;;  %v1615_v38 = vmax.f32 %v1613_v9, %v1614_v11 }
 0x1a7   :  { %7126 = vst [vmem:[#allocation82_spill] sm:$0xff] %v4946_v53  ;;  %v1623_v33 = vrot.slane %v1622_v57, 4  ;;  %v1631_v45 = vmax.f32 %v1629_v35, %v1630_v43  ;;  %v7128_v32 = vunpack.c.l.bf16 %v7127_v25  ;;  %v4951_v3 = vmax.f32 %v1590_v62, %v1591_v44  ;;  %v7134_v43 = vld [vmem:[#allocation145_spill] sm:$0xff] }
 0x1a8   :  { %v1600_v36 = vrot.slane %v1599_v50, 1  ;;  %v1608_v37 = vmax.f32 %v1606_v51, %v1607_v22  ;;  %v7131_v41 = vunpack.c.l.bf16 %v7130_v27  ;;  %v1616_v46 = vrot.slane %v1615_v38, 2 }
 0x1a9   :  { %v1638_v61 = vsel %vm520_vm0, %v7128_v32, -inf  ;;  %7129 = vst [vmem:[#allocation83_spill] sm:$0xff] %v4951_v3  ;;  %v1624_v59 = vmax.f32 %v1622_v57, %v1623_v33  ;;  %v1632_v53 = vrot.slane %v1631_v45, 4  ;;  %v7133_v11 = vunpack.c.h.bf16 %v7127_v25  ;;  %v7137_v57 = vld [vmem:[#allocation146_spill] sm:$0xff] }
 0x1aa   :  { %v1639_v6 = vsel %vm522_vm1, %v7131_v41, -inf  ;;  %v4956_v34 = vmax.f32 %v1599_v50, %v1600_v36  ;;  %v1609_v9 = vrot.slane %v1608_v37, 1  ;;  %v7135_v62 = vunpack.c.l.bf16 %v7134_v43  ;;  %v7139_v36 = vld [vmem:[#allocation147_spill] sm:$0xff] }
 0x1ab   :  { %v1640_v29 = vmax.f32 %v1638_v61, %v1639_v6  ;;  %v1647_v35 = vsel %vm520_vm0, %v7133_v11, -inf  ;;  %v1617_v51 = vmax.f32 %v1615_v38, %v1616_v46  ;;  %v1625_v22 = vrot.slane %v1624_v59, 2 }
 0x1ac   :  { %7132 = vst [vmem:[#allocation84_spill] sm:$0xff] %v4956_v34  ;;  %v1648_v44 = vsel %vm522_vm1, %v7135_v62, -inf  ;;  %v1633_v32 = vmax.f32 %v1631_v45, %v1632_v53  ;;  %v4964_v41 = vmax.f32 %v1608_v37, %v1609_v9  ;;  %v7138_v61 = vunpack.c.l.bf16 %v7137_v57  ;;  %v7142_v37 = vld [vmem:[#allocation148_spill] sm:$0xff] }
 0x1ad   :  { %v1641_v27 = vrot.slane %v1640_v29, 4  ;;  %v1649_v33 = vmax.f32 %v1647_v35, %v1648_v44  ;;  %v7140_v6 = vunpack.c.l.bf16 %v7139_v36  ;;  %v1618_v11 = vrot.slane %v1617_v51, 1 }
 0x1ae   :  { %7136 = vst [vmem:[#allocation85_spill] sm:$0xff] %v4964_v41  ;;  %v1656_v50 = vsel %vm520_vm0, %v7138_v61, -inf  ;;  %v1626_v34 = vmax.f32 %v1624_v59, %v1625_v22  ;;  %v1634_v43 = vrot.slane %v1633_v32, 2  ;;  %v7141_v53 = vunpack.c.h.bf16 %v7137_v57 }
 0x1af   :  { %v1657_v25 = vsel %vm522_vm1, %v7140_v6, -inf  ;;  %v1642_v3 = vmax.f32 %v1640_v29, %v1641_v27  ;;  %v1650_v62 = vrot.slane %v1649_v33, 4  ;;  %v7143_v46 = vunpack.c.l.bf16 %v7142_v37  ;;  %v7222_v29 = vld [vmem:[#allocation78_spill] sm:$0xff]  ;;  %v7225_v37 = vld [vmem:[#allocation81_spill] sm:$0xff] }
 0x1b0   :  { %v1658_v38 = vmax.f32 %v1656_v50, %v1657_v25  ;;  %v1665_v45 = vsel %vm520_vm0, %v7141_v53, -inf  ;;  %v4978_v35 = vmax.f32 %v1617_v51, %v1618_v11  ;;  %v1627_v44 = vrot.slane %v1626_v34, 1 }
 0x1b1   :  { %v1666_v9 = vsel %vm522_vm1, %v7143_v46, -inf  ;;  %v1635_v61 = vmax.f32 %v1633_v32, %v1634_v43  ;;  %v1643_v36 = vrot.slane %v1642_v3, 2  ;;  %v1651_v6 = vmax.f32 %v1649_v33, %v1650_v62  ;;  %v7223_v46 = vld [vmem:[#allocation79_spill] sm:$0xff] }
 0x1b2   :  { %7144 = vst [vmem:[#allocation86_spill] sm:$0xff] %v4978_v35  ;;  %v1659_v41 = vrot.slane %v1658_v38, 4  ;;  %v1667_v59 = vmax.f32 %v1665_v45, %v1666_v9  ;;  %v4982_v22 = vmax.f32 %v1626_v34, %v1627_v44  ;;  %v7150_v9 = vld [vmem:[#allocation6_spill] sm:$0xff]  ;;  %v7227_v43 = vld [vmem:[#allocation83_spill] sm:$0xff]  ;;  %vm2318_vm4 = vcmask 1043459  }
 0x1b3   :  { %v1636_v27 = vrot.slane %v1635_v61, 1  ;;  %v1644_v57 = vmax.f32 %v1642_v3, %v1643_v36  ;;  %v1652_v25 = vrot.slane %v1651_v6, 2  ;;  %v7226_v34 = vld [vmem:[#allocation82_spill] sm:$0xff]  ;;  %v7228_v32 = vld [vmem:[#allocation84_spill] sm:$0xff]  ;;  %vm2320_vm5 = vcmask 1044484  }
 0x1b4   :  { %v1660_v53 = vmax.f32 %v1658_v38, %v1659_v41  ;;  %v1668_v51 = vrot.slane %v1667_v59, 4  ;;  %v7224_v38 = vld [vmem:[#allocation80_spill] sm:$0xff]  ;;  %vm2322_vm6 = vcmask 1045509   ;;  %vm2324_vm7 = vcmask 1046534  }
 0x1b5   :  { %v4988_v11 = vmax.f32 %v1635_v61, %v1636_v27  ;;  %v1645_v33 = vrot.slane %v1644_v57, 1  ;;  %v1653_v62 = vmax.f32 %v1651_v6, %v1652_v25  ;;  %v7148_v6 = vld [vmem:[#allocation4_spill] sm:$0xff]  ;;  %v7229_v50 = vld [vmem:[#allocation85_spill] sm:$0xff]  ;;  %v7277_v27 = vld [vmem:[#allocation7_spill] sm:$0xff]  ;;  %vm2326_vm8 = vcmask 1047559  }
 0x1b6   :  { %v1661_v3 = vrot.slane %v1660_v53, 2  ;;  %v1669_v45 = vmax.f32 %v1667_v59, %v1668_v51  ;;  %v7233_v59 = vpack.c.bf16 %v4022_v42, %v4022_v42  ;;  %v7237_v42 = vpack.c.bf16 %v4069_v23, %v4069_v23 }
 0x1b7   :  { %v4996_v41 = vmax.f32 %v1644_v57, %v1645_v33  ;;  %v1654_v44 = vrot.slane %v1653_v62, 1  ;;  %v7147_v57 = vld [vmem:[#allocation3_spill] sm:$0xff]  ;;  %v7241_v23 = vpack.c.bf16 %v4092_v0, %v4092_v0  ;;  %v7245_v0 = vpack.c.bf16 %v4127_v28, %v4127_v28 }
 0x1b8   :  { %v1662_v61 = vmax.f32 %v1660_v53, %v1661_v3  ;;  %v1670_v36 = vrot.slane %v1669_v45, 2  ;;  %v7149_v3 = vld [vmem:[#allocation5_spill] sm:$0xff]  ;;  %v7249_v28 = vpack.c.bf16 %v4159_v55, %v4159_v55  ;;  %v7253_v55 = vpack.c.bf16 %v4191_v12, %v4191_v12 }
 0x1b9   :  { %v5014_v51 = vmax.f32 %v1653_v62, %v1654_v44  ;;  %v7232_v44 = vpack.c.bf16 %v4020_v48, %v4020_v48  ;;  %v7236_v48 = vpack.c.bf16 %v4055_v19, %v4055_v19  ;;  %v7240_v19 = vpack.c.bf16 %v4090_v24, %v4090_v24 }
 0x1ba   :  { %v1663_v33 = vrot.slane %v1662_v61, 1  ;;  %v1671_v53 = vmax.f32 %v1669_v45, %v1670_v36  ;;  %v7146_v45 = vld [vmem:[#allocation2_spill] sm:$0xff]  ;;  %v7244_v24 = vpack.c.bf16 %v4113_v21, %v4113_v21  ;;  %v7248_v21 = vpack.c.bf16 %v4151_v16, %v4151_v16 }
 0x1bb   :  { %v5261_v36 = vunpack.c.l.b16 %v7232_v44  ;;  %v5281_v44 = vunpack.c.l.b16 %v7236_v48  ;;  %v5301_v48 = vunpack.c.l.b16 %v7240_v19  ;;  %v7252_v16 = vpack.c.bf16 %v4183_v30, %v4183_v30 }
 0x1bc   :  { %v5026_v25 = vmax.f32 %v1662_v61, %v1663_v33  ;;  %v1672_v62 = vrot.slane %v1671_v53, 1  ;;  %v7230_v61 = vpack.c.bf16 %v4016_v20, %v4016_v20  ;;  %v7234_v20 = vpack.c.bf16 %v4030_v13, %v4030_v13 }
 0x1bd   :  { %v7238_v13 = vpack.c.bf16 %v4077_v31, %v4077_v31  ;;  %v7242_v31 = vpack.c.bf16 %v4094_v40, %v4094_v40  ;;  %v5321_v19 = vunpack.c.l.b16 %v7244_v24  ;;  %v7246_v40 = vpack.c.bf16 %v4141_v8, %v4141_v8 }
 0x1be   :  { %7145 = vst [vmem:[#allocation87_spill] sm:$0xff] %v5026_v25  ;;  %v5040_v33 = vmax.f32 %v1671_v53, %v1672_v62  ;;  %v5251_v35 = vunpack.c.l.b16 %v7230_v61  ;;  %v7231_v62 = vpack.c.bf16 %v4018_v15, %v4018_v15  ;;  %v5266_v25 = vunpack.c.l.b16 %v7233_v59 }
 0x1bf   :  { %v5271_v61 = vunpack.c.l.b16 %v7234_v20  ;;  %v7235_v15 = vpack.c.bf16 %v4032_v1, %v4032_v1  ;;  %v5286_v59 = vunpack.c.l.b16 %v7237_v42  ;;  %v5291_v20 = vunpack.c.l.b16 %v7238_v13 }
 0x1c0   :  { %v5256_v53 = vunpack.c.l.b16 %v7231_v62  ;;  %v7239_v1 = vpack.c.bf16 %v4082_v18, %v4082_v18  ;;  %v5306_v42 = vunpack.c.l.b16 %v7241_v23  ;;  %v5311_v13 = vunpack.c.l.b16 %v7242_v31 }
 0x1c1   :  { %v5276_v62 = vunpack.c.l.b16 %v7235_v15  ;;  %v7243_v18 = vpack.c.bf16 %v4108_v52, %v4108_v52  ;;  %v5326_v23 = vunpack.c.l.b16 %v7245_v0  ;;  %v5331_v31 = vunpack.c.l.b16 %v7246_v40 }
 0x1c2   :  { %v5296_v15 = vunpack.c.l.b16 %v7239_v1  ;;  %v7247_v52 = vpack.c.bf16 %v4146_v47, %v4146_v47  ;;  %v5341_v24 = vunpack.c.l.b16 %v7248_v21  ;;  %v5346_v0 = vunpack.c.l.b16 %v7249_v28 }
 0x1c3   :  { %v5316_v1 = vunpack.c.l.b16 %v7243_v18  ;;  %v7250_v8 = vpack.c.bf16 %v4167_v7, %v4167_v7  ;;  %v7251_v47 = vpack.c.bf16 %v4175_v2, %v4175_v2  ;;  %v5361_v21 = vunpack.c.l.b16 %v7252_v16 }
 0x1c4   :  { %v5336_v18 = vunpack.c.l.b16 %v7247_v52  ;;  %v5366_v28 = vunpack.c.l.b16 %v7253_v55  ;;  %v7254_v7 = vpack.c.bf16 %v4205_v58, %v4205_v58  ;;  %v7255_v2 = vpack.c.bf16 %v4210_v26, %v4210_v26 }
 0x1c5   :  { %v5351_v40 = vunpack.c.l.b16 %v7250_v8  ;;  %v5356_v52 = vunpack.c.l.b16 %v7251_v47  ;;  %v7256_v30 = vpack.c.bf16 %v4215_v5, %v4215_v5  ;;  %v7257_v12 = vpack.c.bf16 %v4226_v39, %v4226_v39 }
 0x1c6   :  { %v5371_v8 = vunpack.c.l.b16 %v7254_v7  ;;  %v5376_v47 = vunpack.c.l.b16 %v7255_v2  ;;  %v7258_v58 = vpack.c.bf16 %v4231_v10, %v4231_v10  ;;  %v7259_v26 = vpack.c.bf16 %v4236_v63, %v4236_v63 }
 0x1c7   :  { %v5381_v16 = vunpack.c.l.b16 %v7256_v30  ;;  %v5386_v55 = vunpack.c.l.b16 %v7257_v12  ;;  %v7260_v5 = vpack.c.bf16 %v4244_v54, %v4244_v54  ;;  %v7261_v39 = vpack.c.bf16 %v4252_v60, %v4252_v60 }
 0x1c8   :  { %v5391_v7 = vunpack.c.l.b16 %v7258_v58  ;;  %v5396_v2 = vunpack.c.l.b16 %v7259_v26  ;;  %v7262_v10 = vpack.c.bf16 %v4260_v56, %v4260_v56  ;;  %v7263_v63 = vpack.c.bf16 %v4274_v17, %v4274_v17 }
 0x1c9   :  { %v5401_v30 = vunpack.c.l.b16 %v7260_v5  ;;  %v5406_v12 = vunpack.c.l.b16 %v7261_v39  ;;  %v7264_v54 = vpack.c.bf16 %v4279_v4, %v4279_v4  ;;  %v7265_v60 = vpack.c.bf16 %v4284_v14, %v4284_v14 }
 0x1ca   :  { %v5411_v58 = vunpack.c.l.b16 %v7262_v10  ;;  %v5416_v26 = vunpack.c.l.b16 %v7263_v63  ;;  %v7267_v56 = vpack.c.bf16 %v4298_v49, %v4298_v49  ;;  %v7269_v17 = vpack.c.bf16 %v7146_v45, %v7146_v45 }
 0x1cb   :  { %v5421_v5 = vunpack.c.l.b16 %v7264_v54  ;;  %v5426_v39 = vunpack.c.l.b16 %v7265_v60  ;;  %v7271_v4 = vpack.c.bf16 %v7147_v57, %v7147_v57  ;;  %v7273_v14 = vpack.c.bf16 %v7148_v6, %v7148_v6 }
 0x1cc   :  { %v5431_v10 = vunpack.c.l.b16 %v7267_v56  ;;  %v5436_v63 = vunpack.c.l.b16 %v7269_v17  ;;  %v7275_v49 = vpack.c.bf16 %v7149_v3, %v7149_v3  ;;  %v7276_v45 = vpack.c.bf16 %v7150_v9, %v7150_v9 }
 0x1cd   :  { %7266 = vst [vmem:[#allocation88_spill] sm:$0xff] %v5426_v39  ;;  %v5441_v54 = vunpack.c.l.b16 %v7271_v4  ;;  %v5446_v60 = vunpack.c.l.b16 %v7273_v14  ;;  %v7278_v57 = vpack.c.bf16 %v7277_v27, %v7277_v27  ;;  %v7309_v39 = vld [vmem:[#allocation18_spill] sm:$0xff]  ;;  %vm2465_vm9 = vcmask 519168  }
 0x1ce   :  { %7268 = vst [vmem:[#allocation89_spill] sm:$0xff] %v5431_v10  ;;  %7270 = vst [vmem:[#allocation90_spill] sm:$0xff] %v5436_v63  ;;  %v5451_v56 = vunpack.c.l.b16 %v7275_v49  ;;  %v5456_v17 = vunpack.c.l.b16 %v7276_v45  ;;  %v7286_v63 = vld [vmem:[#allocation10_spill] sm:$0xff]  ;;  %v7289_v10 = vld [vmem:[#allocation11_spill] sm:$0xff] }
 0x1cf   :  { %7272 = vst [vmem:[#allocation91_spill] sm:$0xff] %v5441_v54  ;;  %7274 = vst [vmem:[#allocation92_spill] sm:$0xff] %v5446_v60  ;;  %v5461_v4 = vunpack.c.l.b16 %v7278_v57  ;;  %v7280_v54 = vld [vmem:[#allocation8_spill] sm:$0xff]  ;;  %v7283_v60 = vld [vmem:[#allocation9_spill] sm:$0xff]  ;;  %v7287_v9 = vpack.c.bf16 %v7286_v63, %v7286_v63  ;;  %v7290_v27 = vpack.c.bf16 %v7289_v10, %v7289_v10 }
 0x1d0   :  { %v7281_v6 = vpack.c.bf16 %v7280_v54, %v7280_v54  ;;  %v7284_v3 = vpack.c.bf16 %v7283_v60, %v7283_v60 }
 0x1d1   :  { %7279 = vst [vmem:[#allocation93_spill] sm:$0xff] %v5461_v4  ;;  %v5476_v45 = vunpack.c.l.b16 %v7287_v9  ;;  %v5481_v57 = vunpack.c.l.b16 %v7290_v27  ;;  %v7292_v4 = vld [vmem:[#allocation12_spill] sm:$0xff] }
 0x1d2   :  { %v5466_v14 = vunpack.c.l.b16 %v7281_v6  ;;  %v5471_v49 = vunpack.c.l.b16 %v7284_v3  ;;  %v7293_v54 = vpack.c.bf16 %v7292_v4, %v7292_v4 }
 0x1d3   :  { %7288 = vst [vmem:[#allocation96_spill] sm:$0xff] %v5476_v45  ;;  %7291 = vst [vmem:[#allocation97_spill] sm:$0xff] %v5481_v57  ;;  %v7300_v45 = vld [vmem:[#allocation15_spill] sm:$0xff]  ;;  %v7303_v57 = vld [vmem:[#allocation16_spill] sm:$0xff] }
 0x1d4   :  { %7282 = vst [vmem:[#allocation94_spill] sm:$0xff] %v5466_v14  ;;  %7285 = vst [vmem:[#allocation95_spill] sm:$0xff] %v5471_v49  ;;  %v5486_v6 = vunpack.c.l.b16 %v7293_v54  ;;  %v7295_v14 = vld [vmem:[#allocation13_spill] sm:$0xff]  ;;  %v7297_v49 = vld [vmem:[#allocation14_spill] sm:$0xff]  ;;  %v7301_v10 = vpack.c.bf16 %v7300_v45, %v7300_v45  ;;  %v7304_v4 = vpack.c.bf16 %v7303_v57, %v7303_v57 }
 0x1d5   :  { %v7296_v60 = vpack.c.bf16 %v7295_v14, %v7295_v14  ;;  %v7298_v63 = vpack.c.bf16 %v7297_v49, %v7297_v49  ;;  %v7310_v49 = vpack.c.bf16 %v7309_v39, %v7309_v39 }
 0x1d6   :  { %7294 = vst [vmem:[#allocation98_spill] sm:$0xff] %v5486_v6  ;;  %v5501_v27 = vunpack.c.l.b16 %v7301_v10  ;;  %v5506_v54 = vunpack.c.l.b16 %v7304_v4  ;;  %v7306_v6 = vld [vmem:[#allocation17_spill] sm:$0xff] }
 0x1d7   :  { %v5491_v3 = vunpack.c.l.b16 %v7296_v60  ;;  %v5496_v9 = vunpack.c.l.b16 %v7298_v63  ;;  %v7307_v14 = vpack.c.bf16 %v7306_v6, %v7306_v6  ;;  %v5516_v63 = vunpack.c.l.b16 %v7310_v49 }
 0x1d8   :  { %7302 = vst [vmem:[#allocation100_spill] sm:$0xff] %v5501_v27  ;;  %7305 = vst [vmem:[#allocation101_spill] sm:$0xff] %v5506_v54  ;;  %v7315_v27 = vld [vmem:[#allocation20_spill] sm:$0xff]  ;;  %v7318_v54 = vld [vmem:[#allocation21_spill] sm:$0xff] }
 0x1d9   :  { %7299 = vst [vmem:[#allocation99_spill] sm:$0xff] %v5496_v9  ;;  %v5511_v60 = vunpack.c.l.b16 %v7307_v14  ;;  %7311 = vst [vmem:[#allocation103_spill] sm:$0xff] %v5516_v63  ;;  %v7312_v9 = vld [vmem:[#allocation19_spill] sm:$0xff]  ;;  %v7316_v57 = vpack.c.bf16 %v7315_v27, %v7315_v27  ;;  %v7319_v6 = vpack.c.bf16 %v7318_v54, %v7318_v54 }
 0x1da   :  { %v7313_v45 = vpack.c.bf16 %v7312_v9, %v7312_v9  ;;  %v7324_v63 = vld [vmem:[#allocation23_spill] sm:$0xff] }
 0x1db   :  { %7308 = vst [vmem:[#allocation102_spill] sm:$0xff] %v5511_v60  ;;  %v5526_v4 = vunpack.c.l.b16 %v7316_v57  ;;  %v5531_v14 = vunpack.c.l.b16 %v7319_v6  ;;  %v7321_v60 = vld [vmem:[#allocation22_spill] sm:$0xff]  ;;  %v7325_v9 = vpack.c.bf16 %v7324_v63, %v7324_v63 }
 0x1dc   :  { %v5521_v10 = vunpack.c.l.b16 %v7313_v45  ;;  %v7322_v39 = vpack.c.bf16 %v7321_v60, %v7321_v60 }
 0x1dd   :  { %7317 = vst [vmem:[#allocation105_spill] sm:$0xff] %v5526_v4  ;;  %7320 = vst [vmem:[#allocation106_spill] sm:$0xff] %v5531_v14  ;;  %v5541_v45 = vunpack.c.l.b16 %v7325_v9  ;;  %v7330_v4 = vld [vmem:[#allocation25_spill] sm:$0xff]  ;;  %v7333_v14 = vld [vmem:[#allocation26_spill] sm:$0xff] }
 0x1de   :  { %7314 = vst [vmem:[#allocation104_spill] sm:$0xff] %v5521_v10  ;;  %v5536_v49 = vunpack.c.l.b16 %v7322_v39  ;;  %v7327_v10 = vld [vmem:[#allocation24_spill] sm:$0xff]  ;;  %v7331_v54 = vpack.c.bf16 %v7330_v4, %v7330_v4  ;;  %v7334_v60 = vpack.c.bf16 %v7333_v14, %v7333_v14 }
 0x1df   :  { %7326 = vst [vmem:[#allocation108_spill] sm:$0xff] %v5541_v45  ;;  %v7328_v27 = vpack.c.bf16 %v7327_v10, %v7327_v10  ;;  %v7339_v45 = vld [vmem:[#allocation28_spill] sm:$0xff] }
 0x1e0   :  { %7323 = vst [vmem:[#allocation107_spill] sm:$0xff] %v5536_v49  ;;  %v5551_v6 = vunpack.c.l.b16 %v7331_v54  ;;  %v5556_v39 = vunpack.c.l.b16 %v7334_v60  ;;  %v7336_v49 = vld [vmem:[#allocation27_spill] sm:$0xff]  ;;  %v7340_v10 = vpack.c.bf16 %v7339_v45, %v7339_v45 }
 0x1e1   :  { %v5546_v57 = vunpack.c.l.b16 %v7328_v27  ;;  %v7337_v63 = vpack.c.bf16 %v7336_v49, %v7336_v49 }
 0x1e2   :  { %7332 = vst [vmem:[#allocation110_spill] sm:$0xff] %v5551_v6  ;;  %7335 = vst [vmem:[#allocation111_spill] sm:$0xff] %v5556_v39  ;;  %v5566_v27 = vunpack.c.l.b16 %v7340_v10  ;;  %v7345_v6 = vld [vmem:[#allocation30_spill] sm:$0xff]  ;;  %v7348_v39 = vld [vmem:[#allocation31_spill] sm:$0xff] }
 0x1e3   :  { %7329 = vst [vmem:[#allocation109_spill] sm:$0xff] %v5546_v57  ;;  %v5561_v9 = vunpack.c.l.b16 %v7337_v63  ;;  %v7342_v57 = vld [vmem:[#allocation29_spill] sm:$0xff]  ;;  %v7346_v14 = vpack.c.bf16 %v7345_v6, %v7345_v6  ;;  %v7349_v49 = vpack.c.bf16 %v7348_v39, %v7348_v39 }
 0x1e4   :  { %7341 = vst [vmem:[#allocation113_spill] sm:$0xff] %v5566_v27  ;;  %v7343_v4 = vpack.c.bf16 %v7342_v57, %v7342_v57  ;;  %v7354_v27 = vld [vmem:[#allocation33_spill] sm:$0xff] }
 0x1e5   :  { %7338 = vst [vmem:[#allocation112_spill] sm:$0xff] %v5561_v9  ;;  %v5576_v60 = vunpack.c.l.b16 %v7346_v14  ;;  %v5581_v63 = vunpack.c.l.b16 %v7349_v49  ;;  %v7351_v9 = vld [vmem:[#allocation32_spill] sm:$0xff]  ;;  %v7355_v57 = vpack.c.bf16 %v7354_v27, %v7354_v27 }
 0x1e6   :  { %v5571_v54 = vunpack.c.l.b16 %v7343_v4  ;;  %v7352_v45 = vpack.c.bf16 %v7351_v9, %v7351_v9 }
 0x1e7   :  { %7347 = vst [vmem:[#allocation115_spill] sm:$0xff] %v5576_v60  ;;  %7350 = vst [vmem:[#allocation116_spill] sm:$0xff] %v5581_v63  ;;  %v5591_v4 = vunpack.c.l.b16 %v7355_v57  ;;  %v7360_v60 = vld [vmem:[#allocation35_spill] sm:$0xff]  ;;  %v7363_v63 = vld [vmem:[#allocation36_spill] sm:$0xff] }
 0x1e8   :  { %7344 = vst [vmem:[#allocation114_spill] sm:$0xff] %v5571_v54  ;;  %v5586_v10 = vunpack.c.l.b16 %v7352_v45  ;;  %v7357_v54 = vld [vmem:[#allocation34_spill] sm:$0xff]  ;;  %v7361_v39 = vpack.c.bf16 %v7360_v60, %v7360_v60  ;;  %v7364_v9 = vpack.c.bf16 %v7363_v63, %v7363_v63 }
 0x1e9   :  { %7356 = vst [vmem:[#allocation118_spill] sm:$0xff] %v5591_v4  ;;  %v7358_v6 = vpack.c.bf16 %v7357_v54, %v7357_v54  ;;  %v7369_v4 = vld [vmem:[#allocation38_spill] sm:$0xff] }
 0x1ea   :  { %7353 = vst [vmem:[#allocation117_spill] sm:$0xff] %v5586_v10  ;;  %v5601_v49 = vunpack.c.l.b16 %v7361_v39  ;;  %v5606_v45 = vunpack.c.l.b16 %v7364_v9  ;;  %v7366_v10 = vld [vmem:[#allocation37_spill] sm:$0xff]  ;;  %v7370_v54 = vpack.c.bf16 %v7369_v4, %v7369_v4 }
 0x1eb   :  { %v5596_v14 = vunpack.c.l.b16 %v7358_v6  ;;  %v7367_v27 = vpack.c.bf16 %v7366_v10, %v7366_v10 }
 0x1ec   :  { %7362 = vst [vmem:[#allocation120_spill] sm:$0xff] %v5601_v49  ;;  %7365 = vst [vmem:[#allocation121_spill] sm:$0xff] %v5606_v45  ;;  %v5616_v6 = vunpack.c.l.b16 %v7370_v54  ;;  %v7375_v49 = vld [vmem:[#allocation40_spill] sm:$0xff]  ;;  %v7378_v45 = vld [vmem:[#allocation41_spill] sm:$0xff] }
 0x1ed   :  { %7359 = vst [vmem:[#allocation119_spill] sm:$0xff] %v5596_v14  ;;  %v5611_v57 = vunpack.c.l.b16 %v7367_v27  ;;  %v7372_v14 = vld [vmem:[#allocation39_spill] sm:$0xff]  ;;  %v7376_v63 = vpack.c.bf16 %v7375_v49, %v7375_v49  ;;  %v7379_v10 = vpack.c.bf16 %v7378_v45, %v7378_v45 }
 0x1ee   :  { %7371 = vst [vmem:[#allocation123_spill] sm:$0xff] %v5616_v6  ;;  %v7373_v60 = vpack.c.bf16 %v7372_v14, %v7372_v14  ;;  %v7384_v6 = vld [vmem:[#allocation43_spill] sm:$0xff] }
 0x1ef   :  { %7368 = vst [vmem:[#allocation122_spill] sm:$0xff] %v5611_v57  ;;  %v5626_v9 = vunpack.c.l.b16 %v7376_v63  ;;  %v5631_v27 = vunpack.c.l.b16 %v7379_v10  ;;  %v7381_v57 = vld [vmem:[#allocation42_spill] sm:$0xff]  ;;  %v7385_v14 = vpack.c.bf16 %v7384_v6, %v7384_v6 }
 0x1f0   :  { %v5621_v39 = vunpack.c.l.b16 %v7373_v60  ;;  %v7382_v4 = vpack.c.bf16 %v7381_v57, %v7381_v57 }
 0x1f1   :  { %7377 = vst [vmem:[#allocation125_spill] sm:$0xff] %v5626_v9  ;;  %7380 = vst [vmem:[#allocation126_spill] sm:$0xff] %v5631_v27  ;;  %v5641_v60 = vunpack.c.l.b16 %v7385_v14  ;;  %v7390_v9 = vld [vmem:[#allocation45_spill] sm:$0xff]  ;;  %v7393_v27 = vld [vmem:[#allocation46_spill] sm:$0xff] }
 0x1f2   :  { %7374 = vst [vmem:[#allocation124_spill] sm:$0xff] %v5621_v39  ;;  %v5636_v54 = vunpack.c.l.b16 %v7382_v4  ;;  %v7387_v39 = vld [vmem:[#allocation44_spill] sm:$0xff]  ;;  %v7391_v45 = vpack.c.bf16 %v7390_v9, %v7390_v9  ;;  %v7394_v57 = vpack.c.bf16 %v7393_v27, %v7393_v27 }
 0x1f3   :  { %7386 = vst [vmem:[#allocation128_spill] sm:$0xff] %v5641_v60  ;;  %v7388_v49 = vpack.c.bf16 %v7387_v39, %v7387_v39  ;;  %v7399_v60 = vld [vmem:[#allocation48_spill] sm:$0xff] }
 0x1f4   :  { %7383 = vst [vmem:[#allocation127_spill] sm:$0xff] %v5636_v54  ;;  %v5651_v10 = vunpack.c.l.b16 %v7391_v45  ;;  %v5656_v4 = vunpack.c.l.b16 %v7394_v57  ;;  %v7396_v54 = vld [vmem:[#allocation47_spill] sm:$0xff]  ;;  %v7400_v39 = vpack.c.bf16 %v7399_v60, %v7399_v60 }
 0x1f5   :  { %v5646_v63 = vunpack.c.l.b16 %v7388_v49  ;;  %v7397_v6 = vpack.c.bf16 %v7396_v54, %v7396_v54 }
 0x1f6   :  { %7392 = vst [vmem:[#allocation130_spill] sm:$0xff] %v5651_v10  ;;  %7395 = vst [vmem:[#allocation131_spill] sm:$0xff] %v5656_v4  ;;  %v5666_v49 = vunpack.c.l.b16 %v7400_v39  ;;  %v7405_v10 = vld [vmem:[#allocation50_spill] sm:$0xff]  ;;  %v7408_v4 = vld [vmem:[#allocation51_spill] sm:$0xff] }
 0x1f7   :  { %7389 = vst [vmem:[#allocation129_spill] sm:$0xff] %v5646_v63  ;;  %v5661_v14 = vunpack.c.l.b16 %v7397_v6  ;;  %v7402_v63 = vld [vmem:[#allocation49_spill] sm:$0xff]  ;;  %v7406_v27 = vpack.c.bf16 %v7405_v10, %v7405_v10  ;;  %v7409_v54 = vpack.c.bf16 %v7408_v4, %v7408_v4 }
 0x1f8   :  { %7401 = vst [vmem:[#allocation133_spill] sm:$0xff] %v5666_v49  ;;  %v7403_v9 = vpack.c.bf16 %v7402_v63, %v7402_v63  ;;  %v7414_v49 = vld [vmem:[#allocation53_spill] sm:$0xff] }
 0x1f9   :  { %7398 = vst [vmem:[#allocation132_spill] sm:$0xff] %v5661_v14  ;;  %v5676_v57 = vunpack.c.l.b16 %v7406_v27  ;;  %v5681_v6 = vunpack.c.l.b16 %v7409_v54  ;;  %v7411_v14 = vld [vmem:[#allocation52_spill] sm:$0xff]  ;;  %v7415_v63 = vpack.c.bf16 %v7414_v49, %v7414_v49 }
 0x1fa   :  { %v5671_v45 = vunpack.c.l.b16 %v7403_v9  ;;  %v7412_v60 = vpack.c.bf16 %v7411_v14, %v7411_v14 }
 0x1fb   :  { %7407 = vst [vmem:[#allocation135_spill] sm:$0xff] %v5676_v57  ;;  %7410 = vst [vmem:[#allocation136_spill] sm:$0xff] %v5681_v6  ;;  %v5691_v9 = vunpack.c.l.b16 %v7415_v63  ;;  %v7420_v57 = vld [vmem:[#allocation55_spill] sm:$0xff]  ;;  %v7423_v6 = vld [vmem:[#allocation56_spill] sm:$0xff] }
 0x1fc   :  { %7404 = vst [vmem:[#allocation134_spill] sm:$0xff] %v5671_v45  ;;  %v5686_v39 = vunpack.c.l.b16 %v7412_v60  ;;  %v7417_v45 = vld [vmem:[#allocation54_spill] sm:$0xff]  ;;  %v7421_v4 = vpack.c.bf16 %v7420_v57, %v7420_v57  ;;  %v7424_v14 = vpack.c.bf16 %v7423_v6, %v7423_v6 }
 0x1fd   :  { %7416 = vst [vmem:[#allocation138_spill] sm:$0xff] %v5691_v9  ;;  %v7418_v10 = vpack.c.bf16 %v7417_v45, %v7417_v45  ;;  %v7429_v9 = vld [vmem:[#allocation58_spill] sm:$0xff] }
 0x1fe   :  { %7413 = vst [vmem:[#allocation137_spill] sm:$0xff] %v5686_v39  ;;  %v5701_v54 = vunpack.c.l.b16 %v7421_v4  ;;  %v5706_v60 = vunpack.c.l.b16 %v7424_v14  ;;  %v7426_v39 = vld [vmem:[#allocation57_spill] sm:$0xff]  ;;  %v7430_v45 = vpack.c.bf16 %v7429_v9, %v7429_v9 }
 0x1ff   :  { %v5696_v27 = vunpack.c.l.b16 %v7418_v10  ;;  %v7427_v49 = vpack.c.bf16 %v7426_v39, %v7426_v39 }
 0x200   :  { %7422 = vst [vmem:[#allocation140_spill] sm:$0xff] %v5701_v54  ;;  %7425 = vst [vmem:[#allocation141_spill] sm:$0xff] %v5706_v60  ;;  %v5716_v10 = vunpack.c.l.b16 %v7430_v45  ;;  %v7435_v54 = vld [vmem:[#allocation60_spill] sm:$0xff]  ;;  %v7438_v60 = vld [vmem:[#allocation61_spill] sm:$0xff] }
 0x201   :  { %7419 = vst [vmem:[#allocation139_spill] sm:$0xff] %v5696_v27  ;;  %v5711_v63 = vunpack.c.l.b16 %v7427_v49  ;;  %v7432_v27 = vld [vmem:[#allocation59_spill] sm:$0xff]  ;;  %v7436_v6 = vpack.c.bf16 %v7435_v54, %v7435_v54  ;;  %v7439_v39 = vpack.c.bf16 %v7438_v60, %v7438_v60 }
 0x202   :  { %7431 = vst [vmem:[#allocation143_spill] sm:$0xff] %v5716_v10  ;;  %v7433_v57 = vpack.c.bf16 %v7432_v27, %v7432_v27  ;;  %v7444_v10 = vld [vmem:[#allocation63_spill] sm:$0xff] }
 0x203   :  { %7428 = vst [vmem:[#allocation142_spill] sm:$0xff] %v5711_v63  ;;  %v5726_v14 = vunpack.c.l.b16 %v7436_v6  ;;  %v5731_v49 = vunpack.c.l.b16 %v7439_v39  ;;  %v7441_v63 = vld [vmem:[#allocation62_spill] sm:$0xff]  ;;  %v7445_v27 = vpack.c.bf16 %v7444_v10, %v7444_v10 }
 0x204   :  { %v5721_v4 = vunpack.c.l.b16 %v7433_v57  ;;  %v7442_v9 = vpack.c.bf16 %v7441_v63, %v7441_v63 }
 0x205   :  { %7437 = vst [vmem:[#allocation145_spill] sm:$0xff] %v5726_v14  ;;  %7440 = vst [vmem:[#allocation146_spill] sm:$0xff] %v5731_v49  ;;  %v5741_v57 = vunpack.c.l.b16 %v7445_v27  ;;  %v7450_v14 = vld [vmem:[#allocation65_spill] sm:$0xff]  ;;  %v7453_v49 = vld [vmem:[#allocation66_spill] sm:$0xff] }
 0x206   :  { %7434 = vst [vmem:[#allocation144_spill] sm:$0xff] %v5721_v4  ;;  %v5736_v45 = vunpack.c.l.b16 %v7442_v9  ;;  %v7447_v4 = vld [vmem:[#allocation64_spill] sm:$0xff]  ;;  %v7451_v60 = vpack.c.bf16 %v7450_v14, %v7450_v14  ;;  %v7454_v63 = vpack.c.bf16 %v7453_v49, %v7453_v49 }
 0x207   :  { %7446 = vst [vmem:[#allocation148_spill] sm:$0xff] %v5741_v57  ;;  %v7448_v54 = vpack.c.bf16 %v7447_v4, %v7447_v4  ;;  %v7459_v57 = vld [vmem:[#allocation68_spill] sm:$0xff] }
 0x208   :  { %7443 = vst [vmem:[#allocation147_spill] sm:$0xff] %v5736_v45  ;;  %v5751_v39 = vunpack.c.l.b16 %v7451_v60  ;;  %v5756_v9 = vunpack.c.l.b16 %v7454_v63  ;;  %v7456_v45 = vld [vmem:[#allocation67_spill] sm:$0xff]  ;;  %v7460_v4 = vpack.c.bf16 %v7459_v57, %v7459_v57 }
 0x209   :  { %v5746_v6 = vunpack.c.l.b16 %v7448_v54  ;;  %v7457_v10 = vpack.c.bf16 %v7456_v45, %v7456_v45 }
 0x20a   :  { %7452 = vst [vmem:[#allocation3_spill] sm:$0xff] %v5751_v39  ;;  %7455 = vst [vmem:[#allocation4_spill] sm:$0xff] %v5756_v9  ;;  %v5766_v54 = vunpack.c.l.b16 %v7460_v4  ;;  %v7465_v39 = vld [vmem:[#allocation70_spill] sm:$0xff]  ;;  %v7468_v9 = vld [vmem:[#allocation71_spill] sm:$0xff] }
 0x20b   :  { %7449 = vst [vmem:[#allocation2_spill] sm:$0xff] %v5746_v6  ;;  %v5761_v27 = vunpack.c.l.b16 %v7457_v10  ;;  %v7462_v6 = vld [vmem:[#allocation69_spill] sm:$0xff]  ;;  %v7466_v49 = vpack.c.bf16 %v7465_v39, %v7465_v39  ;;  %v7469_v45 = vpack.c.bf16 %v7468_v9, %v7468_v9 }
 0x20c   :  { %7461 = vst [vmem:[#allocation6_spill] sm:$0xff] %v5766_v54  ;;  %v7463_v14 = vpack.c.bf16 %v7462_v6, %v7462_v6  ;;  %v7474_v54 = vld [vmem:[#allocation73_spill] sm:$0xff] }
 0x20d   :  { %7458 = vst [vmem:[#allocation5_spill] sm:$0xff] %v5761_v27  ;;  %v5776_v63 = vunpack.c.l.b16 %v7466_v49  ;;  %v5781_v10 = vunpack.c.l.b16 %v7469_v45  ;;  %v7471_v27 = vld [vmem:[#allocation72_spill] sm:$0xff]  ;;  %v7475_v6 = vpack.c.bf16 %v7474_v54, %v7474_v54 }
 0x20e   :  { %v5771_v60 = vunpack.c.l.b16 %v7463_v14  ;;  %v7472_v57 = vpack.c.bf16 %v7471_v27, %v7471_v27 }
 0x20f   :  { %7467 = vst [vmem:[#allocation79_spill] sm:$0xff] %v5776_v63  ;;  %7470 = vst [vmem:[#allocation80_spill] sm:$0xff] %v5781_v10  ;;  %v5791_v14 = vunpack.c.l.b16 %v7475_v6  ;;  %v7478_v63 = vld [vmem:[#allocation75_spill] sm:$0xff]  ;;  %v7480_v10 = vld [vmem:[#allocation76_spill] sm:$0xff] }
 0x210   :  { %7464 = vst [vmem:[#allocation78_spill] sm:$0xff] %v5771_v60  ;;  %v5786_v4 = vunpack.c.l.b16 %v7472_v57  ;;  %v7476_v60 = vld [vmem:[#allocation74_spill] sm:$0xff]  ;;  %v7479_v9 = vpack.c.bf16 %v7478_v63, %v7478_v63  ;;  %v7481_v27 = vpack.c.bf16 %v7480_v10, %v7480_v10  ;;  %v7486_v63 = vpack.c.bf16 %v7223_v46, %v7223_v46 }
 0x211   :  { %v7477_v39 = vpack.c.bf16 %v7476_v60, %v7476_v60  ;;  %v7485_v60 = vpack.c.bf16 %v7222_v29, %v7222_v29  ;;  %v7487_v10 = vpack.c.bf16 %v7224_v38, %v7224_v38  ;;  %v7489_v29 = vpack.c.bf16 %v7226_v34, %v7226_v34 }
 0x212   :  { %7473 = vst [vmem:[#allocation81_spill] sm:$0xff] %v5786_v4  ;;  %v5801_v45 = vunpack.c.l.b16 %v7479_v9  ;;  %v5806_v57 = vunpack.c.l.b16 %v7481_v27  ;;  %v7483_v4 = vld [vmem:[#allocation77_spill] sm:$0xff]  ;;  %v5821_v9 = vunpack.c.l.b16 %v7486_v63  ;;  %v7490_v46 = vpack.c.bf16 %v7227_v43, %v7227_v43 }
 0x213   :  { %v5796_v49 = vunpack.c.l.b16 %v7477_v39  ;;  %v7484_v54 = vpack.c.bf16 %v7483_v4, %v7483_v4  ;;  %v5816_v39 = vunpack.c.l.b16 %v7485_v60  ;;  %v5826_v27 = vunpack.c.l.b16 %v7487_v10 }
 0x214   :  { %7482 = vst [vmem:[#allocation82_spill] sm:$0xff] %v5806_v57  ;;  %v7488_v4 = vpack.c.bf16 %v7225_v37, %v7225_v37  ;;  %v5836_v60 = vunpack.c.l.b16 %v7489_v29  ;;  %v5841_v63 = vunpack.c.l.b16 %v7490_v46  ;;  %v7491_v38 = vpack.c.bf16 %v7228_v32, %v7228_v32  ;;  %v7494_v57 = vld [vmem:[#allocation86_spill] sm:$0xff] }
 0x215   :  { %v5811_v6 = vunpack.c.l.b16 %v7484_v54  ;;  %v7493_v37 = vpack.c.bf16 %v7229_v50, %v7229_v50  ;;  %v7495_v34 = vpack.c.bf16 %v7494_v57, %v7494_v57  ;;  %v7496_v43 = vpack.c.bf16 %v4982_v22, %v4982_v22 }
 0x216   :  { %v5831_v54 = vunpack.c.l.b16 %v7488_v4  ;;  %v5846_v10 = vunpack.c.l.b16 %v7491_v38  ;;  %v7497_v32 = vpack.c.bf16 %v4988_v11, %v4988_v11  ;;  %v7498_v50 = vpack.c.bf16 %v4996_v41, %v4996_v41 }
 0x217   :  { %v5851_v4 = vunpack.c.l.b16 %v7493_v37  ;;  %v5856_v29 = vunpack.c.l.b16 %v7495_v34  ;;  %v5861_v46 = vunpack.c.l.b16 %v7496_v43  ;;  %v7499_v57 = vpack.c.bf16 %v5014_v51, %v5014_v51 }
 0x218   :  { %7492 = vst [vmem:[#allocation83_spill] sm:$0xff] %v5846_v10  ;;  %v5866_v38 = vunpack.c.l.b16 %v7497_v32  ;;  %v5871_v37 = vunpack.c.l.b16 %v7498_v50  ;;  %v7500_v10 = vld [vmem:[#allocation87_spill] sm:$0xff]  ;;  %v7502_v11 = vpack.c.bf16 %v5040_v33, %v5040_v33  ;;  %v2315_v41 = vsel %vm2314_vm2, %v5256_v53, %v5251_v35 }
 0x219   :  { %v5876_v34 = vunpack.c.l.b16 %v7499_v57  ;;  %v7501_v22 = vpack.c.bf16 %v7500_v10, %v7500_v10  ;;  %v2317_v51 = vsel %vm2316_vm3, %v5261_v36, %v2315_v41  ;;  %v2328_v33 = vsel %vm2314_vm2, %v5296_v15, %v5291_v20 }
 0x21a   :  { %v5886_v32 = vunpack.c.l.b16 %v7502_v11  ;;  %v2335_v10 = vsel %vm2314_vm2, %v5336_v18, %v5331_v31  ;;  %v2342_v50 = vsel %vm2314_vm2, %v5376_v47, %v5371_v8  ;;  %v2319_v35 = vsel %vm2318_vm4, %v5266_v25, %v2317_v51  ;;  %v7509_v11 = vld [vmem:[#allocation108_spill] sm:$0xff] }
 0x21b   :  { %v5881_v43 = vunpack.c.l.b16 %v7501_v22  ;;  %v2329_v53 = vsel %vm2316_vm3, %v5301_v48, %v2328_v33  ;;  %v2336_v36 = vsel %vm2316_vm3, %v5341_v24, %v2335_v10  ;;  %v2343_v20 = vsel %vm2316_vm3, %v5381_v16, %v2342_v50  ;;  %v7507_v22 = vld [vmem:[#allocation93_spill] sm:$0xff] }
 0x21c   :  { %v2321_v15 = vsel %vm2320_vm5, %v5271_v61, %v2319_v35  ;;  %v2330_v31 = vsel %vm2318_vm4, %v5306_v42, %v2329_v53  ;;  %v2337_v18 = vsel %vm2318_vm4, %v5346_v0, %v2336_v36  ;;  %v2344_v25 = vsel %vm2318_vm4, %v5386_v55, %v2343_v20  ;;  %v7503_v55 = vld [vmem:[#allocation99_spill] sm:$0xff]  ;;  %v7512_v33 = vld [vmem:[#allocation101_spill] sm:$0xff]  ;;  %v7514_v53 = vld [vmem:[#allocation90_spill] sm:$0xff] }
 0x21d   :  { %v2323_v48 = vsel %vm2322_vm6, %v5276_v62, %v2321_v15  ;;  %v2331_v24 = vsel %vm2320_vm5, %v5311_v13, %v2330_v31  ;;  %v2338_v8 = vsel %vm2320_vm5, %v5351_v40, %v2337_v18  ;;  %v2345_v61 = vsel %vm2320_vm5, %v5391_v7, %v2344_v25  ;;  %v7504_v7 = vld [vmem:[#allocation106_spill] sm:$0xff]  ;;  %v7513_v50 = vld [vmem:[#allocation109_spill] sm:$0xff]  ;;  %v7515_v20 = vld [vmem:[#allocation95_spill] sm:$0xff] }
 0x21e   :  { %v2325_v42 = vsel %vm2324_vm7, %v5281_v44, %v2323_v48  ;;  %v2332_v0 = vsel %vm2322_vm6, %v5316_v1, %v2331_v24  ;;  %v2339_v47 = vsel %vm2322_vm6, %v5356_v52, %v2338_v8  ;;  %v2346_v62 = vsel %vm2322_vm6, %v5396_v2, %v2345_v61  ;;  %v7505_v2 = vld [vmem:[#allocation107_spill] sm:$0xff]  ;;  %v7516_v31 = vld [vmem:[#allocation102_spill] sm:$0xff]  ;;  %v7519_v61 = vld [vmem:[#allocation96_spill] sm:$0xff] }
 0x21f   :  { %v5936_v13 = vsel %vm2326_vm8, %v5286_v59, %v2325_v42  ;;  %v2333_v40 = vsel %vm2324_vm7, %v5321_v19, %v2332_v0  ;;  %v2340_v16 = vsel %vm2324_vm7, %v5361_v21, %v2339_v47  ;;  %v2347_v44 = vsel %vm2324_vm7, %v5401_v30, %v2346_v62  ;;  %v7517_v25 = vld [vmem:[#allocation110_spill] sm:$0xff]  ;;  %v7518_v24 = vld [vmem:[#allocation91_spill] sm:$0xff] }
 0x220   :  { %v5946_v1 = vsel %vm2326_vm8, %v5326_v23, %v2333_v40  ;;  %v5950_v52 = vsel %vm2326_vm8, %v5366_v28, %v2340_v16  ;;  %v5954_v59 = vsel %vm2326_vm8, %v5406_v12, %v2347_v44  ;;  %v2349_v19 = vsel %vm2314_vm2, %v5416_v26, %v5411_v58  ;;  %v7506_v12 = vld [vmem:[#allocation88_spill] sm:$0xff]  ;;  %v7520_v0 = vld [vmem:[#allocation103_spill] sm:$0xff] }
 0x221   :  { %v2350_v21 = vsel %vm2316_vm3, %v5421_v5, %v2349_v19  ;;  %v2356_v23 = vsel %vm2314_vm2, %v5456_v17, %v5451_v56  ;;  %v2363_v28 = vsel %vm2314_vm2, %v7503_v55, %v5491_v3  ;;  %v2370_v30 = vsel %vm2314_vm2, %v7505_v2, %v7504_v7  ;;  %v7508_v26 = vld [vmem:[#allocation100_spill] sm:$0xff]  ;;  %v7510_v17 = vld [vmem:[#allocation89_spill] sm:$0xff]  ;;  %v7511_v3 = vld [vmem:[#allocation94_spill] sm:$0xff] }
 0x222   :  { %v2351_v57 = vsel %vm2318_vm4, %v7506_v12, %v2350_v21  ;;  %v2357_v58 = vsel %vm2316_vm3, %v7507_v22, %v2356_v23  ;;  %v2364_v5 = vsel %vm2316_vm3, %v7508_v26, %v2363_v28  ;;  %v2371_v56 = vsel %vm2316_vm3, %v7509_v11, %v2370_v30  ;;  %v7521_v62 = vld [vmem:[#allocation111_spill] sm:$0xff]  ;;  %v7522_v16 = vld [vmem:[#allocation92_spill] sm:$0xff]  ;;  %v7523_v19 = vld [vmem:[#allocation97_spill] sm:$0xff] }
 0x223   :  { %v2352_v41 = vsel %vm2320_vm5, %v7510_v17, %v2351_v57  ;;  %v2358_v51 = vsel %vm2318_vm4, %v7511_v3, %v2357_v58  ;;  %v2365_v10 = vsel %vm2318_vm4, %v7512_v33, %v2364_v5  ;;  %v2372_v35 = vsel %vm2318_vm4, %v7513_v50, %v2371_v56  ;;  %v7524_v23 = vld [vmem:[#allocation104_spill] sm:$0xff]  ;;  %v7526_v2 = vld [vmem:[#allocation98_spill] sm:$0xff]  ;;  %v7527_v12 = vld [vmem:[#allocation105_spill] sm:$0xff] }
 0x224   :  { %v2353_v36 = vsel %vm2322_vm6, %v7514_v53, %v2352_v41  ;;  %v2359_v15 = vsel %vm2320_vm5, %v7515_v20, %v2358_v51  ;;  %v2366_v18 = vsel %vm2320_vm5, %v7516_v31, %v2365_v10  ;;  %v2373_v48 = vsel %vm2320_vm5, %v7517_v25, %v2372_v35  ;;  %v7525_v28 = vld [vmem:[#allocation112_spill] sm:$0xff]  ;;  %v7528_v22 = vld [vmem:[#allocation113_spill] sm:$0xff]  ;;  %v7529_v26 = vld [vmem:[#allocation114_spill] sm:$0xff] }
 0x225   :  { %v2354_v8 = vsel %vm2324_vm7, %v7518_v24, %v2353_v36  ;;  %v2360_v42 = vsel %vm2322_vm6, %v7519_v61, %v2359_v15  ;;  %v2367_v47 = vsel %vm2322_vm6, %v7520_v0, %v2366_v18  ;;  %v2374_v40 = vsel %vm2322_vm6, %v7521_v62, %v2373_v48  ;;  %v7530_v5 = vld [vmem:[#allocation115_spill] sm:$0xff]  ;;  %v7531_v56 = vld [vmem:[#allocation116_spill] sm:$0xff]  ;;  %v7532_v41 = vld [vmem:[#allocation122_spill] sm:$0xff] }
 0x226   :  { %v6004_v44 = vsel %vm2326_vm8, %v7522_v16, %v2354_v8  ;;  %v2361_v21 = vsel %vm2324_vm7, %v7523_v19, %v2360_v42  ;;  %v2368_v55 = vsel %vm2324_vm7, %v7524_v23, %v2367_v47  ;;  %v2375_v7 = vsel %vm2324_vm7, %v7525_v28, %v2374_v40  ;;  %v7533_v3 = vld [vmem:[#allocation123_spill] sm:$0xff]  ;;  %v7534_v33 = vld [vmem:[#allocation130_spill] sm:$0xff]  ;;  %v7538_v20 = vld [vmem:[#allocation117_spill] sm:$0xff] }
 0x227   :  { %v6014_v30 = vsel %vm2326_vm8, %v7526_v2, %v2361_v21  ;;  %v6018_v57 = vsel %vm2326_vm8, %v7527_v12, %v2368_v55  ;;  %v6022_v58 = vsel %vm2326_vm8, %v7528_v22, %v2375_v7  ;;  %v2377_v11 = vsel %vm2314_vm2, %v7530_v5, %v7529_v26  ;;  %v7535_v10 = vld [vmem:[#allocation131_spill] sm:$0xff]  ;;  %v7536_v35 = vld [vmem:[#allocation138_spill] sm:$0xff]  ;;  %v7539_v31 = vld [vmem:[#allocation124_spill] sm:$0xff] }
 0x228   :  { %v2378_v17 = vsel %vm2316_vm3, %v7531_v56, %v2377_v11  ;;  %v2384_v51 = vsel %vm2314_vm2, %v7533_v3, %v7532_v41  ;;  %v2391_v50 = vsel %vm2314_vm2, %v7535_v10, %v7534_v33  ;;  %v7537_v53 = vld [vmem:[#allocation139_spill] sm:$0xff]  ;;  %v7540_v25 = vld [vmem:[#allocation132_spill] sm:$0xff]  ;;  %v7542_v61 = vld [vmem:[#allocation118_spill] sm:$0xff] }
 0x229   :  { %v2398_v36 = vsel %vm2314_vm2, %v7537_v53, %v7536_v35  ;;  %v2379_v15 = vsel %vm2318_vm4, %v7538_v20, %v2378_v17  ;;  %v2385_v18 = vsel %vm2316_vm3, %v7539_v31, %v2384_v51  ;;  %v2392_v48 = vsel %vm2316_vm3, %v7540_v25, %v2391_v50  ;;  %v7541_v24 = vld [vmem:[#allocation140_spill] sm:$0xff]  ;;  %v7543_v0 = vld [vmem:[#allocation125_spill] sm:$0xff]  ;;  %v7546_v21 = vld [vmem:[#allocation119_spill] sm:$0xff] }
 0x22a   :  { %v2399_v8 = vsel %vm2316_vm3, %v7541_v24, %v2398_v36  ;;  %v2380_v42 = vsel %vm2320_vm5, %v7542_v61, %v2379_v15  ;;  %v2386_v47 = vsel %vm2318_vm4, %v7543_v0, %v2385_v18  ;;  %v7544_v62 = vld [vmem:[#allocation133_spill] sm:$0xff]  ;;  %v7547_v55 = vld [vmem:[#allocation126_spill] sm:$0xff]  ;;  %v7550_v26 = vld [vmem:[#allocation120_spill] sm:$0xff] }
 0x22b   :  { %v2393_v40 = vsel %vm2318_vm4, %v7544_v62, %v2392_v48  ;;  %v7545_v16 = vld [vmem:[#allocation141_spill] sm:$0xff]  ;;  %v2381_v23 = vsel %vm2322_vm6, %v7546_v21, %v2380_v42  ;;  %v2387_v28 = vsel %vm2320_vm5, %v7547_v55, %v2386_v47  ;;  %v7548_v7 = vld [vmem:[#allocation134_spill] sm:$0xff]  ;;  %v7551_v11 = vld [vmem:[#allocation127_spill] sm:$0xff]  ;;  %v2419_v21 = vsel %vm2314_vm2, %v5816_v39, %v5811_v6 }
 0x22c   :  { %v2400_v19 = vsel %vm2318_vm4, %v7545_v16, %v2399_v8  ;;  %v2394_v2 = vsel %vm2320_vm5, %v7548_v7, %v2393_v40  ;;  %v7549_v12 = vld [vmem:[#allocation142_spill] sm:$0xff]  ;;  %v2382_v5 = vsel %vm2324_vm7, %v7550_v26, %v2381_v23  ;;  %v2388_v56 = vsel %vm2322_vm6, %v7551_v11, %v2387_v28  ;;  %v7552_v17 = vld [vmem:[#allocation135_spill] sm:$0xff]  ;;  %v7554_v33 = vld [vmem:[#allocation121_spill] sm:$0xff] }
 0x22d   :  { %v2401_v22 = vsel %vm2320_vm5, %v7549_v12, %v2400_v19  ;;  %v2395_v41 = vsel %vm2322_vm6, %v7552_v17, %v2394_v2  ;;  %v7553_v3 = vld [vmem:[#allocation143_spill] sm:$0xff]  ;;  %v2383_v10 = vsel %vm2326_vm8, %v7554_v33, %v2382_v5  ;;  %v7555_v50 = vld [vmem:[#allocation128_spill] sm:$0xff]  ;;  %v7558_v31 = vld [vmem:[#allocation129_spill] sm:$0xff]  ;;  %v2426_v23 = vsel %vm2314_vm2, %v5856_v29, %v5851_v4 }
 0x22e   :  { %v2402_v51 = vsel %vm2322_vm6, %v7553_v3, %v2401_v22  ;;  %v2389_v35 = vsel %vm2324_vm7, %v7555_v50, %v2388_v56  ;;  %v7556_v53 = vld [vmem:[#allocation136_spill] sm:$0xff]  ;;  %v7559_v25 = vld [vmem:[#allocation137_spill] sm:$0xff]  ;;  %v7561_v61 = vld [vmem:[#allocation146_spill] sm:$0xff]  ;;  %v2420_v12 = vsel %vm2316_vm3, %v5821_v9, %v2419_v21  ;;  %v2427_v22 = vsel %vm2316_vm3, %v5861_v46, %v2426_v23 }
 0x22f   :  { %v2396_v36 = vsel %vm2324_vm7, %v7556_v53, %v2395_v41  ;;  %v7557_v20 = vld [vmem:[#allocation144_spill] sm:$0xff]  ;;  %v2390_v18 = vsel %vm2326_vm8, %v7558_v31, %v2389_v35  ;;  %v7560_v24 = vld [vmem:[#allocation145_spill] sm:$0xff]  ;;  %v7562_v42 = vld [vmem:[#allocation147_spill] sm:$0xff]  ;;  %v2421_v4 = vsel %vm2318_vm4, %v5826_v27, %v2420_v12  ;;  %v2428_v29 = vsel %vm2318_vm4, %v5866_v38, %v2427_v22 }
 0x230   :  { %v2403_v15 = vsel %vm2324_vm7, %v7557_v20, %v2402_v51  ;;  %v2397_v48 = vsel %vm2326_vm8, %v7559_v25, %v2396_v36  ;;  %v2405_v0 = vsel %vm2314_vm2, %v7562_v42, %v7561_v61  ;;  %v7563_v47 = vld [vmem:[#allocation148_spill] sm:$0xff]  ;;  %v7564_v40 = vld [vmem:[#allocation78_spill] sm:$0xff]  ;;  %v7565_v16 = vld [vmem:[#allocation79_spill] sm:$0xff]  ;;  %v2422_v46 = vsel %vm2320_vm5, %v5831_v54, %v2421_v4 }
 0x231   :  { %v2404_v8 = vsel %vm2326_vm8, %v7560_v24, %v2403_v15  ;;  %v2406_v62 = vsel %vm2316_vm3, %v7563_v47, %v2405_v0  ;;  %v2412_v19 = vsel %vm2314_vm2, %v7565_v16, %v7564_v40  ;;  %v7566_v55 = vld [vmem:[#allocation2_spill] sm:$0xff]  ;;  %v7567_v7 = vld [vmem:[#allocation80_spill] sm:$0xff]  ;;  %v7568_v26 = vld [vmem:[#allocation3_spill] sm:$0xff]  ;;  %v2429_v17 = vsel %vm2320_vm5, %v5871_v37, %v2428_v29 }
 0x232   :  { %v2407_v28 = vsel %vm2318_vm4, %v7566_v55, %v2406_v62  ;;  %v2413_v2 = vsel %vm2316_vm3, %v7567_v7, %v2412_v19  ;;  %v7569_v6 = vld [vmem:[#allocation81_spill] sm:$0xff]  ;;  %v7570_v11 = vld [vmem:[#allocation4_spill] sm:$0xff]  ;;  %v2423_v38 = vsel %vm2322_vm6, %v5836_v60, %v2422_v46  ;;  %v2430_v51 = vsel %vm2322_vm6, %v5876_v34, %v2429_v17  ;;  %v7572_v33 = vld [vmem:[#allocation6_spill] sm:$0xff] }
 0x233   :  { %v2408_v5 = vsel %vm2320_vm5, %v7568_v26, %v2407_v28  ;;  %v2414_v39 = vsel %vm2318_vm4, %v7569_v6, %v2413_v2  ;;  %v7571_v41 = vld [vmem:[#allocation5_spill] sm:$0xff]  ;;  %v2424_v37 = vsel %vm2324_vm7, %v5841_v63, %v2423_v38  ;;  %v2431_v50 = vsel %vm2324_vm7, %v5881_v43, %v2430_v51  ;;  %v7573_v35 = vld [vmem:[#allocation82_spill] sm:$0xff]  ;;  %v7574_v53 = vld [vmem:[#allocation83_spill] sm:$0xff] }
 0x234   :  { %v2409_v56 = vsel %vm2322_vm6, %v7570_v11, %v2408_v5  ;;  %v2415_v9 = vsel %vm2320_vm5, %v5791_v14, %v2414_v39  ;;  %v2425_v60 = vsel %vm2326_vm8, %v7574_v53, %v2424_v37  ;;  %v2432_v34 = vsel %vm2326_vm8, %v5886_v32, %v2431_v50 }
 0x235   :  { %v2410_v3 = vsel %vm2324_vm7, %v7571_v41, %v2409_v56  ;;  %v2416_v27 = vsel %vm2322_vm6, %v5796_v49, %v2415_v9  ;;  %v2433_v36 = vpack.c.b16 %v5936_v13, %v5936_v13  ;;  %v2435_v63 = vpack.c.b16 %v5950_v52, %v5950_v52 }
 0x236   :  { %v2411_v14 = vsel %vm2326_vm8, %v7572_v33, %v2410_v3  ;;  %v2417_v54 = vsel %vm2324_vm7, %v5801_v45, %v2416_v27  ;;  %v2434_v45 = vpack.c.b16 %v5946_v1, %v5946_v1  ;;  %v2436_v43 = vpack.c.b16 %v5954_v59, %v5954_v59 }
 0x237   :  { %v2418_v49 = vsel %vm2326_vm8, %v7573_v35, %v2417_v54  ;;  %v2437_v20 = vpack.c.b16 %v6004_v44, %v6004_v44  ;;  %v2438_v15 = vpack.c.b16 %v6014_v30, %v6014_v30  ;;  %v2439_v32 = vpack.c.b16 %v6018_v57, %v6018_v57  ;;  %2466 = vst.msk [vmem:[%s6225_s1] sm:$0xf] %vm2465_vm9, %v2433_v36 }
 0x238   :  { %v2440_v13 = vpack.c.b16 %v6022_v58, %v6022_v58  ;;  %v2441_v31 = vpack.c.b16 %v2383_v10, %v2383_v10  ;;  %v2442_v1 = vpack.c.b16 %v2390_v18, %v2390_v18  ;;  %v2443_v25 = vpack.c.b16 %v2397_v48, %v2397_v48  ;;  %2467 = vst.msk [vmem:[%s6225_s1 + $0x4] sm:$0xf] %vm2465_vm9, %v2434_v45 }
 0x239   :  { %v2444_v24 = vpack.c.b16 %v2404_v8, %v2404_v8  ;;  %v2445_v52 = vpack.c.b16 %v2411_v14, %v2411_v14  ;;  %v2446_v61 = vpack.c.b16 %v2418_v49, %v2418_v49  ;;  %v2447_v42 = vpack.c.b16 %v2425_v60, %v2425_v60  ;;  %2468 = vst.msk [vmem:[%s6225_s1 + $0x8] sm:$0xf] %vm2465_vm9, %v2435_v63 }
 0x23a   :  { %v2448_v59 = vpack.c.b16 %v2432_v34, %v2432_v34  ;;  %2469 = vst.msk [vmem:[%s6225_s1 + $0xc] sm:$0xf] %vm2465_vm9, %v2436_v43  ;;  %2470 = vst.msk [vmem:[%s6225_s1 + $0x10] sm:$0xf] %vm2465_vm9, %v2437_v20 }
 0x23b   :  { %2471 = vst.msk [vmem:[%s6225_s1 + $0x14] sm:$0xf] %vm2465_vm9, %v2438_v15  ;;  %2472 = vst.msk [vmem:[%s6225_s1 + $0x18] sm:$0xf] %vm2465_vm9, %v2439_v32 }
 0x23c   :  { %2473 = vst.msk [vmem:[%s6225_s1 + $0x1c] sm:$0xf] %vm2465_vm9, %v2440_v13  ;;  %2474 = vst.msk [vmem:[%s6225_s1 + $0x20] sm:$0xf] %vm2465_vm9, %v2441_v31 }
 0x23d   :  { %2475 = vst.msk [vmem:[%s6225_s1 + $0x24] sm:$0xf] %vm2465_vm9, %v2442_v1  ;;  %2476 = vst.msk [vmem:[%s6225_s1 + $0x28] sm:$0xf] %vm2465_vm9, %v2443_v25 }
 0x23e   :  { %2477 = vst.msk [vmem:[%s6225_s1 + $0x2c] sm:$0xf] %vm2465_vm9, %v2444_v24  ;;  %2478 = vst.msk [vmem:[%s6225_s1 + $0x30] sm:$0xf] %vm2465_vm9, %v2445_v52 }
 0x23f   :  { %2479 = vst.msk [vmem:[%s6225_s1 + $0x34] sm:$0xf] %vm2465_vm9, %v2446_v61  ;;  %2480 = vst.msk [vmem:[%s6225_s1 + $0x38] sm:$0xf] %vm2465_vm9, %v2447_v42 }
 0x240   :  { %2481 = vst.msk [vmem:[%s6225_s1 + $0x3c] sm:$0xf] %vm2465_vm9, %v2448_v59 }

// kernel: _lambda_.23
= control target key start
LH: loop header
LB: loop body
LE: loop exit
PB: predicated region body
PF: predicated region fallthrough
CT: control target
= control target key end

     0   :  { %s1148_s12 = smov 0   ;;  %s1150_s13 = smov 0   ;;  %s1352_s0 = inlined_call_operand.vmem [shape: bf16[128,640], index: 0, kind: input, shape index: {}]   ;;  %s1353_s1 = inlined_call_operand.vmem [shape: bf16[640,64], index: 1, kind: input, shape index: {}]   ;;  %s1354_s2 = inlined_call_operand.vmem [shape: f32[1,64], index: 2, kind: input, shape index: {}]   ;;  %s1355_s3 = inlined_call_operand.vmem [shape: bf16[128,64], index: 3, kind: output, shape index: {}]  }
   0x1   :  { %s1152_s14 = smov 0   ;;  %s1154_s15 = smov 0  }
   0x2   :  { %s1156_s16 = smov 0  }
   0x3 LB: > { %s25_s17 = sadd.s32 1, %s1121_s15  ;;  %p48_p1 = scmp.ne.s32.totalorder %s1113_s13, %s1109_s12  ;;  %s1125_s16 = sphi %s1156_s16, %s13_s16   ;;  %s1121_s15 = sphi %s1154_s15, %s1359_s15   ;;  %s1117_s14 = sphi %s1152_s14, %s1358_s14   ;;  %s1113_s13 = sphi %s1150_s13, %s1357_s13   ;;  %s1109_s12 = sphi %s1148_s12, %s1356_s12  }
   0x4   : > { %p26_p0 = scmp.ge.s32.totalorder %s25_s17, 5  ;;  %p49_p2 = scmp.eq.s32.totalorder %s1125_s16, 0 }
   0x5   : > { %s41_s19 = sadd.s32 1, %s1113_s13  ;;  %p904_p5 = scmp.ge.s32.totalorder %s1125_s16, 5 }
   0x6   : > { %s1361_s17 = smov (%p26_p0, %s25_s17), 0  ;;  %p50_p3 = por %p49_p2, %p48_p1 }
   0x7   : > { %s37_s18 = ssub.s32 %s1121_s15, %s1361_s17  ;;  %162 = sbr.rel (%p904_p5) target bundleno = 26 (0x1a), region = 20 }
   0x8   : > { %p39_p4 = scmp.eq.s32.totalorder %s37_s18, 0 }
   0xa   : > { %s1183_s20 = scalar_select %p39_p4, %s1113_s13, %s41_s19  }
   0xc   : > { %165 = sbr.rel (!%p50_p3) target bundleno = 26 (0x1a), region = 24  ;;  %s167_s21 = sand.u32 (%p50_p3), 1, %s1113_s13  }
   0xd   : > { %s906_s22 = sshll.u32 (%p50_p3), %s1121_s15, 2  ;;  %s905_s23 = sshll.u32 (%p50_p3), %s167_s21, 6 }
   0xe   : > { %s1191_s26 = scalar_lea.vmem (%p50_p3), %s1352_s0, %s906_s22  ;;  %s169_s27 = scalar_lea.vmem (%p50_p3), [#allocation3], %s905_s23 }
   0xf   : > { %v191_v0 = vld [vmem:[%s1191_s26] sm:$0xf] (%p50_p3)  ;;  %v193_v1 = vld [vmem:[%s1191_s26 + $0x14] sm:$0xf] (%p50_p3)  ;;  %v195_v2 = vld [vmem:[%s1191_s26 + $0x28] sm:$0xf] (%p50_p3) }
  0x10   : > { %192 = vst [vmem:[%s169_s27] sm:$0xf] (%p50_p3), %v191_v0  ;;  %194 = vst [vmem:[%s169_s27 + $0x4] sm:$0xf] (%p50_p3), %v193_v1  ;;  %v197_v3 = vld [vmem:[%s1191_s26 + $0x3c] sm:$0xf] (%p50_p3) }
  0x11   : > { %v199_v4 = vld [vmem:[%s1191_s26 + $0x50] sm:$0xf]  ;;  %196 = vst [vmem:[%s169_s27 + $0x8] sm:$0xf] %v195_v2  ;;  %198 = vst [vmem:[%s169_s27 + $0xc] sm:$0xf] %v197_v3 }
  0x12   : > { %200 = vst [vmem:[%s169_s27 + $0x10] sm:$0xf] %v199_v4  ;;  %v201_v5 = vld [vmem:[%s1191_s26 + $0x64] sm:$0xf]  ;;  %v203_v6 = vld [vmem:[%s1191_s26 + $0x78] sm:$0xf] }
  0x13   : > { %v205_v7 = vld [vmem:[%s1191_s26 + $0x8c] sm:$0xf]  ;;  %202 = vst [vmem:[%s169_s27 + $0x14] sm:$0xf] %v201_v5  ;;  %204 = vst [vmem:[%s169_s27 + $0x18] sm:$0xf] %v203_v6 }
  0x14   : > { %206 = vst [vmem:[%s169_s27 + $0x1c] sm:$0xf] %v205_v7  ;;  %v207_v8 = vld [vmem:[%s1191_s26 + $0xa0] sm:$0xf]  ;;  %v209_v9 = vld [vmem:[%s1191_s26 + $0xb4] sm:$0xf] }
  0x15   : > { %v211_v10 = vld [vmem:[%s1191_s26 + $0xc8] sm:$0xf]  ;;  %208 = vst [vmem:[%s169_s27 + $0x20] sm:$0xf] %v207_v8  ;;  %210 = vst [vmem:[%s169_s27 + $0x24] sm:$0xf] %v209_v9 }
  0x16   : > { %212 = vst [vmem:[%s169_s27 + $0x28] sm:$0xf] %v211_v10  ;;  %v213_v11 = vld [vmem:[%s1191_s26 + $0xdc] sm:$0xf]  ;;  %v215_v12 = vld [vmem:[%s1191_s26 + $0xf0] sm:$0xf] }
  0x17   : > { %v217_v13 = vld [vmem:[%s1191_s26 + $0x104] sm:$0xf]  ;;  %214 = vst [vmem:[%s169_s27 + $0x2c] sm:$0xf] %v213_v11  ;;  %216 = vst [vmem:[%s169_s27 + $0x30] sm:$0xf] %v215_v12 }
  0x18   : > { %218 = vst [vmem:[%s169_s27 + $0x34] sm:$0xf] %v217_v13  ;;  %v219_v14 = vld [vmem:[%s1191_s26 + $0x118] sm:$0xf]  ;;  %v221_v15 = vld [vmem:[%s1191_s26 + $0x12c] sm:$0xf] }
  0x19   : > { %220 = vst [vmem:[%s169_s27 + $0x38] sm:$0xf] %v219_v14  ;;  %222 = vst [vmem:[%s169_s27 + $0x3c] sm:$0xf] %v221_v15 }
  0x1a PF: > { %p907_p6 = scmp.ge.s32.totalorder %s1125_s16, 1  ;;  %p289_p7 = scmp.lt.s32.totalorder %s1125_s16, 6 }
  0x1c   : > { %p290_p8 = pnand %p907_p6, %p289_p7 }
  0x1d   : > { %s296_s28 = sand.u32 (!%p290_p8), 1, %s1109_s12   ;;  %s909_s29 = sshll.u32 (!%p290_p8), %s1117_s14, 4 }
  0x1e   : > { %293 = sbr.rel (%p290_p8) target bundleno = 309 (0x135), region = 69  ;;  %s908_s30 = sshll.u32 (!%p290_p8), %s296_s28, 6 }
  0x1f   : > { %p335_p9 = scmp.lt.s32.totalorder (!%p290_p8), %s909_s29, 79  ;;  %s1218_s8 = scalar_lea.vmem (!%p290_p8), [#allocation3], %s908_s30 }
  0x20   : > { %p911_p10 = scmp.ne.s32.totalorder (!%p290_p8), %s1117_s14, 0 }
  0x23   : > { %s1363_s29 = smov (!%p335_p9, %s909_s29), 79  ;;  %359 = sbr.rel (%p911_p10) target bundleno = 49 (0x31), region = 77 }
  0x24   : > { %s910_s4 = sshll.u32 %s1363_s29, 2 }
  0x25   : > { %s1216_s7 = scalar_lea.vmem %s1353_s1, %s910_s4 }
  0x28   : > { %vm360_vm0 = vcmask 523264   ;;  %v1127_v16 = vmov 0.0  }
  0x29   : > { %361 = vst.msk [vmem:[#allocation2] sm:$0xff] %vm360_vm0, %v1127_v16  ;;  %362 = vst.msk [vmem:[#allocation2 + $0x8] sm:$0xff] %vm360_vm0, %v1127_v16 }
  0x2a   : > { %363 = vst.msk [vmem:[#allocation2 + $0x10] sm:$0xff] %vm360_vm0, %v1127_v16  ;;  %364 = vst.msk [vmem:[#allocation2 + $0x18] sm:$0xff] %vm360_vm0, %v1127_v16 }
  0x2b   : > { %365 = vst.msk [vmem:[#allocation2 + $0x20] sm:$0xff] %vm360_vm0, %v1127_v16  ;;  %366 = vst.msk [vmem:[#allocation2 + $0x28] sm:$0xff] %vm360_vm0, %v1127_v16 }
  0x2c   : > { %367 = vst.msk [vmem:[#allocation2 + $0x30] sm:$0xff] %vm360_vm0, %v1127_v16  ;;  %368 = vst.msk [vmem:[#allocation2 + $0x38] sm:$0xff] %vm360_vm0, %v1127_v16 }
  0x2d   : > { %369 = vst.msk [vmem:[#allocation2 + $0x40] sm:$0xff] %vm360_vm0, %v1127_v16  ;;  %370 = vst.msk [vmem:[#allocation2 + $0x48] sm:$0xff] %vm360_vm0, %v1127_v16 }
  0x2e   : > { %371 = vst.msk [vmem:[#allocation2 + $0x50] sm:$0xff] %vm360_vm0, %v1127_v16  ;;  %372 = vst.msk [vmem:[#allocation2 + $0x58] sm:$0xff] %vm360_vm0, %v1127_v16 }
  0x2f   : > { %373 = vst.msk [vmem:[#allocation2 + $0x60] sm:$0xff] %vm360_vm0, %v1127_v16  ;;  %374 = vst.msk [vmem:[#allocation2 + $0x68] sm:$0xff] %vm360_vm0, %v1127_v16 }
  0x30   : > { %375 = vst.msk [vmem:[#allocation2 + $0x70] sm:$0xff] %vm360_vm0, %v1127_v16  ;;  %376 = vst.msk [vmem:[#allocation2 + $0x78] sm:$0xff] %vm360_vm0, %v1127_v16 }
  0x31 PF: > { %v1071_v17 = vld [vmem:[%s1216_s7 + $0x38] sm:$0xff]   ;;  %v1072_v18 = vld [vmem:[%s1216_s7 + $0x30] sm:$0xff]   ;;  %v1073_v19 = vld [vmem:[%s1216_s7 + $0x28] sm:$0xff]   ;;  %vm634_vm1 = vcmask 523264   ;;  %p928_p11 = scmp.ne.s32.totalorder %s1117_s14, 4 }
  0x32   : > { %982 = vmatprep.subr.bf16.mxu0 %v1071_v17  ;;  %1014 = vmatprep.subr.bf16.mxu1 %v1071_v17  ;;  %v1074_v20 = vld [vmem:[%s1216_s7 + $0x20] sm:$0xff]   ;;  %v1075_v23 = vld [vmem:[%s1216_s7 + $0x18] sm:$0xff]   ;;  %v1076_v24 = vld [vmem:[%s1216_s7 + $0x10] sm:$0xff]  }
  0x33   : > { %983 = vmatpush3.bf16.msra.mxu0 %v1071_v17  ;;  %1022 = vmatpush3.bf16.msra.mxu1 %v1071_v17  ;;  %v1079_v21 = vld [vmem:[%s1218_s8] sm:$0xff]   ;;  %v1077_v25 = vld [vmem:[%s1216_s7 + $0x8] sm:$0xff]   ;;  %v1083_v29 = vld [vmem:[%s1218_s8 + $0x10] sm:$0xff]  }
  0x34   : > { %984 = vmatprep.subr.bf16.mxu0 %v1072_v18  ;;  %1015 = vmatprep.subr.bf16.mxu1 %v1072_v18  ;;  %v1080_v22 = vld [vmem:[%s1218_s8 + $0x20] sm:$0xff]   ;;  %v1081_v27 = vld [vmem:[%s1218_s8 + $0x8] sm:$0xff]   ;;  %v1084_v30 = vld [vmem:[%s1218_s8 + $0x30] sm:$0xff]  }
  0x35   : > { %998 = vmatprep.mubr.bf16.mxu0 %v1079_v21  ;;  %1006 = vmatprep.mubr.bf16.mxu1 %v1080_v22  ;;  %v1078_v26 = vld [vmem:[%s1216_s7] sm:$0xff]   ;;  %v1082_v28 = vld [vmem:[%s1218_s8 + $0x28] sm:$0xff]   ;;  %v1085_v31 = vld [vmem:[%s1218_s8 + $0x18] sm:$0xff]  }
  0x36   : > { %v1086_v32 = vld [vmem:[%s1218_s8 + $0x38] sm:$0xff]   ;;  %v379_v33 = vld [vmem:[#allocation2 + $0x10] sm:$0xff]  ;;  %v377_v37 = vld [vmem:[#allocation2] sm:$0xff] }
  0x37   : > { %985 = vmatpush3.bf16.msra.mxu0 %v1072_v18  ;;  %1023 = vmatpush3.bf16.msra.mxu1 %v1072_v18  ;;  %v387_v34 = vld [vmem:[#allocation2 + $0x50] sm:$0xff]  ;;  %v385_v38 = vld [vmem:[#allocation2 + $0x40] sm:$0xff]  ;;  %v380_v43 = vld [vmem:[#allocation2 + $0x18] sm:$0xff] }
  0x38   : > { %986 = vmatprep.subr.bf16.mxu0 %v1073_v19  ;;  %1016 = vmatprep.subr.bf16.mxu1 %v1073_v19  ;;  %v388_v44 = vld [vmem:[#allocation2 + $0x58] sm:$0xff]  ;;  %v378_v49 = vld [vmem:[#allocation2 + $0x8] sm:$0xff]  ;;  %v383_v55 = vld [vmem:[#allocation2 + $0x30] sm:$0xff] }
  0x39   : > { %v386_v50 = vld [vmem:[#allocation2 + $0x48] sm:$0xff]  ;;  %v391_v56 = vld [vmem:[#allocation2 + $0x70] sm:$0xff]  ;;  %v381_v61 = vld [vmem:[#allocation2 + $0x20] sm:$0xff] }
  0x3a   : > { %v389_v62 = vld [vmem:[#allocation2 + $0x60] sm:$0xff]  ;;  %v384_v3 = vld [vmem:[#allocation2 + $0x38] sm:$0xff]  ;;  %v382_v9 = vld [vmem:[#allocation2 + $0x28] sm:$0xff] }
  0x3b   : > { %987 = vmatpush3.bf16.msra.mxu0 %v1073_v19  ;;  %1024 = vmatpush3.bf16.msra.mxu1 %v1073_v19  ;;  %v392_v4 = vld [vmem:[#allocation2 + $0x78] sm:$0xff]  ;;  %v390_v10 = vld [vmem:[#allocation2 + $0x68] sm:$0xff] }
  0x3c   : > { %988 = vmatprep.subr.bf16.mxu0 %v1074_v20  ;;  %1017 = vmatprep.subr.bf16.mxu1 %v1074_v20 }
  0x3f   : > { %989 = vmatpush3.bf16.msra.mxu0 %v1074_v20  ;;  %1025 = vmatpush3.bf16.msra.mxu1 %v1074_v20 }
  0x40   : > { %990 = vmatprep.subr.bf16.mxu0 %v1075_v23  ;;  %1018 = vmatprep.subr.bf16.mxu1 %v1075_v23 }
  0x43   : > { %991 = vmatpush3.bf16.msra.mxu0 %v1075_v23  ;;  %1026 = vmatpush3.bf16.msra.mxu1 %v1075_v23 }
  0x44   : > { %992 = vmatprep.subr.bf16.mxu0 %v1076_v24  ;;  %1019 = vmatprep.subr.bf16.mxu1 %v1076_v24 }
  0x47   : > { %993 = vmatpush3.bf16.msra.mxu0 %v1076_v24  ;;  %1027 = vmatpush3.bf16.msra.mxu1 %v1076_v24 }
  0x48   : > { %994 = vmatprep.subr.bf16.mxu0 %v1077_v25  ;;  %1020 = vmatprep.subr.bf16.mxu1 %v1077_v25 }
  0x4b   : > { %995 = vmatpush3.bf16.msra.mxu0 %v1077_v25  ;;  %1028 = vmatpush3.bf16.msra.mxu1 %v1077_v25 }
  0x4c   : > { %996 = vmatprep.subr.bf16.mxu0 %v1078_v26  ;;  %1021 = vmatprep.subr.bf16.mxu1 %v1078_v26 }
  0x4f   : > { %997 = vmatpush3.bf16.msra.mxu0 %v1078_v26  ;;  %1029 = vmatpush3.bf16.msra.mxu1 %v1078_v26 }
  0x52   : > { %999 = vmatmul.mubr.bf16.vlgmr.msra.gmra.mxu0 %v1081_v27  ;;  %1007 = vmatmul.mubr.bf16.vlgmr.msra.gmra.mxu1 %v1082_v28 }
  0x53   : > { %1002 = vmatprep.mubr.bf16.mxu0 %v1083_v29  ;;  %1010 = vmatprep.mubr.bf16.mxu1 %v1084_v30 }
  0x5a   : > { %1003 = vmatmul.mubr.bf16.gmra.mxu0 %v1085_v31  ;;  %1011 = vmatmul.mubr.bf16.gmra.mxu1 %v1086_v32 }
 0x112   : > { %v1000_v35 = vpop.f32.mrf.mxu0  ;;  %v1008_v36 = vpop.f32.mrf.mxu1 }
 0x113   : > { %v620_v39 = vadd.f32 %v1000_v35, %v379_v33  ;;  %v628_v40 = vadd.f32 %v1008_v36, %v387_v34 }
 0x114   : > { %v555_v41 = vpop.f32.mrf.mxu0  ;;  %v587_v42 = vpop.f32.mrf.mxu1 }
 0x115   : > { %637 = vst.msk [vmem:[#allocation2 + $0x10] sm:$0xff] %vm634_vm1, %v620_v39  ;;  %645 = vst.msk [vmem:[#allocation2 + $0x50] sm:$0xff] %vm634_vm1, %v628_v40  ;;  %v618_v45 = vadd.f32 %v555_v41, %v377_v37  ;;  %v626_v46 = vadd.f32 %v587_v42, %v385_v38 }
 0x116   : > { %v1001_v47 = vpop.f32.mrf.mxu0  ;;  %v1009_v48 = vpop.f32.mrf.mxu1 }
 0x117   : > { %635 = vst.msk [vmem:[#allocation2] sm:$0xff] %vm634_vm1, %v618_v45  ;;  %643 = vst.msk [vmem:[#allocation2 + $0x40] sm:$0xff] %vm634_vm1, %v626_v46  ;;  %v621_v51 = vadd.f32 %v1001_v47, %v380_v43  ;;  %v629_v52 = vadd.f32 %v1009_v48, %v388_v44 }
 0x118   : > { %v558_v53 = vpop.f32.mrf.mxu0  ;;  %v590_v54 = vpop.f32.mrf.mxu1 }
 0x119   : > { %638 = vst.msk [vmem:[#allocation2 + $0x18] sm:$0xff] %vm634_vm1, %v621_v51  ;;  %646 = vst.msk [vmem:[#allocation2 + $0x58] sm:$0xff] %vm634_vm1, %v629_v52  ;;  %v619_v57 = vadd.f32 %v558_v53, %v378_v49  ;;  %v627_v58 = vadd.f32 %v590_v54, %v386_v50 }
 0x11a   : > { %v1004_v59 = vpop.f32.mrf.mxu0  ;;  %v1012_v60 = vpop.f32.mrf.mxu1 }
 0x11b   : > { %636 = vst.msk [vmem:[#allocation2 + $0x8] sm:$0xff] %vm634_vm1, %v619_v57  ;;  %644 = vst.msk [vmem:[#allocation2 + $0x48] sm:$0xff] %vm634_vm1, %v627_v58  ;;  %v624_v63 = vadd.f32 %v1004_v59, %v383_v55  ;;  %v632_v0 = vadd.f32 %v1012_v60, %v391_v56 }
 0x11c   : > { %v571_v1 = vpop.f32.mrf.mxu0  ;;  %v603_v2 = vpop.f32.mrf.mxu1 }
 0x11d   : > { %641 = vst.msk [vmem:[#allocation2 + $0x30] sm:$0xff] %vm634_vm1, %v624_v63  ;;  %649 = vst.msk [vmem:[#allocation2 + $0x70] sm:$0xff] %vm634_vm1, %v632_v0  ;;  %v622_v5 = vadd.f32 %v571_v1, %v381_v61  ;;  %v630_v6 = vadd.f32 %v603_v2, %v389_v62 }
 0x11e   : > { %v1005_v7 = vpop.f32.mrf.mxu0  ;;  %v1013_v8 = vpop.f32.mrf.mxu1 }
 0x11f   : > { %639 = vst.msk [vmem:[#allocation2 + $0x20] sm:$0xff] %vm634_vm1, %v622_v5  ;;  %647 = vst.msk [vmem:[#allocation2 + $0x60] sm:$0xff] %vm634_vm1, %v630_v6  ;;  %v625_v11 = vadd.f32 %v1005_v7, %v384_v3  ;;  %v633_v12 = vadd.f32 %v1013_v8, %v392_v4  ;;  %654 = sbr.rel (%p928_p11) target bundleno = 309 (0x135), region = 81 }
 0x120   : > { %v574_v13 = vpop.f32.mrf.mxu0  ;;  %v606_v14 = vpop.f32.mrf.mxu1 }
 0x121   : > { %642 = vst.msk [vmem:[#allocation2 + $0x38] sm:$0xff] %vm634_vm1, %v625_v11  ;;  %650 = vst.msk [vmem:[#allocation2 + $0x78] sm:$0xff] %vm634_vm1, %v633_v12  ;;  %v623_v15 = vadd.f32 %v574_v13, %v382_v9  ;;  %v631_v16 = vadd.f32 %v606_v14, %v390_v10 }
 0x123   : > { %640 = vst.msk [vmem:[#allocation2 + $0x28] sm:$0xff] %vm634_vm1, %v623_v15  ;;  %648 = vst.msk [vmem:[#allocation2 + $0x68] sm:$0xff] %vm634_vm1, %v631_v16 }
 0x124   : > { %v655_v17 = vld [vmem:[#allocation2] sm:$0xff]  ;;  %v656_v19 = vld [vmem:[#allocation2 + $0x8] sm:$0xff]  ;;  %v657_v22 = vld [vmem:[#allocation2 + $0x10] sm:$0xff]  ;;  %vm774_vm2 = vcmask 519168  }
 0x125   : > { %v929_v18 = vld [vmem:[%s1354_s2] ss:$0 sm:$0xff]  ;;  %v658_v23 = vld [vmem:[#allocation2 + $0x18] sm:$0xff]  ;;  %v661_v29 = vld [vmem:[#allocation2 + $0x30] sm:$0xff] }
 0x126   : > { %v678_v20 = vadd.f32 %v929_v18, %v655_v17  ;;  %v679_v21 = vadd.f32 %v929_v18, %v656_v19  ;;  %v659_v24 = vld [vmem:[#allocation2 + $0x20] sm:$0xff]  ;;  %v680_v25 = vadd.f32 %v929_v18, %v657_v22  ;;  %v681_v26 = vadd.f32 %v929_v18, %v658_v23  ;;  %v664_v40 = vld [vmem:[#allocation2 + $0x48] sm:$0xff]  ;;  %v665_v45 = vld [vmem:[#allocation2 + $0x50] sm:$0xff] }
 0x127   : > { %v682_v27 = vadd.f32 %v929_v18, %v659_v24  ;;  %v684_v34 = vadd.f32 %v929_v18, %v661_v29  ;;  %v663_v39 = vld [vmem:[#allocation2 + $0x40] sm:$0xff]  ;;  %v666_v46 = vld [vmem:[#allocation2 + $0x58] sm:$0xff]  ;;  %v669_v53 = vld [vmem:[#allocation2 + $0x70] sm:$0xff]  ;;  %v687_v57 = vadd.f32 %v929_v18, %v664_v40  ;;  %v688_v60 = vadd.f32 %v929_v18, %v665_v45 }
 0x128   : > { %v662_v30 = vld [vmem:[#allocation2 + $0x38] sm:$0xff]  ;;  %v694_v31 = vmax.f32 %v678_v20, 0.0  ;;  %v695_v32 = vmax.f32 %v679_v21, 0.0  ;;  %v696_v35 = vmax.f32 %v680_v25, 0.0  ;;  %v697_v36 = vmax.f32 %v681_v26, 0.0  ;;  %v667_v47 = vld [vmem:[#allocation2 + $0x60] sm:$0xff] }
 0x129   : > { %v698_v37 = vmax.f32 %v682_v27, 0.0  ;;  %v685_v38 = vadd.f32 %v929_v18, %v662_v30  ;;  %v700_v44 = vmax.f32 %v684_v34, 0.0  ;;  %v686_v56 = vadd.f32 %v929_v18, %v663_v39  ;;  %v670_v58 = vld [vmem:[#allocation2 + $0x78] sm:$0xff] }
 0x12a   : > { %v660_v28 = vld [vmem:[#allocation2 + $0x28] sm:$0xff]  ;;  %v950_v41 = vpack.c.bf16 %v694_v31, %v694_v31  ;;  %v951_v42 = vpack.c.bf16 %v695_v32, %v695_v32  ;;  %v952_v48 = vpack.c.bf16 %v696_v35, %v696_v35  ;;  %v953_v49 = vpack.c.bf16 %v697_v36, %v697_v36 }
 0x12b   : > { %v683_v33 = vadd.f32 %v929_v18, %v660_v28  ;;  %v954_v50 = vpack.c.bf16 %v698_v37, %v698_v37  ;;  %v701_v51 = vmax.f32 %v685_v38, 0.0  ;;  %v668_v52 = vld [vmem:[#allocation2 + $0x68] sm:$0xff]  ;;  %v956_v55 = vpack.c.bf16 %v700_v44, %v700_v44 }
 0x12c   : > { %775 = vst.msk [vmem:[%s1355_s3] sm:$0xf] %vm774_vm2, %v950_v41  ;;  %776 = vst.msk [vmem:[%s1355_s3 + $0x4] sm:$0xf] %vm774_vm2, %v951_v42  ;;  %v689_v61 = vadd.f32 %v929_v18, %v666_v46  ;;  %v690_v62 = vadd.f32 %v929_v18, %v667_v47  ;;  %v702_v63 = vmax.f32 %v686_v56, 0.0  ;;  %v703_v0 = vmax.f32 %v687_v57, 0.0 }
 0x12d   : > { %v699_v43 = vmax.f32 %v683_v33, 0.0  ;;  %777 = vst.msk [vmem:[%s1355_s3 + $0x8] sm:$0xf] %vm774_vm2, %v952_v48  ;;  %778 = vst.msk [vmem:[%s1355_s3 + $0xc] sm:$0xf] %vm774_vm2, %v953_v49  ;;  %v957_v59 = vpack.c.bf16 %v701_v51, %v701_v51  ;;  %v691_v1 = vadd.f32 %v929_v18, %v668_v52  ;;  %v692_v2 = vadd.f32 %v929_v18, %v669_v53 }
 0x12e   : > { %779 = vst.msk [vmem:[%s1355_s3 + $0x10] sm:$0xf] %vm774_vm2, %v954_v50  ;;  %781 = vst.msk [vmem:[%s1355_s3 + $0x18] sm:$0xf] %vm774_vm2, %v956_v55  ;;  %v704_v3 = vmax.f32 %v688_v60, 0.0  ;;  %v705_v4 = vmax.f32 %v689_v61, 0.0  ;;  %v693_v6 = vadd.f32 %v929_v18, %v670_v58  ;;  %v958_v7 = vpack.c.bf16 %v702_v63, %v702_v63 }
 0x12f   : > { %v955_v54 = vpack.c.bf16 %v699_v43, %v699_v43  ;;  %782 = vst.msk [vmem:[%s1355_s3 + $0x1c] sm:$0xf] %vm774_vm2, %v957_v59  ;;  %v706_v5 = vmax.f32 %v690_v62, 0.0  ;;  %v959_v8 = vpack.c.bf16 %v703_v0, %v703_v0  ;;  %v707_v9 = vmax.f32 %v691_v1, 0.0 }
 0x130   : > { %v708_v10 = vmax.f32 %v692_v2, 0.0  ;;  %v960_v11 = vpack.c.bf16 %v704_v3, %v704_v3  ;;  %v961_v12 = vpack.c.bf16 %v705_v4, %v705_v4  ;;  %v709_v14 = vmax.f32 %v693_v6, 0.0  ;;  %783 = vst.msk [vmem:[%s1355_s3 + $0x20] sm:$0xf] %vm774_vm2, %v958_v7 }
 0x131   : > { %780 = vst.msk [vmem:[%s1355_s3 + $0x14] sm:$0xf] %vm774_vm2, %v955_v54  ;;  %v962_v13 = vpack.c.bf16 %v706_v5, %v706_v5  ;;  %784 = vst.msk [vmem:[%s1355_s3 + $0x24] sm:$0xf] %vm774_vm2, %v959_v8  ;;  %v963_v15 = vpack.c.bf16 %v707_v9, %v707_v9 }
 0x132   : > { %v964_v16 = vpack.c.bf16 %v708_v10, %v708_v10  ;;  %785 = vst.msk [vmem:[%s1355_s3 + $0x28] sm:$0xf] %vm774_vm2, %v960_v11  ;;  %786 = vst.msk [vmem:[%s1355_s3 + $0x2c] sm:$0xf] %vm774_vm2, %v961_v12  ;;  %v965_v17 = vpack.c.bf16 %v709_v14, %v709_v14 }
 0x133   : > { %787 = vst.msk [vmem:[%s1355_s3 + $0x30] sm:$0xf] %vm774_vm2, %v962_v13  ;;  %788 = vst.msk [vmem:[%s1355_s3 + $0x34] sm:$0xf] %vm774_vm2, %v963_v15 }
 0x134   : > { %789 = vst.msk [vmem:[%s1355_s3 + $0x38] sm:$0xf] %vm774_vm2, %v964_v16  ;;  %790 = vst.msk [vmem:[%s1355_s3 + $0x3c] sm:$0xf] %vm774_vm2, %v965_v17 }
 0x135 PF: > { %s13_s16 = sadd.s32 1, %s1125_s16   ;;  %s1356_s12 = smov %s1113_s13 }
 0x136   : > { %p10_p12 = scmp.ge.s32.totalorder %s13_s16, 7   ;;  %s1357_s13 = smov %s1183_s20 }
 0x137   : > { %s1358_s14 = smov %s1121_s15  ;;  %s1359_s15 = smov %s1361_s17 }
 0x138   :  { %12 = sbr.rel (!%p10_p12) target bundleno = 3 (0x3), region = 122 }

// kernel: _lambda_.24
= control target key start
LH: loop header
LB: loop body
LE: loop exit
PB: predicated region body
PF: predicated region fallthrough
CT: control target
= control target key end

     0   :  { %s1319_s15 = smov 0   ;;  %s1321_s16 = smov 0   ;;  %s1565_s0 = inlined_call_operand.vmem [shape: bf16[128,640], index: 0, kind: input, shape index: {}]   ;;  %s1566_s1 = inlined_call_operand.vmem [shape: bf16[640,64], index: 1, kind: input, shape index: {}]   ;;  %s1567_s2 = inlined_call_operand.vmem [shape: f32[1,64], index: 2, kind: input, shape index: {}]   ;;  %s1568_s3 = inlined_call_operand.vmem [shape: bf16[128,64], index: 3, kind: input, shape index: {}]   ;;  %s1569_s4 = inlined_call_operand.vmem [shape: bf16[128,64], index: 4, kind: output, shape index: {}]  }
   0x1   :  { %s1323_s17 = smov 0   ;;  %s1325_s18 = smov 0  }
   0x2   :  { %s1327_s19 = smov 0  }
   0x3 LB: > { %s26_s20 = sadd.s32 1, %s1287_s18  ;;  %p49_p1 = scmp.ne.s32.totalorder %s1279_s16, %s1275_s15  ;;  %s1291_s19 = sphi %s1327_s19, %s14_s19   ;;  %s1287_s18 = sphi %s1325_s18, %s1573_s18   ;;  %s1283_s17 = sphi %s1323_s17, %s1572_s17   ;;  %s1279_s16 = sphi %s1321_s16, %s1571_s16   ;;  %s1275_s15 = sphi %s1319_s15, %s1570_s15  }
   0x4   : > { %p27_p0 = scmp.ge.s32.totalorder %s26_s20, 5  ;;  %p50_p2 = scmp.eq.s32.totalorder %s1291_s19, 0 }
   0x5   : > { %s42_s22 = sadd.s32 1, %s1279_s16  ;;  %p1031_p5 = scmp.ge.s32.totalorder %s1291_s19, 5 }
   0x6   : > { %s1575_s20 = smov (%p27_p0, %s26_s20), 0  ;;  %p51_p3 = por %p50_p2, %p49_p1 }
   0x7   : > { %s38_s21 = ssub.s32 %s1287_s18, %s1575_s20  ;;  %203 = sbr.rel (%p1031_p5) target bundleno = 26 (0x1a), region = 24 }
   0x8   : > { %p40_p4 = scmp.eq.s32.totalorder %s38_s21, 0 }
   0xa   : > { %s1354_s23 = scalar_select %p40_p4, %s1279_s16, %s42_s22  }
   0xc   : > { %206 = sbr.rel (!%p51_p3) target bundleno = 26 (0x1a), region = 28  ;;  %s208_s24 = sand.u32 (%p51_p3), 1, %s1279_s16  }
   0xd   : > { %s1033_s25 = sshll.u32 (%p51_p3), %s1287_s18, 2  ;;  %s1032_s26 = sshll.u32 (%p51_p3), %s208_s24, 6 }
   0xe   : > { %s1362_s29 = scalar_lea.vmem (%p51_p3), %s1565_s0, %s1033_s25  ;;  %s210_s30 = scalar_lea.vmem (%p51_p3), [#allocation3], %s1032_s26 }
   0xf   : > { %v232_v0 = vld [vmem:[%s1362_s29] sm:$0xf] (%p51_p3)  ;;  %v234_v1 = vld [vmem:[%s1362_s29 + $0x14] sm:$0xf] (%p51_p3)  ;;  %v236_v2 = vld [vmem:[%s1362_s29 + $0x28] sm:$0xf] (%p51_p3) }
  0x10   : > { %233 = vst [vmem:[%s210_s30] sm:$0xf] (%p51_p3), %v232_v0  ;;  %235 = vst [vmem:[%s210_s30 + $0x4] sm:$0xf] (%p51_p3), %v234_v1  ;;  %v238_v3 = vld [vmem:[%s1362_s29 + $0x3c] sm:$0xf] (%p51_p3) }
  0x11   : > { %v240_v4 = vld [vmem:[%s1362_s29 + $0x50] sm:$0xf]  ;;  %237 = vst [vmem:[%s210_s30 + $0x8] sm:$0xf] %v236_v2  ;;  %239 = vst [vmem:[%s210_s30 + $0xc] sm:$0xf] %v238_v3 }
  0x12   : > { %241 = vst [vmem:[%s210_s30 + $0x10] sm:$0xf] %v240_v4  ;;  %v242_v5 = vld [vmem:[%s1362_s29 + $0x64] sm:$0xf]  ;;  %v244_v6 = vld [vmem:[%s1362_s29 + $0x78] sm:$0xf] }
  0x13   : > { %v246_v7 = vld [vmem:[%s1362_s29 + $0x8c] sm:$0xf]  ;;  %243 = vst [vmem:[%s210_s30 + $0x14] sm:$0xf] %v242_v5  ;;  %245 = vst [vmem:[%s210_s30 + $0x18] sm:$0xf] %v244_v6 }
  0x14   : > { %247 = vst [vmem:[%s210_s30 + $0x1c] sm:$0xf] %v246_v7  ;;  %v248_v8 = vld [vmem:[%s1362_s29 + $0xa0] sm:$0xf]  ;;  %v250_v9 = vld [vmem:[%s1362_s29 + $0xb4] sm:$0xf] }
  0x15   : > { %v252_v10 = vld [vmem:[%s1362_s29 + $0xc8] sm:$0xf]  ;;  %249 = vst [vmem:[%s210_s30 + $0x20] sm:$0xf] %v248_v8  ;;  %251 = vst [vmem:[%s210_s30 + $0x24] sm:$0xf] %v250_v9 }
  0x16   : > { %253 = vst [vmem:[%s210_s30 + $0x28] sm:$0xf] %v252_v10  ;;  %v254_v11 = vld [vmem:[%s1362_s29 + $0xdc] sm:$0xf]  ;;  %v256_v12 = vld [vmem:[%s1362_s29 + $0xf0] sm:$0xf] }
  0x17   : > { %v258_v13 = vld [vmem:[%s1362_s29 + $0x104] sm:$0xf]  ;;  %255 = vst [vmem:[%s210_s30 + $0x2c] sm:$0xf] %v254_v11  ;;  %257 = vst [vmem:[%s210_s30 + $0x30] sm:$0xf] %v256_v12 }
  0x18   : > { %259 = vst [vmem:[%s210_s30 + $0x34] sm:$0xf] %v258_v13  ;;  %v260_v14 = vld [vmem:[%s1362_s29 + $0x118] sm:$0xf]  ;;  %v262_v15 = vld [vmem:[%s1362_s29 + $0x12c] sm:$0xf] }
  0x19   : > { %261 = vst [vmem:[%s210_s30 + $0x38] sm:$0xf] %v260_v14  ;;  %263 = vst [vmem:[%s210_s30 + $0x3c] sm:$0xf] %v262_v15 }
  0x1a PF: > { %p1034_p6 = scmp.ge.s32.totalorder %s1291_s19, 1  ;;  %p330_p7 = scmp.lt.s32.totalorder %s1291_s19, 6 }
  0x1c   : > { %p331_p8 = pnand %p1034_p6, %p330_p7 }
  0x1d   : > { %s337_s5 = sand.u32 (!%p331_p8), 1, %s1275_s15   ;;  %s1036_s6 = sshll.u32 (!%p331_p8), %s1283_s17, 4 }
  0x1e   : > { %334 = sbr.rel (%p331_p8) target bundleno = 320 (0x140), region = 73  ;;  %s1035_s7 = sshll.u32 (!%p331_p8), %s337_s5, 6 }
  0x1f   : > { %p386_p9 = scmp.lt.s32.totalorder (!%p331_p8), %s1036_s6, 79  ;;  %s1389_s12 = scalar_lea.vmem (!%p331_p8), [#allocation3], %s1035_s7 }
  0x20   : > { %p1038_p10 = scmp.ne.s32.totalorder (!%p331_p8), %s1283_s17, 0 }
  0x23   : > { %s1577_s6 = smov (!%p386_p9, %s1036_s6), 79  ;;  %419 = sbr.rel (%p1038_p10) target bundleno = 49 (0x31), region = 81 }
  0x24   : > { %s1037_s8 = sshll.u32 %s1577_s6, 2 }
  0x25   : > { %s1387_s11 = scalar_lea.vmem %s1566_s1, %s1037_s8 }
  0x28   : > { %vm420_vm0 = vcmask 523264   ;;  %v1293_v16 = vmov 0.0  }
  0x29   : > { %421 = vst.msk [vmem:[#allocation2] sm:$0xff] %vm420_vm0, %v1293_v16  ;;  %422 = vst.msk [vmem:[#allocation2 + $0x8] sm:$0xff] %vm420_vm0, %v1293_v16 }
  0x2a   : > { %423 = vst.msk [vmem:[#allocation2 + $0x10] sm:$0xff] %vm420_vm0, %v1293_v16  ;;  %424 = vst.msk [vmem:[#allocation2 + $0x18] sm:$0xff] %vm420_vm0, %v1293_v16 }
  0x2b   : > { %425 = vst.msk [vmem:[#allocation2 + $0x20] sm:$0xff] %vm420_vm0, %v1293_v16  ;;  %426 = vst.msk [vmem:[#allocation2 + $0x28] sm:$0xff] %vm420_vm0, %v1293_v16 }
  0x2c   : > { %427 = vst.msk [vmem:[#allocation2 + $0x30] sm:$0xff] %vm420_vm0, %v1293_v16  ;;  %428 = vst.msk [vmem:[#allocation2 + $0x38] sm:$0xff] %vm420_vm0, %v1293_v16 }
  0x2d   : > { %429 = vst.msk [vmem:[#allocation2 + $0x40] sm:$0xff] %vm420_vm0, %v1293_v16  ;;  %430 = vst.msk [vmem:[#allocation2 + $0x48] sm:$0xff] %vm420_vm0, %v1293_v16 }
  0x2e   : > { %431 = vst.msk [vmem:[#allocation2 + $0x50] sm:$0xff] %vm420_vm0, %v1293_v16  ;;  %432 = vst.msk [vmem:[#allocation2 + $0x58] sm:$0xff] %vm420_vm0, %v1293_v16 }
  0x2f   : > { %433 = vst.msk [vmem:[#allocation2 + $0x60] sm:$0xff] %vm420_vm0, %v1293_v16  ;;  %434 = vst.msk [vmem:[#allocation2 + $0x68] sm:$0xff] %vm420_vm0, %v1293_v16 }
  0x30   : > { %435 = vst.msk [vmem:[#allocation2 + $0x70] sm:$0xff] %vm420_vm0, %v1293_v16  ;;  %436 = vst.msk [vmem:[#allocation2 + $0x78] sm:$0xff] %vm420_vm0, %v1293_v16 }
  0x31 PF: > { %v1237_v17 = vld [vmem:[%s1387_s11 + $0x38] sm:$0xff]   ;;  %v1238_v18 = vld [vmem:[%s1387_s11 + $0x30] sm:$0xff]   ;;  %v1239_v19 = vld [vmem:[%s1387_s11 + $0x28] sm:$0xff]   ;;  %vm694_vm1 = vcmask 523264   ;;  %p1055_p11 = scmp.ne.s32.totalorder %s1283_s17, 4 }
  0x32   : > { %1148 = vmatprep.subr.bf16.mxu0 %v1237_v17  ;;  %1180 = vmatprep.subr.bf16.mxu1 %v1237_v17  ;;  %v1240_v20 = vld [vmem:[%s1387_s11 + $0x20] sm:$0xff]   ;;  %v1241_v23 = vld [vmem:[%s1387_s11 + $0x18] sm:$0xff]   ;;  %v1242_v24 = vld [vmem:[%s1387_s11 + $0x10] sm:$0xff]  }
  0x33   : > { %1149 = vmatpush3.bf16.msra.mxu0 %v1237_v17  ;;  %1188 = vmatpush3.bf16.msra.mxu1 %v1237_v17  ;;  %v1245_v21 = vld [vmem:[%s1389_s12] sm:$0xff]   ;;  %v1243_v25 = vld [vmem:[%s1387_s11 + $0x8] sm:$0xff]   ;;  %v1249_v29 = vld [vmem:[%s1389_s12 + $0x10] sm:$0xff]  }
  0x34   : > { %1150 = vmatprep.subr.bf16.mxu0 %v1238_v18  ;;  %1181 = vmatprep.subr.bf16.mxu1 %v1238_v18  ;;  %v1246_v22 = vld [vmem:[%s1389_s12 + $0x20] sm:$0xff]   ;;  %v1247_v27 = vld [vmem:[%s1389_s12 + $0x8] sm:$0xff]   ;;  %v1250_v30 = vld [vmem:[%s1389_s12 + $0x30] sm:$0xff]  }
  0x35   : > { %1164 = vmatprep.mubr.bf16.mxu0 %v1245_v21  ;;  %1172 = vmatprep.mubr.bf16.mxu1 %v1246_v22  ;;  %v1244_v26 = vld [vmem:[%s1387_s11] sm:$0xff]   ;;  %v1248_v28 = vld [vmem:[%s1389_s12 + $0x28] sm:$0xff]   ;;  %v1251_v31 = vld [vmem:[%s1389_s12 + $0x18] sm:$0xff]  }
  0x36   : > { %v1252_v32 = vld [vmem:[%s1389_s12 + $0x38] sm:$0xff]   ;;  %v439_v33 = vld [vmem:[#allocation2 + $0x10] sm:$0xff]  ;;  %v437_v37 = vld [vmem:[#allocation2] sm:$0xff] }
  0x37   : > { %1151 = vmatpush3.bf16.msra.mxu0 %v1238_v18  ;;  %1189 = vmatpush3.bf16.msra.mxu1 %v1238_v18  ;;  %v447_v34 = vld [vmem:[#allocation2 + $0x50] sm:$0xff]  ;;  %v445_v38 = vld [vmem:[#allocation2 + $0x40] sm:$0xff]  ;;  %v440_v43 = vld [vmem:[#allocation2 + $0x18] sm:$0xff] }
  0x38   : > { %1152 = vmatprep.subr.bf16.mxu0 %v1239_v19  ;;  %1182 = vmatprep.subr.bf16.mxu1 %v1239_v19  ;;  %v448_v44 = vld [vmem:[#allocation2 + $0x58] sm:$0xff]  ;;  %v438_v49 = vld [vmem:[#allocation2 + $0x8] sm:$0xff]  ;;  %v443_v55 = vld [vmem:[#allocation2 + $0x30] sm:$0xff] }
  0x39   : > { %v446_v50 = vld [vmem:[#allocation2 + $0x48] sm:$0xff]  ;;  %v451_v56 = vld [vmem:[#allocation2 + $0x70] sm:$0xff]  ;;  %v441_v61 = vld [vmem:[#allocation2 + $0x20] sm:$0xff] }
  0x3a   : > { %v449_v62 = vld [vmem:[#allocation2 + $0x60] sm:$0xff]  ;;  %v444_v3 = vld [vmem:[#allocation2 + $0x38] sm:$0xff]  ;;  %v442_v9 = vld [vmem:[#allocation2 + $0x28] sm:$0xff] }
  0x3b   : > { %1153 = vmatpush3.bf16.msra.mxu0 %v1239_v19  ;;  %1190 = vmatpush3.bf16.msra.mxu1 %v1239_v19  ;;  %v452_v4 = vld [vmem:[#allocation2 + $0x78] sm:$0xff]  ;;  %v450_v10 = vld [vmem:[#allocation2 + $0x68] sm:$0xff] }
  0x3c   : > { %1154 = vmatprep.subr.bf16.mxu0 %v1240_v20  ;;  %1183 = vmatprep.subr.bf16.mxu1 %v1240_v20 }
  0x3f   : > { %1155 = vmatpush3.bf16.msra.mxu0 %v1240_v20  ;;  %1191 = vmatpush3.bf16.msra.mxu1 %v1240_v20 }
  0x40   : > { %1156 = vmatprep.subr.bf16.mxu0 %v1241_v23  ;;  %1184 = vmatprep.subr.bf16.mxu1 %v1241_v23 }
  0x43   : > { %1157 = vmatpush3.bf16.msra.mxu0 %v1241_v23  ;;  %1192 = vmatpush3.bf16.msra.mxu1 %v1241_v23 }
  0x44   : > { %1158 = vmatprep.subr.bf16.mxu0 %v1242_v24  ;;  %1185 = vmatprep.subr.bf16.mxu1 %v1242_v24 }
  0x47   : > { %1159 = vmatpush3.bf16.msra.mxu0 %v1242_v24  ;;  %1193 = vmatpush3.bf16.msra.mxu1 %v1242_v24 }
  0x48   : > { %1160 = vmatprep.subr.bf16.mxu0 %v1243_v25  ;;  %1186 = vmatprep.subr.bf16.mxu1 %v1243_v25 }
  0x4b   : > { %1161 = vmatpush3.bf16.msra.mxu0 %v1243_v25  ;;  %1194 = vmatpush3.bf16.msra.mxu1 %v1243_v25 }
  0x4c   : > { %1162 = vmatprep.subr.bf16.mxu0 %v1244_v26  ;;  %1187 = vmatprep.subr.bf16.mxu1 %v1244_v26 }
  0x4f   : > { %1163 = vmatpush3.bf16.msra.mxu0 %v1244_v26  ;;  %1195 = vmatpush3.bf16.msra.mxu1 %v1244_v26 }
  0x52   : > { %1165 = vmatmul.mubr.bf16.vlgmr.msra.gmra.mxu0 %v1247_v27  ;;  %1173 = vmatmul.mubr.bf16.vlgmr.msra.gmra.mxu1 %v1248_v28 }
  0x53   : > { %1168 = vmatprep.mubr.bf16.mxu0 %v1249_v29  ;;  %1176 = vmatprep.mubr.bf16.mxu1 %v1250_v30 }
  0x5a   : > { %1169 = vmatmul.mubr.bf16.gmra.mxu0 %v1251_v31  ;;  %1177 = vmatmul.mubr.bf16.gmra.mxu1 %v1252_v32 }
 0x112   : > { %v1166_v35 = vpop.f32.mrf.mxu0  ;;  %v1174_v36 = vpop.f32.mrf.mxu1 }
 0x113   : > { %v680_v39 = vadd.f32 %v1166_v35, %v439_v33  ;;  %v688_v40 = vadd.f32 %v1174_v36, %v447_v34 }
 0x114   : > { %v615_v41 = vpop.f32.mrf.mxu0  ;;  %v647_v42 = vpop.f32.mrf.mxu1 }
 0x115   : > { %697 = vst.msk [vmem:[#allocation2 + $0x10] sm:$0xff] %vm694_vm1, %v680_v39  ;;  %705 = vst.msk [vmem:[#allocation2 + $0x50] sm:$0xff] %vm694_vm1, %v688_v40  ;;  %v678_v45 = vadd.f32 %v615_v41, %v437_v37  ;;  %v686_v46 = vadd.f32 %v647_v42, %v445_v38 }
 0x116   : > { %v1167_v47 = vpop.f32.mrf.mxu0  ;;  %v1175_v48 = vpop.f32.mrf.mxu1 }
 0x117   : > { %695 = vst.msk [vmem:[#allocation2] sm:$0xff] %vm694_vm1, %v678_v45  ;;  %703 = vst.msk [vmem:[#allocation2 + $0x40] sm:$0xff] %vm694_vm1, %v686_v46  ;;  %v681_v51 = vadd.f32 %v1167_v47, %v440_v43  ;;  %v689_v52 = vadd.f32 %v1175_v48, %v448_v44 }
 0x118   : > { %v618_v53 = vpop.f32.mrf.mxu0  ;;  %v650_v54 = vpop.f32.mrf.mxu1 }
 0x119   : > { %698 = vst.msk [vmem:[#allocation2 + $0x18] sm:$0xff] %vm694_vm1, %v681_v51  ;;  %706 = vst.msk [vmem:[#allocation2 + $0x58] sm:$0xff] %vm694_vm1, %v689_v52  ;;  %v679_v57 = vadd.f32 %v618_v53, %v438_v49  ;;  %v687_v58 = vadd.f32 %v650_v54, %v446_v50 }
 0x11a   : > { %v1170_v59 = vpop.f32.mrf.mxu0  ;;  %v1178_v60 = vpop.f32.mrf.mxu1 }
 0x11b   : > { %696 = vst.msk [vmem:[#allocation2 + $0x8] sm:$0xff] %vm694_vm1, %v679_v57  ;;  %704 = vst.msk [vmem:[#allocation2 + $0x48] sm:$0xff] %vm694_vm1, %v687_v58  ;;  %v684_v63 = vadd.f32 %v1170_v59, %v443_v55  ;;  %v692_v0 = vadd.f32 %v1178_v60, %v451_v56 }
 0x11c   : > { %v631_v1 = vpop.f32.mrf.mxu0  ;;  %v663_v2 = vpop.f32.mrf.mxu1 }
 0x11d   : > { %701 = vst.msk [vmem:[#allocation2 + $0x30] sm:$0xff] %vm694_vm1, %v684_v63  ;;  %709 = vst.msk [vmem:[#allocation2 + $0x70] sm:$0xff] %vm694_vm1, %v692_v0  ;;  %v682_v5 = vadd.f32 %v631_v1, %v441_v61  ;;  %v690_v6 = vadd.f32 %v663_v2, %v449_v62 }
 0x11e   : > { %v1171_v7 = vpop.f32.mrf.mxu0  ;;  %v1179_v8 = vpop.f32.mrf.mxu1 }
 0x11f   : > { %699 = vst.msk [vmem:[#allocation2 + $0x20] sm:$0xff] %vm694_vm1, %v682_v5  ;;  %707 = vst.msk [vmem:[#allocation2 + $0x60] sm:$0xff] %vm694_vm1, %v690_v6  ;;  %v685_v11 = vadd.f32 %v1171_v7, %v444_v3  ;;  %v693_v12 = vadd.f32 %v1179_v8, %v452_v4  ;;  %714 = sbr.rel (%p1055_p11) target bundleno = 320 (0x140), region = 85 }
 0x120   : > { %v634_v13 = vpop.f32.mrf.mxu0  ;;  %v666_v14 = vpop.f32.mrf.mxu1 }
 0x121   : > { %702 = vst.msk [vmem:[#allocation2 + $0x38] sm:$0xff] %vm694_vm1, %v685_v11  ;;  %710 = vst.msk [vmem:[#allocation2 + $0x78] sm:$0xff] %vm694_vm1, %v693_v12  ;;  %v683_v15 = vadd.f32 %v634_v13, %v442_v9  ;;  %v691_v16 = vadd.f32 %v666_v14, %v450_v10 }
 0x123   : > { %700 = vst.msk [vmem:[#allocation2 + $0x28] sm:$0xff] %vm694_vm1, %v683_v15  ;;  %708 = vst.msk [vmem:[#allocation2 + $0x68] sm:$0xff] %vm694_vm1, %v691_v16 }
 0x124   : > { %v715_v17 = vld [vmem:[#allocation2] sm:$0xff]  ;;  %vm882_vm2 = vcmask 519168   ;;  %v716_v22 = vld [vmem:[#allocation2 + $0x8] sm:$0xff]  ;;  %v717_v24 = vld [vmem:[#allocation2 + $0x10] sm:$0xff] }
 0x125   : > { %v1444_v18 = vld [vmem:[%s1567_s2] ss:$0 sm:$0xff]  ;;  %v1125_v25 = vld [vmem:[%s1568_s3 + $0x8] sm:$0xff]   ;;  %v718_v29 = vld [vmem:[#allocation2 + $0x18] sm:$0xff] }
 0x126   : > { %v1094_v19 = vld [vmem:[%s1568_s3] sm:$0xff]   ;;  %v738_v20 = vadd.f32 %v1444_v18, %v715_v17  ;;  %v739_v26 = vadd.f32 %v1444_v18, %v716_v22  ;;  %v740_v27 = vadd.f32 %v1444_v18, %v717_v24  ;;  %v1099_v28 = vunpack.c.l.bf16 %v1125_v25  ;;  %v1126_v32 = vld [vmem:[%s1568_s3 + $0x10] sm:$0xff]   ;;  %v1127_v39 = vld [vmem:[%s1568_s3 + $0x18] sm:$0xff]  }
 0x127   : > { %v1095_v21 = vunpack.c.l.bf16 %v1094_v19  ;;  %v1096_v23 = vunpack.c.h.bf16 %v1094_v19  ;;  %v1100_v30 = vunpack.c.h.bf16 %v1125_v25  ;;  %v719_v31 = vld [vmem:[#allocation2 + $0x20] sm:$0xff]  ;;  %v741_v34 = vadd.f32 %v1444_v18, %v718_v29  ;;  %v721_v38 = vld [vmem:[#allocation2 + $0x30] sm:$0xff]  ;;  %v724_v59 = vld [vmem:[#allocation2 + $0x48] sm:$0xff] }
 0x128   : > { %v742_v35 = vadd.f32 %v1444_v18, %v719_v31  ;;  %v1103_v36 = vunpack.c.l.bf16 %v1126_v32  ;;  %v788_v41 = vadd.f32 %v1099_v28, %v740_v27  ;;  %v1104_v43 = vunpack.c.h.bf16 %v1126_v32  ;;  %v722_v44 = vld [vmem:[#allocation2 + $0x38] sm:$0xff]  ;;  %v723_v53 = vld [vmem:[#allocation2 + $0x40] sm:$0xff]  ;;  %v725_v0 = vld [vmem:[#allocation2 + $0x50] sm:$0xff] }
 0x129   : > { %v786_v33 = vadd.f32 %v1095_v21, %v738_v20  ;;  %v787_v40 = vadd.f32 %v1096_v23, %v739_v26  ;;  %v789_v46 = vadd.f32 %v1100_v30, %v741_v34  ;;  %v744_v48 = vadd.f32 %v1444_v18, %v721_v38  ;;  %v1128_v58 = vld [vmem:[%s1568_s3 + $0x20] sm:$0xff]   ;;  %v1129_v1 = vld [vmem:[%s1568_s3 + $0x28] sm:$0xff]   ;;  %v726_v6 = vld [vmem:[#allocation2 + $0x58] sm:$0xff] }
 0x12a   : > { %v720_v37 = vld [vmem:[#allocation2 + $0x28] sm:$0xff]  ;;  %v790_v47 = vadd.f32 %v1103_v36, %v742_v35  ;;  %v804_v50 = vmax.f32 %v788_v41, 0.0  ;;  %v1107_v52 = vunpack.c.l.bf16 %v1127_v39  ;;  %v745_v57 = vadd.f32 %v1444_v18, %v722_v44  ;;  %v727_v11 = vld [vmem:[#allocation2 + $0x60] sm:$0xff]  ;;  %v1130_v16 = vld [vmem:[%s1568_s3 + $0x30] sm:$0xff]  }
 0x12b   : > { %v743_v42 = vadd.f32 %v1444_v18, %v720_v37  ;;  %v802_v45 = vmax.f32 %v786_v33, 0.0  ;;  %v803_v49 = vmax.f32 %v787_v40, 0.0  ;;  %v805_v55 = vmax.f32 %v789_v46, 0.0  ;;  %v728_v17 = vld [vmem:[#allocation2 + $0x68] sm:$0xff]  ;;  %v729_v27 = vld [vmem:[#allocation2 + $0x70] sm:$0xff]  ;;  %v1131_v32 = vld [vmem:[%s1568_s3 + $0x38] sm:$0xff]  }
 0x12c   : > { %v806_v56 = vmax.f32 %v790_v47, 0.0  ;;  %v1079_v61 = vpack.c.bf16 %v804_v50, %v804_v50  ;;  %v792_v63 = vadd.f32 %v1107_v52, %v744_v48  ;;  %v1108_v4 = vunpack.c.h.bf16 %v1127_v39  ;;  %v730_v37 = vld [vmem:[#allocation2 + $0x78] sm:$0xff] }
 0x12d   : > { %v791_v51 = vadd.f32 %v1104_v43, %v743_v42  ;;  %v1077_v54 = vpack.c.bf16 %v802_v45, %v802_v45  ;;  %v1078_v60 = vpack.c.bf16 %v803_v49, %v803_v49  ;;  %v1080_v2 = vpack.c.bf16 %v805_v55, %v805_v55 }
 0x12e   : > { %v1081_v3 = vpack.c.bf16 %v806_v56, %v806_v56  ;;  %v746_v5 = vadd.f32 %v1444_v18, %v723_v53  ;;  %885 = vst.msk [vmem:[%s1569_s4 + $0x8] sm:$0xf] %vm882_vm2, %v1079_v61  ;;  %v808_v8 = vmax.f32 %v792_v63, 0.0  ;;  %v1111_v9 = vunpack.c.l.bf16 %v1128_v58 }
 0x12f   : > { %v807_v62 = vmax.f32 %v791_v51, 0.0  ;;  %883 = vst.msk [vmem:[%s1569_s4] sm:$0xf] %vm882_vm2, %v1077_v54  ;;  %884 = vst.msk [vmem:[%s1569_s4 + $0x4] sm:$0xf] %vm882_vm2, %v1078_v60  ;;  %v747_v10 = vadd.f32 %v1444_v18, %v724_v59  ;;  %v793_v12 = vadd.f32 %v1108_v4, %v745_v57  ;;  %v1112_v13 = vunpack.c.h.bf16 %v1128_v58 }
 0x130   : > { %886 = vst.msk [vmem:[%s1569_s4 + $0xc] sm:$0xf] %vm882_vm2, %v1080_v2  ;;  %887 = vst.msk [vmem:[%s1569_s4 + $0x10] sm:$0xf] %vm882_vm2, %v1081_v3  ;;  %v748_v14 = vadd.f32 %v1444_v18, %v725_v0  ;;  %v1115_v15 = vunpack.c.l.bf16 %v1129_v1  ;;  %v1083_v19 = vpack.c.bf16 %v808_v8, %v808_v8  ;;  %v794_v20 = vadd.f32 %v1111_v9, %v746_v5 }
 0x131   : > { %v1082_v7 = vpack.c.bf16 %v807_v62, %v807_v62  ;;  %v749_v21 = vadd.f32 %v1444_v18, %v726_v6  ;;  %v1116_v22 = vunpack.c.h.bf16 %v1129_v1  ;;  %v809_v23 = vmax.f32 %v793_v12, 0.0 }
 0x132   : > { %v795_v24 = vadd.f32 %v1112_v13, %v747_v10  ;;  %v796_v25 = vadd.f32 %v1115_v15, %v748_v14  ;;  %v750_v26 = vadd.f32 %v1444_v18, %v727_v11  ;;  %889 = vst.msk [vmem:[%s1569_s4 + $0x18] sm:$0xf] %vm882_vm2, %v1083_v19  ;;  %v810_v28 = vmax.f32 %v794_v20, 0.0 }
 0x133   : > { %888 = vst.msk [vmem:[%s1569_s4 + $0x14] sm:$0xf] %vm882_vm2, %v1082_v7  ;;  %v797_v29 = vadd.f32 %v1116_v22, %v749_v21  ;;  %v1119_v30 = vunpack.c.l.bf16 %v1130_v16  ;;  %v751_v31 = vadd.f32 %v1444_v18, %v728_v17  ;;  %v1084_v33 = vpack.c.bf16 %v809_v23, %v809_v23 }
 0x134   : > { %v811_v34 = vmax.f32 %v795_v24, 0.0  ;;  %v812_v35 = vmax.f32 %v796_v25, 0.0  ;;  %v1120_v36 = vunpack.c.h.bf16 %v1130_v16  ;;  %v1085_v38 = vpack.c.bf16 %v810_v28, %v810_v28 }
 0x135   : > { %v813_v39 = vmax.f32 %v797_v29, 0.0  ;;  %v798_v40 = vadd.f32 %v1119_v30, %v750_v26  ;;  %v752_v41 = vadd.f32 %v1444_v18, %v729_v27  ;;  %890 = vst.msk [vmem:[%s1569_s4 + $0x1c] sm:$0xf] %vm882_vm2, %v1084_v33  ;;  %v1123_v45 = vunpack.c.l.bf16 %v1131_v32 }
 0x136   : > { %v1086_v42 = vpack.c.bf16 %v811_v34, %v811_v34  ;;  %v1087_v43 = vpack.c.bf16 %v812_v35, %v812_v35  ;;  %v799_v44 = vadd.f32 %v1120_v36, %v751_v31  ;;  %891 = vst.msk [vmem:[%s1569_s4 + $0x20] sm:$0xf] %vm882_vm2, %v1085_v38  ;;  %v753_v48 = vadd.f32 %v1444_v18, %v730_v37 }
 0x137   : > { %v1088_v46 = vpack.c.bf16 %v813_v39, %v813_v39  ;;  %v814_v47 = vmax.f32 %v798_v40, 0.0  ;;  %v1124_v49 = vunpack.c.h.bf16 %v1131_v32  ;;  %v800_v51 = vadd.f32 %v1123_v45, %v752_v41 }
 0x138   : > { %892 = vst.msk [vmem:[%s1569_s4 + $0x24] sm:$0xf] %vm882_vm2, %v1086_v42  ;;  %893 = vst.msk [vmem:[%s1569_s4 + $0x28] sm:$0xf] %vm882_vm2, %v1087_v43  ;;  %v815_v50 = vmax.f32 %v799_v44, 0.0 }
 0x139   : > { %894 = vst.msk [vmem:[%s1569_s4 + $0x2c] sm:$0xf] %vm882_vm2, %v1088_v46  ;;  %v1089_v52 = vpack.c.bf16 %v814_v47, %v814_v47  ;;  %v801_v18 = vadd.f32 %v1124_v49, %v753_v48  ;;  %v816_v54 = vmax.f32 %v800_v51, 0.0 }
 0x13a   : > { %v1090_v53 = vpack.c.bf16 %v815_v50, %v815_v50 }
 0x13b   : > { %895 = vst.msk [vmem:[%s1569_s4 + $0x30] sm:$0xf] %vm882_vm2, %v1089_v52  ;;  %v817_v55 = vmax.f32 %v801_v18, 0.0  ;;  %v1091_v56 = vpack.c.bf16 %v816_v54, %v816_v54 }
 0x13c   : > { %896 = vst.msk [vmem:[%s1569_s4 + $0x34] sm:$0xf] %vm882_vm2, %v1090_v53 }
 0x13d   : > { %v1092_v57 = vpack.c.bf16 %v817_v55, %v817_v55  ;;  %897 = vst.msk [vmem:[%s1569_s4 + $0x38] sm:$0xf] %vm882_vm2, %v1091_v56 }
 0x13f   : > { %898 = vst.msk [vmem:[%s1569_s4 + $0x3c] sm:$0xf] %vm882_vm2, %v1092_v57 }
 0x140 PF: > { %s14_s19 = sadd.s32 1, %s1291_s19   ;;  %s1570_s15 = smov %s1279_s16 }
 0x141   : > { %p11_p12 = scmp.ge.s32.totalorder %s14_s19, 7   ;;  %s1571_s16 = smov %s1354_s23 }
 0x142   : > { %s1572_s17 = smov %s1287_s18  ;;  %s1573_s18 = smov %s1575_s20 }
 0x143   :  { %13 = sbr.rel (!%p11_p12) target bundleno = 3 (0x3), region = 129 }

// kernel: _lambda_.27
= control target key start
LH: loop header
LB: loop body
LE: loop exit
PB: predicated region body
PF: predicated region fallthrough
CT: control target
= control target key end

     0   :  { %s798_s12 = smov 0   ;;  %s800_s13 = smov 0   ;;  %s891_s0 = inlined_call_operand.vmem [shape: bf16[32,640], index: 0, kind: input, shape index: {}]   ;;  %s892_s1 = inlined_call_operand.vmem [shape: bf16[640,128], index: 1, kind: input, shape index: {}]   ;;  %s893_s2 = inlined_call_operand.vmem [shape: f32[1,128], index: 2, kind: input, shape index: {}]   ;;  %s894_s3 = inlined_call_operand.vmem [shape: bf16[32,128], index: 3, kind: output, shape index: {}]  }
   0x1   :  { %s802_s14 = smov 0   ;;  %s804_s15 = smov 0  }
   0x2   :  { %s806_s16 = smov 0  }
   0x3 LB: > { %s25_s17 = sadd.s32 1, %s771_s15  ;;  %p48_p1 = scmp.ne.s32.totalorder %s763_s13, %s759_s12  ;;  %s775_s16 = sphi %s806_s16, %s13_s16   ;;  %s771_s15 = sphi %s804_s15, %s898_s15   ;;  %s767_s14 = sphi %s802_s14, %s897_s14   ;;  %s763_s13 = sphi %s800_s13, %s896_s13   ;;  %s759_s12 = sphi %s798_s12, %s895_s12  }
   0x4   : > { %p26_p0 = scmp.ge.s32.totalorder %s25_s17, 5  ;;  %p49_p2 = scmp.eq.s32.totalorder %s775_s16, 0 }
   0x5   : > { %s41_s19 = sadd.s32 1, %s763_s13  ;;  %p613_p5 = scmp.ge.s32.totalorder %s775_s16, 5 }
   0x6   : > { %s900_s17 = smov (%p26_p0, %s25_s17), 0  ;;  %p50_p3 = por %p49_p2, %p48_p1 }
   0x7   : > { %s37_s18 = ssub.s32 %s771_s15, %s900_s17  ;;  %162 = sbr.rel (%p613_p5) target bundleno = 18 (0x12), region = 20 }
   0x8   : > { %p39_p4 = scmp.eq.s32.totalorder %s37_s18, 0 }
   0xa   : > { %s833_s20 = scalar_select %p39_p4, %s763_s13, %s41_s19  }
   0xc   : > { %165 = sbr.rel (!%p50_p3) target bundleno = 18 (0x12), region = 24  ;;  %s167_s21 = sand.u32 (%p50_p3), 1, %s763_s13  }
   0xd   : > { %s615_s22 = sshll.u32 (%p50_p3), %s771_s15, 2  ;;  %s614_s23 = sshll.u32 (%p50_p3), %s167_s21, 4 }
   0xe   : > { %s174_s26 = scalar_lea.vmem (%p50_p3), %s891_s0, %s615_s22  ;;  %s169_s27 = scalar_lea.vmem (%p50_p3), [#allocation3], %s614_s23 }
   0xf   : > { %v191_v0 = vld [vmem:[%s174_s26] sm:$0xf] (%p50_p3)  ;;  %v193_v1 = vld [vmem:[%s174_s26 + $0x14] sm:$0xf] (%p50_p3)  ;;  %v195_v2 = vld [vmem:[%s174_s26 + $0x28] sm:$0xf] (%p50_p3) }
  0x10   : > { %192 = vst [vmem:[%s169_s27] sm:$0xf] (%p50_p3), %v191_v0  ;;  %194 = vst [vmem:[%s169_s27 + $0x4] sm:$0xf] (%p50_p3), %v193_v1  ;;  %v197_v3 = vld [vmem:[%s174_s26 + $0x3c] sm:$0xf] (%p50_p3) }
  0x11   : > { %196 = vst [vmem:[%s169_s27 + $0x8] sm:$0xf] %v195_v2  ;;  %198 = vst [vmem:[%s169_s27 + $0xc] sm:$0xf] %v197_v3 }
  0x12 PF: > { %p616_p6 = scmp.ge.s32.totalorder %s775_s16, 1  ;;  %p241_p7 = scmp.lt.s32.totalorder %s775_s16, 6 }
  0x14   : > { %p242_p8 = pnand %p616_p6, %p241_p7 }
  0x15   : > { %s248_s28 = sand.u32 (!%p242_p8), 1, %s759_s12   ;;  %s618_s29 = sshll.u32 (!%p242_p8), %s767_s14, 4 }
  0x16   : > { %245 = sbr.rel (%p242_p8) target bundleno = 284 (0x11c), region = 69  ;;  %s845_s30 = sshll.u32 (!%p242_p8), %s248_s28, 4 }
  0x17   : > { %p287_p9 = scmp.lt.s32.totalorder (!%p242_p8), %s618_s29, 79  ;;  %s250_s8 = scalar_lea.vmem (!%p242_p8), [#allocation3], %s845_s30 }
  0x18   : > { %p620_p10 = scmp.ne.s32.totalorder (!%p242_p8), %s767_s14, 0 }
  0x1b   : > { %s902_s29 = smov (!%p287_p9, %s618_s29), 79  ;;  %311 = sbr.rel (%p620_p10) target bundleno = 35 (0x23), region = 77 }
  0x1c   : > { %s619_s4 = sshll.u32 %s902_s29, 2 }
  0x1d   : > { %s850_s7 = scalar_lea.vmem %s892_s1, %s619_s4 }
  0x20   : > { %v777_v4 = vmov 0.0  }
  0x21   : > { %312 = vst [vmem:[#allocation2 + $0x10] sm:$0xff] %v777_v4  ;;  %313 = vst [vmem:[#allocation2] sm:$0xff] %v777_v4 }
  0x22   : > { %314 = vst [vmem:[#allocation2 + $0x18] sm:$0xff] %v777_v4  ;;  %315 = vst [vmem:[#allocation2 + $0x8] sm:$0xff] %v777_v4 }
  0x23 PF: > { %v727_v5 = vld [vmem:[%s850_s7 + $0x38] sm:$0xff]   ;;  %v728_v6 = vld [vmem:[%s850_s7 + $0x30] sm:$0xff]   ;;  %v729_v7 = vld [vmem:[%s850_s7 + $0x28] sm:$0xff]   ;;  %p631_p11 = scmp.ne.s32.totalorder %s767_s14, 4 }
  0x24   : > { %666 = vmatprep.subr.bf16.mxu0 %v727_v5  ;;  %v730_v8 = vld [vmem:[%s850_s7 + $0x20] sm:$0xff]   ;;  %v731_v10 = vld [vmem:[%s850_s7 + $0x18] sm:$0xff]   ;;  %v732_v11 = vld [vmem:[%s850_s7 + $0x10] sm:$0xff]  }
  0x25   : > { %667 = vmatpush3.bf16.msra.mxu0 %v727_v5  ;;  %v735_v9 = vld [vmem:[%s250_s8] sm:$0xff]   ;;  %v733_v12 = vld [vmem:[%s850_s7 + $0x8] sm:$0xff]  }
  0x26   : > { %668 = vmatprep.subr.bf16.mxu0 %v728_v6  ;;  %682 = vmatprep.mubr.bf16.mxu0 %v735_v9  ;;  %v734_v13 = vld [vmem:[%s850_s7] sm:$0xff]   ;;  %v736_v14 = vld [vmem:[%s250_s8 + $0x8] sm:$0xff]  }
  0x28   : > { %v316_v17 = vld [vmem:[#allocation2 + $0x10] sm:$0xff]  ;;  %v317_v23 = vld [vmem:[#allocation2] sm:$0xff] }
  0x29   : > { %669 = vmatpush3.bf16.msra.mxu0 %v728_v6  ;;  %v318_v15 = vld [vmem:[#allocation2 + $0x18] sm:$0xff]  ;;  %v319_v20 = vld [vmem:[#allocation2 + $0x8] sm:$0xff] }
  0x2a   : > { %670 = vmatprep.subr.bf16.mxu0 %v729_v7 }
  0x2d   : > { %671 = vmatpush3.bf16.msra.mxu0 %v729_v7 }
  0x2e   : > { %672 = vmatprep.subr.bf16.mxu0 %v730_v8 }
  0x31   : > { %673 = vmatpush3.bf16.msra.mxu0 %v730_v8 }
  0x32   : > { %674 = vmatprep.subr.bf16.mxu0 %v731_v10 }
  0x35   : > { %675 = vmatpush3.bf16.msra.mxu0 %v731_v10 }
  0x36   : > { %676 = vmatprep.subr.bf16.mxu0 %v732_v11 }
  0x39   : > { %677 = vmatpush3.bf16.msra.mxu0 %v732_v11 }
  0x3a   : > { %678 = vmatprep.subr.bf16.mxu0 %v733_v12 }
  0x3d   : > { %679 = vmatpush3.bf16.msra.mxu0 %v733_v12 }
  0x3e   : > { %680 = vmatprep.subr.bf16.mxu0 %v734_v13 }
  0x41   : > { %681 = vmatpush3.bf16.msra.mxu0 %v734_v13 }
  0x44   : > { %683 = vmatmul.mubr.bf16.vlgmr.msra.gmra.mxu0 %v736_v14 }
 0x104   : > { %v684_v16 = vpop.f32.mrf.mxu0 }
 0x105   : > { %v451_v18 = vadd.f32 %v684_v16, %v318_v15 }
 0x106   : > { %v434_v19 = vpop.f32.mrf.mxu0 }
 0x107   : > { %455 = vst [vmem:[#allocation2 + $0x18] sm:$0xff] %v451_v18  ;;  %v449_v21 = vadd.f32 %v434_v19, %v316_v17 }
 0x108   : > { %v685_v22 = vpop.f32.mrf.mxu0 }
 0x109   : > { %453 = vst [vmem:[#allocation2 + $0x10] sm:$0xff] %v449_v21  ;;  %v452_v24 = vadd.f32 %v685_v22, %v319_v20  ;;  %460 = sbr.rel (%p631_p11) target bundleno = 284 (0x11c), region = 81 }
 0x10a   : > { %v437_v25 = vpop.f32.mrf.mxu0 }
 0x10b   : > { %456 = vst [vmem:[#allocation2 + $0x8] sm:$0xff] %v452_v24  ;;  %v450_v26 = vadd.f32 %v437_v25, %v317_v23 }
 0x10d   : > { %454 = vst [vmem:[#allocation2] sm:$0xff] %v450_v26 }
 0x10e   : > { %v632_v29 = vld [vmem:[%s893_s2] ss:$0 sm:$0xff]  ;;  %v463_v32 = vld [vmem:[#allocation2 + $0x18] sm:$0xff] }
 0x10f   : > { %v474_v34 = vadd.f32 %v632_v29, %v463_v32 }
 0x110   : > { %v461_v27 = vld [vmem:[#allocation2 + $0x10] sm:$0xff] }
 0x111   : > { %v472_v30 = vadd.f32 %v632_v29, %v461_v27  ;;  %v478_v38 = vmax.f32 %v474_v34, 0.0 }
 0x112   : > { %v464_v33 = vld [vmem:[#allocation2 + $0x8] sm:$0xff] }
 0x113   : > { %v475_v35 = vadd.f32 %v632_v29, %v464_v33  ;;  %v476_v36 = vmax.f32 %v472_v30, 0.0 }
 0x114   : > { %v462_v28 = vld [vmem:[#allocation2] sm:$0xff] }
 0x115   : > { %v473_v31 = vadd.f32 %v632_v29, %v462_v28  ;;  %v479_v39 = vmax.f32 %v475_v35, 0.0 }
 0x117   : > { %v477_v37 = vmax.f32 %v473_v31, 0.0  ;;  %v653_v41 = vpack.c.bf16 %v479_v39, %v478_v38 }
 0x119   : > { %v648_v40 = vpack.c.bf16 %v477_v37, %v476_v36  ;;  %655 = vst [vmem:[%s894_s3 + $0x8] sm:$0xff] %v653_v41  }
 0x11b   : > { %649 = vst [vmem:[%s894_s3] sm:$0xff] %v648_v40  }
 0x11c PF: > { %s13_s16 = sadd.s32 1, %s775_s16   ;;  %s895_s12 = smov %s763_s13 }
 0x11d   : > { %p10_p12 = scmp.ge.s32.totalorder %s13_s16, 7   ;;  %s896_s13 = smov %s833_s20 }
 0x11e   : > { %s897_s14 = smov %s771_s15  ;;  %s898_s15 = smov %s900_s17 }
 0x11f   :  { %12 = sbr.rel (!%p10_p12) target bundleno = 3 (0x3), region = 122 }

// kernel: _lambda_.28
= control target key start
LH: loop header
LB: loop body
LE: loop exit
PB: predicated region body
PF: predicated region fallthrough
CT: control target
= control target key end

     0   :  { %s335_s1 = inlined_call_operand.vmem [shape: bf16[128,128], index: 1, kind: input, shape index: {}]   ;;  %s336_s0 = inlined_call_operand.vmem [shape: bf16[32,128], index: 0, kind: input, shape index: {}]   ;;  %s337_s2 = inlined_call_operand.vmem [shape: f32[1,128], index: 2, kind: input, shape index: {}]   ;;  %s338_s3 = inlined_call_operand.vmem [shape: bf16[32,128], index: 3, kind: output, shape index: {}]  }
   0x1   :  { %v266_v0 = vld [vmem:[%s335_s1 + $0x38] sm:$0xff]   ;;  %v267_v1 = vld [vmem:[%s335_s1 + $0x30] sm:$0xff]   ;;  %v268_v2 = vld [vmem:[%s335_s1 + $0x28] sm:$0xff]  }
   0x2   :  { %246 = vmatprep.subr.bf16.mxu0 %v266_v0  ;;  %v269_v3 = vld [vmem:[%s335_s1 + $0x20] sm:$0xff]   ;;  %v270_v5 = vld [vmem:[%s335_s1 + $0x18] sm:$0xff]   ;;  %v271_v6 = vld [vmem:[%s335_s1 + $0x10] sm:$0xff]  }
   0x3   :  { %247 = vmatpush3.bf16.msra.mxu0 %v266_v0  ;;  %v274_v4 = vld [vmem:[%s336_s0] sm:$0xff]   ;;  %v272_v7 = vld [vmem:[%s335_s1 + $0x8] sm:$0xff]  }
   0x4   :  { %248 = vmatprep.subr.bf16.mxu0 %v267_v1  ;;  %262 = vmatprep.mubr.bf16.mxu0 %v274_v4  ;;  %v273_v8 = vld [vmem:[%s335_s1] sm:$0xff]   ;;  %v275_v9 = vld [vmem:[%s336_s0 + $0x8] sm:$0xff]  }
   0x5   :  { %v216_v11 = vld [vmem:[%s337_s2] ss:$0 sm:$0xff] }
   0x7   :  { %249 = vmatpush3.bf16.msra.mxu0 %v267_v1 }
   0x8   :  { %250 = vmatprep.subr.bf16.mxu0 %v268_v2 }
   0xb   :  { %251 = vmatpush3.bf16.msra.mxu0 %v268_v2 }
   0xc   :  { %252 = vmatprep.subr.bf16.mxu0 %v269_v3 }
   0xf   :  { %253 = vmatpush3.bf16.msra.mxu0 %v269_v3 }
  0x10   :  { %254 = vmatprep.subr.bf16.mxu0 %v270_v5 }
  0x13   :  { %255 = vmatpush3.bf16.msra.mxu0 %v270_v5 }
  0x14   :  { %256 = vmatprep.subr.bf16.mxu0 %v271_v6 }
  0x17   :  { %257 = vmatpush3.bf16.msra.mxu0 %v271_v6 }
  0x18   :  { %258 = vmatprep.subr.bf16.mxu0 %v272_v7 }
  0x1b   :  { %259 = vmatpush3.bf16.msra.mxu0 %v272_v7 }
  0x1c   :  { %260 = vmatprep.subr.bf16.mxu0 %v273_v8 }
  0x1f   :  { %261 = vmatpush3.bf16.msra.mxu0 %v273_v8 }
  0x22   :  { %263 = vmatmul.mubr.bf16.vlgmr.msra.gmra.mxu0 %v275_v9 }
  0xe2   :  { %v264_v10 = vpop.f32.mrf.mxu0 }
  0xe3   :  { %v180_v14 = vadd.f32 %v264_v10, %v216_v11 }
  0xe4   :  { %v141_v12 = vpop.f32.mrf.mxu0 }
  0xe5   :  { %v178_v17 = vadd.f32 %v216_v11, %v141_v12 }
  0xe6   :  { %v265_v13 = vpop.f32.mrf.mxu0 }
  0xe7   :  { %v181_v15 = vadd.f32 %v265_v13, %v216_v11 }
  0xe8   :  { %v144_v16 = vpop.f32.mrf.mxu0 }
  0xe9   :  { %v233_v18 = vpack.c.bf16 %v181_v15, %v180_v14  ;;  %v179_v19 = vadd.f32 %v216_v11, %v144_v16 }
  0xeb   :  { %235 = vst [vmem:[%s338_s3 + $0x8] sm:$0xff] %v233_v18   ;;  %v228_v20 = vpack.c.bf16 %v179_v19, %v178_v17 }
  0xed   :  { %229 = vst [vmem:[%s338_s3] sm:$0xff] %v228_v20  }

// kernel: _lambda_.29
= control target key start
LH: loop header
LB: loop body
LE: loop exit
PB: predicated region body
PF: predicated region fallthrough
CT: control target
= control target key end

     0   :  { %s1177_s15 = smov 0   ;;  %s1179_s16 = smov 0   ;;  %s1293_s0 = inlined_call_operand.vmem [shape: bf16[32,1152], index: 0, kind: input, shape index: {}]   ;;  %s1294_s1 = inlined_call_operand.vmem [shape: bf16[1152,128], index: 1, kind: input, shape index: {}]   ;;  %s1295_s2 = inlined_call_operand.vmem [shape: f32[1,128], index: 2, kind: input, shape index: {}]   ;;  %s1296_s3 = inlined_call_operand.vmem [shape: bf16[32,128], index: 3, kind: input, shape index: {}]   ;;  %s1297_s4 = inlined_call_operand.vmem [shape: bf16[32,128], index: 4, kind: output, shape index: {}]  }
   0x1   :  { %s1181_s17 = smov 0   ;;  %s1183_s18 = smov 0  }
   0x2   :  { %s1185_s19 = smov 0  }
   0x3 LB: > { %s26_s20 = sadd.s32 1, %s1145_s18  ;;  %p49_p1 = scmp.ne.s32.totalorder %s1137_s16, %s1133_s15  ;;  %s1149_s19 = sphi %s1185_s19, %s14_s19   ;;  %s1145_s18 = sphi %s1183_s18, %s1301_s18   ;;  %s1141_s17 = sphi %s1181_s17, %s1300_s17   ;;  %s1137_s16 = sphi %s1179_s16, %s1299_s16   ;;  %s1133_s15 = sphi %s1177_s15, %s1298_s15  }
   0x4   : > { %p27_p0 = scmp.ge.s32.totalorder %s26_s20, 3  ;;  %p50_p2 = scmp.eq.s32.totalorder %s1149_s19, 0 }
   0x5   : > { %s42_s22 = sadd.s32 1, %s1137_s16  ;;  %p900_p5 = scmp.ge.s32.totalorder %s1149_s19, 3 }
   0x6   : > { %s1303_s20 = smov (%p27_p0, %s26_s20), 0  ;;  %p51_p3 = por %p50_p2, %p49_p1 }
   0x7   : > { %s38_s21 = ssub.s32 %s1145_s18, %s1303_s20  ;;  %203 = sbr.rel (%p900_p5) target bundleno = 21 (0x15), region = 24 }
   0x8   : > { %p40_p4 = scmp.eq.s32.totalorder %s38_s21, 0 }
   0xa   : > { %s1212_s23 = scalar_select %p40_p4, %s1137_s16, %s42_s22  }
   0xc   : > { %206 = sbr.rel (!%p51_p3) target bundleno = 21 (0x15), region = 28  ;;  %s208_s24 = sand.u32 (%p51_p3), 1, %s1137_s16  }
   0xd   : > { %s953_s25 = smul.u32 (%p51_p3), 12, %s1145_s18 }
   0xe   : > { %s1036_s26 = smul.u32 (%p51_p3), 48, %s208_s24 }
   0xf   : > { %s216_s29 = scalar_lea.vmem (%p51_p3), %s1293_s0, %s953_s25 }
  0x10   : > { %v231_v0 = vld [vmem:[%s216_s29] sm:$0xff] (%p51_p3)  ;;  %v235_v2 = vld [vmem:[%s216_s29 + $0x48] sm:$0xff] (%p51_p3)  ;;  %s210_s30 = scalar_lea.vmem (%p51_p3), [#allocation3], %s1036_s26  ;;  %v906_v6 = vld [vmem:[%s216_s29 + $0x50] sm:$0xf] (%p51_p3) }
  0x11   : > { %v233_v1 = vld [vmem:[%s216_s29 + $0x24] sm:$0xff]  ;;  %232 = vst [vmem:[%s210_s30] sm:$0xff] %v231_v0  ;;  %236 = vst [vmem:[%s210_s30 + $0x18] sm:$0xff] %v235_v2  ;;  %v237_v3 = vld [vmem:[%s216_s29 + $0x6c] sm:$0xff] }
  0x12   : > { %234 = vst [vmem:[%s210_s30 + $0xc] sm:$0xff] %v233_v1  ;;  %v902_v4 = vld [vmem:[%s216_s29 + $0x8] sm:$0xf]  ;;  %v904_v5 = vld [vmem:[%s216_s29 + $0x2c] sm:$0xf]  ;;  %238 = vst [vmem:[%s210_s30 + $0x24] sm:$0xff] %v237_v3 }
  0x13   : > { %903 = vst [vmem:[%s210_s30 + $0x8] sm:$0xf] %v902_v4  ;;  %905 = vst [vmem:[%s210_s30 + $0x14] sm:$0xf] %v904_v5  ;;  %v908_v7 = vld [vmem:[%s216_s29 + $0x74] sm:$0xf] }
  0x14   : > { %907 = vst [vmem:[%s210_s30 + $0x20] sm:$0xf] %v906_v6  ;;  %909 = vst [vmem:[%s210_s30 + $0x2c] sm:$0xf] %v908_v7 }
  0x15 PF: > { %p910_p6 = scmp.ge.s32.totalorder %s1149_s19, 1  ;;  %p271_p7 = scmp.lt.s32.totalorder %s1149_s19, 4 }
  0x17   : > { %p272_p8 = pnand %p910_p6, %p271_p7 }
  0x18   : > { %s278_s5 = sand.u32 (!%p272_p8), 1, %s1133_s15   ;;  %s327_s6 = smul.u32 (!%p272_p8), 48, %s1141_s17 }
  0x19   : > { %275 = sbr.rel (%p272_p8) target bundleno = 301 (0x12d), region = 58  ;;  %p912_p10 = scmp.ne.s32.totalorder (!%p272_p8), %s1141_s17, 0 }
  0x1a   : > { %s1037_s7 = smul.u32 (!%p272_p8), 48, %s278_s5  ;;  %p328_p9 = scmp.lt.s32.totalorder (!%p272_p8), %s327_s6, 143 }
  0x1c   : > { %s1229_s12 = scalar_lea.vmem (!%p272_p8), [#allocation3], %s1037_s7 }
  0x1e   : > { %s1305_s6 = smov (!%p328_p9, %s327_s6), 143  ;;  %361 = sbr.rel (%p912_p10) target bundleno = 38 (0x26), region = 66 }
  0x1f   : > { %s911_s8 = sshll.u32 %s1305_s6, 2 }
  0x20   : > { %s1227_s11 = scalar_lea.vmem %s1294_s1, %s911_s8 }
  0x23   : > { %v1151_v8 = vmov 0.0  }
  0x24   : > { %362 = vst [vmem:[#allocation2 + $0x10] sm:$0xff] %v1151_v8  ;;  %363 = vst [vmem:[#allocation2] sm:$0xff] %v1151_v8 }
  0x25   : > { %364 = vst [vmem:[#allocation2 + $0x18] sm:$0xff] %v1151_v8  ;;  %365 = vst [vmem:[#allocation2 + $0x8] sm:$0xff] %v1151_v8 }
  0x26 PF: > { %v1079_v9 = vld [vmem:[%s1227_s11 + $0x78] sm:$0xff]   ;;  %v1082_v12 = vld [vmem:[%s1227_s11 + $0x70] sm:$0xff]   ;;  %v1085_v15 = vld [vmem:[%s1227_s11 + $0x68] sm:$0xff]   ;;  %p943_p11 = scmp.ne.s32.totalorder %s1141_s17, 2 }
  0x27   : > { %v1080_v10 = vld [vmem:[%s1227_s11 + $0x38] sm:$0xff]   ;;  %978 = vmatprep.subr.bf16.mxu0 %v1079_v9  ;;  %v1083_v13 = vld [vmem:[%s1227_s11 + $0x30] sm:$0xff]   ;;  %v1086_v16 = vld [vmem:[%s1227_s11 + $0x28] sm:$0xff]  }
  0x28   : > { %v1081_v11 = vld [vmem:[%s1227_s11 + $0xb8] sm:$0xff]   ;;  %979 = vmatpush3.bf16.msra.mxu0 %v1080_v10  ;;  %v1084_v14 = vld [vmem:[%s1227_s11 + $0xb0] sm:$0xff]   ;;  %v1087_v17 = vld [vmem:[%s1227_s11 + $0xa8] sm:$0xff]  }
  0x29   : > { %1016 = vmatprep.subr.bf16.mxu1 %v1081_v11  ;;  %980 = vmatprep.subr.bf16.mxu0 %v1082_v12  ;;  %v1088_v18 = vld [vmem:[%s1227_s11 + $0x60] sm:$0xff]   ;;  %v1091_v21 = vld [vmem:[%s1227_s11 + $0x58] sm:$0xff]   ;;  %v1094_v24 = vld [vmem:[%s1227_s11 + $0x50] sm:$0xff]  }
  0x2a   : > { %1017 = vmatpush3.bf16.msra.mxu1 %v1081_v11  ;;  %v1089_v19 = vld [vmem:[%s1227_s11 + $0x20] sm:$0xff]   ;;  %v1093_v22 = vld [vmem:[%s1227_s11 + $0x98] sm:$0xff]   ;;  %v1096_v25 = vld [vmem:[%s1227_s11 + $0x90] sm:$0xff]  }
  0x2b   : > { %1018 = vmatprep.subr.bf16.mxu1 %v1084_v14  ;;  %v1090_v20 = vld [vmem:[%s1227_s11 + $0xa0] sm:$0xff]   ;;  %v1092_v23 = vld [vmem:[%s1227_s11 + $0x18] sm:$0xff]   ;;  %v1095_v26 = vld [vmem:[%s1227_s11 + $0x10] sm:$0xff]  }
  0x2c   : > { %981 = vmatpush3.bf16.msra.mxu0 %v1083_v13  ;;  %v1097_v27 = vld [vmem:[%s1227_s11 + $0x48] sm:$0xff]   ;;  %v1100_v30 = vld [vmem:[%s1227_s11 + $0x40] sm:$0xff]   ;;  %v366_v44 = vld [vmem:[#allocation2 + $0x10] sm:$0xff] }
  0x2d   : > { %982 = vmatprep.subr.bf16.mxu0 %v1085_v15  ;;  %v1098_v28 = vld [vmem:[%s1227_s11 + $0x8] sm:$0xff]   ;;  %v1102_v31 = vld [vmem:[%s1227_s11 + $0x80] sm:$0xff]   ;;  %v368_v58 = vld [vmem:[#allocation2 + $0x18] sm:$0xff] }
  0x2e   : > { %1019 = vmatpush3.bf16.msra.mxu1 %v1084_v14  ;;  %v1099_v29 = vld [vmem:[%s1227_s11 + $0x88] sm:$0xff]   ;;  %v1105_v32 = vld [vmem:[%s1229_s12 + $0x4] ss:$12 sps:$4 sm:$0xff]  }
  0x2f   : > { %1020 = vmatprep.subr.bf16.mxu1 %v1087_v17  ;;  %v1106_v33 = vld [vmem:[%s1229_s12 + $0x8] ss:$12 sps:$4 sm:$0xff]   ;;  %634 = vmatprep.mubr.bf16.mxu0 %v1105_v32  ;;  %v1103_v35 = vld [vmem:[%s1229_s12] ss:$12 sps:$4 sm:$0xff]   ;;  %v1110_v38 = vld [vmem:[%s1229_s12 + $0x18] ss:$12 sps:$4 sm:$0xff]  }
  0x30   : > { %983 = vmatpush3.bf16.msra.mxu0 %v1086_v16  ;;  %v1101_v34 = vld [vmem:[%s1227_s11] sm:$0xff]   ;;  %1032 = vmatprep.mubr.bf16.mxu1 %v1106_v33  ;;  %v1108_v36 = vld [vmem:[%s1229_s12 + $0x1c] ss:$12 sps:$4 sm:$0xff]  }
  0x31   : > { %984 = vmatprep.subr.bf16.mxu0 %v1088_v18  ;;  %v1107_v37 = vld [vmem:[%s1229_s12 + $0x20] ss:$12 sps:$4 sm:$0xff]  }
  0x32   : > { %1021 = vmatpush3.bf16.msra.mxu1 %v1087_v17  ;;  %v367_v52 = vld [vmem:[#allocation2] sm:$0xff]  ;;  %v369_v0 = vld [vmem:[#allocation2 + $0x8] sm:$0xff] }
  0x33   : > { %1022 = vmatprep.subr.bf16.mxu1 %v1090_v20 }
  0x34   : > { %985 = vmatpush3.bf16.msra.mxu0 %v1089_v19 }
  0x35   : > { %986 = vmatprep.subr.bf16.mxu0 %v1091_v21 }
  0x36   : > { %1023 = vmatpush3.bf16.msra.mxu1 %v1090_v20 }
  0x37   : > { %1024 = vmatprep.subr.bf16.mxu1 %v1093_v22 }
  0x38   : > { %987 = vmatpush3.bf16.msra.mxu0 %v1092_v23 }
  0x39   : > { %988 = vmatprep.subr.bf16.mxu0 %v1094_v24 }
  0x3a   : > { %1025 = vmatpush3.bf16.msra.mxu1 %v1093_v22 }
  0x3b   : > { %1026 = vmatprep.subr.bf16.mxu1 %v1096_v25 }
  0x3c   : > { %989 = vmatpush3.bf16.msra.mxu0 %v1095_v26 }
  0x3d   : > { %990 = vmatprep.subr.bf16.mxu0 %v1097_v27 }
  0x3e   : > { %1027 = vmatpush3.bf16.msra.mxu1 %v1096_v25 }
  0x3f   : > { %1028 = vmatprep.subr.bf16.mxu1 %v1099_v29 }
  0x40   : > { %991 = vmatpush3.bf16.msra.mxu0 %v1098_v28 }
  0x41   : > { %992 = vmatprep.subr.bf16.mxu0 %v1100_v30 }
  0x42   : > { %1029 = vmatpush3.bf16.msra.mxu1 %v1099_v29 }
  0x43   : > { %1030 = vmatprep.subr.bf16.mxu1 %v1102_v31 }
  0x44   : > { %993 = vmatpush3.bf16.msra.mxu0 %v1101_v34 }
  0x46   : > { %1031 = vmatpush3.bf16.msra.mxu1 %v1102_v31 }
  0x47   : > { %635 = vmatmul.mubr.bf16.vlgmr.msra.gmra.mxu0 %v1103_v35 }
  0x48   : > { %642 = vmatprep.mubr.bf16.mxu0 %v1108_v36 }
  0x49   : > { %1033 = vmatmul.mubr.bf16.vlgmr.msra.gmra.mxu1 %v1107_v37 }
  0x4f   : > { %643 = vmatmul.mubr.bf16.gmra.mxu0 %v1110_v38 }
 0x107   : > { %v994_v39 = vpop.f32.mrf.mxu0 }
 0x109   : > { %v995_v40 = vpop.f32.mrf.mxu0  ;;  %v1034_v41 = vpop.f32.mrf.mxu1 }
 0x10a   : > { %v996_v42 = vadd.f32 %v995_v40, %v994_v39 }
 0x10b   : > { %v997_v43 = vpop.f32.mrf.mxu0  ;;  %v685_v45 = vpop.f32.mrf.mxu1 }
 0x10c   : > { %v686_v46 = vadd.f32 %v996_v42, %v685_v45 }
 0x10d   : > { %v998_v47 = vpop.f32.mrf.mxu0  ;;  %v1035_v48 = vpop.f32.mrf.mxu1 }
 0x10e   : > { %v700_v49 = vadd.f32 %v686_v46, %v366_v44  ;;  %v999_v50 = vadd.f32 %v998_v47, %v997_v43 }
 0x10f   : > { %v1000_v51 = vpop.f32.mrf.mxu0  ;;  %v688_v53 = vpop.f32.mrf.mxu1 }
 0x110   : > { %704 = vst [vmem:[#allocation2 + $0x10] sm:$0xff] %v700_v49  ;;  %v689_v54 = vadd.f32 %v999_v50, %v688_v53 }
 0x111   : > { %v1001_v55 = vpop.f32.mrf.mxu0 }
 0x112   : > { %v701_v56 = vadd.f32 %v689_v54, %v367_v52  ;;  %v1002_v57 = vadd.f32 %v1001_v55, %v1000_v51 }
 0x113   : > { %v1003_v59 = vpop.f32.mrf.mxu0 }
 0x114   : > { %705 = vst [vmem:[#allocation2] sm:$0xff] %v701_v56  ;;  %v694_v60 = vadd.f32 %v1034_v41, %v1002_v57 }
 0x115   : > { %v1004_v61 = vpop.f32.mrf.mxu0 }
 0x116   : > { %v702_v62 = vadd.f32 %v694_v60, %v368_v58  ;;  %v1005_v63 = vadd.f32 %v1004_v61, %v1003_v59 }
 0x118   : > { %706 = vst [vmem:[#allocation2 + $0x18] sm:$0xff] %v702_v62  ;;  %v697_v1 = vadd.f32 %v1035_v48, %v1005_v63  ;;  %711 = sbr.rel (%p943_p11) target bundleno = 301 (0x12d), region = 70 }
 0x11a   : > { %v703_v2 = vadd.f32 %v697_v1, %v369_v0 }
 0x11c   : > { %707 = vst [vmem:[#allocation2 + $0x8] sm:$0xff] %v703_v2 }
 0x11d   : > { %v712_v3 = vld [vmem:[#allocation2 + $0x10] sm:$0xff]  ;;  %v713_v4 = vld [vmem:[#allocation2] sm:$0xff]  ;;  %v976_v15 = vld [vmem:[%s1296_s3 + $0x8] sm:$0xff]  }
 0x11e   : > { %v944_v5 = vld [vmem:[%s1295_s2] ss:$0 sm:$0xff]  ;;  %v964_v16 = vunpack.c.l.bf16 %v976_v15  ;;  %v965_v17 = vunpack.c.h.bf16 %v976_v15 }
 0x11f   : > { %v723_v6 = vadd.f32 %v944_v5, %v712_v3  ;;  %v724_v7 = vadd.f32 %v944_v5, %v713_v4  ;;  %v959_v8 = vld [vmem:[%s1296_s3] sm:$0xff]   ;;  %v714_v9 = vld [vmem:[#allocation2 + $0x18] sm:$0xff] }
 0x120   : > { %v960_v11 = vunpack.c.l.bf16 %v959_v8  ;;  %v961_v12 = vunpack.c.h.bf16 %v959_v8  ;;  %v725_v13 = vadd.f32 %v944_v5, %v714_v9 }
 0x122   : > { %v735_v18 = vadd.f32 %v960_v11, %v723_v6  ;;  %v736_v19 = vadd.f32 %v961_v12, %v724_v7  ;;  %v737_v20 = vadd.f32 %v964_v16, %v725_v13 }
 0x123   : > { %v715_v10 = vld [vmem:[#allocation2 + $0x8] sm:$0xff] }
 0x124   : > { %v726_v14 = vadd.f32 %v944_v5, %v715_v10  ;;  %v739_v22 = vmax.f32 %v735_v18, 0.0  ;;  %v740_v23 = vmax.f32 %v736_v19, 0.0  ;;  %v741_v24 = vmax.f32 %v737_v20, 0.0 }
 0x126   : > { %v738_v21 = vadd.f32 %v965_v17, %v726_v14  ;;  %v969_v26 = vpack.c.bf16 %v740_v23, %v739_v22 }
 0x128   : > { %v742_v25 = vmax.f32 %v738_v21, 0.0  ;;  %970 = vst [vmem:[%s1297_s4] sm:$0xff] %v969_v26  }
 0x12a   : > { %v974_v27 = vpack.c.bf16 %v742_v25, %v741_v24 }
 0x12c   : > { %977 = vst [vmem:[%s1297_s4 + $0x8] sm:$0xff] %v974_v27  }
 0x12d PF: > { %s14_s19 = sadd.s32 1, %s1149_s19   ;;  %s1298_s15 = smov %s1137_s16 }
 0x12e   : > { %p11_p12 = scmp.ge.s32.totalorder %s14_s19, 5   ;;  %s1299_s16 = smov %s1212_s23 }
 0x12f   : > { %s1300_s17 = smov %s1145_s18  ;;  %s1301_s18 = smov %s1303_s20 }
 0x130   :  { %13 = sbr.rel (!%p11_p12) target bundleno = 3 (0x3), region = 120 }

// kernel: _lambda_.30
= control target key start
LH: loop header
LB: loop body
LE: loop exit
PB: predicated region body
PF: predicated region fallthrough
CT: control target
= control target key end

     0   :  { %s1072_s12 = smov 0   ;;  %s1074_s13 = smov 0   ;;  %s1182_s0 = inlined_call_operand.vmem [shape: bf16[32,1152], index: 0, kind: input, shape index: {}]   ;;  %s1183_s1 = inlined_call_operand.vmem [shape: bf16[1152,128], index: 1, kind: input, shape index: {}]   ;;  %s1184_s2 = inlined_call_operand.vmem [shape: f32[1,128], index: 2, kind: input, shape index: {}]   ;;  %s1185_s3 = inlined_call_operand.vmem [shape: bf16[32,128], index: 3, kind: output, shape index: {}]  }
   0x1   :  { %s1076_s14 = smov 0   ;;  %s1078_s15 = smov 0  }
   0x2   :  { %s1080_s16 = smov 0  }
   0x3 LB: > { %s25_s17 = sadd.s32 1, %s1045_s15  ;;  %p48_p1 = scmp.ne.s32.totalorder %s1037_s13, %s1033_s12  ;;  %s1049_s16 = sphi %s1080_s16, %s13_s16   ;;  %s1045_s15 = sphi %s1078_s15, %s1189_s15   ;;  %s1041_s14 = sphi %s1076_s14, %s1188_s14   ;;  %s1037_s13 = sphi %s1074_s13, %s1187_s13   ;;  %s1033_s12 = sphi %s1072_s12, %s1186_s12  }
   0x4   : > { %p26_p0 = scmp.ge.s32.totalorder %s25_s17, 3  ;;  %p49_p2 = scmp.eq.s32.totalorder %s1049_s16, 0 }
   0x5   : > { %s41_s19 = sadd.s32 1, %s1037_s13  ;;  %p809_p5 = scmp.ge.s32.totalorder %s1049_s16, 3 }
   0x6   : > { %s1191_s17 = smov (%p26_p0, %s25_s17), 0  ;;  %p50_p3 = por %p49_p2, %p48_p1 }
   0x7   : > { %s37_s18 = ssub.s32 %s1045_s15, %s1191_s17  ;;  %162 = sbr.rel (%p809_p5) target bundleno = 21 (0x15), region = 20 }
   0x8   : > { %p39_p4 = scmp.eq.s32.totalorder %s37_s18, 0 }
   0xa   : > { %s1107_s20 = scalar_select %p39_p4, %s1037_s13, %s41_s19  }
   0xc   : > { %165 = sbr.rel (!%p50_p3) target bundleno = 21 (0x15), region = 24  ;;  %s167_s21 = sand.u32 (%p50_p3), 1, %s1037_s13  }
   0xd   : > { %s862_s22 = smul.u32 (%p50_p3), 12, %s1045_s15 }
   0xe   : > { %s936_s23 = smul.u32 (%p50_p3), 48, %s167_s21 }
   0xf   : > { %s175_s26 = scalar_lea.vmem (%p50_p3), %s1182_s0, %s862_s22 }
  0x10   : > { %v190_v0 = vld [vmem:[%s175_s26] sm:$0xff] (%p50_p3)  ;;  %v194_v2 = vld [vmem:[%s175_s26 + $0x48] sm:$0xff] (%p50_p3)  ;;  %s169_s27 = scalar_lea.vmem (%p50_p3), [#allocation3], %s936_s23  ;;  %v815_v6 = vld [vmem:[%s175_s26 + $0x50] sm:$0xf] (%p50_p3) }
  0x11   : > { %v192_v1 = vld [vmem:[%s175_s26 + $0x24] sm:$0xff]  ;;  %191 = vst [vmem:[%s169_s27] sm:$0xff] %v190_v0  ;;  %195 = vst [vmem:[%s169_s27 + $0x18] sm:$0xff] %v194_v2  ;;  %v196_v3 = vld [vmem:[%s175_s26 + $0x6c] sm:$0xff] }
  0x12   : > { %193 = vst [vmem:[%s169_s27 + $0xc] sm:$0xff] %v192_v1  ;;  %v811_v4 = vld [vmem:[%s175_s26 + $0x8] sm:$0xf]  ;;  %v813_v5 = vld [vmem:[%s175_s26 + $0x2c] sm:$0xf]  ;;  %197 = vst [vmem:[%s169_s27 + $0x24] sm:$0xff] %v196_v3 }
  0x13   : > { %812 = vst [vmem:[%s169_s27 + $0x8] sm:$0xf] %v811_v4  ;;  %814 = vst [vmem:[%s169_s27 + $0x14] sm:$0xf] %v813_v5  ;;  %v817_v7 = vld [vmem:[%s175_s26 + $0x74] sm:$0xf] }
  0x14   : > { %816 = vst [vmem:[%s169_s27 + $0x20] sm:$0xf] %v815_v6  ;;  %818 = vst [vmem:[%s169_s27 + $0x2c] sm:$0xf] %v817_v7 }
  0x15 PF: > { %p819_p6 = scmp.ge.s32.totalorder %s1049_s16, 1  ;;  %p230_p7 = scmp.lt.s32.totalorder %s1049_s16, 4 }
  0x17   : > { %p231_p8 = pnand %p819_p6, %p230_p7 }
  0x18   : > { %s237_s28 = sand.u32 (!%p231_p8), 1, %s1033_s12   ;;  %s276_s29 = smul.u32 (!%p231_p8), 48, %s1041_s14 }
  0x19   : > { %234 = sbr.rel (%p231_p8) target bundleno = 299 (0x12b), region = 54  ;;  %p821_p10 = scmp.ne.s32.totalorder (!%p231_p8), %s1041_s14, 0 }
  0x1a   : > { %s937_s30 = smul.u32 (!%p231_p8), 48, %s237_s28  ;;  %p277_p9 = scmp.lt.s32.totalorder (!%p231_p8), %s276_s29, 143 }
  0x1c   : > { %s1124_s8 = scalar_lea.vmem (!%p231_p8), [#allocation3], %s937_s30 }
  0x1e   : > { %s1193_s29 = smov (!%p277_p9, %s276_s29), 143  ;;  %301 = sbr.rel (%p821_p10) target bundleno = 38 (0x26), region = 62 }
  0x1f   : > { %s820_s4 = sshll.u32 %s1193_s29, 2 }
  0x20   : > { %s1122_s7 = scalar_lea.vmem %s1183_s1, %s820_s4 }
  0x23   : > { %v1051_v8 = vmov 0.0  }
  0x24   : > { %302 = vst [vmem:[#allocation2 + $0x10] sm:$0xff] %v1051_v8  ;;  %303 = vst [vmem:[#allocation2] sm:$0xff] %v1051_v8 }
  0x25   : > { %304 = vst [vmem:[#allocation2 + $0x18] sm:$0xff] %v1051_v8  ;;  %305 = vst [vmem:[#allocation2 + $0x8] sm:$0xff] %v1051_v8 }
  0x26 PF: > { %v979_v9 = vld [vmem:[%s1122_s7 + $0x78] sm:$0xff]   ;;  %v982_v12 = vld [vmem:[%s1122_s7 + $0x70] sm:$0xff]   ;;  %v985_v15 = vld [vmem:[%s1122_s7 + $0x68] sm:$0xff]   ;;  %p852_p11 = scmp.ne.s32.totalorder %s1041_s14, 2 }
  0x27   : > { %v980_v10 = vld [vmem:[%s1122_s7 + $0x38] sm:$0xff]   ;;  %878 = vmatprep.subr.bf16.mxu0 %v979_v9  ;;  %v983_v13 = vld [vmem:[%s1122_s7 + $0x30] sm:$0xff]   ;;  %v986_v16 = vld [vmem:[%s1122_s7 + $0x28] sm:$0xff]  }
  0x28   : > { %v981_v11 = vld [vmem:[%s1122_s7 + $0xb8] sm:$0xff]   ;;  %879 = vmatpush3.bf16.msra.mxu0 %v980_v10  ;;  %v984_v14 = vld [vmem:[%s1122_s7 + $0xb0] sm:$0xff]   ;;  %v987_v17 = vld [vmem:[%s1122_s7 + $0xa8] sm:$0xff]  }
  0x29   : > { %916 = vmatprep.subr.bf16.mxu1 %v981_v11  ;;  %880 = vmatprep.subr.bf16.mxu0 %v982_v12  ;;  %v988_v18 = vld [vmem:[%s1122_s7 + $0x60] sm:$0xff]   ;;  %v991_v21 = vld [vmem:[%s1122_s7 + $0x58] sm:$0xff]   ;;  %v994_v24 = vld [vmem:[%s1122_s7 + $0x50] sm:$0xff]  }
  0x2a   : > { %917 = vmatpush3.bf16.msra.mxu1 %v981_v11  ;;  %v989_v19 = vld [vmem:[%s1122_s7 + $0x20] sm:$0xff]   ;;  %v993_v22 = vld [vmem:[%s1122_s7 + $0x98] sm:$0xff]   ;;  %v996_v25 = vld [vmem:[%s1122_s7 + $0x90] sm:$0xff]  }
  0x2b   : > { %918 = vmatprep.subr.bf16.mxu1 %v984_v14  ;;  %v990_v20 = vld [vmem:[%s1122_s7 + $0xa0] sm:$0xff]   ;;  %v992_v23 = vld [vmem:[%s1122_s7 + $0x18] sm:$0xff]   ;;  %v995_v26 = vld [vmem:[%s1122_s7 + $0x10] sm:$0xff]  }
  0x2c   : > { %881 = vmatpush3.bf16.msra.mxu0 %v983_v13  ;;  %v997_v27 = vld [vmem:[%s1122_s7 + $0x48] sm:$0xff]   ;;  %v1000_v30 = vld [vmem:[%s1122_s7 + $0x40] sm:$0xff]   ;;  %v306_v44 = vld [vmem:[#allocation2 + $0x10] sm:$0xff] }
  0x2d   : > { %882 = vmatprep.subr.bf16.mxu0 %v985_v15  ;;  %v998_v28 = vld [vmem:[%s1122_s7 + $0x8] sm:$0xff]   ;;  %v1002_v31 = vld [vmem:[%s1122_s7 + $0x80] sm:$0xff]   ;;  %v308_v58 = vld [vmem:[#allocation2 + $0x18] sm:$0xff] }
  0x2e   : > { %919 = vmatpush3.bf16.msra.mxu1 %v984_v14  ;;  %v999_v29 = vld [vmem:[%s1122_s7 + $0x88] sm:$0xff]   ;;  %v1005_v32 = vld [vmem:[%s1124_s8 + $0x4] ss:$12 sps:$4 sm:$0xff]  }
  0x2f   : > { %920 = vmatprep.subr.bf16.mxu1 %v987_v17  ;;  %v1006_v33 = vld [vmem:[%s1124_s8 + $0x8] ss:$12 sps:$4 sm:$0xff]   ;;  %574 = vmatprep.mubr.bf16.mxu0 %v1005_v32  ;;  %v1003_v35 = vld [vmem:[%s1124_s8] ss:$12 sps:$4 sm:$0xff]   ;;  %v1010_v38 = vld [vmem:[%s1124_s8 + $0x18] ss:$12 sps:$4 sm:$0xff]  }
  0x30   : > { %883 = vmatpush3.bf16.msra.mxu0 %v986_v16  ;;  %v1001_v34 = vld [vmem:[%s1122_s7] sm:$0xff]   ;;  %932 = vmatprep.mubr.bf16.mxu1 %v1006_v33  ;;  %v1008_v36 = vld [vmem:[%s1124_s8 + $0x1c] ss:$12 sps:$4 sm:$0xff]  }
  0x31   : > { %884 = vmatprep.subr.bf16.mxu0 %v988_v18  ;;  %v1007_v37 = vld [vmem:[%s1124_s8 + $0x20] ss:$12 sps:$4 sm:$0xff]  }
  0x32   : > { %921 = vmatpush3.bf16.msra.mxu1 %v987_v17  ;;  %v307_v52 = vld [vmem:[#allocation2] sm:$0xff]  ;;  %v309_v0 = vld [vmem:[#allocation2 + $0x8] sm:$0xff] }
  0x33   : > { %922 = vmatprep.subr.bf16.mxu1 %v990_v20 }
  0x34   : > { %885 = vmatpush3.bf16.msra.mxu0 %v989_v19 }
  0x35   : > { %886 = vmatprep.subr.bf16.mxu0 %v991_v21 }
  0x36   : > { %923 = vmatpush3.bf16.msra.mxu1 %v990_v20 }
  0x37   : > { %924 = vmatprep.subr.bf16.mxu1 %v993_v22 }
  0x38   : > { %887 = vmatpush3.bf16.msra.mxu0 %v992_v23 }
  0x39   : > { %888 = vmatprep.subr.bf16.mxu0 %v994_v24 }
  0x3a   : > { %925 = vmatpush3.bf16.msra.mxu1 %v993_v22 }
  0x3b   : > { %926 = vmatprep.subr.bf16.mxu1 %v996_v25 }
  0x3c   : > { %889 = vmatpush3.bf16.msra.mxu0 %v995_v26 }
  0x3d   : > { %890 = vmatprep.subr.bf16.mxu0 %v997_v27 }
  0x3e   : > { %927 = vmatpush3.bf16.msra.mxu1 %v996_v25 }
  0x3f   : > { %928 = vmatprep.subr.bf16.mxu1 %v999_v29 }
  0x40   : > { %891 = vmatpush3.bf16.msra.mxu0 %v998_v28 }
  0x41   : > { %892 = vmatprep.subr.bf16.mxu0 %v1000_v30 }
  0x42   : > { %929 = vmatpush3.bf16.msra.mxu1 %v999_v29 }
  0x43   : > { %930 = vmatprep.subr.bf16.mxu1 %v1002_v31 }
  0x44   : > { %893 = vmatpush3.bf16.msra.mxu0 %v1001_v34 }
  0x46   : > { %931 = vmatpush3.bf16.msra.mxu1 %v1002_v31 }
  0x47   : > { %575 = vmatmul.mubr.bf16.vlgmr.msra.gmra.mxu0 %v1003_v35 }
  0x48   : > { %582 = vmatprep.mubr.bf16.mxu0 %v1008_v36 }
  0x49   : > { %933 = vmatmul.mubr.bf16.vlgmr.msra.gmra.mxu1 %v1007_v37 }
  0x4f   : > { %583 = vmatmul.mubr.bf16.gmra.mxu0 %v1010_v38 }
 0x107   : > { %v894_v39 = vpop.f32.mrf.mxu0 }
 0x109   : > { %v895_v40 = vpop.f32.mrf.mxu0  ;;  %v934_v41 = vpop.f32.mrf.mxu1 }
 0x10a   : > { %v896_v42 = vadd.f32 %v895_v40, %v894_v39 }
 0x10b   : > { %v897_v43 = vpop.f32.mrf.mxu0  ;;  %v625_v45 = vpop.f32.mrf.mxu1 }
 0x10c   : > { %v626_v46 = vadd.f32 %v896_v42, %v625_v45 }
 0x10d   : > { %v898_v47 = vpop.f32.mrf.mxu0  ;;  %v935_v48 = vpop.f32.mrf.mxu1 }
 0x10e   : > { %v640_v49 = vadd.f32 %v626_v46, %v306_v44  ;;  %v899_v50 = vadd.f32 %v898_v47, %v897_v43 }
 0x10f   : > { %v900_v51 = vpop.f32.mrf.mxu0  ;;  %v628_v53 = vpop.f32.mrf.mxu1 }
 0x110   : > { %644 = vst [vmem:[#allocation2 + $0x10] sm:$0xff] %v640_v49  ;;  %v629_v54 = vadd.f32 %v899_v50, %v628_v53 }
 0x111   : > { %v901_v55 = vpop.f32.mrf.mxu0 }
 0x112   : > { %v641_v56 = vadd.f32 %v629_v54, %v307_v52  ;;  %v902_v57 = vadd.f32 %v901_v55, %v900_v51 }
 0x113   : > { %v903_v59 = vpop.f32.mrf.mxu0 }
 0x114   : > { %645 = vst [vmem:[#allocation2] sm:$0xff] %v641_v56  ;;  %v634_v60 = vadd.f32 %v934_v41, %v902_v57 }
 0x115   : > { %v904_v61 = vpop.f32.mrf.mxu0 }
 0x116   : > { %v642_v62 = vadd.f32 %v634_v60, %v308_v58  ;;  %v905_v63 = vadd.f32 %v904_v61, %v903_v59 }
 0x118   : > { %646 = vst [vmem:[#allocation2 + $0x18] sm:$0xff] %v642_v62  ;;  %v637_v1 = vadd.f32 %v935_v48, %v905_v63  ;;  %651 = sbr.rel (%p852_p11) target bundleno = 299 (0x12b), region = 66 }
 0x11a   : > { %v643_v2 = vadd.f32 %v637_v1, %v309_v0 }
 0x11c   : > { %647 = vst [vmem:[#allocation2 + $0x8] sm:$0xff] %v643_v2 }
 0x11d   : > { %v652_v3 = vld [vmem:[#allocation2 + $0x10] sm:$0xff]  ;;  %v653_v4 = vld [vmem:[#allocation2] sm:$0xff] }
 0x11e   : > { %v853_v5 = vld [vmem:[%s1184_s2] ss:$0 sm:$0xff] }
 0x11f   : > { %v663_v6 = vadd.f32 %v853_v5, %v652_v3  ;;  %v664_v7 = vadd.f32 %v853_v5, %v653_v4  ;;  %v654_v8 = vld [vmem:[#allocation2 + $0x18] sm:$0xff] }
 0x120   : > { %v665_v10 = vadd.f32 %v853_v5, %v654_v8 }
 0x121   : > { %v667_v12 = vmax.f32 %v663_v6, 0.0  ;;  %v668_v13 = vmax.f32 %v664_v7, 0.0 }
 0x122   : > { %v669_v14 = vmax.f32 %v665_v10, 0.0 }
 0x123   : > { %v655_v9 = vld [vmem:[#allocation2 + $0x8] sm:$0xff]  ;;  %v870_v16 = vpack.c.bf16 %v668_v13, %v667_v12 }
 0x124   : > { %v666_v11 = vadd.f32 %v853_v5, %v655_v9 }
 0x125   : > { %871 = vst [vmem:[%s1185_s3] sm:$0xff] %v870_v16  }
 0x126   : > { %v670_v15 = vmax.f32 %v666_v11, 0.0 }
 0x128   : > { %v875_v17 = vpack.c.bf16 %v670_v15, %v669_v14 }
 0x12a   : > { %877 = vst [vmem:[%s1185_s3 + $0x8] sm:$0xff] %v875_v17  }
 0x12b PF: > { %s13_s16 = sadd.s32 1, %s1049_s16   ;;  %s1186_s12 = smov %s1037_s13 }
 0x12c   : > { %p10_p12 = scmp.ge.s32.totalorder %s13_s16, 5   ;;  %s1187_s13 = smov %s1107_s20 }
 0x12d   : > { %s1188_s14 = smov %s1045_s15  ;;  %s1189_s15 = smov %s1191_s17 }
 0x12e   :  { %12 = sbr.rel (!%p10_p12) target bundleno = 3 (0x3), region = 113 }

// kernel: _lambda_.32
= control target key start
LH: loop header
LB: loop body
LE: loop exit
PB: predicated region body
PF: predicated region fallthrough
CT: control target
= control target key end

     0   :  { %s1036_s12 = smov 0   ;;  %s1038_s13 = smov 0   ;;  %s1135_s0 = inlined_call_operand.vmem [shape: bf16[8,1152], index: 0, kind: input, shape index: {}]   ;;  %s1136_s1 = inlined_call_operand.vmem [shape: bf16[1152,256], index: 1, kind: input, shape index: {}]   ;;  %s1137_s2 = inlined_call_operand.vmem [shape: f32[1,256], index: 2, kind: input, shape index: {}]   ;;  %s1138_s3 = inlined_call_operand.vmem [shape: bf16[8,256], index: 3, kind: output, shape index: {}]  }
   0x1   :  { %s1040_s14 = smov 0  }
   0x2 LB: > { %s25_s15 = sadd.s32 1, %s1008_s13  ;;  %p825_p0 = scmp.ge.s32.totalorder %s1012_s14, 1  ;;  %s1012_s14 = sphi %s1040_s14, %s13_s14   ;;  %s1008_s13 = sphi %s1038_s13, %s1140_s13   ;;  %s1004_s12 = sphi %s1036_s12, %s1139_s12  }
   0x3   : > { %p26_p1 = scmp.ge.s32.totalorder %s25_s15, 3  ;;  %p194_p2 = scmp.lt.s32.totalorder %s1012_s14, 4 }
   0x5   : > { %s1142_s15 = smov (%p26_p1, %s25_s15), 0  ;;  %p195_p3 = pnand %p825_p0, %p194_p2 }
   0x6   : > { %s240_s16 = smul.u32 (!%p195_p3), 3, %s1004_s12  ;;  %p829_p6 = scmp.ne.s32.totalorder (!%p195_p3), %s1004_s12, 0 }
   0x7   : > { %198 = sbr.rel (%p195_p3) target bundleno = 302 (0x12e), region = 32 }
   0x8   : > { %s250_s17 = smul.u32 (!%p195_p3), 48, %s1004_s12  ;;  %p243_p4 = scmp.lt.s32.totalorder (!%p195_p3), %s240_s16, 8 }
   0xa   : > { %p252_p5 = scmp.lt.s32.totalorder (!%p195_p3), %s250_s17, 143 }
   0xc   : > { %s1144_s16 = smov (!%p243_p4, %s240_s16), 8  ;;  %s1146_s17 = smov (!%p252_p5, %s250_s17), 143 }
   0xd   : > { %s826_s18 = sshll.u32 %s1144_s16, 2  ;;  %s887_s22 = sshll.u32 %s1146_s17, 3 }
   0xe   : > { %s1061_s21 = scalar_lea.vmem %s1135_s0, %s826_s18  ;;  %s1066_s25 = scalar_lea.vmem %s1136_s1, %s887_s22 }
   0xf   : > { %281 = sbr.rel (%p829_p6) target bundleno = 22 (0x16), region = 36 }
  0x14   : > { %v1014_v0 = vmov 0.0  }
  0x15   : > { %282 = vst [vmem:[#allocation2] sm:$0xff] %v1014_v0  ;;  %283 = vst [vmem:[#allocation2 + $0x8] sm:$0xff] %v1014_v0 }
  0x16 PF: > { %v915_v1 = vld [vmem:[%s1066_s25 + $0x74] ss:$8 sps:$4 sm:$0xff]   ;;  %v917_v2 = vld [vmem:[%s1066_s25 + $0x70] ss:$8 sps:$4 sm:$0xff]   ;;  %v1015_v3 = vmov 0   ;;  %v286_v34 = vld [vmem:[%s1061_s21] sm:$0xff] }
  0x17   : > { %660 = vmatprep.mubr.bf16.mxu1 %v1015_v3  ;;  %587 = vmatprep.subr.bf16.mxu0 %v915_v1  ;;  %v918_v4 = vld [vmem:[%s1066_s25 + $0x64] ss:$8 sps:$4 sm:$0xff]   ;;  %v920_v5 = vld [vmem:[%s1066_s25 + $0x60] ss:$8 sps:$4 sm:$0xff]   ;;  %v921_v6 = vld [vmem:[%s1066_s25 + $0x54] ss:$8 sps:$4 sm:$0xff]   ;;  %v831_v36 = vcombine.high %v286_v34, %v286_v34  ;;  %v830_v53 = vcombine.low %v286_v34, %v286_v34 }
  0x18   : > { %588 = vmatpush1.bf16.msra.mxu0 %v917_v2  ;;  %v923_v7 = vld [vmem:[%s1066_s25 + $0x50] ss:$8 sps:$4 sm:$0xff]   ;;  %v924_v8 = vld [vmem:[%s1066_s25 + $0x44] ss:$8 sps:$4 sm:$0xff]   ;;  %v936_v9 = vld [vmem:[%s1066_s25 + $0x174] ss:$8 sps:$4 sm:$0xff]  }
  0x19   : > { %589 = vmatprep.subr.bf16.mxu0 %v918_v4  ;;  %v938_v10 = vld [vmem:[%s1066_s25 + $0x170] ss:$8 sps:$4 sm:$0xff]   ;;  %v926_v11 = vld [vmem:[%s1066_s25 + $0x40] ss:$8 sps:$4 sm:$0xff]   ;;  %v927_v12 = vld [vmem:[%s1066_s25 + $0x34] ss:$8 sps:$4 sm:$0xff]   ;;  %628 = vmatprep.subr.bf16.mxu1 %v936_v9 }
  0x1a   : > { %v942_v13 = vld [vmem:[%s1066_s25 + $0x164] ss:$8 sps:$4 sm:$0xff]   ;;  %629 = vmatpush1.bf16.msra.mxu1 %v938_v10  ;;  %v944_v14 = vld [vmem:[%s1066_s25 + $0x160] ss:$8 sps:$4 sm:$0xff]   ;;  %v929_v15 = vld [vmem:[%s1066_s25 + $0x30] ss:$8 sps:$4 sm:$0xff]   ;;  %619 = vmatprep.mubr.bf16.mxu0 %v831_v36 }
  0x1b   : > { %630 = vmatprep.subr.bf16.mxu1 %v942_v13  ;;  %v948_v16 = vld [vmem:[%s1066_s25 + $0x154] ss:$8 sps:$4 sm:$0xff]   ;;  %v930_v17 = vld [vmem:[%s1066_s25 + $0x24] ss:$8 sps:$4 sm:$0xff]   ;;  %v950_v18 = vld [vmem:[%s1066_s25 + $0x150] ss:$8 sps:$4 sm:$0xff]  }
  0x1c   : > { %590 = vmatpush1.bf16.msra.mxu0 %v920_v5  ;;  %v954_v19 = vld [vmem:[%s1066_s25 + $0x144] ss:$8 sps:$4 sm:$0xff]   ;;  %v932_v20 = vld [vmem:[%s1066_s25 + $0x20] ss:$8 sps:$4 sm:$0xff]   ;;  %v933_v21 = vld [vmem:[%s1066_s25 + $0x14] ss:$8 sps:$4 sm:$0xff]  }
  0x1d   : > { %591 = vmatprep.subr.bf16.mxu0 %v921_v6  ;;  %v956_v22 = vld [vmem:[%s1066_s25 + $0x140] ss:$8 sps:$4 sm:$0xff]   ;;  %v960_v23 = vld [vmem:[%s1066_s25 + $0x134] ss:$8 sps:$4 sm:$0xff]   ;;  %v935_v24 = vld [vmem:[%s1066_s25 + $0x10] ss:$8 sps:$4 sm:$0xff]  }
  0x1e   : > { %631 = vmatpush1.bf16.msra.mxu1 %v944_v14  ;;  %v939_v25 = vld [vmem:[%s1066_s25 + $0x4] ss:$8 sps:$4 sm:$0xff]   ;;  %v962_v26 = vld [vmem:[%s1066_s25 + $0x130] ss:$8 sps:$4 sm:$0xff]   ;;  %v941_v28 = vld [vmem:[%s1066_s25] ss:$8 sps:$4 sm:$0xff]  }
  0x1f   : > { %632 = vmatprep.subr.bf16.mxu1 %v948_v16  ;;  %v966_v27 = vld [vmem:[%s1066_s25 + $0x124] ss:$8 sps:$4 sm:$0xff]   ;;  %v945_v29 = vld [vmem:[%s1066_s25 + $0xf4] ss:$8 sps:$4 sm:$0xff]   ;;  %v968_v30 = vld [vmem:[%s1066_s25 + $0x120] ss:$8 sps:$4 sm:$0xff]  }
  0x20   : > { %592 = vmatpush1.bf16.msra.mxu0 %v923_v7  ;;  %v972_v31 = vld [vmem:[%s1066_s25 + $0x114] ss:$8 sps:$4 sm:$0xff]   ;;  %v947_v32 = vld [vmem:[%s1066_s25 + $0xf0] ss:$8 sps:$4 sm:$0xff]   ;;  %v951_v33 = vld [vmem:[%s1066_s25 + $0xe4] ss:$8 sps:$4 sm:$0xff]  }
  0x21   : > { %593 = vmatprep.subr.bf16.mxu0 %v924_v8  ;;  %v974_v35 = vld [vmem:[%s1066_s25 + $0x110] ss:$8 sps:$4 sm:$0xff]   ;;  %v978_v37 = vld [vmem:[%s1066_s25 + $0x104] ss:$8 sps:$4 sm:$0xff]   ;;  %v953_v38 = vld [vmem:[%s1066_s25 + $0xe0] ss:$8 sps:$4 sm:$0xff]  }
  0x22   : > { %633 = vmatpush1.bf16.msra.mxu1 %v950_v18  ;;  %v957_v39 = vld [vmem:[%s1066_s25 + $0xd4] ss:$8 sps:$4 sm:$0xff]   ;;  %v980_v40 = vld [vmem:[%s1066_s25 + $0x100] ss:$8 sps:$4 sm:$0xff]   ;;  %v959_v41 = vld [vmem:[%s1066_s25 + $0xd0] ss:$8 sps:$4 sm:$0xff]  }
  0x23   : > { %634 = vmatprep.subr.bf16.mxu1 %v954_v19  ;;  %v963_v42 = vld [vmem:[%s1066_s25 + $0xc4] ss:$8 sps:$4 sm:$0xff]   ;;  %v984_v43 = vld [vmem:[%s1061_s21 + $0x8] ss:$0 sps:$4 sm:$0xff]   ;;  %v969_v45 = vld [vmem:[%s1066_s25 + $0xb4] ss:$8 sps:$4 sm:$0xff]  }
  0x24   : > { %594 = vmatpush1.bf16.msra.mxu0 %v926_v11  ;;  %v965_v44 = vld [vmem:[%s1066_s25 + $0xc0] ss:$8 sps:$4 sm:$0xff]   ;;  %v971_v46 = vld [vmem:[%s1066_s25 + $0xb0] ss:$8 sps:$4 sm:$0xff]   ;;  %v975_v47 = vld [vmem:[%s1066_s25 + $0xa4] ss:$8 sps:$4 sm:$0xff]  }
  0x25   : > { %595 = vmatprep.subr.bf16.mxu0 %v927_v12  ;;  %v977_v48 = vld [vmem:[%s1066_s25 + $0xa0] ss:$8 sps:$4 sm:$0xff]   ;;  %v981_v49 = vld [vmem:[%s1066_s25 + $0x94] ss:$8 sps:$4 sm:$0xff]   ;;  %v983_v50 = vld [vmem:[%s1066_s25 + $0x90] ss:$8 sps:$4 sm:$0xff]  }
  0x26   : > { %635 = vmatpush1.bf16.msra.mxu1 %v956_v22  ;;  %v985_v51 = vld [vmem:[%s1066_s25 + $0x84] ss:$8 sps:$4 sm:$0xff]   ;;  %v987_v52 = vld [vmem:[%s1066_s25 + $0x80] ss:$8 sps:$4 sm:$0xff]   ;;  %p881_p7 = scmp.ne.s32.totalorder %s1004_s12, 2 }
  0x27   : > { %636 = vmatprep.subr.bf16.mxu1 %v960_v23  ;;  %v284_v58 = vld [vmem:[#allocation2] sm:$0xff]  ;;  %v285_v61 = vld [vmem:[#allocation2 + $0x8] sm:$0xff] }
  0x28   : > { %596 = vmatpush1.bf16.msra.mxu0 %v929_v15 }
  0x29   : > { %597 = vmatprep.subr.bf16.mxu0 %v930_v17 }
  0x2a   : > { %637 = vmatpush1.bf16.msra.mxu1 %v962_v26 }
  0x2b   : > { %638 = vmatprep.subr.bf16.mxu1 %v966_v27 }
  0x2c   : > { %598 = vmatpush1.bf16.msra.mxu0 %v932_v20 }
  0x2d   : > { %599 = vmatprep.subr.bf16.mxu0 %v933_v21 }
  0x2e   : > { %639 = vmatpush1.bf16.msra.mxu1 %v968_v30 }
  0x2f   : > { %640 = vmatprep.subr.bf16.mxu1 %v972_v31 }
  0x30   : > { %600 = vmatpush1.bf16.msra.mxu0 %v935_v24 }
  0x31   : > { %601 = vmatprep.subr.bf16.mxu0 %v939_v25 }
  0x32   : > { %641 = vmatpush1.bf16.msra.mxu1 %v974_v35 }
  0x33   : > { %642 = vmatprep.subr.bf16.mxu1 %v978_v37 }
  0x34   : > { %602 = vmatpush1.bf16.msra.mxu0 %v941_v28 }
  0x35   : > { %603 = vmatprep.subr.bf16.mxu0 %v945_v29 }
  0x36   : > { %643 = vmatpush1.bf16.msra.mxu1 %v980_v40 }
  0x38   : > { %604 = vmatpush2.bf16.msra.mxu0 %v947_v32 }
  0x39   : > { %605 = vmatprep.subr.bf16.mxu0 %v951_v33  ;;  %661 = vmatmul.mubr.bf16.vlgmr.msra.gmra.mxu1 %v984_v43 }
  0x3c   : > { %606 = vmatpush2.bf16.msra.mxu0 %v953_v38 }
  0x3d   : > { %607 = vmatprep.subr.bf16.mxu0 %v957_v39 }
  0x40   : > { %608 = vmatpush2.bf16.msra.mxu0 %v959_v41 }
  0x41   : > { %609 = vmatprep.subr.bf16.mxu0 %v963_v42 }
  0x44   : > { %610 = vmatpush2.bf16.msra.mxu0 %v965_v44 }
  0x45   : > { %611 = vmatprep.subr.bf16.mxu0 %v969_v45 }
  0x48   : > { %612 = vmatpush2.bf16.msra.mxu0 %v971_v46 }
  0x49   : > { %613 = vmatprep.subr.bf16.mxu0 %v975_v47 }
  0x4c   : > { %614 = vmatpush2.bf16.msra.mxu0 %v977_v48 }
  0x4d   : > { %615 = vmatprep.subr.bf16.mxu0 %v981_v49 }
  0x50   : > { %616 = vmatpush2.bf16.msra.mxu0 %v983_v50 }
  0x51   : > { %617 = vmatprep.subr.bf16.mxu0 %v985_v51 }
  0x54   : > { %618 = vmatpush2.bf16.msra.mxu0 %v987_v52 }
  0x57   : > { %620 = vmatmul.mubr.bf16.vlgmr.msra.gmra.mxu0 %v830_v53 }
  0xf9   : > { %v662_v54 = vpop.f32.mrf.mxu1 }
  0xfb   : > { %v664_v55 = vpop.f32.mrf.mxu1 }
  0xfd   : > { %v666_v56 = vpop.f32.mrf.mxu1 }
  0xff   : > { %v667_v57 = vpop.f32.mrf.mxu1 }
 0x117   : > { %v621_v59 = vpop.f32.mrf.mxu0 }
 0x118   : > { %v663_v60 = vadd.f32 %v662_v54, %v621_v59 }
 0x119   : > { %v623_v62 = vpop.f32.mrf.mxu0 }
 0x11a   : > { %v669_v63 = vadd.f32 %v663_v60, %v284_v58  ;;  %v665_v0 = vadd.f32 %v664_v55, %v623_v62  ;;  %676 = sbr.rel (%p881_p7) target bundleno = 302 (0x12e), region = 40 }
 0x11b   : > { %v625_v1 = vpop.f32.mrf.mxu0 }
 0x11c   : > { %671 = vst [vmem:[#allocation2] sm:$0xff] %v669_v63  ;;  %v670_v2 = vadd.f32 %v665_v0, %v285_v61 }
 0x11d   : > { %v626_v3 = vpop.f32.mrf.mxu0 }
 0x11e   : > { %672 = vst [vmem:[#allocation2 + $0x8] sm:$0xff] %v670_v2 }
 0x11f   : > { %v681_v4 = vlaneseq  ;;  %v679_v6 = vld [vmem:[%s1137_s2] sm:$0x3] }
 0x121   : > { %v682_v5 = vshrl.u32 %v681_v4, 7 }
 0x123   : > { %v683_v7 = vsub.s32 0, %v682_v5  ;;  %v687_v8 = vsub.s32 1, %v682_v5  ;;  %v677_v9 = vld [vmem:[#allocation2] sm:$0xff] }
 0x125   : > { %v678_v10 = vld [vmem:[#allocation2 + $0x8] sm:$0xff]  ;;  %v684_v11 = vrot.slane %v679_v6, %v683_v7  ;;  %v688_v12 = vrot.slane %v679_v6, %v687_v8 }
 0x127   : > { %v691_v13 = vadd.f32 %v684_v11, %v677_v9  ;;  %v692_v14 = vadd.f32 %v688_v12, %v678_v10 }
 0x129   : > { %v693_v15 = vmax.f32 %v691_v13, 0.0  ;;  %v694_v16 = vmax.f32 %v692_v14, 0.0 }
 0x12b   : > { %v888_v17 = vpack.c.bf16 %v694_v16, %v693_v15 }
 0x12d   : > { %703 = vst [vmem:[%s1138_s3] sm:$0xff] %v888_v17 }
 0x12e PF: > { %s13_s14 = sadd.s32 1, %s1012_s14   ;;  %s1139_s12 = smov %s1008_s13 }
 0x12f   : > { %p10_p8 = scmp.ge.s32.totalorder %s13_s14, 5   ;;  %s1140_s13 = smov %s1142_s15 }
 0x131   :  { %12 = sbr.rel (!%p10_p8) target bundleno = 2 (0x2), region = 76 }

// kernel: _lambda_.33
= control target key start
LH: loop header
LB: loop body
LE: loop exit
PB: predicated region body
PF: predicated region fallthrough
CT: control target
= control target key end

     0   :  { %v240_v1 = vmov 0   ;;  %v172_v18 = vlaneseq  ;;  %s318_s1 = inlined_call_operand.vmem [shape: bf16[128,256], index: 1, kind: input, shape index: {}]   ;;  %s319_s0 = inlined_call_operand.vmem [shape: bf16[8,128], index: 0, kind: input, shape index: {}]   ;;  %s320_s2 = inlined_call_operand.vmem [shape: f32[1,256], index: 2, kind: input, shape index: {}]   ;;  %s321_s3 = inlined_call_operand.vmem [shape: bf16[8,256], index: 3, kind: output, shape index: {}]  }
   0x1   :  { %v216_v0 = vld [vmem:[%s318_s1 + $0x74] ss:$8 sps:$4 sm:$0xff]   ;;  %152 = vmatprep.mubr.bf16.mxu0 %v240_v1  ;;  %v218_v2 = vld [vmem:[%s318_s1 + $0x70] ss:$8 sps:$4 sm:$0xff]   ;;  %v219_v3 = vld [vmem:[%s318_s1 + $0x64] ss:$8 sps:$4 sm:$0xff]  }
   0x2   :  { %120 = vmatprep.subr.bf16.mxu0 %v216_v0  ;;  %v221_v4 = vld [vmem:[%s318_s1 + $0x60] ss:$8 sps:$4 sm:$0xff]   ;;  %v222_v5 = vld [vmem:[%s318_s1 + $0x54] ss:$8 sps:$4 sm:$0xff]   ;;  %v224_v6 = vld [vmem:[%s318_s1 + $0x50] ss:$8 sps:$4 sm:$0xff]  }
   0x3   :  { %121 = vmatpush1.bf16.msra.mxu0 %v218_v2  ;;  %v225_v7 = vld [vmem:[%s318_s1 + $0x44] ss:$8 sps:$4 sm:$0xff]   ;;  %v227_v8 = vld [vmem:[%s318_s1 + $0x40] ss:$8 sps:$4 sm:$0xff]   ;;  %v228_v9 = vld [vmem:[%s318_s1 + $0x34] ss:$8 sps:$4 sm:$0xff]  }
   0x4   :  { %122 = vmatprep.subr.bf16.mxu0 %v219_v3  ;;  %v230_v10 = vld [vmem:[%s318_s1 + $0x30] ss:$8 sps:$4 sm:$0xff]   ;;  %v231_v11 = vld [vmem:[%s318_s1 + $0x24] ss:$8 sps:$4 sm:$0xff]   ;;  %v233_v12 = vld [vmem:[%s318_s1 + $0x20] ss:$8 sps:$4 sm:$0xff]  }
   0x5   :  { %v234_v13 = vld [vmem:[%s318_s1 + $0x14] ss:$8 sps:$4 sm:$0xff]   ;;  %v236_v14 = vld [vmem:[%s318_s1 + $0x10] ss:$8 sps:$4 sm:$0xff]   ;;  %v237_v15 = vld [vmem:[%s318_s1 + $0x4] ss:$8 sps:$4 sm:$0xff]  }
   0x6   :  { %v239_v16 = vld [vmem:[%s318_s1] ss:$8 sps:$4 sm:$0xff]   ;;  %v173_v19 = vshrl.u32 %v172_v18, 7 }
   0x7   :  { %123 = vmatpush1.bf16.msra.mxu0 %v221_v4  ;;  %v23_v17 = vld [vmem:[%s319_s0] sm:$0xf] }
   0x8   :  { %124 = vmatprep.subr.bf16.mxu0 %v222_v5  ;;  %v174_v20 = vsub.s32 0, %v173_v19  ;;  %v178_v21 = vsub.s32 1, %v173_v19  ;;  %v170_v22 = vld [vmem:[%s320_s2] sm:$0x3] }
   0xa   :  { %v175_v23 = vrot.slane %v170_v22, %v174_v20  ;;  %v179_v24 = vrot.slane %v170_v22, %v178_v21 }
   0xb   :  { %125 = vmatpush1.bf16.msra.mxu0 %v224_v6 }
   0xc   :  { %126 = vmatprep.subr.bf16.mxu0 %v225_v7 }
   0xf   :  { %127 = vmatpush1.bf16.msra.mxu0 %v227_v8 }
  0x10   :  { %128 = vmatprep.subr.bf16.mxu0 %v228_v9 }
  0x13   :  { %129 = vmatpush1.bf16.msra.mxu0 %v230_v10 }
  0x14   :  { %130 = vmatprep.subr.bf16.mxu0 %v231_v11 }
  0x17   :  { %131 = vmatpush1.bf16.msra.mxu0 %v233_v12 }
  0x18   :  { %132 = vmatprep.subr.bf16.mxu0 %v234_v13 }
  0x1b   :  { %133 = vmatpush1.bf16.msra.mxu0 %v236_v14 }
  0x1c   :  { %134 = vmatprep.subr.bf16.mxu0 %v237_v15 }
  0x1f   :  { %135 = vmatpush1.bf16.msra.mxu0 %v239_v16 }
  0x22   :  { %153 = vmatmul.mubr.bf16.vlgmr.msra.gmra.mxu0 %v23_v17 }
  0xe2   :  { %v154_v25 = vpop.f32.mrf.mxu0 }
  0xe3   :  { %v182_v27 = vadd.f32 %v175_v23, %v154_v25 }
  0xe4   :  { %v156_v26 = vpop.f32.mrf.mxu0 }
  0xe5   :  { %v183_v28 = vadd.f32 %v179_v24, %v156_v26 }
  0xe6   :  { %v158_v29 = vpop.f32.mrf.mxu0 }
  0xe7   :  { %v214_v30 = vpack.c.bf16 %v183_v28, %v182_v27 }
  0xe8   :  { %v159_v31 = vpop.f32.mrf.mxu0 }
  0xe9   :  { %192 = vst [vmem:[%s321_s3] sm:$0xff] %v214_v30 }

// kernel: _lambda_.34
= control target key start
LH: loop header
LB: loop body
LE: loop exit
PB: predicated region body
PF: predicated region fallthrough
CT: control target
= control target key end

     0   :  { %s1131_s15 = smov 0   ;;  %s1133_s16 = smov 0   ;;  %s1233_s0 = inlined_call_operand.vmem [shape: bf16[8,2304], index: 0, kind: input, shape index: {}]   ;;  %s1234_s1 = inlined_call_operand.vmem [shape: bf16[2304,256], index: 1, kind: input, shape index: {}]   ;;  %s1235_s2 = inlined_call_operand.vmem [shape: f32[1,256], index: 2, kind: input, shape index: {}]   ;;  %s1236_s3 = inlined_call_operand.vmem [shape: bf16[8,256], index: 3, kind: input, shape index: {}]   ;;  %s1237_s4 = inlined_call_operand.vmem [shape: bf16[8,256], index: 4, kind: output, shape index: {}]  }
   0x1   :  { %s1135_s17 = smov 0  }
   0x2 LB: > { %s26_s18 = sadd.s32 1, %s1098_s16  ;;  %p915_p0 = scmp.ge.s32.totalorder %s1102_s17, 1  ;;  %s1102_s17 = sphi %s1135_s17, %s14_s17   ;;  %s1098_s16 = sphi %s1133_s16, %s1239_s16   ;;  %s1094_s15 = sphi %s1131_s15, %s1238_s15  }
   0x3   : > { %p27_p1 = scmp.ge.s32.totalorder %s26_s18, 6  ;;  %p236_p2 = scmp.lt.s32.totalorder %s1102_s17, 7 }
   0x5   : > { %s1241_s18 = smov (%p27_p1, %s26_s18), 0  ;;  %p237_p3 = pnand %p915_p0, %p236_p2 }
   0x6   : > { %s293_s19 = smul.u32 (!%p237_p3), 3, %s1094_s15  ;;  %p919_p6 = scmp.ne.s32.totalorder (!%p237_p3), %s1094_s15, 0 }
   0x7   : > { %240 = sbr.rel (%p237_p3) target bundleno = 304 (0x130), region = 36 }
   0x8   : > { %s303_s20 = smul.u32 (!%p237_p3), 48, %s1094_s15  ;;  %p296_p4 = scmp.lt.s32.totalorder (!%p237_p3), %s293_s19, 17 }
   0xa   : > { %p305_p5 = scmp.lt.s32.totalorder (!%p237_p3), %s303_s20, 287 }
   0xc   : > { %s1243_s19 = smov (!%p296_p4, %s293_s19), 17  ;;  %s1245_s20 = smov (!%p305_p5, %s303_s20), 287 }
   0xd   : > { %s916_s21 = sshll.u32 %s1243_s19, 2  ;;  %s977_s25 = sshll.u32 %s1245_s20, 3 }
   0xe   : > { %s1156_s24 = scalar_lea.vmem %s1233_s0, %s916_s21  ;;  %s1161_s28 = scalar_lea.vmem %s1234_s1, %s977_s25 }
   0xf   : > { %344 = sbr.rel (%p919_p6) target bundleno = 22 (0x16), region = 40 }
  0x14   : > { %v1104_v0 = vmov 0.0  }
  0x15   : > { %345 = vst [vmem:[#allocation2] sm:$0xff] %v1104_v0  ;;  %346 = vst [vmem:[#allocation2 + $0x8] sm:$0xff] %v1104_v0 }
  0x16 PF: > { %v1005_v1 = vld [vmem:[%s1161_s28 + $0x74] ss:$8 sps:$4 sm:$0xff]   ;;  %v1007_v2 = vld [vmem:[%s1161_s28 + $0x70] ss:$8 sps:$4 sm:$0xff]   ;;  %v1105_v3 = vmov 0   ;;  %v349_v34 = vld [vmem:[%s1156_s24] sm:$0xff] }
  0x17   : > { %723 = vmatprep.mubr.bf16.mxu1 %v1105_v3  ;;  %650 = vmatprep.subr.bf16.mxu0 %v1005_v1  ;;  %v1008_v4 = vld [vmem:[%s1161_s28 + $0x64] ss:$8 sps:$4 sm:$0xff]   ;;  %v1010_v5 = vld [vmem:[%s1161_s28 + $0x60] ss:$8 sps:$4 sm:$0xff]   ;;  %v1011_v6 = vld [vmem:[%s1161_s28 + $0x54] ss:$8 sps:$4 sm:$0xff]   ;;  %v921_v36 = vcombine.high %v349_v34, %v349_v34  ;;  %v920_v53 = vcombine.low %v349_v34, %v349_v34 }
  0x18   : > { %651 = vmatpush1.bf16.msra.mxu0 %v1007_v2  ;;  %v1013_v7 = vld [vmem:[%s1161_s28 + $0x50] ss:$8 sps:$4 sm:$0xff]   ;;  %v1014_v8 = vld [vmem:[%s1161_s28 + $0x44] ss:$8 sps:$4 sm:$0xff]   ;;  %v1026_v9 = vld [vmem:[%s1161_s28 + $0x174] ss:$8 sps:$4 sm:$0xff]  }
  0x19   : > { %652 = vmatprep.subr.bf16.mxu0 %v1008_v4  ;;  %v1028_v10 = vld [vmem:[%s1161_s28 + $0x170] ss:$8 sps:$4 sm:$0xff]   ;;  %v1016_v11 = vld [vmem:[%s1161_s28 + $0x40] ss:$8 sps:$4 sm:$0xff]   ;;  %v1017_v12 = vld [vmem:[%s1161_s28 + $0x34] ss:$8 sps:$4 sm:$0xff]   ;;  %691 = vmatprep.subr.bf16.mxu1 %v1026_v9 }
  0x1a   : > { %v1032_v13 = vld [vmem:[%s1161_s28 + $0x164] ss:$8 sps:$4 sm:$0xff]   ;;  %692 = vmatpush1.bf16.msra.mxu1 %v1028_v10  ;;  %v1034_v14 = vld [vmem:[%s1161_s28 + $0x160] ss:$8 sps:$4 sm:$0xff]   ;;  %v1019_v15 = vld [vmem:[%s1161_s28 + $0x30] ss:$8 sps:$4 sm:$0xff]   ;;  %682 = vmatprep.mubr.bf16.mxu0 %v921_v36 }
  0x1b   : > { %693 = vmatprep.subr.bf16.mxu1 %v1032_v13  ;;  %v1038_v16 = vld [vmem:[%s1161_s28 + $0x154] ss:$8 sps:$4 sm:$0xff]   ;;  %v1020_v17 = vld [vmem:[%s1161_s28 + $0x24] ss:$8 sps:$4 sm:$0xff]   ;;  %v1040_v18 = vld [vmem:[%s1161_s28 + $0x150] ss:$8 sps:$4 sm:$0xff]  }
  0x1c   : > { %653 = vmatpush1.bf16.msra.mxu0 %v1010_v5  ;;  %v1044_v19 = vld [vmem:[%s1161_s28 + $0x144] ss:$8 sps:$4 sm:$0xff]   ;;  %v1022_v20 = vld [vmem:[%s1161_s28 + $0x20] ss:$8 sps:$4 sm:$0xff]   ;;  %v1023_v21 = vld [vmem:[%s1161_s28 + $0x14] ss:$8 sps:$4 sm:$0xff]  }
  0x1d   : > { %654 = vmatprep.subr.bf16.mxu0 %v1011_v6  ;;  %v1046_v22 = vld [vmem:[%s1161_s28 + $0x140] ss:$8 sps:$4 sm:$0xff]   ;;  %v1050_v23 = vld [vmem:[%s1161_s28 + $0x134] ss:$8 sps:$4 sm:$0xff]   ;;  %v1025_v24 = vld [vmem:[%s1161_s28 + $0x10] ss:$8 sps:$4 sm:$0xff]  }
  0x1e   : > { %694 = vmatpush1.bf16.msra.mxu1 %v1034_v14  ;;  %v1029_v25 = vld [vmem:[%s1161_s28 + $0x4] ss:$8 sps:$4 sm:$0xff]   ;;  %v1052_v26 = vld [vmem:[%s1161_s28 + $0x130] ss:$8 sps:$4 sm:$0xff]   ;;  %v1031_v28 = vld [vmem:[%s1161_s28] ss:$8 sps:$4 sm:$0xff]  }
  0x1f   : > { %695 = vmatprep.subr.bf16.mxu1 %v1038_v16  ;;  %v1056_v27 = vld [vmem:[%s1161_s28 + $0x124] ss:$8 sps:$4 sm:$0xff]   ;;  %v1035_v29 = vld [vmem:[%s1161_s28 + $0xf4] ss:$8 sps:$4 sm:$0xff]   ;;  %v1058_v30 = vld [vmem:[%s1161_s28 + $0x120] ss:$8 sps:$4 sm:$0xff]  }
  0x20   : > { %655 = vmatpush1.bf16.msra.mxu0 %v1013_v7  ;;  %v1062_v31 = vld [vmem:[%s1161_s28 + $0x114] ss:$8 sps:$4 sm:$0xff]   ;;  %v1037_v32 = vld [vmem:[%s1161_s28 + $0xf0] ss:$8 sps:$4 sm:$0xff]   ;;  %v1041_v33 = vld [vmem:[%s1161_s28 + $0xe4] ss:$8 sps:$4 sm:$0xff]  }
  0x21   : > { %656 = vmatprep.subr.bf16.mxu0 %v1014_v8  ;;  %v1064_v35 = vld [vmem:[%s1161_s28 + $0x110] ss:$8 sps:$4 sm:$0xff]   ;;  %v1068_v37 = vld [vmem:[%s1161_s28 + $0x104] ss:$8 sps:$4 sm:$0xff]   ;;  %v1043_v38 = vld [vmem:[%s1161_s28 + $0xe0] ss:$8 sps:$4 sm:$0xff]  }
  0x22   : > { %696 = vmatpush1.bf16.msra.mxu1 %v1040_v18  ;;  %v1047_v39 = vld [vmem:[%s1161_s28 + $0xd4] ss:$8 sps:$4 sm:$0xff]   ;;  %v1070_v40 = vld [vmem:[%s1161_s28 + $0x100] ss:$8 sps:$4 sm:$0xff]   ;;  %v1049_v41 = vld [vmem:[%s1161_s28 + $0xd0] ss:$8 sps:$4 sm:$0xff]  }
  0x23   : > { %697 = vmatprep.subr.bf16.mxu1 %v1044_v19  ;;  %v1053_v42 = vld [vmem:[%s1161_s28 + $0xc4] ss:$8 sps:$4 sm:$0xff]   ;;  %v1074_v43 = vld [vmem:[%s1156_s24 + $0x8] ss:$0 sps:$4 sm:$0xff]   ;;  %v1059_v45 = vld [vmem:[%s1161_s28 + $0xb4] ss:$8 sps:$4 sm:$0xff]  }
  0x24   : > { %657 = vmatpush1.bf16.msra.mxu0 %v1016_v11  ;;  %v1055_v44 = vld [vmem:[%s1161_s28 + $0xc0] ss:$8 sps:$4 sm:$0xff]   ;;  %v1061_v46 = vld [vmem:[%s1161_s28 + $0xb0] ss:$8 sps:$4 sm:$0xff]   ;;  %v1065_v47 = vld [vmem:[%s1161_s28 + $0xa4] ss:$8 sps:$4 sm:$0xff]  }
  0x25   : > { %658 = vmatprep.subr.bf16.mxu0 %v1017_v12  ;;  %v1067_v48 = vld [vmem:[%s1161_s28 + $0xa0] ss:$8 sps:$4 sm:$0xff]   ;;  %v1071_v49 = vld [vmem:[%s1161_s28 + $0x94] ss:$8 sps:$4 sm:$0xff]   ;;  %v1073_v50 = vld [vmem:[%s1161_s28 + $0x90] ss:$8 sps:$4 sm:$0xff]  }
  0x26   : > { %698 = vmatpush1.bf16.msra.mxu1 %v1046_v22  ;;  %v1075_v51 = vld [vmem:[%s1161_s28 + $0x84] ss:$8 sps:$4 sm:$0xff]   ;;  %v1077_v52 = vld [vmem:[%s1161_s28 + $0x80] ss:$8 sps:$4 sm:$0xff]   ;;  %p971_p7 = scmp.ne.s32.totalorder %s1094_s15, 5 }
  0x27   : > { %699 = vmatprep.subr.bf16.mxu1 %v1050_v23  ;;  %v347_v58 = vld [vmem:[#allocation2] sm:$0xff]  ;;  %v348_v61 = vld [vmem:[#allocation2 + $0x8] sm:$0xff] }
  0x28   : > { %659 = vmatpush1.bf16.msra.mxu0 %v1019_v15 }
  0x29   : > { %660 = vmatprep.subr.bf16.mxu0 %v1020_v17 }
  0x2a   : > { %700 = vmatpush1.bf16.msra.mxu1 %v1052_v26 }
  0x2b   : > { %701 = vmatprep.subr.bf16.mxu1 %v1056_v27 }
  0x2c   : > { %661 = vmatpush1.bf16.msra.mxu0 %v1022_v20 }
  0x2d   : > { %662 = vmatprep.subr.bf16.mxu0 %v1023_v21 }
  0x2e   : > { %702 = vmatpush1.bf16.msra.mxu1 %v1058_v30 }
  0x2f   : > { %703 = vmatprep.subr.bf16.mxu1 %v1062_v31 }
  0x30   : > { %663 = vmatpush1.bf16.msra.mxu0 %v1025_v24 }
  0x31   : > { %664 = vmatprep.subr.bf16.mxu0 %v1029_v25 }
  0x32   : > { %704 = vmatpush1.bf16.msra.mxu1 %v1064_v35 }
  0x33   : > { %705 = vmatprep.subr.bf16.mxu1 %v1068_v37 }
  0x34   : > { %665 = vmatpush1.bf16.msra.mxu0 %v1031_v28 }
  0x35   : > { %666 = vmatprep.subr.bf16.mxu0 %v1035_v29 }
  0x36   : > { %706 = vmatpush1.bf16.msra.mxu1 %v1070_v40 }
  0x38   : > { %667 = vmatpush2.bf16.msra.mxu0 %v1037_v32 }
  0x39   : > { %668 = vmatprep.subr.bf16.mxu0 %v1041_v33  ;;  %724 = vmatmul.mubr.bf16.vlgmr.msra.gmra.mxu1 %v1074_v43 }
  0x3c   : > { %669 = vmatpush2.bf16.msra.mxu0 %v1043_v38 }
  0x3d   : > { %670 = vmatprep.subr.bf16.mxu0 %v1047_v39 }
  0x40   : > { %671 = vmatpush2.bf16.msra.mxu0 %v1049_v41 }
  0x41   : > { %672 = vmatprep.subr.bf16.mxu0 %v1053_v42 }
  0x44   : > { %673 = vmatpush2.bf16.msra.mxu0 %v1055_v44 }
  0x45   : > { %674 = vmatprep.subr.bf16.mxu0 %v1059_v45 }
  0x48   : > { %675 = vmatpush2.bf16.msra.mxu0 %v1061_v46 }
  0x49   : > { %676 = vmatprep.subr.bf16.mxu0 %v1065_v47 }
  0x4c   : > { %677 = vmatpush2.bf16.msra.mxu0 %v1067_v48 }
  0x4d   : > { %678 = vmatprep.subr.bf16.mxu0 %v1071_v49 }
  0x50   : > { %679 = vmatpush2.bf16.msra.mxu0 %v1073_v50 }
  0x51   : > { %680 = vmatprep.subr.bf16.mxu0 %v1075_v51 }
  0x54   : > { %681 = vmatpush2.bf16.msra.mxu0 %v1077_v52 }
  0x57   : > { %683 = vmatmul.mubr.bf16.vlgmr.msra.gmra.mxu0 %v920_v53 }
  0xf9   : > { %v725_v54 = vpop.f32.mrf.mxu1 }
  0xfb   : > { %v727_v55 = vpop.f32.mrf.mxu1 }
  0xfd   : > { %v729_v56 = vpop.f32.mrf.mxu1 }
  0xff   : > { %v730_v57 = vpop.f32.mrf.mxu1 }
 0x117   : > { %v684_v59 = vpop.f32.mrf.mxu0 }
 0x118   : > { %v726_v60 = vadd.f32 %v725_v54, %v684_v59 }
 0x119   : > { %v686_v62 = vpop.f32.mrf.mxu0 }
 0x11a   : > { %v732_v63 = vadd.f32 %v726_v60, %v347_v58  ;;  %v728_v0 = vadd.f32 %v727_v55, %v686_v62  ;;  %739 = sbr.rel (%p971_p7) target bundleno = 304 (0x130), region = 44 }
 0x11b   : > { %v688_v1 = vpop.f32.mrf.mxu0 }
 0x11c   : > { %734 = vst [vmem:[#allocation2] sm:$0xff] %v732_v63  ;;  %v733_v2 = vadd.f32 %v728_v0, %v348_v61 }
 0x11d   : > { %v689_v3 = vpop.f32.mrf.mxu0 }
 0x11e   : > { %735 = vst [vmem:[#allocation2 + $0x8] sm:$0xff] %v733_v2 }
 0x11f   : > { %v744_v4 = vlaneseq  ;;  %v742_v6 = vld [vmem:[%s1235_s2] sm:$0x3] }
 0x120   : > { %v756_v7 = vld [vmem:[%s1236_s3] sm:$0xff] }
 0x121   : > { %v745_v5 = vshrl.u32 %v744_v4, 7  ;;  %v757_v14 = vunpack.c.l.bf16 %v756_v7  ;;  %v758_v15 = vunpack.c.h.bf16 %v756_v7 }
 0x123   : > { %v746_v8 = vsub.s32 0, %v745_v5  ;;  %v750_v9 = vsub.s32 1, %v745_v5  ;;  %v740_v10 = vld [vmem:[#allocation2] sm:$0xff] }
 0x125   : > { %v741_v11 = vld [vmem:[#allocation2 + $0x8] sm:$0xff]  ;;  %v747_v12 = vrot.slane %v742_v6, %v746_v8  ;;  %v751_v13 = vrot.slane %v742_v6, %v750_v9 }
 0x127   : > { %v754_v16 = vadd.f32 %v747_v12, %v740_v10  ;;  %v755_v17 = vadd.f32 %v751_v13, %v741_v11 }
 0x129   : > { %v759_v18 = vadd.f32 %v757_v14, %v754_v16  ;;  %v760_v19 = vadd.f32 %v758_v15, %v755_v17 }
 0x12b   : > { %v761_v20 = vmax.f32 %v759_v18, 0.0  ;;  %v762_v21 = vmax.f32 %v760_v19, 0.0 }
 0x12d   : > { %v978_v22 = vpack.c.bf16 %v762_v21, %v761_v20 }
 0x12f   : > { %771 = vst [vmem:[%s1237_s4] sm:$0xff] %v978_v22 }
 0x130 PF: > { %s14_s17 = sadd.s32 1, %s1102_s17   ;;  %s1238_s15 = smov %s1098_s16 }
 0x131   : > { %p11_p8 = scmp.ge.s32.totalorder %s14_s17, 8   ;;  %s1239_s16 = smov %s1241_s18 }
 0x133   :  { %13 = sbr.rel (!%p11_p8) target bundleno = 2 (0x2), region = 83 }

// kernel: _lambda_.35
= control target key start
LH: loop header
LB: loop body
LE: loop exit
PB: predicated region body
PF: predicated region fallthrough
CT: control target
= control target key end

     0   :  { %s1036_s12 = smov 0   ;;  %s1038_s13 = smov 0   ;;  %s1135_s0 = inlined_call_operand.vmem [shape: bf16[8,2304], index: 0, kind: input, shape index: {}]   ;;  %s1136_s1 = inlined_call_operand.vmem [shape: bf16[2304,256], index: 1, kind: input, shape index: {}]   ;;  %s1137_s2 = inlined_call_operand.vmem [shape: f32[1,256], index: 2, kind: input, shape index: {}]   ;;  %s1138_s3 = inlined_call_operand.vmem [shape: bf16[8,256], index: 3, kind: output, shape index: {}]  }
   0x1   :  { %s1040_s14 = smov 0  }
   0x2 LB: > { %s25_s15 = sadd.s32 1, %s1008_s13  ;;  %p825_p0 = scmp.ge.s32.totalorder %s1012_s14, 1  ;;  %s1012_s14 = sphi %s1040_s14, %s13_s14   ;;  %s1008_s13 = sphi %s1038_s13, %s1140_s13   ;;  %s1004_s12 = sphi %s1036_s12, %s1139_s12  }
   0x3   : > { %p26_p1 = scmp.ge.s32.totalorder %s25_s15, 6  ;;  %p194_p2 = scmp.lt.s32.totalorder %s1012_s14, 7 }
   0x5   : > { %s1142_s15 = smov (%p26_p1, %s25_s15), 0  ;;  %p195_p3 = pnand %p825_p0, %p194_p2 }
   0x6   : > { %s240_s16 = smul.u32 (!%p195_p3), 3, %s1004_s12  ;;  %p829_p6 = scmp.ne.s32.totalorder (!%p195_p3), %s1004_s12, 0 }
   0x7   : > { %198 = sbr.rel (%p195_p3) target bundleno = 302 (0x12e), region = 32 }
   0x8   : > { %s250_s17 = smul.u32 (!%p195_p3), 48, %s1004_s12  ;;  %p243_p4 = scmp.lt.s32.totalorder (!%p195_p3), %s240_s16, 17 }
   0xa   : > { %p252_p5 = scmp.lt.s32.totalorder (!%p195_p3), %s250_s17, 287 }
   0xc   : > { %s1144_s16 = smov (!%p243_p4, %s240_s16), 17  ;;  %s1146_s17 = smov (!%p252_p5, %s250_s17), 287 }
   0xd   : > { %s826_s18 = sshll.u32 %s1144_s16, 2  ;;  %s887_s22 = sshll.u32 %s1146_s17, 3 }
   0xe   : > { %s1061_s21 = scalar_lea.vmem %s1135_s0, %s826_s18  ;;  %s1066_s25 = scalar_lea.vmem %s1136_s1, %s887_s22 }
   0xf   : > { %281 = sbr.rel (%p829_p6) target bundleno = 22 (0x16), region = 36 }
  0x14   : > { %v1014_v0 = vmov 0.0  }
  0x15   : > { %282 = vst [vmem:[#allocation2] sm:$0xff] %v1014_v0  ;;  %283 = vst [vmem:[#allocation2 + $0x8] sm:$0xff] %v1014_v0 }
  0x16 PF: > { %v915_v1 = vld [vmem:[%s1066_s25 + $0x74] ss:$8 sps:$4 sm:$0xff]   ;;  %v917_v2 = vld [vmem:[%s1066_s25 + $0x70] ss:$8 sps:$4 sm:$0xff]   ;;  %v1015_v3 = vmov 0   ;;  %v286_v34 = vld [vmem:[%s1061_s21] sm:$0xff] }
  0x17   : > { %660 = vmatprep.mubr.bf16.mxu1 %v1015_v3  ;;  %587 = vmatprep.subr.bf16.mxu0 %v915_v1  ;;  %v918_v4 = vld [vmem:[%s1066_s25 + $0x64] ss:$8 sps:$4 sm:$0xff]   ;;  %v920_v5 = vld [vmem:[%s1066_s25 + $0x60] ss:$8 sps:$4 sm:$0xff]   ;;  %v921_v6 = vld [vmem:[%s1066_s25 + $0x54] ss:$8 sps:$4 sm:$0xff]   ;;  %v831_v36 = vcombine.high %v286_v34, %v286_v34  ;;  %v830_v53 = vcombine.low %v286_v34, %v286_v34 }
  0x18   : > { %588 = vmatpush1.bf16.msra.mxu0 %v917_v2  ;;  %v923_v7 = vld [vmem:[%s1066_s25 + $0x50] ss:$8 sps:$4 sm:$0xff]   ;;  %v924_v8 = vld [vmem:[%s1066_s25 + $0x44] ss:$8 sps:$4 sm:$0xff]   ;;  %v936_v9 = vld [vmem:[%s1066_s25 + $0x174] ss:$8 sps:$4 sm:$0xff]  }
  0x19   : > { %589 = vmatprep.subr.bf16.mxu0 %v918_v4  ;;  %v938_v10 = vld [vmem:[%s1066_s25 + $0x170] ss:$8 sps:$4 sm:$0xff]   ;;  %v926_v11 = vld [vmem:[%s1066_s25 + $0x40] ss:$8 sps:$4 sm:$0xff]   ;;  %v927_v12 = vld [vmem:[%s1066_s25 + $0x34] ss:$8 sps:$4 sm:$0xff]   ;;  %628 = vmatprep.subr.bf16.mxu1 %v936_v9 }
  0x1a   : > { %v942_v13 = vld [vmem:[%s1066_s25 + $0x164] ss:$8 sps:$4 sm:$0xff]   ;;  %629 = vmatpush1.bf16.msra.mxu1 %v938_v10  ;;  %v944_v14 = vld [vmem:[%s1066_s25 + $0x160] ss:$8 sps:$4 sm:$0xff]   ;;  %v929_v15 = vld [vmem:[%s1066_s25 + $0x30] ss:$8 sps:$4 sm:$0xff]   ;;  %619 = vmatprep.mubr.bf16.mxu0 %v831_v36 }
  0x1b   : > { %630 = vmatprep.subr.bf16.mxu1 %v942_v13  ;;  %v948_v16 = vld [vmem:[%s1066_s25 + $0x154] ss:$8 sps:$4 sm:$0xff]   ;;  %v930_v17 = vld [vmem:[%s1066_s25 + $0x24] ss:$8 sps:$4 sm:$0xff]   ;;  %v950_v18 = vld [vmem:[%s1066_s25 + $0x150] ss:$8 sps:$4 sm:$0xff]  }
  0x1c   : > { %590 = vmatpush1.bf16.msra.mxu0 %v920_v5  ;;  %v954_v19 = vld [vmem:[%s1066_s25 + $0x144] ss:$8 sps:$4 sm:$0xff]   ;;  %v932_v20 = vld [vmem:[%s1066_s25 + $0x20] ss:$8 sps:$4 sm:$0xff]   ;;  %v933_v21 = vld [vmem:[%s1066_s25 + $0x14] ss:$8 sps:$4 sm:$0xff]  }
  0x1d   : > { %591 = vmatprep.subr.bf16.mxu0 %v921_v6  ;;  %v956_v22 = vld [vmem:[%s1066_s25 + $0x140] ss:$8 sps:$4 sm:$0xff]   ;;  %v960_v23 = vld [vmem:[%s1066_s25 + $0x134] ss:$8 sps:$4 sm:$0xff]   ;;  %v935_v24 = vld [vmem:[%s1066_s25 + $0x10] ss:$8 sps:$4 sm:$0xff]  }
  0x1e   : > { %631 = vmatpush1.bf16.msra.mxu1 %v944_v14  ;;  %v939_v25 = vld [vmem:[%s1066_s25 + $0x4] ss:$8 sps:$4 sm:$0xff]   ;;  %v962_v26 = vld [vmem:[%s1066_s25 + $0x130] ss:$8 sps:$4 sm:$0xff]   ;;  %v941_v28 = vld [vmem:[%s1066_s25] ss:$8 sps:$4 sm:$0xff]  }
  0x1f   : > { %632 = vmatprep.subr.bf16.mxu1 %v948_v16  ;;  %v966_v27 = vld [vmem:[%s1066_s25 + $0x124] ss:$8 sps:$4 sm:$0xff]   ;;  %v945_v29 = vld [vmem:[%s1066_s25 + $0xf4] ss:$8 sps:$4 sm:$0xff]   ;;  %v968_v30 = vld [vmem:[%s1066_s25 + $0x120] ss:$8 sps:$4 sm:$0xff]  }
  0x20   : > { %592 = vmatpush1.bf16.msra.mxu0 %v923_v7  ;;  %v972_v31 = vld [vmem:[%s1066_s25 + $0x114] ss:$8 sps:$4 sm:$0xff]   ;;  %v947_v32 = vld [vmem:[%s1066_s25 + $0xf0] ss:$8 sps:$4 sm:$0xff]   ;;  %v951_v33 = vld [vmem:[%s1066_s25 + $0xe4] ss:$8 sps:$4 sm:$0xff]  }
  0x21   : > { %593 = vmatprep.subr.bf16.mxu0 %v924_v8  ;;  %v974_v35 = vld [vmem:[%s1066_s25 + $0x110] ss:$8 sps:$4 sm:$0xff]   ;;  %v978_v37 = vld [vmem:[%s1066_s25 + $0x104] ss:$8 sps:$4 sm:$0xff]   ;;  %v953_v38 = vld [vmem:[%s1066_s25 + $0xe0] ss:$8 sps:$4 sm:$0xff]  }
  0x22   : > { %633 = vmatpush1.bf16.msra.mxu1 %v950_v18  ;;  %v957_v39 = vld [vmem:[%s1066_s25 + $0xd4] ss:$8 sps:$4 sm:$0xff]   ;;  %v980_v40 = vld [vmem:[%s1066_s25 + $0x100] ss:$8 sps:$4 sm:$0xff]   ;;  %v959_v41 = vld [vmem:[%s1066_s25 + $0xd0] ss:$8 sps:$4 sm:$0xff]  }
  0x23   : > { %634 = vmatprep.subr.bf16.mxu1 %v954_v19  ;;  %v963_v42 = vld [vmem:[%s1066_s25 + $0xc4] ss:$8 sps:$4 sm:$0xff]   ;;  %v984_v43 = vld [vmem:[%s1061_s21 + $0x8] ss:$0 sps:$4 sm:$0xff]   ;;  %v969_v45 = vld [vmem:[%s1066_s25 + $0xb4] ss:$8 sps:$4 sm:$0xff]  }
  0x24   : > { %594 = vmatpush1.bf16.msra.mxu0 %v926_v11  ;;  %v965_v44 = vld [vmem:[%s1066_s25 + $0xc0] ss:$8 sps:$4 sm:$0xff]   ;;  %v971_v46 = vld [vmem:[%s1066_s25 + $0xb0] ss:$8 sps:$4 sm:$0xff]   ;;  %v975_v47 = vld [vmem:[%s1066_s25 + $0xa4] ss:$8 sps:$4 sm:$0xff]  }
  0x25   : > { %595 = vmatprep.subr.bf16.mxu0 %v927_v12  ;;  %v977_v48 = vld [vmem:[%s1066_s25 + $0xa0] ss:$8 sps:$4 sm:$0xff]   ;;  %v981_v49 = vld [vmem:[%s1066_s25 + $0x94] ss:$8 sps:$4 sm:$0xff]   ;;  %v983_v50 = vld [vmem:[%s1066_s25 + $0x90] ss:$8 sps:$4 sm:$0xff]  }
  0x26   : > { %635 = vmatpush1.bf16.msra.mxu1 %v956_v22  ;;  %v985_v51 = vld [vmem:[%s1066_s25 + $0x84] ss:$8 sps:$4 sm:$0xff]   ;;  %v987_v52 = vld [vmem:[%s1066_s25 + $0x80] ss:$8 sps:$4 sm:$0xff]   ;;  %p881_p7 = scmp.ne.s32.totalorder %s1004_s12, 5 }
  0x27   : > { %636 = vmatprep.subr.bf16.mxu1 %v960_v23  ;;  %v284_v58 = vld [vmem:[#allocation2] sm:$0xff]  ;;  %v285_v61 = vld [vmem:[#allocation2 + $0x8] sm:$0xff] }
  0x28   : > { %596 = vmatpush1.bf16.msra.mxu0 %v929_v15 }
  0x29   : > { %597 = vmatprep.subr.bf16.mxu0 %v930_v17 }
  0x2a   : > { %637 = vmatpush1.bf16.msra.mxu1 %v962_v26 }
  0x2b   : > { %638 = vmatprep.subr.bf16.mxu1 %v966_v27 }
  0x2c   : > { %598 = vmatpush1.bf16.msra.mxu0 %v932_v20 }
  0x2d   : > { %599 = vmatprep.subr.bf16.mxu0 %v933_v21 }
  0x2e   : > { %639 = vmatpush1.bf16.msra.mxu1 %v968_v30 }
  0x2f   : > { %640 = vmatprep.subr.bf16.mxu1 %v972_v31 }
  0x30   : > { %600 = vmatpush1.bf16.msra.mxu0 %v935_v24 }
  0x31   : > { %601 = vmatprep.subr.bf16.mxu0 %v939_v25 }
  0x32   : > { %641 = vmatpush1.bf16.msra.mxu1 %v974_v35 }
  0x33   : > { %642 = vmatprep.subr.bf16.mxu1 %v978_v37 }
  0x34   : > { %602 = vmatpush1.bf16.msra.mxu0 %v941_v28 }
  0x35   : > { %603 = vmatprep.subr.bf16.mxu0 %v945_v29 }
  0x36   : > { %643 = vmatpush1.bf16.msra.mxu1 %v980_v40 }
  0x38   : > { %604 = vmatpush2.bf16.msra.mxu0 %v947_v32 }
  0x39   : > { %605 = vmatprep.subr.bf16.mxu0 %v951_v33  ;;  %661 = vmatmul.mubr.bf16.vlgmr.msra.gmra.mxu1 %v984_v43 }
  0x3c   : > { %606 = vmatpush2.bf16.msra.mxu0 %v953_v38 }
  0x3d   : > { %607 = vmatprep.subr.bf16.mxu0 %v957_v39 }
  0x40   : > { %608 = vmatpush2.bf16.msra.mxu0 %v959_v41 }
  0x41   : > { %609 = vmatprep.subr.bf16.mxu0 %v963_v42 }
  0x44   : > { %610 = vmatpush2.bf16.msra.mxu0 %v965_v44 }
  0x45   : > { %611 = vmatprep.subr.bf16.mxu0 %v969_v45 }
  0x48   : > { %612 = vmatpush2.bf16.msra.mxu0 %v971_v46 }
  0x49   : > { %613 = vmatprep.subr.bf16.mxu0 %v975_v47 }
  0x4c   : > { %614 = vmatpush2.bf16.msra.mxu0 %v977_v48 }
  0x4d   : > { %615 = vmatprep.subr.bf16.mxu0 %v981_v49 }
  0x50   : > { %616 = vmatpush2.bf16.msra.mxu0 %v983_v50 }
  0x51   : > { %617 = vmatprep.subr.bf16.mxu0 %v985_v51 }
  0x54   : > { %618 = vmatpush2.bf16.msra.mxu0 %v987_v52 }
  0x57   : > { %620 = vmatmul.mubr.bf16.vlgmr.msra.gmra.mxu0 %v830_v53 }
  0xf9   : > { %v662_v54 = vpop.f32.mrf.mxu1 }
  0xfb   : > { %v664_v55 = vpop.f32.mrf.mxu1 }
  0xfd   : > { %v666_v56 = vpop.f32.mrf.mxu1 }
  0xff   : > { %v667_v57 = vpop.f32.mrf.mxu1 }
 0x117   : > { %v621_v59 = vpop.f32.mrf.mxu0 }
 0x118   : > { %v663_v60 = vadd.f32 %v662_v54, %v621_v59 }
 0x119   : > { %v623_v62 = vpop.f32.mrf.mxu0 }
 0x11a   : > { %v669_v63 = vadd.f32 %v663_v60, %v284_v58  ;;  %v665_v0 = vadd.f32 %v664_v55, %v623_v62  ;;  %676 = sbr.rel (%p881_p7) target bundleno = 302 (0x12e), region = 40 }
 0x11b   : > { %v625_v1 = vpop.f32.mrf.mxu0 }
 0x11c   : > { %671 = vst [vmem:[#allocation2] sm:$0xff] %v669_v63  ;;  %v670_v2 = vadd.f32 %v665_v0, %v285_v61 }
 0x11d   : > { %v626_v3 = vpop.f32.mrf.mxu0 }
 0x11e   : > { %672 = vst [vmem:[#allocation2 + $0x8] sm:$0xff] %v670_v2 }
 0x11f   : > { %v681_v4 = vlaneseq  ;;  %v679_v6 = vld [vmem:[%s1137_s2] sm:$0x3] }
 0x121   : > { %v682_v5 = vshrl.u32 %v681_v4, 7 }
 0x123   : > { %v683_v7 = vsub.s32 0, %v682_v5  ;;  %v687_v8 = vsub.s32 1, %v682_v5  ;;  %v677_v9 = vld [vmem:[#allocation2] sm:$0xff] }
 0x125   : > { %v678_v10 = vld [vmem:[#allocation2 + $0x8] sm:$0xff]  ;;  %v684_v11 = vrot.slane %v679_v6, %v683_v7  ;;  %v688_v12 = vrot.slane %v679_v6, %v687_v8 }
 0x127   : > { %v691_v13 = vadd.f32 %v684_v11, %v677_v9  ;;  %v692_v14 = vadd.f32 %v688_v12, %v678_v10 }
 0x129   : > { %v693_v15 = vmax.f32 %v691_v13, 0.0  ;;  %v694_v16 = vmax.f32 %v692_v14, 0.0 }
 0x12b   : > { %v888_v17 = vpack.c.bf16 %v694_v16, %v693_v15 }
 0x12d   : > { %703 = vst [vmem:[%s1138_s3] sm:$0xff] %v888_v17 }
 0x12e PF: > { %s13_s14 = sadd.s32 1, %s1012_s14   ;;  %s1139_s12 = smov %s1008_s13 }
 0x12f   : > { %p10_p8 = scmp.ge.s32.totalorder %s13_s14, 8   ;;  %s1140_s13 = smov %s1142_s15 }
 0x131   :  { %12 = sbr.rel (!%p10_p8) target bundleno = 2 (0x2), region = 76 }

// kernel: _lambda_.37
= control target key start
LH: loop header
LB: loop body
LE: loop exit
PB: predicated region body
PF: predicated region fallthrough
CT: control target
= control target key end

     0   :  { %s1320_s12 = smov 0   ;;  %s1322_s13 = smov 0   ;;  %s1583_s0 = inlined_call_operand.vmem [shape: bf16[8,2304], index: 0, kind: input, shape index: {}]   ;;  %s1584_s1 = inlined_call_operand.vmem [shape: bf16[2304,512], index: 1, kind: input, shape index: {}]   ;;  %s1585_s2 = inlined_call_operand.vmem [shape: f32[1,512], index: 2, kind: input, shape index: {}]   ;;  %s1586_s3 = inlined_call_operand.vmem [shape: bf16[8,512], index: 3, kind: output, shape index: {}]  }
   0x1   :  { %s1324_s14 = smov 0   ;;  %s1326_s15 = smov 0  }
   0x2   :  { %s1328_s16 = smov 0   ;;  %s1330_s17 = smov 0  }
   0x3   :  { %s1332_s18 = smov 0  }
   0x4 LB: > { %s25_s19 = sadd.s32 1, %s1288_s16  ;;  %s28_s20 = sadd.s32 1, %s1292_s17  ;;  %s1296_s18 = sphi %s1332_s18, %s13_s18   ;;  %s1292_s17 = sphi %s1330_s17, %s1592_s17   ;;  %s1288_s16 = sphi %s1328_s16, %s1591_s16   ;;  %s1284_s15 = sphi %s1326_s15, %s1590_s15   ;;  %s1280_s14 = sphi %s1324_s14, %s1589_s14   ;;  %s1276_s13 = sphi %s1322_s13, %s1588_s13   ;;  %s1272_s12 = sphi %s1320_s12, %s1587_s12  }
   0x5   : > { %p26_p0 = scmp.ge.s32.totalorder %s25_s19, 6  ;;  %p76_p1 = scmp.ne.s32.totalorder %s1276_s13, %s1272_s12 }
   0x6   : > { %p77_p2 = scmp.eq.s32.totalorder %s1296_s18, 0  ;;  %s69_s24 = sadd.s32 1, %s1276_s13 }
   0x7   : > { %s1594_s19 = smov (%p26_p0, %s25_s19), 0  ;;  %s1596_s20 = smov (!%p26_p0, %s28_s20), %s1292_s17 }
   0x8   : > { %p78_p3 = por %p77_p2, %p76_p1  ;;  %p30_p4 = scmp.ge.s32.totalorder %s1596_s20, 2 }
   0x9   : > { %s64_s21 = ssub.s32 %s1288_s16, %s1594_s19  ;;  %p1040_p6 = scmp.ge.s32.totalorder %s1296_s18, 12 }
   0xa   : > { %s1598_s20 = smov (%p30_p4, %s1596_s20), 0 }
   0xb   : > { %s65_s22 = ssub.s32 %s1292_s17, %s1598_s20  ;;  %156 = sbr.rel (%p1040_p6) target bundleno = 48 (0x30), region = 16 }
   0xc   : > { %s66_s23 = sor.u32 %s65_s22, %s64_s21 }
   0xd   : > { %p67_p5 = scmp.eq.s32.totalorder %s66_s23, 0 }
   0xf   : > { %s1371_s25 = scalar_select %p67_p5, %s1276_s13, %s69_s24  }
  0x10   : > { %172 = sbr.rel (!%p78_p3) target bundleno = 48 (0x30), region = 24  ;;  %s174_s26 = sand.u32 (%p78_p3), 1, %s1276_s13  }
  0x11   : > { %s1107_s27 = smul.u32 (%p78_p3), 384, %s174_s26  ;;  %s1041_s28 = sshll.u32 (%p78_p3), %s1292_s17, 1 }
  0x12   : > { %s1105_s29 = smul.u32 (%p78_p3), 192, %s1288_s16 }
  0x13   : > { %s1385_s8 = scalar_lea.vmem (%p78_p3), [#allocation3], %s1107_s27 }
  0x14   : > { %s180_s30 = sadd.s32 (%p78_p3), %s1105_s29, %s1041_s28 }
  0x15   : > { %s1043_s4 = sshll.u32 %s180_s30, 2 }
  0x16   : > { %s1380_s7 = scalar_lea.vmem %s1584_s1, %s1043_s4 }
  0x17   : > { %v305_v0 = vld [vmem:[%s1380_s7] sm:$0xff]  ;;  %v307_v1 = vld [vmem:[%s1380_s7 + $0x10] sm:$0xff] }
  0x18   : > { %v309_v2 = vld [vmem:[%s1380_s7 + $0x20] sm:$0xff]  ;;  %306 = vst [vmem:[%s1385_s8] sm:$0xff] %v305_v0  ;;  %308 = vst [vmem:[%s1385_s8 + $0x8] sm:$0xff] %v307_v1  ;;  %v311_v3 = vld [vmem:[%s1380_s7 + $0x30] sm:$0xff] }
  0x19   : > { %310 = vst [vmem:[%s1385_s8 + $0x10] sm:$0xff] %v309_v2  ;;  %v313_v4 = vld [vmem:[%s1380_s7 + $0x40] sm:$0xff]  ;;  %v315_v5 = vld [vmem:[%s1380_s7 + $0x50] sm:$0xff]  ;;  %312 = vst [vmem:[%s1385_s8 + $0x18] sm:$0xff] %v311_v3 }
  0x1a   : > { %314 = vst [vmem:[%s1385_s8 + $0x20] sm:$0xff] %v313_v4  ;;  %316 = vst [vmem:[%s1385_s8 + $0x28] sm:$0xff] %v315_v5  ;;  %v317_v6 = vld [vmem:[%s1380_s7 + $0x60] sm:$0xff]  ;;  %v319_v7 = vld [vmem:[%s1380_s7 + $0x70] sm:$0xff] }
  0x1b   : > { %v321_v8 = vld [vmem:[%s1380_s7 + $0x80] sm:$0xff]  ;;  %318 = vst [vmem:[%s1385_s8 + $0x30] sm:$0xff] %v317_v6  ;;  %320 = vst [vmem:[%s1385_s8 + $0x38] sm:$0xff] %v319_v7  ;;  %v323_v9 = vld [vmem:[%s1380_s7 + $0x90] sm:$0xff] }
  0x1c   : > { %322 = vst [vmem:[%s1385_s8 + $0x40] sm:$0xff] %v321_v8  ;;  %v325_v10 = vld [vmem:[%s1380_s7 + $0xa0] sm:$0xff]  ;;  %v327_v11 = vld [vmem:[%s1380_s7 + $0xb0] sm:$0xff]  ;;  %324 = vst [vmem:[%s1385_s8 + $0x48] sm:$0xff] %v323_v9 }
  0x1d   : > { %326 = vst [vmem:[%s1385_s8 + $0x50] sm:$0xff] %v325_v10  ;;  %328 = vst [vmem:[%s1385_s8 + $0x58] sm:$0xff] %v327_v11  ;;  %v329_v12 = vld [vmem:[%s1380_s7 + $0xc0] sm:$0xff]  ;;  %v331_v13 = vld [vmem:[%s1380_s7 + $0xd0] sm:$0xff] }
  0x1e   : > { %v333_v14 = vld [vmem:[%s1380_s7 + $0xe0] sm:$0xff]  ;;  %330 = vst [vmem:[%s1385_s8 + $0x60] sm:$0xff] %v329_v12  ;;  %332 = vst [vmem:[%s1385_s8 + $0x68] sm:$0xff] %v331_v13  ;;  %v335_v15 = vld [vmem:[%s1380_s7 + $0xf0] sm:$0xff] }
  0x1f   : > { %334 = vst [vmem:[%s1385_s8 + $0x70] sm:$0xff] %v333_v14  ;;  %v337_v16 = vld [vmem:[%s1380_s7 + $0x100] sm:$0xff]  ;;  %v339_v17 = vld [vmem:[%s1380_s7 + $0x110] sm:$0xff]  ;;  %336 = vst [vmem:[%s1385_s8 + $0x78] sm:$0xff] %v335_v15 }
  0x20   : > { %338 = vst [vmem:[%s1385_s8 + $0x80] sm:$0xff] %v337_v16  ;;  %340 = vst [vmem:[%s1385_s8 + $0x88] sm:$0xff] %v339_v17  ;;  %v341_v18 = vld [vmem:[%s1380_s7 + $0x120] sm:$0xff]  ;;  %v343_v19 = vld [vmem:[%s1380_s7 + $0x130] sm:$0xff] }
  0x21   : > { %v345_v20 = vld [vmem:[%s1380_s7 + $0x140] sm:$0xff]  ;;  %342 = vst [vmem:[%s1385_s8 + $0x90] sm:$0xff] %v341_v18  ;;  %344 = vst [vmem:[%s1385_s8 + $0x98] sm:$0xff] %v343_v19  ;;  %v347_v21 = vld [vmem:[%s1380_s7 + $0x150] sm:$0xff] }
  0x22   : > { %346 = vst [vmem:[%s1385_s8 + $0xa0] sm:$0xff] %v345_v20  ;;  %v349_v22 = vld [vmem:[%s1380_s7 + $0x160] sm:$0xff]  ;;  %v351_v23 = vld [vmem:[%s1380_s7 + $0x170] sm:$0xff]  ;;  %348 = vst [vmem:[%s1385_s8 + $0xa8] sm:$0xff] %v347_v21 }
  0x23   : > { %350 = vst [vmem:[%s1385_s8 + $0xb0] sm:$0xff] %v349_v22  ;;  %352 = vst [vmem:[%s1385_s8 + $0xb8] sm:$0xff] %v351_v23  ;;  %v353_v24 = vld [vmem:[%s1380_s7 + $0x180] sm:$0xff]  ;;  %v355_v25 = vld [vmem:[%s1380_s7 + $0x190] sm:$0xff] }
  0x24   : > { %v357_v26 = vld [vmem:[%s1380_s7 + $0x1a0] sm:$0xff]  ;;  %354 = vst [vmem:[%s1385_s8 + $0xc0] sm:$0xff] %v353_v24  ;;  %356 = vst [vmem:[%s1385_s8 + $0xc8] sm:$0xff] %v355_v25  ;;  %v359_v27 = vld [vmem:[%s1380_s7 + $0x1b0] sm:$0xff] }
  0x25   : > { %358 = vst [vmem:[%s1385_s8 + $0xd0] sm:$0xff] %v357_v26  ;;  %v361_v28 = vld [vmem:[%s1380_s7 + $0x1c0] sm:$0xff]  ;;  %v363_v29 = vld [vmem:[%s1380_s7 + $0x1d0] sm:$0xff]  ;;  %360 = vst [vmem:[%s1385_s8 + $0xd8] sm:$0xff] %v359_v27 }
  0x26   : > { %362 = vst [vmem:[%s1385_s8 + $0xe0] sm:$0xff] %v361_v28  ;;  %364 = vst [vmem:[%s1385_s8 + $0xe8] sm:$0xff] %v363_v29  ;;  %v365_v30 = vld [vmem:[%s1380_s7 + $0x1e0] sm:$0xff]  ;;  %v367_v31 = vld [vmem:[%s1380_s7 + $0x1f0] sm:$0xff] }
  0x27   : > { %v369_v32 = vld [vmem:[%s1380_s7 + $0x200] sm:$0xff]  ;;  %366 = vst [vmem:[%s1385_s8 + $0xf0] sm:$0xff] %v365_v30  ;;  %368 = vst [vmem:[%s1385_s8 + $0xf8] sm:$0xff] %v367_v31  ;;  %v371_v33 = vld [vmem:[%s1380_s7 + $0x210] sm:$0xff] }
  0x28   : > { %370 = vst [vmem:[%s1385_s8 + $0x100] sm:$0xff] %v369_v32  ;;  %v373_v34 = vld [vmem:[%s1380_s7 + $0x220] sm:$0xff]  ;;  %v375_v35 = vld [vmem:[%s1380_s7 + $0x230] sm:$0xff]  ;;  %372 = vst [vmem:[%s1385_s8 + $0x108] sm:$0xff] %v371_v33 }
  0x29   : > { %374 = vst [vmem:[%s1385_s8 + $0x110] sm:$0xff] %v373_v34  ;;  %376 = vst [vmem:[%s1385_s8 + $0x118] sm:$0xff] %v375_v35  ;;  %v377_v36 = vld [vmem:[%s1380_s7 + $0x240] sm:$0xff]  ;;  %v379_v37 = vld [vmem:[%s1380_s7 + $0x250] sm:$0xff] }
  0x2a   : > { %v381_v38 = vld [vmem:[%s1380_s7 + $0x260] sm:$0xff]  ;;  %378 = vst [vmem:[%s1385_s8 + $0x120] sm:$0xff] %v377_v36  ;;  %380 = vst [vmem:[%s1385_s8 + $0x128] sm:$0xff] %v379_v37  ;;  %v383_v39 = vld [vmem:[%s1380_s7 + $0x270] sm:$0xff] }
  0x2b   : > { %382 = vst [vmem:[%s1385_s8 + $0x130] sm:$0xff] %v381_v38  ;;  %v385_v40 = vld [vmem:[%s1380_s7 + $0x280] sm:$0xff]  ;;  %v387_v41 = vld [vmem:[%s1380_s7 + $0x290] sm:$0xff]  ;;  %384 = vst [vmem:[%s1385_s8 + $0x138] sm:$0xff] %v383_v39 }
  0x2c   : > { %386 = vst [vmem:[%s1385_s8 + $0x140] sm:$0xff] %v385_v40  ;;  %388 = vst [vmem:[%s1385_s8 + $0x148] sm:$0xff] %v387_v41  ;;  %v389_v42 = vld [vmem:[%s1380_s7 + $0x2a0] sm:$0xff]  ;;  %v391_v43 = vld [vmem:[%s1380_s7 + $0x2b0] sm:$0xff] }
  0x2d   : > { %v393_v44 = vld [vmem:[%s1380_s7 + $0x2c0] sm:$0xff]  ;;  %390 = vst [vmem:[%s1385_s8 + $0x150] sm:$0xff] %v389_v42  ;;  %392 = vst [vmem:[%s1385_s8 + $0x158] sm:$0xff] %v391_v43  ;;  %v395_v45 = vld [vmem:[%s1380_s7 + $0x2d0] sm:$0xff] }
  0x2e   : > { %394 = vst [vmem:[%s1385_s8 + $0x160] sm:$0xff] %v393_v44  ;;  %v397_v46 = vld [vmem:[%s1380_s7 + $0x2e0] sm:$0xff]  ;;  %v399_v47 = vld [vmem:[%s1380_s7 + $0x2f0] sm:$0xff]  ;;  %396 = vst [vmem:[%s1385_s8 + $0x168] sm:$0xff] %v395_v45 }
  0x2f   : > { %398 = vst [vmem:[%s1385_s8 + $0x170] sm:$0xff] %v397_v46  ;;  %400 = vst [vmem:[%s1385_s8 + $0x178] sm:$0xff] %v399_v47 }
  0x30 PF: > { %p1044_p7 = scmp.ge.s32.totalorder %s1296_s18, 1  ;;  %p413_p8 = scmp.lt.s32.totalorder %s1296_s18, 13 }
  0x32   : > { %p414_p9 = pnand %p1044_p7, %p413_p8 }
  0x33   : > { %s420_s9 = sand.u32 (!%p414_p9), 1, %s1272_s12   ;;  %s460_s10 = smul.u32 (!%p414_p9), 3, %s1280_s14 }
  0x34   : > { %417 = sbr.rel (%p414_p9) target bundleno = 347 (0x15b), region = 66  ;;  %s1046_s21 = sshll.u32 (!%p414_p9), %s1284_s15, 1 }
  0x35   : > { %s1108_s11 = smul.u32 (!%p414_p9), 384, %s420_s9  ;;  %p463_p10 = scmp.lt.s32.totalorder (!%p414_p9), %s460_s10, 17 }
  0x36   : > { %p473_p11 = scmp.lt.s32.totalorder (!%p414_p9), %s1046_s21, 3  ;;  %p1049_p12 = scmp.ne.s32.totalorder (!%p414_p9), %s1280_s14, 0 }
  0x37   : > { %s1502_s5 = scalar_lea.vmem (!%p414_p9), [#allocation3], %s1108_s11 }
  0x39   : > { %s1600_s10 = smov (!%p463_p10, %s460_s10), 17  ;;  %s1602_s21 = smov (!%p473_p11, %s1046_s21), 3 }
  0x3a   : > { %s1045_s22 = sshll.u32 %s1600_s10, 2  ;;  %s475_s12 = scalar_lea.vmem %s1585_s2, %s1602_s21 }
  0x3b   : > { %s1490_s26 = scalar_lea.vmem %s1583_s0, %s1045_s22  ;;  %s1048_s29 = sshll.u32 %s1602_s21, 2 }
  0x3c   : > { %s1500_s4 = scalar_lea.vmem %s1586_s3, %s1048_s29  ;;  %491 = sbr.rel (%p1049_p12) target bundleno = 67 (0x43), region = 74 }
  0x41   : > { %v1298_v48 = vmov 0.0  }
  0x42   : > { %492 = vst [vmem:[#allocation2] sm:$0xff] %v1298_v48  ;;  %493 = vst [vmem:[#allocation2 + $0x8] sm:$0xff] %v1298_v48 }
  0x43 PF: > { %v1167_v49 = vld [vmem:[%s1502_s5 + $0x74] ss:$8 sps:$4 sm:$0xff]   ;;  %v1169_v50 = vld [vmem:[%s1502_s5 + $0x70] ss:$8 sps:$4 sm:$0xff]   ;;  %v1299_v51 = vmov 0   ;;  %p1101_p13 = scmp.ne.s32.totalorder %s1280_s14, 5 }
  0x44   : > { %870 = vmatprep.mubr.bf16.mxu1 %v1299_v51  ;;  %797 = vmatprep.subr.bf16.mxu0 %v1167_v49  ;;  %v1170_v52 = vld [vmem:[%s1502_s5 + $0x64] ss:$8 sps:$4 sm:$0xff]   ;;  %v1172_v53 = vld [vmem:[%s1502_s5 + $0x60] ss:$8 sps:$4 sm:$0xff]   ;;  %v1173_v54 = vld [vmem:[%s1502_s5 + $0x54] ss:$8 sps:$4 sm:$0xff]  }
  0x45   : > { %798 = vmatpush1.bf16.msra.mxu0 %v1169_v50  ;;  %v1175_v55 = vld [vmem:[%s1502_s5 + $0x50] ss:$8 sps:$4 sm:$0xff]   ;;  %v1176_v56 = vld [vmem:[%s1502_s5 + $0x44] ss:$8 sps:$4 sm:$0xff]   ;;  %v1188_v57 = vld [vmem:[%s1502_s5 + $0x174] ss:$8 sps:$4 sm:$0xff]  }
  0x46   : > { %799 = vmatprep.subr.bf16.mxu0 %v1170_v52  ;;  %v1190_v58 = vld [vmem:[%s1502_s5 + $0x170] ss:$8 sps:$4 sm:$0xff]   ;;  %v1178_v59 = vld [vmem:[%s1502_s5 + $0x40] ss:$8 sps:$4 sm:$0xff]   ;;  %v1179_v60 = vld [vmem:[%s1502_s5 + $0x34] ss:$8 sps:$4 sm:$0xff]   ;;  %838 = vmatprep.subr.bf16.mxu1 %v1188_v57 }
  0x47   : > { %v1194_v61 = vld [vmem:[%s1502_s5 + $0x164] ss:$8 sps:$4 sm:$0xff]   ;;  %839 = vmatpush1.bf16.msra.mxu1 %v1190_v58  ;;  %v1196_v62 = vld [vmem:[%s1502_s5 + $0x160] ss:$8 sps:$4 sm:$0xff]   ;;  %v1181_v63 = vld [vmem:[%s1502_s5 + $0x30] ss:$8 sps:$4 sm:$0xff]  }
  0x48   : > { %840 = vmatprep.subr.bf16.mxu1 %v1194_v61  ;;  %v1200_v0 = vld [vmem:[%s1502_s5 + $0x154] ss:$8 sps:$4 sm:$0xff]   ;;  %v1182_v1 = vld [vmem:[%s1502_s5 + $0x24] ss:$8 sps:$4 sm:$0xff]   ;;  %v1202_v2 = vld [vmem:[%s1502_s5 + $0x150] ss:$8 sps:$4 sm:$0xff]  }
  0x49   : > { %800 = vmatpush1.bf16.msra.mxu0 %v1172_v53  ;;  %v1206_v3 = vld [vmem:[%s1502_s5 + $0x144] ss:$8 sps:$4 sm:$0xff]   ;;  %v1184_v4 = vld [vmem:[%s1502_s5 + $0x20] ss:$8 sps:$4 sm:$0xff]   ;;  %v1185_v5 = vld [vmem:[%s1502_s5 + $0x14] ss:$8 sps:$4 sm:$0xff]  }
  0x4a   : > { %801 = vmatprep.subr.bf16.mxu0 %v1173_v54  ;;  %v1208_v6 = vld [vmem:[%s1502_s5 + $0x140] ss:$8 sps:$4 sm:$0xff]   ;;  %v1212_v7 = vld [vmem:[%s1502_s5 + $0x134] ss:$8 sps:$4 sm:$0xff]   ;;  %v1187_v8 = vld [vmem:[%s1502_s5 + $0x10] ss:$8 sps:$4 sm:$0xff]  }
  0x4b   : > { %841 = vmatpush1.bf16.msra.mxu1 %v1196_v62  ;;  %v1191_v9 = vld [vmem:[%s1502_s5 + $0x4] ss:$8 sps:$4 sm:$0xff]   ;;  %v1214_v10 = vld [vmem:[%s1502_s5 + $0x130] ss:$8 sps:$4 sm:$0xff]   ;;  %v1193_v12 = vld [vmem:[%s1502_s5] ss:$8 sps:$4 sm:$0xff]  }
  0x4c   : > { %842 = vmatprep.subr.bf16.mxu1 %v1200_v0  ;;  %v1218_v11 = vld [vmem:[%s1502_s5 + $0x124] ss:$8 sps:$4 sm:$0xff]   ;;  %v1197_v13 = vld [vmem:[%s1502_s5 + $0xf4] ss:$8 sps:$4 sm:$0xff]   ;;  %v1220_v14 = vld [vmem:[%s1502_s5 + $0x120] ss:$8 sps:$4 sm:$0xff]  }
  0x4d   : > { %802 = vmatpush1.bf16.msra.mxu0 %v1175_v55  ;;  %v1224_v15 = vld [vmem:[%s1502_s5 + $0x114] ss:$8 sps:$4 sm:$0xff]   ;;  %v1199_v16 = vld [vmem:[%s1502_s5 + $0xf0] ss:$8 sps:$4 sm:$0xff]   ;;  %v1203_v17 = vld [vmem:[%s1502_s5 + $0xe4] ss:$8 sps:$4 sm:$0xff]  }
  0x4e   : > { %803 = vmatprep.subr.bf16.mxu0 %v1176_v56  ;;  %v496_v18 = vld [vmem:[%s1490_s26] sm:$0xff]  ;;  %v1230_v21 = vld [vmem:[%s1502_s5 + $0x104] ss:$8 sps:$4 sm:$0xff]   ;;  %v1205_v22 = vld [vmem:[%s1502_s5 + $0xe0] ss:$8 sps:$4 sm:$0xff]  }
  0x4f   : > { %843 = vmatpush1.bf16.msra.mxu1 %v1202_v2  ;;  %v1226_v19 = vld [vmem:[%s1502_s5 + $0x110] ss:$8 sps:$4 sm:$0xff]   ;;  %v1051_v20 = vcombine.high %v496_v18, %v496_v18  ;;  %v1209_v23 = vld [vmem:[%s1502_s5 + $0xd4] ss:$8 sps:$4 sm:$0xff]   ;;  %v1232_v24 = vld [vmem:[%s1502_s5 + $0x100] ss:$8 sps:$4 sm:$0xff]   ;;  %v1050_v37 = vcombine.low %v496_v18, %v496_v18 }
  0x50   : > { %844 = vmatprep.subr.bf16.mxu1 %v1206_v3  ;;  %v1211_v25 = vld [vmem:[%s1502_s5 + $0xd0] ss:$8 sps:$4 sm:$0xff]   ;;  %v1215_v26 = vld [vmem:[%s1502_s5 + $0xc4] ss:$8 sps:$4 sm:$0xff]   ;;  %v1217_v28 = vld [vmem:[%s1502_s5 + $0xc0] ss:$8 sps:$4 sm:$0xff]  }
  0x51   : > { %804 = vmatpush1.bf16.msra.mxu0 %v1178_v59  ;;  %829 = vmatprep.mubr.bf16.mxu0 %v1051_v20  ;;  %v1236_v27 = vld [vmem:[%s1490_s26 + $0x8] ss:$0 sps:$4 sm:$0xff]   ;;  %v1221_v29 = vld [vmem:[%s1502_s5 + $0xb4] ss:$8 sps:$4 sm:$0xff]   ;;  %v1227_v31 = vld [vmem:[%s1502_s5 + $0xa4] ss:$8 sps:$4 sm:$0xff]  }
  0x52   : > { %805 = vmatprep.subr.bf16.mxu0 %v1179_v60  ;;  %v1223_v30 = vld [vmem:[%s1502_s5 + $0xb0] ss:$8 sps:$4 sm:$0xff]   ;;  %v1229_v32 = vld [vmem:[%s1502_s5 + $0xa0] ss:$8 sps:$4 sm:$0xff]   ;;  %v1233_v33 = vld [vmem:[%s1502_s5 + $0x94] ss:$8 sps:$4 sm:$0xff]  }
  0x53   : > { %845 = vmatpush1.bf16.msra.mxu1 %v1208_v6  ;;  %v1235_v34 = vld [vmem:[%s1502_s5 + $0x90] ss:$8 sps:$4 sm:$0xff]   ;;  %v1237_v35 = vld [vmem:[%s1502_s5 + $0x84] ss:$8 sps:$4 sm:$0xff]   ;;  %v1239_v36 = vld [vmem:[%s1502_s5 + $0x80] ss:$8 sps:$4 sm:$0xff]  }
  0x54   : > { %846 = vmatprep.subr.bf16.mxu1 %v1212_v7  ;;  %v494_v42 = vld [vmem:[#allocation2] sm:$0xff]  ;;  %v495_v45 = vld [vmem:[#allocation2 + $0x8] sm:$0xff] }
  0x55   : > { %806 = vmatpush1.bf16.msra.mxu0 %v1181_v63 }
  0x56   : > { %807 = vmatprep.subr.bf16.mxu0 %v1182_v1 }
  0x57   : > { %847 = vmatpush1.bf16.msra.mxu1 %v1214_v10 }
  0x58   : > { %848 = vmatprep.subr.bf16.mxu1 %v1218_v11 }
  0x59   : > { %808 = vmatpush1.bf16.msra.mxu0 %v1184_v4 }
  0x5a   : > { %809 = vmatprep.subr.bf16.mxu0 %v1185_v5 }
  0x5b   : > { %849 = vmatpush1.bf16.msra.mxu1 %v1220_v14 }
  0x5c   : > { %850 = vmatprep.subr.bf16.mxu1 %v1224_v15 }
  0x5d   : > { %810 = vmatpush1.bf16.msra.mxu0 %v1187_v8 }
  0x5e   : > { %811 = vmatprep.subr.bf16.mxu0 %v1191_v9 }
  0x5f   : > { %851 = vmatpush1.bf16.msra.mxu1 %v1226_v19 }
  0x60   : > { %852 = vmatprep.subr.bf16.mxu1 %v1230_v21 }
  0x61   : > { %812 = vmatpush1.bf16.msra.mxu0 %v1193_v12 }
  0x62   : > { %813 = vmatprep.subr.bf16.mxu0 %v1197_v13 }
  0x63   : > { %853 = vmatpush1.bf16.msra.mxu1 %v1232_v24 }
  0x65   : > { %814 = vmatpush2.bf16.msra.mxu0 %v1199_v16 }
  0x66   : > { %815 = vmatprep.subr.bf16.mxu0 %v1203_v17  ;;  %871 = vmatmul.mubr.bf16.vlgmr.msra.gmra.mxu1 %v1236_v27 }
  0x69   : > { %816 = vmatpush2.bf16.msra.mxu0 %v1205_v22 }
  0x6a   : > { %817 = vmatprep.subr.bf16.mxu0 %v1209_v23 }
  0x6d   : > { %818 = vmatpush2.bf16.msra.mxu0 %v1211_v25 }
  0x6e   : > { %819 = vmatprep.subr.bf16.mxu0 %v1215_v26 }
  0x71   : > { %820 = vmatpush2.bf16.msra.mxu0 %v1217_v28 }
  0x72   : > { %821 = vmatprep.subr.bf16.mxu0 %v1221_v29 }
  0x75   : > { %822 = vmatpush2.bf16.msra.mxu0 %v1223_v30 }
  0x76   : > { %823 = vmatprep.subr.bf16.mxu0 %v1227_v31 }
  0x79   : > { %824 = vmatpush2.bf16.msra.mxu0 %v1229_v32 }
  0x7a   : > { %825 = vmatprep.subr.bf16.mxu0 %v1233_v33 }
  0x7d   : > { %826 = vmatpush2.bf16.msra.mxu0 %v1235_v34 }
  0x7e   : > { %827 = vmatprep.subr.bf16.mxu0 %v1237_v35 }
  0x81   : > { %828 = vmatpush2.bf16.msra.mxu0 %v1239_v36 }
  0x84   : > { %830 = vmatmul.mubr.bf16.vlgmr.msra.gmra.mxu0 %v1050_v37 }
 0x126   : > { %v872_v38 = vpop.f32.mrf.mxu1 }
 0x128   : > { %v874_v39 = vpop.f32.mrf.mxu1 }
 0x12a   : > { %v876_v40 = vpop.f32.mrf.mxu1 }
 0x12c   : > { %v877_v41 = vpop.f32.mrf.mxu1 }
 0x144   : > { %v831_v43 = vpop.f32.mrf.mxu0 }
 0x145   : > { %v873_v44 = vadd.f32 %v872_v38, %v831_v43 }
 0x146   : > { %v833_v46 = vpop.f32.mrf.mxu0 }
 0x147   : > { %v879_v47 = vadd.f32 %v873_v44, %v494_v42  ;;  %v875_v48 = vadd.f32 %v874_v39, %v833_v46  ;;  %886 = sbr.rel (%p1101_p13) target bundleno = 347 (0x15b), region = 78 }
 0x148   : > { %v835_v49 = vpop.f32.mrf.mxu0 }
 0x149   : > { %881 = vst [vmem:[#allocation2] sm:$0xff] %v879_v47  ;;  %v880_v50 = vadd.f32 %v875_v48, %v495_v45 }
 0x14a   : > { %v836_v51 = vpop.f32.mrf.mxu0 }
 0x14b   : > { %882 = vst [vmem:[#allocation2 + $0x8] sm:$0xff] %v880_v50 }
 0x14c   : > { %v891_v52 = vlaneseq  ;;  %v889_v54 = vld [vmem:[%s475_s12] sm:$0x3] }
 0x14e   : > { %v892_v53 = vshrl.u32 %v891_v52, 7 }
 0x150   : > { %v893_v55 = vsub.s32 0, %v892_v53  ;;  %v897_v56 = vsub.s32 1, %v892_v53  ;;  %v887_v57 = vld [vmem:[#allocation2] sm:$0xff] }
 0x152   : > { %v888_v58 = vld [vmem:[#allocation2 + $0x8] sm:$0xff]  ;;  %v894_v59 = vrot.slane %v889_v54, %v893_v55  ;;  %v898_v60 = vrot.slane %v889_v54, %v897_v56 }
 0x154   : > { %v901_v61 = vadd.f32 %v894_v59, %v887_v57  ;;  %v902_v62 = vadd.f32 %v898_v60, %v888_v58 }
 0x156   : > { %v903_v63 = vmax.f32 %v901_v61, 0.0  ;;  %v904_v0 = vmax.f32 %v902_v62, 0.0 }
 0x158   : > { %v1106_v1 = vpack.c.bf16 %v904_v0, %v903_v63 }
 0x15a   : > { %913 = vst [vmem:[%s1500_s4] sm:$0xff] %v1106_v1 }
 0x15b PF: > { %s13_s18 = sadd.s32 1, %s1296_s18   ;;  %s1587_s12 = smov %s1276_s13 }
 0x15c   : > { %p10_p0 = scmp.ge.s32.totalorder %s13_s18, 14   ;;  %s1588_s13 = smov %s1371_s25 }
 0x15d   : > { %s1589_s14 = smov %s1288_s16  ;;  %s1590_s15 = smov %s1292_s17 }
 0x15e   : > { %s1591_s16 = smov %s1594_s19  ;;  %s1592_s17 = smov %s1598_s20 }
 0x15f   :  { %12 = sbr.rel (!%p10_p0) target bundleno = 4 (0x4), region = 119 }

// kernel: _lambda_.38
= control target key start
LH: loop header
LB: loop body
LE: loop exit
PB: predicated region body
PF: predicated region fallthrough
CT: control target
= control target key end

     0   :  { %s1029_s12 = smov 0   ;;  %s1031_s13 = smov 0   ;;  %s1208_s0 = inlined_call_operand.vmem [shape: bf16[8,256], index: 0, kind: input, shape index: {}]   ;;  %s1209_s1 = inlined_call_operand.vmem [shape: bf16[256,512], index: 1, kind: input, shape index: {}]   ;;  %s1210_s2 = inlined_call_operand.vmem [shape: f32[1,512], index: 2, kind: input, shape index: {}]   ;;  %s1211_s3 = inlined_call_operand.vmem [shape: bf16[8,512], index: 3, kind: output, shape index: {}]  }
   0x1   :  { %s1033_s14 = smov 0   ;;  %s1035_s15 = smov 0  }
   0x2   :  { %s1037_s16 = smov 0  }
   0x3 LB: > { %s28_s17 = sadd.s32 1, %s1003_s15  ;;  %p76_p1 = scmp.ne.s32.totalorder %s995_s13, %s991_s12  ;;  %s1007_s16 = sphi %s1037_s16, %s13_s16   ;;  %s1003_s15 = sphi %s1035_s15, %s1215_s15   ;;  %s999_s14 = sphi %s1033_s14, %s1214_s14   ;;  %s995_s13 = sphi %s1031_s13, %s1213_s13   ;;  %s991_s12 = sphi %s1029_s12, %s1212_s12  }
   0x4   : > { %p30_p0 = scmp.ge.s32.totalorder %s28_s17, 2  ;;  %p77_p2 = scmp.eq.s32.totalorder %s1007_s16, 0 }
   0x5   : > { %s69_s19 = sadd.s32 1, %s995_s13  ;;  %p831_p5 = scmp.ge.s32.totalorder %s1007_s16, 2 }
   0x6   : > { %s1217_s17 = smov (%p30_p0, %s28_s17), 0  ;;  %p78_p3 = por %p77_p2, %p76_p1 }
   0x7   : > { %s65_s18 = ssub.s32 %s1003_s15, %s1217_s17  ;;  %169 = sbr.rel (%p831_p5) target bundleno = 32 (0x20), region = 20 }
   0x8   : > { %p67_p4 = scmp.eq.s32.totalorder %s65_s18, 0 }
   0xa   : > { %s1064_s20 = scalar_select %p67_p4, %s995_s13, %s69_s19  }
   0xc   : > { %172 = sbr.rel (!%p78_p3) target bundleno = 32 (0x20), region = 24  ;;  %s174_s21 = sand.u32 (%p78_p3), 1, %s995_s13  }
   0xd   : > { %s877_s22 = sshll.u32 (%p78_p3), %s1003_s15, 3  ;;  %s832_s23 = sshll.u32 (%p78_p3), %s174_s21, 8 }
   0xe   : > { %s1072_s26 = scalar_lea.vmem (%p78_p3), %s1209_s1, %s877_s22  ;;  %s1077_s27 = scalar_lea.vmem (%p78_p3), [#allocation3], %s832_s23 }
   0xf   : > { %v273_v0 = vld [vmem:[%s1072_s26] sm:$0xff] (%p78_p3)  ;;  %v275_v1 = vld [vmem:[%s1072_s26 + $0x10] sm:$0xff] (%p78_p3) }
  0x10   : > { %v277_v2 = vld [vmem:[%s1072_s26 + $0x20] sm:$0xff] (%p78_p3)  ;;  %274 = vst [vmem:[%s1077_s27] sm:$0xff] (%p78_p3), %v273_v0  ;;  %276 = vst [vmem:[%s1077_s27 + $0x8] sm:$0xff] (%p78_p3), %v275_v1  ;;  %v279_v3 = vld [vmem:[%s1072_s26 + $0x30] sm:$0xff] (%p78_p3) }
  0x11   : > { %278 = vst [vmem:[%s1077_s27 + $0x10] sm:$0xff] %v277_v2  ;;  %v281_v4 = vld [vmem:[%s1072_s26 + $0x40] sm:$0xff]  ;;  %v283_v5 = vld [vmem:[%s1072_s26 + $0x50] sm:$0xff]  ;;  %280 = vst [vmem:[%s1077_s27 + $0x18] sm:$0xff] %v279_v3 }
  0x12   : > { %282 = vst [vmem:[%s1077_s27 + $0x20] sm:$0xff] %v281_v4  ;;  %284 = vst [vmem:[%s1077_s27 + $0x28] sm:$0xff] %v283_v5  ;;  %v285_v6 = vld [vmem:[%s1072_s26 + $0x60] sm:$0xff]  ;;  %v287_v7 = vld [vmem:[%s1072_s26 + $0x70] sm:$0xff] }
  0x13   : > { %v289_v8 = vld [vmem:[%s1072_s26 + $0x80] sm:$0xff]  ;;  %286 = vst [vmem:[%s1077_s27 + $0x30] sm:$0xff] %v285_v6  ;;  %288 = vst [vmem:[%s1077_s27 + $0x38] sm:$0xff] %v287_v7  ;;  %v291_v9 = vld [vmem:[%s1072_s26 + $0x90] sm:$0xff] }
  0x14   : > { %290 = vst [vmem:[%s1077_s27 + $0x40] sm:$0xff] %v289_v8  ;;  %v293_v10 = vld [vmem:[%s1072_s26 + $0xa0] sm:$0xff]  ;;  %v295_v11 = vld [vmem:[%s1072_s26 + $0xb0] sm:$0xff]  ;;  %292 = vst [vmem:[%s1077_s27 + $0x48] sm:$0xff] %v291_v9 }
  0x15   : > { %294 = vst [vmem:[%s1077_s27 + $0x50] sm:$0xff] %v293_v10  ;;  %296 = vst [vmem:[%s1077_s27 + $0x58] sm:$0xff] %v295_v11  ;;  %v297_v12 = vld [vmem:[%s1072_s26 + $0xc0] sm:$0xff]  ;;  %v299_v13 = vld [vmem:[%s1072_s26 + $0xd0] sm:$0xff] }
  0x16   : > { %v301_v14 = vld [vmem:[%s1072_s26 + $0xe0] sm:$0xff]  ;;  %298 = vst [vmem:[%s1077_s27 + $0x60] sm:$0xff] %v297_v12  ;;  %300 = vst [vmem:[%s1077_s27 + $0x68] sm:$0xff] %v299_v13  ;;  %v303_v15 = vld [vmem:[%s1072_s26 + $0xf0] sm:$0xff] }
  0x17   : > { %302 = vst [vmem:[%s1077_s27 + $0x70] sm:$0xff] %v301_v14  ;;  %v305_v16 = vld [vmem:[%s1072_s26 + $0x100] sm:$0xff]  ;;  %v307_v17 = vld [vmem:[%s1072_s26 + $0x110] sm:$0xff]  ;;  %304 = vst [vmem:[%s1077_s27 + $0x78] sm:$0xff] %v303_v15 }
  0x18   : > { %306 = vst [vmem:[%s1077_s27 + $0x80] sm:$0xff] %v305_v16  ;;  %308 = vst [vmem:[%s1077_s27 + $0x88] sm:$0xff] %v307_v17  ;;  %v309_v18 = vld [vmem:[%s1072_s26 + $0x120] sm:$0xff]  ;;  %v311_v19 = vld [vmem:[%s1072_s26 + $0x130] sm:$0xff] }
  0x19   : > { %v313_v20 = vld [vmem:[%s1072_s26 + $0x140] sm:$0xff]  ;;  %310 = vst [vmem:[%s1077_s27 + $0x90] sm:$0xff] %v309_v18  ;;  %312 = vst [vmem:[%s1077_s27 + $0x98] sm:$0xff] %v311_v19  ;;  %v315_v21 = vld [vmem:[%s1072_s26 + $0x150] sm:$0xff] }
  0x1a   : > { %314 = vst [vmem:[%s1077_s27 + $0xa0] sm:$0xff] %v313_v20  ;;  %v317_v22 = vld [vmem:[%s1072_s26 + $0x160] sm:$0xff]  ;;  %v319_v23 = vld [vmem:[%s1072_s26 + $0x170] sm:$0xff]  ;;  %316 = vst [vmem:[%s1077_s27 + $0xa8] sm:$0xff] %v315_v21 }
  0x1b   : > { %318 = vst [vmem:[%s1077_s27 + $0xb0] sm:$0xff] %v317_v22  ;;  %320 = vst [vmem:[%s1077_s27 + $0xb8] sm:$0xff] %v319_v23  ;;  %v321_v24 = vld [vmem:[%s1072_s26 + $0x180] sm:$0xff]  ;;  %v323_v25 = vld [vmem:[%s1072_s26 + $0x190] sm:$0xff] }
  0x1c   : > { %v325_v26 = vld [vmem:[%s1072_s26 + $0x1a0] sm:$0xff]  ;;  %322 = vst [vmem:[%s1077_s27 + $0xc0] sm:$0xff] %v321_v24  ;;  %324 = vst [vmem:[%s1077_s27 + $0xc8] sm:$0xff] %v323_v25  ;;  %v327_v27 = vld [vmem:[%s1072_s26 + $0x1b0] sm:$0xff] }
  0x1d   : > { %326 = vst [vmem:[%s1077_s27 + $0xd0] sm:$0xff] %v325_v26  ;;  %v329_v28 = vld [vmem:[%s1072_s26 + $0x1c0] sm:$0xff]  ;;  %v331_v29 = vld [vmem:[%s1072_s26 + $0x1d0] sm:$0xff]  ;;  %328 = vst [vmem:[%s1077_s27 + $0xd8] sm:$0xff] %v327_v27 }
  0x1e   : > { %330 = vst [vmem:[%s1077_s27 + $0xe0] sm:$0xff] %v329_v28  ;;  %332 = vst [vmem:[%s1077_s27 + $0xe8] sm:$0xff] %v331_v29  ;;  %v333_v30 = vld [vmem:[%s1072_s26 + $0x1e0] sm:$0xff]  ;;  %v335_v31 = vld [vmem:[%s1072_s26 + $0x1f0] sm:$0xff] }
  0x1f   : > { %334 = vst [vmem:[%s1077_s27 + $0xf0] sm:$0xff] %v333_v30  ;;  %336 = vst [vmem:[%s1077_s27 + $0xf8] sm:$0xff] %v335_v31 }
  0x20 PF: > { %p835_p6 = scmp.ge.s32.totalorder %s1007_s16, 1  ;;  %p349_p7 = scmp.lt.s32.totalorder %s1007_s16, 3 }
  0x22   : > { %p350_p8 = pnand %p835_p6, %p349_p7 }
  0x23   : > { %s356_s28 = sand.u32 (!%p350_p8), 1, %s991_s12   ;;  %s837_s6 = sshll.u32 (!%p350_p8), %s999_s14, 1 }
  0x24   : > { %353 = sbr.rel (%p350_p8) target bundleno = 306 (0x132), region = 66  ;;  %s836_s4 = sshll.u32 (!%p350_p8), %s356_s28, 8 }
  0x25   : > { %s1150_s5 = scalar_lea.vmem (!%p350_p8), [#allocation3], %s836_s4  ;;  %p409_p9 = scmp.lt.s32.totalorder (!%p350_p8), %s837_s6, 3 }
  0x29   : > { %v1146_v32 = vld [vmem:[%s1208_s0] sm:$0xff]  ;;  %v919_v34 = vld [vmem:[%s1150_s5 + $0x74] ss:$8 sps:$4 sm:$0xff]   ;;  %v921_v35 = vld [vmem:[%s1150_s5 + $0x70] ss:$8 sps:$4 sm:$0xff]   ;;  %v683_v3 = vlaneseq  ;;  %s1219_s6 = smov (!%p409_p9, %s837_s6), 3 }
  0x2a   : > { %v841_v33 = vcombine.high %v1146_v32, %v1146_v32  ;;  %631 = vmatprep.subr.bf16.mxu0 %v919_v34  ;;  %v922_v36 = vld [vmem:[%s1150_s5 + $0x64] ss:$8 sps:$4 sm:$0xff]   ;;  %v924_v37 = vld [vmem:[%s1150_s5 + $0x60] ss:$8 sps:$4 sm:$0xff]   ;;  %v925_v38 = vld [vmem:[%s1150_s5 + $0x54] ss:$8 sps:$4 sm:$0xff]   ;;  %v840_v2 = vcombine.low %v1146_v32, %v1146_v32  ;;  %s411_s9 = scalar_lea.vmem %s1210_s2, %s1219_s6 }
  0x2b   : > { %632 = vmatpush1.bf16.msra.mxu0 %v921_v35  ;;  %v927_v39 = vld [vmem:[%s1150_s5 + $0x50] ss:$8 sps:$4 sm:$0xff]   ;;  %v928_v40 = vld [vmem:[%s1150_s5 + $0x44] ss:$8 sps:$4 sm:$0xff]   ;;  %v930_v41 = vld [vmem:[%s1150_s5 + $0x40] ss:$8 sps:$4 sm:$0xff]  }
  0x2c   : > { %663 = vmatprep.mubr.bf16.mxu0 %v841_v33  ;;  %633 = vmatprep.subr.bf16.mxu0 %v922_v36  ;;  %v931_v42 = vld [vmem:[%s1150_s5 + $0x34] ss:$8 sps:$4 sm:$0xff]   ;;  %v933_v43 = vld [vmem:[%s1150_s5 + $0x30] ss:$8 sps:$4 sm:$0xff]   ;;  %v934_v44 = vld [vmem:[%s1150_s5 + $0x24] ss:$8 sps:$4 sm:$0xff]  }
  0x2d   : > { %v936_v45 = vld [vmem:[%s1150_s5 + $0x20] ss:$8 sps:$4 sm:$0xff]   ;;  %v937_v46 = vld [vmem:[%s1150_s5 + $0x14] ss:$8 sps:$4 sm:$0xff]   ;;  %v939_v47 = vld [vmem:[%s1150_s5 + $0x10] ss:$8 sps:$4 sm:$0xff]  }
  0x2e   : > { %v940_v48 = vld [vmem:[%s1150_s5 + $0x4] ss:$8 sps:$4 sm:$0xff]   ;;  %v942_v49 = vld [vmem:[%s1150_s5] ss:$8 sps:$4 sm:$0xff]   ;;  %v943_v50 = vld [vmem:[%s1150_s5 + $0xf4] ss:$8 sps:$4 sm:$0xff]  }
  0x2f   : > { %634 = vmatpush1.bf16.msra.mxu0 %v924_v37  ;;  %v945_v51 = vld [vmem:[%s1150_s5 + $0xf0] ss:$8 sps:$4 sm:$0xff]   ;;  %v946_v52 = vld [vmem:[%s1150_s5 + $0xe4] ss:$8 sps:$4 sm:$0xff]   ;;  %v948_v53 = vld [vmem:[%s1150_s5 + $0xe0] ss:$8 sps:$4 sm:$0xff]  }
  0x30   : > { %635 = vmatprep.subr.bf16.mxu0 %v925_v38  ;;  %v949_v54 = vld [vmem:[%s1150_s5 + $0xd4] ss:$8 sps:$4 sm:$0xff]   ;;  %v951_v55 = vld [vmem:[%s1150_s5 + $0xd0] ss:$8 sps:$4 sm:$0xff]   ;;  %v952_v56 = vld [vmem:[%s1150_s5 + $0xc4] ss:$8 sps:$4 sm:$0xff]  }
  0x31   : > { %v954_v57 = vld [vmem:[%s1150_s5 + $0xc0] ss:$8 sps:$4 sm:$0xff]   ;;  %v955_v58 = vld [vmem:[%s1150_s5 + $0xb4] ss:$8 sps:$4 sm:$0xff]   ;;  %v957_v59 = vld [vmem:[%s1150_s5 + $0xb0] ss:$8 sps:$4 sm:$0xff]  }
  0x32   : > { %v958_v60 = vld [vmem:[%s1150_s5 + $0xa4] ss:$8 sps:$4 sm:$0xff]   ;;  %v960_v61 = vld [vmem:[%s1150_s5 + $0xa0] ss:$8 sps:$4 sm:$0xff]   ;;  %v961_v62 = vld [vmem:[%s1150_s5 + $0x94] ss:$8 sps:$4 sm:$0xff]  }
  0x33   : > { %636 = vmatpush1.bf16.msra.mxu0 %v927_v39  ;;  %v963_v63 = vld [vmem:[%s1150_s5 + $0x90] ss:$8 sps:$4 sm:$0xff]   ;;  %v964_v0 = vld [vmem:[%s1150_s5 + $0x84] ss:$8 sps:$4 sm:$0xff]   ;;  %v966_v1 = vld [vmem:[%s1150_s5 + $0x80] ss:$8 sps:$4 sm:$0xff]  }
  0x34   : > { %637 = vmatprep.subr.bf16.mxu0 %v928_v40  ;;  %v684_v4 = vshrl.u32 %v683_v3, 7  ;;  %v681_v7 = vld [vmem:[%s411_s9] sm:$0x3]  ;;  %s839_s10 = sshll.u32 %s1219_s6, 2 }
  0x35   : > { %s421_s14 = scalar_lea.vmem %s1211_s3, %s839_s10 }
  0x36   : > { %v685_v5 = vsub.s32 0, %v684_v4  ;;  %v689_v6 = vsub.s32 1, %v684_v4 }
  0x37   : > { %638 = vmatpush1.bf16.msra.mxu0 %v930_v41 }
  0x38   : > { %639 = vmatprep.subr.bf16.mxu0 %v931_v42  ;;  %v686_v8 = vrot.slane %v681_v7, %v685_v5  ;;  %v690_v9 = vrot.slane %v681_v7, %v689_v6 }
  0x3b   : > { %640 = vmatpush1.bf16.msra.mxu0 %v933_v43 }
  0x3c   : > { %641 = vmatprep.subr.bf16.mxu0 %v934_v44 }
  0x3f   : > { %642 = vmatpush1.bf16.msra.mxu0 %v936_v45 }
  0x40   : > { %643 = vmatprep.subr.bf16.mxu0 %v937_v46 }
  0x43   : > { %644 = vmatpush1.bf16.msra.mxu0 %v939_v47 }
  0x44   : > { %645 = vmatprep.subr.bf16.mxu0 %v940_v48 }
  0x47   : > { %646 = vmatpush1.bf16.msra.mxu0 %v942_v49 }
  0x48   : > { %647 = vmatprep.subr.bf16.mxu0 %v943_v50 }
  0x4b   : > { %648 = vmatpush2.bf16.msra.mxu0 %v945_v51 }
  0x4c   : > { %649 = vmatprep.subr.bf16.mxu0 %v946_v52 }
  0x4f   : > { %650 = vmatpush2.bf16.msra.mxu0 %v948_v53 }
  0x50   : > { %651 = vmatprep.subr.bf16.mxu0 %v949_v54 }
  0x53   : > { %652 = vmatpush2.bf16.msra.mxu0 %v951_v55 }
  0x54   : > { %653 = vmatprep.subr.bf16.mxu0 %v952_v56 }
  0x57   : > { %654 = vmatpush2.bf16.msra.mxu0 %v954_v57 }
  0x58   : > { %655 = vmatprep.subr.bf16.mxu0 %v955_v58 }
  0x5b   : > { %656 = vmatpush2.bf16.msra.mxu0 %v957_v59 }
  0x5c   : > { %657 = vmatprep.subr.bf16.mxu0 %v958_v60 }
  0x5f   : > { %658 = vmatpush2.bf16.msra.mxu0 %v960_v61 }
  0x60   : > { %659 = vmatprep.subr.bf16.mxu0 %v961_v62 }
  0x63   : > { %660 = vmatpush2.bf16.msra.mxu0 %v963_v63 }
  0x64   : > { %661 = vmatprep.subr.bf16.mxu0 %v964_v0 }
  0x67   : > { %662 = vmatpush2.bf16.msra.mxu0 %v966_v1 }
  0x6a   : > { %664 = vmatmul.mubr.bf16.vlgmr.msra.gmra.mxu0 %v840_v2 }
 0x12a   : > { %v665_v10 = vpop.f32.mrf.mxu0 }
 0x12b   : > { %v693_v12 = vadd.f32 %v686_v8, %v665_v10 }
 0x12c   : > { %v667_v11 = vpop.f32.mrf.mxu0 }
 0x12d   : > { %v694_v13 = vadd.f32 %v690_v9, %v667_v11 }
 0x12e   : > { %v669_v14 = vpop.f32.mrf.mxu0 }
 0x12f   : > { %v878_v15 = vpack.c.bf16 %v694_v13, %v693_v12 }
 0x130   : > { %v670_v16 = vpop.f32.mrf.mxu0 }
 0x131   : > { %703 = vst [vmem:[%s421_s14] sm:$0xff] %v878_v15 }
 0x132 PF: > { %s13_s16 = sadd.s32 1, %s1007_s16   ;;  %s1212_s12 = smov %s995_s13 }
 0x133   : > { %p10_p10 = scmp.ge.s32.totalorder %s13_s16, 4   ;;  %s1213_s13 = smov %s1064_s20 }
 0x134   : > { %s1214_s14 = smov %s1003_s15  ;;  %s1215_s15 = smov %s1217_s17 }
 0x135   :  { %12 = sbr.rel (!%p10_p10) target bundleno = 3 (0x3), region = 119 }

// kernel: _lambda_.39
= control target key start
LH: loop header
LB: loop body
LE: loop exit
PB: predicated region body
PF: predicated region fallthrough
CT: control target
= control target key end

     0   :  { %s1617_s15 = smov 0   ;;  %s1619_s16 = smov 0   ;;  %s1934_s0 = inlined_call_operand.vmem [shape: bf16[8,4608], index: 0, kind: input, shape index: {}]   ;;  %s1935_s1 = inlined_call_operand.vmem [shape: bf16[4608,512], index: 1, kind: input, shape index: {}]   ;;  %s1936_s2 = inlined_call_operand.vmem [shape: f32[1,512], index: 2, kind: input, shape index: {}]   ;;  %s1937_s3 = inlined_call_operand.vmem [shape: bf16[8,512], index: 3, kind: input, shape index: {}]   ;;  %s1938_s4 = inlined_call_operand.vmem [shape: bf16[8,512], index: 4, kind: output, shape index: {}]  }
   0x1   :  { %s1621_s17 = smov 0   ;;  %s1623_s18 = smov 0  }
   0x2   :  { %s1625_s19 = smov 0   ;;  %s1627_s20 = smov 0  }
   0x3   :  { %s1629_s21 = smov 0  }
   0x4 LB: > { %s26_s22 = sadd.s32 1, %s1581_s19  ;;  %s29_s23 = sadd.s32 1, %s1585_s20  ;;  %s1589_s21 = sphi %s1629_s21, %s14_s21   ;;  %s1585_s20 = sphi %s1627_s20, %s1944_s20   ;;  %s1581_s19 = sphi %s1625_s19, %s1943_s19   ;;  %s1577_s18 = sphi %s1623_s18, %s1942_s18   ;;  %s1573_s17 = sphi %s1621_s17, %s1941_s17   ;;  %s1569_s16 = sphi %s1619_s16, %s1940_s16   ;;  %s1565_s15 = sphi %s1617_s15, %s1939_s15  }
   0x5   : > { %p27_p0 = scmp.ge.s32.totalorder %s26_s22, 9  ;;  %p77_p1 = scmp.ne.s32.totalorder %s1569_s16, %s1565_s15 }
   0x6   : > { %p78_p2 = scmp.eq.s32.totalorder %s1589_s21, 0  ;;  %s70_s27 = sadd.s32 1, %s1569_s16 }
   0x7   : > { %s1946_s22 = smov (%p27_p0, %s26_s22), 0  ;;  %s1948_s23 = smov (!%p27_p0, %s29_s23), %s1585_s20 }
   0x8   : > { %p79_p3 = por %p78_p2, %p77_p1  ;;  %p31_p4 = scmp.ge.s32.totalorder %s1948_s23, 2 }
   0x9   : > { %s65_s24 = ssub.s32 %s1581_s19, %s1946_s22  ;;  %p1288_p6 = scmp.ge.s32.totalorder %s1589_s21, 18 }
   0xa   : > { %s1950_s23 = smov (%p31_p4, %s1948_s23), 0 }
   0xb   : > { %s66_s25 = ssub.s32 %s1585_s20, %s1950_s23  ;;  %185 = sbr.rel (%p1288_p6) target bundleno = 55 (0x37), region = 16 }
   0xc   : > { %s67_s26 = sor.u32 %s66_s25, %s65_s24 }
   0xd   : > { %p68_p5 = scmp.eq.s32.totalorder %s67_s26, 0 }
   0xf   : > { %s1668_s28 = scalar_select %p68_p5, %s1569_s16, %s70_s27  }
  0x10   : > { %201 = sbr.rel (!%p79_p3) target bundleno = 55 (0x37), region = 24  ;;  %s203_s29 = sand.u32 (%p79_p3), 1, %s1569_s16  }
  0x11   : > { %s1291_s30 = sshll.u32 (%p79_p3), %s1585_s20, 1  ;;  %s1289_s5 = sshll.u32 (%p79_p3), %s203_s29, 9 }
  0x12   : > { %s1376_s6 = sshll.u32 (%p79_p3), %s1581_s19, 8  ;;  %s1682_s12 = scalar_lea.vmem (%p79_p3), [#allocation3], %s1289_s5 }
  0x13   : > { %s209_s7 = sadd.s32 (%p79_p3), %s1376_s6, %s1291_s30 }
  0x14   : > { %s1293_s8 = sshll.u32 (%p79_p3), %s209_s7, 2 }
  0x15   : > { %s1677_s11 = scalar_lea.vmem %s1935_s1, %s1293_s8 }
  0x16   : > { %v366_v0 = vld [vmem:[%s1677_s11] sm:$0xff]  ;;  %v368_v1 = vld [vmem:[%s1677_s11 + $0x10] sm:$0xff] }
  0x17   : > { %v370_v2 = vld [vmem:[%s1677_s11 + $0x20] sm:$0xff]  ;;  %367 = vst [vmem:[%s1682_s12] sm:$0xff] %v366_v0  ;;  %369 = vst [vmem:[%s1682_s12 + $0x8] sm:$0xff] %v368_v1  ;;  %v372_v3 = vld [vmem:[%s1677_s11 + $0x30] sm:$0xff] }
  0x18   : > { %371 = vst [vmem:[%s1682_s12 + $0x10] sm:$0xff] %v370_v2  ;;  %v374_v4 = vld [vmem:[%s1677_s11 + $0x40] sm:$0xff]  ;;  %v376_v5 = vld [vmem:[%s1677_s11 + $0x50] sm:$0xff]  ;;  %373 = vst [vmem:[%s1682_s12 + $0x18] sm:$0xff] %v372_v3 }
  0x19   : > { %375 = vst [vmem:[%s1682_s12 + $0x20] sm:$0xff] %v374_v4  ;;  %377 = vst [vmem:[%s1682_s12 + $0x28] sm:$0xff] %v376_v5  ;;  %v378_v6 = vld [vmem:[%s1677_s11 + $0x60] sm:$0xff]  ;;  %v380_v7 = vld [vmem:[%s1677_s11 + $0x70] sm:$0xff] }
  0x1a   : > { %v382_v8 = vld [vmem:[%s1677_s11 + $0x80] sm:$0xff]  ;;  %379 = vst [vmem:[%s1682_s12 + $0x30] sm:$0xff] %v378_v6  ;;  %381 = vst [vmem:[%s1682_s12 + $0x38] sm:$0xff] %v380_v7  ;;  %v384_v9 = vld [vmem:[%s1677_s11 + $0x90] sm:$0xff] }
  0x1b   : > { %383 = vst [vmem:[%s1682_s12 + $0x40] sm:$0xff] %v382_v8  ;;  %v386_v10 = vld [vmem:[%s1677_s11 + $0xa0] sm:$0xff]  ;;  %v388_v11 = vld [vmem:[%s1677_s11 + $0xb0] sm:$0xff]  ;;  %385 = vst [vmem:[%s1682_s12 + $0x48] sm:$0xff] %v384_v9 }
  0x1c   : > { %387 = vst [vmem:[%s1682_s12 + $0x50] sm:$0xff] %v386_v10  ;;  %389 = vst [vmem:[%s1682_s12 + $0x58] sm:$0xff] %v388_v11  ;;  %v390_v12 = vld [vmem:[%s1677_s11 + $0xc0] sm:$0xff]  ;;  %v392_v13 = vld [vmem:[%s1677_s11 + $0xd0] sm:$0xff] }
  0x1d   : > { %v394_v14 = vld [vmem:[%s1677_s11 + $0xe0] sm:$0xff]  ;;  %391 = vst [vmem:[%s1682_s12 + $0x60] sm:$0xff] %v390_v12  ;;  %393 = vst [vmem:[%s1682_s12 + $0x68] sm:$0xff] %v392_v13  ;;  %v396_v15 = vld [vmem:[%s1677_s11 + $0xf0] sm:$0xff] }
  0x1e   : > { %395 = vst [vmem:[%s1682_s12 + $0x70] sm:$0xff] %v394_v14  ;;  %v398_v16 = vld [vmem:[%s1677_s11 + $0x100] sm:$0xff]  ;;  %v400_v17 = vld [vmem:[%s1677_s11 + $0x110] sm:$0xff]  ;;  %397 = vst [vmem:[%s1682_s12 + $0x78] sm:$0xff] %v396_v15 }
  0x1f   : > { %399 = vst [vmem:[%s1682_s12 + $0x80] sm:$0xff] %v398_v16  ;;  %401 = vst [vmem:[%s1682_s12 + $0x88] sm:$0xff] %v400_v17  ;;  %v402_v18 = vld [vmem:[%s1677_s11 + $0x120] sm:$0xff]  ;;  %v404_v19 = vld [vmem:[%s1677_s11 + $0x130] sm:$0xff] }
  0x20   : > { %v406_v20 = vld [vmem:[%s1677_s11 + $0x140] sm:$0xff]  ;;  %403 = vst [vmem:[%s1682_s12 + $0x90] sm:$0xff] %v402_v18  ;;  %405 = vst [vmem:[%s1682_s12 + $0x98] sm:$0xff] %v404_v19  ;;  %v408_v21 = vld [vmem:[%s1677_s11 + $0x150] sm:$0xff] }
  0x21   : > { %407 = vst [vmem:[%s1682_s12 + $0xa0] sm:$0xff] %v406_v20  ;;  %v410_v22 = vld [vmem:[%s1677_s11 + $0x160] sm:$0xff]  ;;  %v412_v23 = vld [vmem:[%s1677_s11 + $0x170] sm:$0xff]  ;;  %409 = vst [vmem:[%s1682_s12 + $0xa8] sm:$0xff] %v408_v21 }
  0x22   : > { %411 = vst [vmem:[%s1682_s12 + $0xb0] sm:$0xff] %v410_v22  ;;  %413 = vst [vmem:[%s1682_s12 + $0xb8] sm:$0xff] %v412_v23  ;;  %v414_v24 = vld [vmem:[%s1677_s11 + $0x180] sm:$0xff]  ;;  %v416_v25 = vld [vmem:[%s1677_s11 + $0x190] sm:$0xff] }
  0x23   : > { %v418_v26 = vld [vmem:[%s1677_s11 + $0x1a0] sm:$0xff]  ;;  %415 = vst [vmem:[%s1682_s12 + $0xc0] sm:$0xff] %v414_v24  ;;  %417 = vst [vmem:[%s1682_s12 + $0xc8] sm:$0xff] %v416_v25  ;;  %v420_v27 = vld [vmem:[%s1677_s11 + $0x1b0] sm:$0xff] }
  0x24   : > { %419 = vst [vmem:[%s1682_s12 + $0xd0] sm:$0xff] %v418_v26  ;;  %v422_v28 = vld [vmem:[%s1677_s11 + $0x1c0] sm:$0xff]  ;;  %v424_v29 = vld [vmem:[%s1677_s11 + $0x1d0] sm:$0xff]  ;;  %421 = vst [vmem:[%s1682_s12 + $0xd8] sm:$0xff] %v420_v27 }
  0x25   : > { %423 = vst [vmem:[%s1682_s12 + $0xe0] sm:$0xff] %v422_v28  ;;  %425 = vst [vmem:[%s1682_s12 + $0xe8] sm:$0xff] %v424_v29  ;;  %v426_v30 = vld [vmem:[%s1677_s11 + $0x1e0] sm:$0xff]  ;;  %v428_v31 = vld [vmem:[%s1677_s11 + $0x1f0] sm:$0xff] }
  0x26   : > { %v430_v32 = vld [vmem:[%s1677_s11 + $0x200] sm:$0xff]  ;;  %427 = vst [vmem:[%s1682_s12 + $0xf0] sm:$0xff] %v426_v30  ;;  %429 = vst [vmem:[%s1682_s12 + $0xf8] sm:$0xff] %v428_v31  ;;  %v432_v33 = vld [vmem:[%s1677_s11 + $0x210] sm:$0xff] }
  0x27   : > { %431 = vst [vmem:[%s1682_s12 + $0x100] sm:$0xff] %v430_v32  ;;  %v434_v34 = vld [vmem:[%s1677_s11 + $0x220] sm:$0xff]  ;;  %v436_v35 = vld [vmem:[%s1677_s11 + $0x230] sm:$0xff]  ;;  %433 = vst [vmem:[%s1682_s12 + $0x108] sm:$0xff] %v432_v33 }
  0x28   : > { %435 = vst [vmem:[%s1682_s12 + $0x110] sm:$0xff] %v434_v34  ;;  %437 = vst [vmem:[%s1682_s12 + $0x118] sm:$0xff] %v436_v35  ;;  %v438_v36 = vld [vmem:[%s1677_s11 + $0x240] sm:$0xff]  ;;  %v440_v37 = vld [vmem:[%s1677_s11 + $0x250] sm:$0xff] }
  0x29   : > { %v442_v38 = vld [vmem:[%s1677_s11 + $0x260] sm:$0xff]  ;;  %439 = vst [vmem:[%s1682_s12 + $0x120] sm:$0xff] %v438_v36  ;;  %441 = vst [vmem:[%s1682_s12 + $0x128] sm:$0xff] %v440_v37  ;;  %v444_v39 = vld [vmem:[%s1677_s11 + $0x270] sm:$0xff] }
  0x2a   : > { %443 = vst [vmem:[%s1682_s12 + $0x130] sm:$0xff] %v442_v38  ;;  %v446_v40 = vld [vmem:[%s1677_s11 + $0x280] sm:$0xff]  ;;  %v448_v41 = vld [vmem:[%s1677_s11 + $0x290] sm:$0xff]  ;;  %445 = vst [vmem:[%s1682_s12 + $0x138] sm:$0xff] %v444_v39 }
  0x2b   : > { %447 = vst [vmem:[%s1682_s12 + $0x140] sm:$0xff] %v446_v40  ;;  %449 = vst [vmem:[%s1682_s12 + $0x148] sm:$0xff] %v448_v41  ;;  %v450_v42 = vld [vmem:[%s1677_s11 + $0x2a0] sm:$0xff]  ;;  %v452_v43 = vld [vmem:[%s1677_s11 + $0x2b0] sm:$0xff] }
  0x2c   : > { %v454_v44 = vld [vmem:[%s1677_s11 + $0x2c0] sm:$0xff]  ;;  %451 = vst [vmem:[%s1682_s12 + $0x150] sm:$0xff] %v450_v42  ;;  %453 = vst [vmem:[%s1682_s12 + $0x158] sm:$0xff] %v452_v43  ;;  %v456_v45 = vld [vmem:[%s1677_s11 + $0x2d0] sm:$0xff] }
  0x2d   : > { %455 = vst [vmem:[%s1682_s12 + $0x160] sm:$0xff] %v454_v44  ;;  %v458_v46 = vld [vmem:[%s1677_s11 + $0x2e0] sm:$0xff]  ;;  %v460_v47 = vld [vmem:[%s1677_s11 + $0x2f0] sm:$0xff]  ;;  %457 = vst [vmem:[%s1682_s12 + $0x168] sm:$0xff] %v456_v45 }
  0x2e   : > { %459 = vst [vmem:[%s1682_s12 + $0x170] sm:$0xff] %v458_v46  ;;  %461 = vst [vmem:[%s1682_s12 + $0x178] sm:$0xff] %v460_v47  ;;  %v462_v48 = vld [vmem:[%s1677_s11 + $0x300] sm:$0xff]  ;;  %v464_v49 = vld [vmem:[%s1677_s11 + $0x310] sm:$0xff] }
  0x2f   : > { %v466_v50 = vld [vmem:[%s1677_s11 + $0x320] sm:$0xff]  ;;  %463 = vst [vmem:[%s1682_s12 + $0x180] sm:$0xff] %v462_v48  ;;  %465 = vst [vmem:[%s1682_s12 + $0x188] sm:$0xff] %v464_v49  ;;  %v468_v51 = vld [vmem:[%s1677_s11 + $0x330] sm:$0xff] }
  0x30   : > { %467 = vst [vmem:[%s1682_s12 + $0x190] sm:$0xff] %v466_v50  ;;  %v470_v52 = vld [vmem:[%s1677_s11 + $0x340] sm:$0xff]  ;;  %v472_v53 = vld [vmem:[%s1677_s11 + $0x350] sm:$0xff]  ;;  %469 = vst [vmem:[%s1682_s12 + $0x198] sm:$0xff] %v468_v51 }
  0x31   : > { %471 = vst [vmem:[%s1682_s12 + $0x1a0] sm:$0xff] %v470_v52  ;;  %473 = vst [vmem:[%s1682_s12 + $0x1a8] sm:$0xff] %v472_v53  ;;  %v474_v54 = vld [vmem:[%s1677_s11 + $0x360] sm:$0xff]  ;;  %v476_v55 = vld [vmem:[%s1677_s11 + $0x370] sm:$0xff] }
  0x32   : > { %v478_v56 = vld [vmem:[%s1677_s11 + $0x380] sm:$0xff]  ;;  %475 = vst [vmem:[%s1682_s12 + $0x1b0] sm:$0xff] %v474_v54  ;;  %477 = vst [vmem:[%s1682_s12 + $0x1b8] sm:$0xff] %v476_v55  ;;  %v480_v57 = vld [vmem:[%s1677_s11 + $0x390] sm:$0xff] }
  0x33   : > { %479 = vst [vmem:[%s1682_s12 + $0x1c0] sm:$0xff] %v478_v56  ;;  %v482_v58 = vld [vmem:[%s1677_s11 + $0x3a0] sm:$0xff]  ;;  %v484_v59 = vld [vmem:[%s1677_s11 + $0x3b0] sm:$0xff]  ;;  %481 = vst [vmem:[%s1682_s12 + $0x1c8] sm:$0xff] %v480_v57 }
  0x34   : > { %483 = vst [vmem:[%s1682_s12 + $0x1d0] sm:$0xff] %v482_v58  ;;  %485 = vst [vmem:[%s1682_s12 + $0x1d8] sm:$0xff] %v484_v59  ;;  %v486_v60 = vld [vmem:[%s1677_s11 + $0x3c0] sm:$0xff]  ;;  %v488_v61 = vld [vmem:[%s1677_s11 + $0x3d0] sm:$0xff] }
  0x35   : > { %v490_v62 = vld [vmem:[%s1677_s11 + $0x3e0] sm:$0xff]  ;;  %487 = vst [vmem:[%s1682_s12 + $0x1e0] sm:$0xff] %v486_v60  ;;  %489 = vst [vmem:[%s1682_s12 + $0x1e8] sm:$0xff] %v488_v61  ;;  %v492_v63 = vld [vmem:[%s1677_s11 + $0x3f0] sm:$0xff] }
  0x36   : > { %491 = vst [vmem:[%s1682_s12 + $0x1f0] sm:$0xff] %v490_v62  ;;  %493 = vst [vmem:[%s1682_s12 + $0x1f8] sm:$0xff] %v492_v63 }
  0x37 PF: > { %p1294_p7 = scmp.ge.s32.totalorder %s1589_s21, 1  ;;  %p519_p8 = scmp.lt.s32.totalorder %s1589_s21, 19 }
  0x39   : > { %p520_p9 = pnand %p1294_p7, %p519_p8 }
  0x3a   : > { %s526_s13 = sand.u32 (!%p520_p9), 1, %s1565_s15   ;;  %s1296_s14 = sshll.u32 (!%p520_p9), %s1573_s17, 2 }
  0x3b   : > { %523 = sbr.rel (%p520_p9) target bundleno = 358 (0x166), region = 70  ;;  %s1295_s24 = sshll.u32 (!%p520_p9), %s526_s13, 9 }
  0x3c   : > { %p580_p10 = scmp.lt.s32.totalorder (!%p520_p9), %s1296_s14, 35  ;;  %s1298_s25 = sshll.u32 (!%p520_p9), %s1577_s18, 1 }
  0x3d   : > { %p590_p11 = scmp.lt.s32.totalorder (!%p520_p9), %s1298_s25, 3  ;;  %s1836_s13 = scalar_lea.vmem (!%p520_p9), [#allocation3], %s1295_s24 }
  0x3e   : > { %p1303_p12 = scmp.ne.s32.totalorder (!%p520_p9), %s1573_s17, 0 }
  0x40   : > { %s1952_s14 = smov (!%p580_p10, %s1296_s14), 35  ;;  %s1954_s25 = smov (!%p590_p11, %s1298_s25), 3 }
  0x41   : > { %s1297_s26 = sshll.u32 %s1952_s14, 2  ;;  %s592_s15 = scalar_lea.vmem %s1936_s2, %s1954_s25 }
  0x42   : > { %s1817_s30 = scalar_lea.vmem %s1934_s0, %s1297_s26  ;;  %s1300_s7 = sshll.u32 %s1954_s25, 2 }
  0x43   : > { %s1829_s18 = scalar_lea.vmem %s1937_s3, %s1300_s7  ;;  %s1834_s12 = scalar_lea.vmem %s1938_s4, %s1300_s7 }
  0x44   : > { %617 = sbr.rel (%p1303_p12) target bundleno = 75 (0x4b), region = 78 }
  0x49   : > { %v1591_v0 = vmov 0.0  }
  0x4a   : > { %618 = vst [vmem:[#allocation2] sm:$0xff] %v1591_v0  ;;  %619 = vst [vmem:[#allocation2 + $0x8] sm:$0xff] %v1591_v0 }
  0x4b PF: > { %v1435_v1 = vld [vmem:[%s1836_s13 + $0x74] ss:$8 sps:$4 sm:$0xff]   ;;  %v1439_v3 = vld [vmem:[%s1836_s13 + $0x70] ss:$8 sps:$4 sm:$0xff]   ;;  %v1441_v5 = vld [vmem:[%s1836_s13 + $0x64] ss:$8 sps:$4 sm:$0xff]  }
  0x4c   : > { %v1437_v2 = vld [vmem:[%s1836_s13 + $0x174] ss:$8 sps:$4 sm:$0xff]   ;;  %1022 = vmatprep.subr.bf16.mxu0 %v1435_v1  ;;  %v1440_v4 = vld [vmem:[%s1836_s13 + $0x170] ss:$8 sps:$4 sm:$0xff]   ;;  %v1443_v6 = vld [vmem:[%s1836_s13 + $0x164] ss:$8 sps:$4 sm:$0xff]  }
  0x4d   : > { %1063 = vmatprep.subr.bf16.mxu1 %v1437_v2  ;;  %1023 = vmatpush1.bf16.msra.mxu0 %v1439_v3  ;;  %v1445_v7 = vld [vmem:[%s1836_s13 + $0x60] ss:$8 sps:$4 sm:$0xff]   ;;  %v1447_v9 = vld [vmem:[%s1836_s13 + $0x54] ss:$8 sps:$4 sm:$0xff]   ;;  %v1451_v11 = vld [vmem:[%s1836_s13 + $0x50] ss:$8 sps:$4 sm:$0xff]  }
  0x4e   : > { %1064 = vmatpush1.bf16.msra.mxu1 %v1440_v4  ;;  %1024 = vmatprep.subr.bf16.mxu0 %v1441_v5  ;;  %v1446_v8 = vld [vmem:[%s1836_s13 + $0x160] ss:$8 sps:$4 sm:$0xff]   ;;  %v1449_v10 = vld [vmem:[%s1836_s13 + $0x154] ss:$8 sps:$4 sm:$0xff]   ;;  %v1452_v12 = vld [vmem:[%s1836_s13 + $0x150] ss:$8 sps:$4 sm:$0xff]  }
  0x4f   : > { %1065 = vmatprep.subr.bf16.mxu1 %v1443_v6  ;;  %v1453_v13 = vld [vmem:[%s1836_s13 + $0x44] ss:$8 sps:$4 sm:$0xff]   ;;  %v1457_v15 = vld [vmem:[%s1836_s13 + $0x40] ss:$8 sps:$4 sm:$0xff]   ;;  %v1459_v17 = vld [vmem:[%s1836_s13 + $0x34] ss:$8 sps:$4 sm:$0xff]  }
  0x50   : > { %v1455_v14 = vld [vmem:[%s1836_s13 + $0x144] ss:$8 sps:$4 sm:$0xff]   ;;  %v1458_v16 = vld [vmem:[%s1836_s13 + $0x140] ss:$8 sps:$4 sm:$0xff]   ;;  %v1461_v18 = vld [vmem:[%s1836_s13 + $0x134] ss:$8 sps:$4 sm:$0xff]  }
  0x51   : > { %1025 = vmatpush1.bf16.msra.mxu0 %v1445_v7  ;;  %v1463_v19 = vld [vmem:[%s1836_s13 + $0x30] ss:$8 sps:$4 sm:$0xff]   ;;  %v1465_v21 = vld [vmem:[%s1836_s13 + $0x24] ss:$8 sps:$4 sm:$0xff]   ;;  %v1469_v23 = vld [vmem:[%s1836_s13 + $0x20] ss:$8 sps:$4 sm:$0xff]  }
  0x52   : > { %1066 = vmatpush1.bf16.msra.mxu1 %v1446_v8  ;;  %1026 = vmatprep.subr.bf16.mxu0 %v1447_v9  ;;  %v1464_v20 = vld [vmem:[%s1836_s13 + $0x130] ss:$8 sps:$4 sm:$0xff]   ;;  %v1467_v22 = vld [vmem:[%s1836_s13 + $0x124] ss:$8 sps:$4 sm:$0xff]   ;;  %v1470_v24 = vld [vmem:[%s1836_s13 + $0x120] ss:$8 sps:$4 sm:$0xff]  }
  0x53   : > { %1067 = vmatprep.subr.bf16.mxu1 %v1449_v10  ;;  %v1471_v25 = vld [vmem:[%s1836_s13 + $0x14] ss:$8 sps:$4 sm:$0xff]   ;;  %v1475_v27 = vld [vmem:[%s1836_s13 + $0x10] ss:$8 sps:$4 sm:$0xff]   ;;  %v1477_v29 = vld [vmem:[%s1836_s13 + $0x4] ss:$8 sps:$4 sm:$0xff]  }
  0x54   : > { %v1473_v26 = vld [vmem:[%s1836_s13 + $0x114] ss:$8 sps:$4 sm:$0xff]   ;;  %v1476_v28 = vld [vmem:[%s1836_s13 + $0x110] ss:$8 sps:$4 sm:$0xff]   ;;  %v1479_v30 = vld [vmem:[%s1836_s13 + $0x104] ss:$8 sps:$4 sm:$0xff]  }
  0x55   : > { %1027 = vmatpush1.bf16.msra.mxu0 %v1451_v11  ;;  %v1481_v31 = vld [vmem:[%s1836_s13] ss:$8 sps:$4 sm:$0xff]   ;;  %v1483_v33 = vld [vmem:[%s1836_s13 + $0xf4] ss:$8 sps:$4 sm:$0xff]   ;;  %v1487_v35 = vld [vmem:[%s1836_s13 + $0xf0] ss:$8 sps:$4 sm:$0xff]  }
  0x56   : > { %1068 = vmatpush1.bf16.msra.mxu1 %v1452_v12  ;;  %1028 = vmatprep.subr.bf16.mxu0 %v1453_v13  ;;  %v1482_v32 = vld [vmem:[%s1836_s13 + $0x100] ss:$8 sps:$4 sm:$0xff]   ;;  %v1485_v34 = vld [vmem:[%s1836_s13 + $0x1f4] ss:$8 sps:$4 sm:$0xff]   ;;  %v1488_v36 = vld [vmem:[%s1836_s13 + $0x1f0] ss:$8 sps:$4 sm:$0xff]  }
  0x57   : > { %1069 = vmatprep.subr.bf16.mxu1 %v1455_v14  ;;  %v1489_v37 = vld [vmem:[%s1836_s13 + $0xe4] ss:$8 sps:$4 sm:$0xff]   ;;  %v1493_v39 = vld [vmem:[%s1836_s13 + $0xe0] ss:$8 sps:$4 sm:$0xff]   ;;  %v1495_v41 = vld [vmem:[%s1836_s13 + $0xd4] ss:$8 sps:$4 sm:$0xff]  }
  0x58   : > { %v1491_v38 = vld [vmem:[%s1836_s13 + $0x1e4] ss:$8 sps:$4 sm:$0xff]   ;;  %v1494_v40 = vld [vmem:[%s1836_s13 + $0x1e0] ss:$8 sps:$4 sm:$0xff]   ;;  %v1497_v42 = vld [vmem:[%s1836_s13 + $0x1d4] ss:$8 sps:$4 sm:$0xff]  }
  0x59   : > { %1029 = vmatpush1.bf16.msra.mxu0 %v1457_v15  ;;  %v1499_v43 = vld [vmem:[%s1836_s13 + $0xd0] ss:$8 sps:$4 sm:$0xff]   ;;  %v1501_v45 = vld [vmem:[%s1836_s13 + $0xc4] ss:$8 sps:$4 sm:$0xff]   ;;  %v1505_v50 = vld [vmem:[%s1836_s13 + $0xc0] ss:$8 sps:$4 sm:$0xff]  }
  0x5a   : > { %1070 = vmatpush1.bf16.msra.mxu1 %v1458_v16  ;;  %1030 = vmatprep.subr.bf16.mxu0 %v1459_v17  ;;  %v1500_v44 = vld [vmem:[%s1836_s13 + $0x1d0] ss:$8 sps:$4 sm:$0xff]   ;;  %v1503_v46 = vld [vmem:[%s1836_s13 + $0x1c4] ss:$8 sps:$4 sm:$0xff]   ;;  %v1506_v51 = vld [vmem:[%s1836_s13 + $0x1c0] ss:$8 sps:$4 sm:$0xff]  }
  0x5b   : > { %1071 = vmatprep.subr.bf16.mxu1 %v1461_v18  ;;  %v622_v47 = vld [vmem:[%s1817_s30] sm:$0xff]  ;;  %v623_v49 = vld [vmem:[%s1817_s30 + $0x8] sm:$0xff]  ;;  %v1513_v57 = vld [vmem:[%s1836_s13 + $0xa4] ss:$8 sps:$4 sm:$0xff]   ;;  %p1372_p13 = scmp.ne.s32.totalorder %s1573_s17, 8 }
  0x5c   : > { %v1305_v48 = vcombine.high %v622_v47, %v622_v47  ;;  %v1307_v52 = vcombine.high %v623_v49, %v623_v49  ;;  %v1507_v53 = vld [vmem:[%s1836_s13 + $0xb4] ss:$8 sps:$4 sm:$0xff]   ;;  %v1511_v55 = vld [vmem:[%s1836_s13 + $0xb0] ss:$8 sps:$4 sm:$0xff]   ;;  %v1515_v58 = vld [vmem:[%s1836_s13 + $0x1a4] ss:$8 sps:$4 sm:$0xff]   ;;  %v1304_v5 = vcombine.low %v622_v47, %v622_v47  ;;  %v1306_v6 = vcombine.low %v623_v49, %v623_v49 }
  0x5d   : > { %1031 = vmatpush1.bf16.msra.mxu0 %v1463_v19  ;;  %v1509_v54 = vld [vmem:[%s1836_s13 + $0x1b4] ss:$8 sps:$4 sm:$0xff]   ;;  %v1512_v56 = vld [vmem:[%s1836_s13 + $0x1b0] ss:$8 sps:$4 sm:$0xff]   ;;  %v1517_v59 = vld [vmem:[%s1836_s13 + $0xa0] ss:$8 sps:$4 sm:$0xff]  }
  0x5e   : > { %1072 = vmatpush1.bf16.msra.mxu1 %v1464_v20  ;;  %1032 = vmatprep.subr.bf16.mxu0 %v1465_v21  ;;  %v1518_v60 = vld [vmem:[%s1836_s13 + $0x1a0] ss:$8 sps:$4 sm:$0xff]   ;;  %v1519_v61 = vld [vmem:[%s1836_s13 + $0x94] ss:$8 sps:$4 sm:$0xff]   ;;  %v1523_v63 = vld [vmem:[%s1836_s13 + $0x90] ss:$8 sps:$4 sm:$0xff]  }
  0x5f   : > { %1073 = vmatprep.subr.bf16.mxu1 %v1467_v22  ;;  %1054 = vmatprep.mubr.bf16.mxu0 %v1305_v48  ;;  %v1521_v62 = vld [vmem:[%s1836_s13 + $0x194] ss:$8 sps:$4 sm:$0xff]   ;;  %v1524_v0 = vld [vmem:[%s1836_s13 + $0x190] ss:$8 sps:$4 sm:$0xff]   ;;  %v1525_v1 = vld [vmem:[%s1836_s13 + $0x84] ss:$8 sps:$4 sm:$0xff]  }
  0x60   : > { %1095 = vmatprep.mubr.bf16.mxu1 %v1307_v52  ;;  %v1527_v2 = vld [vmem:[%s1836_s13 + $0x184] ss:$8 sps:$4 sm:$0xff]   ;;  %v1529_v3 = vld [vmem:[%s1836_s13 + $0x80] ss:$8 sps:$4 sm:$0xff]   ;;  %v620_v8 = vld [vmem:[#allocation2] sm:$0xff] }
  0x61   : > { %1033 = vmatpush1.bf16.msra.mxu0 %v1469_v23  ;;  %v1530_v4 = vld [vmem:[%s1836_s13 + $0x180] ss:$8 sps:$4 sm:$0xff]   ;;  %v621_v12 = vld [vmem:[#allocation2 + $0x8] sm:$0xff] }
  0x62   : > { %1074 = vmatpush1.bf16.msra.mxu1 %v1470_v24  ;;  %1034 = vmatprep.subr.bf16.mxu0 %v1471_v25 }
  0x63   : > { %1075 = vmatprep.subr.bf16.mxu1 %v1473_v26 }
  0x65   : > { %1035 = vmatpush1.bf16.msra.mxu0 %v1475_v27 }
  0x66   : > { %1076 = vmatpush1.bf16.msra.mxu1 %v1476_v28  ;;  %1036 = vmatprep.subr.bf16.mxu0 %v1477_v29 }
  0x67   : > { %1077 = vmatprep.subr.bf16.mxu1 %v1479_v30 }
  0x69   : > { %1037 = vmatpush1.bf16.msra.mxu0 %v1481_v31 }
  0x6a   : > { %1078 = vmatpush1.bf16.msra.mxu1 %v1482_v32  ;;  %1038 = vmatprep.subr.bf16.mxu0 %v1483_v33 }
  0x6b   : > { %1079 = vmatprep.subr.bf16.mxu1 %v1485_v34 }
  0x6d   : > { %1039 = vmatpush2.bf16.msra.mxu0 %v1487_v35 }
  0x6e   : > { %1080 = vmatpush2.bf16.msra.mxu1 %v1488_v36  ;;  %1040 = vmatprep.subr.bf16.mxu0 %v1489_v37 }
  0x6f   : > { %1081 = vmatprep.subr.bf16.mxu1 %v1491_v38 }
  0x71   : > { %1041 = vmatpush2.bf16.msra.mxu0 %v1493_v39 }
  0x72   : > { %1082 = vmatpush2.bf16.msra.mxu1 %v1494_v40  ;;  %1042 = vmatprep.subr.bf16.mxu0 %v1495_v41 }
  0x73   : > { %1083 = vmatprep.subr.bf16.mxu1 %v1497_v42 }
  0x75   : > { %1043 = vmatpush2.bf16.msra.mxu0 %v1499_v43 }
  0x76   : > { %1084 = vmatpush2.bf16.msra.mxu1 %v1500_v44  ;;  %1044 = vmatprep.subr.bf16.mxu0 %v1501_v45 }
  0x77   : > { %1085 = vmatprep.subr.bf16.mxu1 %v1503_v46 }
  0x79   : > { %1045 = vmatpush2.bf16.msra.mxu0 %v1505_v50 }
  0x7a   : > { %1086 = vmatpush2.bf16.msra.mxu1 %v1506_v51  ;;  %1046 = vmatprep.subr.bf16.mxu0 %v1507_v53 }
  0x7b   : > { %1087 = vmatprep.subr.bf16.mxu1 %v1509_v54 }
  0x7d   : > { %1047 = vmatpush2.bf16.msra.mxu0 %v1511_v55 }
  0x7e   : > { %1088 = vmatpush2.bf16.msra.mxu1 %v1512_v56  ;;  %1048 = vmatprep.subr.bf16.mxu0 %v1513_v57 }
  0x7f   : > { %1089 = vmatprep.subr.bf16.mxu1 %v1515_v58 }
  0x81   : > { %1049 = vmatpush2.bf16.msra.mxu0 %v1517_v59 }
  0x82   : > { %1090 = vmatpush2.bf16.msra.mxu1 %v1518_v60  ;;  %1050 = vmatprep.subr.bf16.mxu0 %v1519_v61 }
  0x83   : > { %1091 = vmatprep.subr.bf16.mxu1 %v1521_v62 }
  0x85   : > { %1051 = vmatpush2.bf16.msra.mxu0 %v1523_v63 }
  0x86   : > { %1092 = vmatpush2.bf16.msra.mxu1 %v1524_v0  ;;  %1052 = vmatprep.subr.bf16.mxu0 %v1525_v1 }
  0x87   : > { %1093 = vmatprep.subr.bf16.mxu1 %v1527_v2 }
  0x89   : > { %1053 = vmatpush2.bf16.msra.mxu0 %v1529_v3 }
  0x8a   : > { %1094 = vmatpush2.bf16.msra.mxu1 %v1530_v4 }
  0x8c   : > { %1055 = vmatmul.mubr.bf16.vlgmr.msra.gmra.mxu0 %v1304_v5 }
  0x8d   : > { %1096 = vmatmul.mubr.bf16.vlgmr.msra.gmra.mxu1 %v1306_v6 }
 0x14c   : > { %v1056_v7 = vpop.f32.mrf.mxu0 }
 0x14d   : > { %v1097_v9 = vpop.f32.mrf.mxu1 }
 0x14e   : > { %v1098_v10 = vadd.f32 %v1097_v9, %v1056_v7  ;;  %v1058_v11 = vpop.f32.mrf.mxu0 }
 0x14f   : > { %v1099_v13 = vpop.f32.mrf.mxu1 }
 0x150   : > { %v1104_v14 = vadd.f32 %v1098_v10, %v620_v8  ;;  %v1100_v15 = vadd.f32 %v1099_v13, %v1058_v11  ;;  %v1060_v16 = vpop.f32.mrf.mxu0  ;;  %1111 = sbr.rel (%p1372_p13) target bundleno = 358 (0x166), region = 82 }
 0x151   : > { %v1101_v17 = vpop.f32.mrf.mxu1 }
 0x152   : > { %1106 = vst [vmem:[#allocation2] sm:$0xff] %v1104_v14  ;;  %v1105_v18 = vadd.f32 %v1100_v15, %v621_v12  ;;  %v1061_v19 = vpop.f32.mrf.mxu0 }
 0x153   : > { %v1102_v20 = vpop.f32.mrf.mxu1 }
 0x154   : > { %1107 = vst [vmem:[#allocation2 + $0x8] sm:$0xff] %v1105_v18 }
 0x155   : > { %v1116_v21 = vlaneseq  ;;  %v1114_v23 = vld [vmem:[%s592_s15] sm:$0x3] }
 0x156   : > { %v1128_v24 = vld [vmem:[%s1829_s18] sm:$0xff] }
 0x157   : > { %v1117_v22 = vshrl.u32 %v1116_v21, 7  ;;  %v1129_v31 = vunpack.c.l.bf16 %v1128_v24  ;;  %v1130_v32 = vunpack.c.h.bf16 %v1128_v24 }
 0x159   : > { %v1118_v25 = vsub.s32 0, %v1117_v22  ;;  %v1122_v26 = vsub.s32 1, %v1117_v22  ;;  %v1112_v27 = vld [vmem:[#allocation2] sm:$0xff] }
 0x15b   : > { %v1113_v28 = vld [vmem:[#allocation2 + $0x8] sm:$0xff]  ;;  %v1119_v29 = vrot.slane %v1114_v23, %v1118_v25  ;;  %v1123_v30 = vrot.slane %v1114_v23, %v1122_v26 }
 0x15d   : > { %v1126_v33 = vadd.f32 %v1119_v29, %v1112_v27  ;;  %v1127_v34 = vadd.f32 %v1123_v30, %v1113_v28 }
 0x15f   : > { %v1131_v35 = vadd.f32 %v1129_v31, %v1126_v33  ;;  %v1132_v36 = vadd.f32 %v1130_v32, %v1127_v34 }
 0x161   : > { %v1133_v37 = vmax.f32 %v1131_v35, 0.0  ;;  %v1134_v38 = vmax.f32 %v1132_v36, 0.0 }
 0x163   : > { %v1377_v39 = vpack.c.bf16 %v1134_v38, %v1133_v37 }
 0x165   : > { %1143 = vst [vmem:[%s1834_s12] sm:$0xff] %v1377_v39 }
 0x166 PF: > { %s14_s21 = sadd.s32 1, %s1589_s21   ;;  %s1939_s15 = smov %s1569_s16 }
 0x167   : > { %p11_p0 = scmp.ge.s32.totalorder %s14_s21, 20   ;;  %s1940_s16 = smov %s1668_s28 }
 0x168   : > { %s1941_s17 = smov %s1581_s19  ;;  %s1942_s18 = smov %s1585_s20 }
 0x169   : > { %s1943_s19 = smov %s1946_s22  ;;  %s1944_s20 = smov %s1950_s23 }
 0x16a   :  { %13 = sbr.rel (!%p11_p0) target bundleno = 4 (0x4), region = 126 }

// kernel: _lambda_.40
= control target key start
LH: loop header
LB: loop body
LE: loop exit
PB: predicated region body
PF: predicated region fallthrough
CT: control target
= control target key end

     0   :  { %s1524_s12 = smov 0   ;;  %s1526_s13 = smov 0   ;;  %s1835_s0 = inlined_call_operand.vmem [shape: bf16[8,4608], index: 0, kind: input, shape index: {}]   ;;  %s1836_s1 = inlined_call_operand.vmem [shape: bf16[4608,512], index: 1, kind: input, shape index: {}]   ;;  %s1837_s2 = inlined_call_operand.vmem [shape: f32[1,512], index: 2, kind: input, shape index: {}]   ;;  %s1838_s3 = inlined_call_operand.vmem [shape: bf16[8,512], index: 3, kind: output, shape index: {}]  }
   0x1   :  { %s1528_s14 = smov 0   ;;  %s1530_s15 = smov 0  }
   0x2   :  { %s1532_s16 = smov 0   ;;  %s1534_s17 = smov 0  }
   0x3   :  { %s1536_s18 = smov 0  }
   0x4 LB: > { %s25_s19 = sadd.s32 1, %s1493_s16  ;;  %s28_s20 = sadd.s32 1, %s1497_s17  ;;  %s1501_s18 = sphi %s1536_s18, %s13_s18   ;;  %s1497_s17 = sphi %s1534_s17, %s1844_s17   ;;  %s1493_s16 = sphi %s1532_s16, %s1843_s16   ;;  %s1489_s15 = sphi %s1530_s15, %s1842_s15   ;;  %s1485_s14 = sphi %s1528_s14, %s1841_s14   ;;  %s1481_s13 = sphi %s1526_s13, %s1840_s13   ;;  %s1477_s12 = sphi %s1524_s12, %s1839_s12  }
   0x5   : > { %p26_p0 = scmp.ge.s32.totalorder %s25_s19, 9  ;;  %p76_p1 = scmp.ne.s32.totalorder %s1481_s13, %s1477_s12 }
   0x6   : > { %p77_p2 = scmp.eq.s32.totalorder %s1501_s18, 0  ;;  %s69_s24 = sadd.s32 1, %s1481_s13 }
   0x7   : > { %s1846_s19 = smov (%p26_p0, %s25_s19), 0  ;;  %s1848_s20 = smov (!%p26_p0, %s28_s20), %s1497_s17 }
   0x8   : > { %p78_p3 = por %p77_p2, %p76_p1  ;;  %p30_p4 = scmp.ge.s32.totalorder %s1848_s20, 2 }
   0x9   : > { %s64_s21 = ssub.s32 %s1493_s16, %s1846_s19  ;;  %p1202_p6 = scmp.ge.s32.totalorder %s1501_s18, 18 }
   0xa   : > { %s1850_s20 = smov (%p30_p4, %s1848_s20), 0 }
   0xb   : > { %s65_s22 = ssub.s32 %s1497_s17, %s1850_s20  ;;  %156 = sbr.rel (%p1202_p6) target bundleno = 55 (0x37), region = 16 }
   0xc   : > { %s66_s23 = sor.u32 %s65_s22, %s64_s21 }
   0xd   : > { %p67_p5 = scmp.eq.s32.totalorder %s66_s23, 0 }
   0xf   : > { %s1575_s25 = scalar_select %p67_p5, %s1481_s13, %s69_s24  }
  0x10   : > { %172 = sbr.rel (!%p78_p3) target bundleno = 55 (0x37), region = 24  ;;  %s174_s26 = sand.u32 (%p78_p3), 1, %s1481_s13  }
  0x11   : > { %s1205_s27 = sshll.u32 (%p78_p3), %s1497_s17, 1  ;;  %s1203_s28 = sshll.u32 (%p78_p3), %s174_s26, 9 }
  0x12   : > { %s1288_s29 = sshll.u32 (%p78_p3), %s1493_s16, 8  ;;  %s1589_s8 = scalar_lea.vmem (%p78_p3), [#allocation3], %s1203_s28 }
  0x13   : > { %s180_s30 = sadd.s32 (%p78_p3), %s1288_s29, %s1205_s27 }
  0x14   : > { %s1207_s4 = sshll.u32 (%p78_p3), %s180_s30, 2 }
  0x15   : > { %s1584_s7 = scalar_lea.vmem %s1836_s1, %s1207_s4 }
  0x16   : > { %v337_v0 = vld [vmem:[%s1584_s7] sm:$0xff]  ;;  %v339_v1 = vld [vmem:[%s1584_s7 + $0x10] sm:$0xff] }
  0x17   : > { %v341_v2 = vld [vmem:[%s1584_s7 + $0x20] sm:$0xff]  ;;  %338 = vst [vmem:[%s1589_s8] sm:$0xff] %v337_v0  ;;  %340 = vst [vmem:[%s1589_s8 + $0x8] sm:$0xff] %v339_v1  ;;  %v343_v3 = vld [vmem:[%s1584_s7 + $0x30] sm:$0xff] }
  0x18   : > { %342 = vst [vmem:[%s1589_s8 + $0x10] sm:$0xff] %v341_v2  ;;  %v345_v4 = vld [vmem:[%s1584_s7 + $0x40] sm:$0xff]  ;;  %v347_v5 = vld [vmem:[%s1584_s7 + $0x50] sm:$0xff]  ;;  %344 = vst [vmem:[%s1589_s8 + $0x18] sm:$0xff] %v343_v3 }
  0x19   : > { %346 = vst [vmem:[%s1589_s8 + $0x20] sm:$0xff] %v345_v4  ;;  %348 = vst [vmem:[%s1589_s8 + $0x28] sm:$0xff] %v347_v5  ;;  %v349_v6 = vld [vmem:[%s1584_s7 + $0x60] sm:$0xff]  ;;  %v351_v7 = vld [vmem:[%s1584_s7 + $0x70] sm:$0xff] }
  0x1a   : > { %v353_v8 = vld [vmem:[%s1584_s7 + $0x80] sm:$0xff]  ;;  %350 = vst [vmem:[%s1589_s8 + $0x30] sm:$0xff] %v349_v6  ;;  %352 = vst [vmem:[%s1589_s8 + $0x38] sm:$0xff] %v351_v7  ;;  %v355_v9 = vld [vmem:[%s1584_s7 + $0x90] sm:$0xff] }
  0x1b   : > { %354 = vst [vmem:[%s1589_s8 + $0x40] sm:$0xff] %v353_v8  ;;  %v357_v10 = vld [vmem:[%s1584_s7 + $0xa0] sm:$0xff]  ;;  %v359_v11 = vld [vmem:[%s1584_s7 + $0xb0] sm:$0xff]  ;;  %356 = vst [vmem:[%s1589_s8 + $0x48] sm:$0xff] %v355_v9 }
  0x1c   : > { %358 = vst [vmem:[%s1589_s8 + $0x50] sm:$0xff] %v357_v10  ;;  %360 = vst [vmem:[%s1589_s8 + $0x58] sm:$0xff] %v359_v11  ;;  %v361_v12 = vld [vmem:[%s1584_s7 + $0xc0] sm:$0xff]  ;;  %v363_v13 = vld [vmem:[%s1584_s7 + $0xd0] sm:$0xff] }
  0x1d   : > { %v365_v14 = vld [vmem:[%s1584_s7 + $0xe0] sm:$0xff]  ;;  %362 = vst [vmem:[%s1589_s8 + $0x60] sm:$0xff] %v361_v12  ;;  %364 = vst [vmem:[%s1589_s8 + $0x68] sm:$0xff] %v363_v13  ;;  %v367_v15 = vld [vmem:[%s1584_s7 + $0xf0] sm:$0xff] }
  0x1e   : > { %366 = vst [vmem:[%s1589_s8 + $0x70] sm:$0xff] %v365_v14  ;;  %v369_v16 = vld [vmem:[%s1584_s7 + $0x100] sm:$0xff]  ;;  %v371_v17 = vld [vmem:[%s1584_s7 + $0x110] sm:$0xff]  ;;  %368 = vst [vmem:[%s1589_s8 + $0x78] sm:$0xff] %v367_v15 }
  0x1f   : > { %370 = vst [vmem:[%s1589_s8 + $0x80] sm:$0xff] %v369_v16  ;;  %372 = vst [vmem:[%s1589_s8 + $0x88] sm:$0xff] %v371_v17  ;;  %v373_v18 = vld [vmem:[%s1584_s7 + $0x120] sm:$0xff]  ;;  %v375_v19 = vld [vmem:[%s1584_s7 + $0x130] sm:$0xff] }
  0x20   : > { %v377_v20 = vld [vmem:[%s1584_s7 + $0x140] sm:$0xff]  ;;  %374 = vst [vmem:[%s1589_s8 + $0x90] sm:$0xff] %v373_v18  ;;  %376 = vst [vmem:[%s1589_s8 + $0x98] sm:$0xff] %v375_v19  ;;  %v379_v21 = vld [vmem:[%s1584_s7 + $0x150] sm:$0xff] }
  0x21   : > { %378 = vst [vmem:[%s1589_s8 + $0xa0] sm:$0xff] %v377_v20  ;;  %v381_v22 = vld [vmem:[%s1584_s7 + $0x160] sm:$0xff]  ;;  %v383_v23 = vld [vmem:[%s1584_s7 + $0x170] sm:$0xff]  ;;  %380 = vst [vmem:[%s1589_s8 + $0xa8] sm:$0xff] %v379_v21 }
  0x22   : > { %382 = vst [vmem:[%s1589_s8 + $0xb0] sm:$0xff] %v381_v22  ;;  %384 = vst [vmem:[%s1589_s8 + $0xb8] sm:$0xff] %v383_v23  ;;  %v385_v24 = vld [vmem:[%s1584_s7 + $0x180] sm:$0xff]  ;;  %v387_v25 = vld [vmem:[%s1584_s7 + $0x190] sm:$0xff] }
  0x23   : > { %v389_v26 = vld [vmem:[%s1584_s7 + $0x1a0] sm:$0xff]  ;;  %386 = vst [vmem:[%s1589_s8 + $0xc0] sm:$0xff] %v385_v24  ;;  %388 = vst [vmem:[%s1589_s8 + $0xc8] sm:$0xff] %v387_v25  ;;  %v391_v27 = vld [vmem:[%s1584_s7 + $0x1b0] sm:$0xff] }
  0x24   : > { %390 = vst [vmem:[%s1589_s8 + $0xd0] sm:$0xff] %v389_v26  ;;  %v393_v28 = vld [vmem:[%s1584_s7 + $0x1c0] sm:$0xff]  ;;  %v395_v29 = vld [vmem:[%s1584_s7 + $0x1d0] sm:$0xff]  ;;  %392 = vst [vmem:[%s1589_s8 + $0xd8] sm:$0xff] %v391_v27 }
  0x25   : > { %394 = vst [vmem:[%s1589_s8 + $0xe0] sm:$0xff] %v393_v28  ;;  %396 = vst [vmem:[%s1589_s8 + $0xe8] sm:$0xff] %v395_v29  ;;  %v397_v30 = vld [vmem:[%s1584_s7 + $0x1e0] sm:$0xff]  ;;  %v399_v31 = vld [vmem:[%s1584_s7 + $0x1f0] sm:$0xff] }
  0x26   : > { %v401_v32 = vld [vmem:[%s1584_s7 + $0x200] sm:$0xff]  ;;  %398 = vst [vmem:[%s1589_s8 + $0xf0] sm:$0xff] %v397_v30  ;;  %400 = vst [vmem:[%s1589_s8 + $0xf8] sm:$0xff] %v399_v31  ;;  %v403_v33 = vld [vmem:[%s1584_s7 + $0x210] sm:$0xff] }
  0x27   : > { %402 = vst [vmem:[%s1589_s8 + $0x100] sm:$0xff] %v401_v32  ;;  %v405_v34 = vld [vmem:[%s1584_s7 + $0x220] sm:$0xff]  ;;  %v407_v35 = vld [vmem:[%s1584_s7 + $0x230] sm:$0xff]  ;;  %404 = vst [vmem:[%s1589_s8 + $0x108] sm:$0xff] %v403_v33 }
  0x28   : > { %406 = vst [vmem:[%s1589_s8 + $0x110] sm:$0xff] %v405_v34  ;;  %408 = vst [vmem:[%s1589_s8 + $0x118] sm:$0xff] %v407_v35  ;;  %v409_v36 = vld [vmem:[%s1584_s7 + $0x240] sm:$0xff]  ;;  %v411_v37 = vld [vmem:[%s1584_s7 + $0x250] sm:$0xff] }
  0x29   : > { %v413_v38 = vld [vmem:[%s1584_s7 + $0x260] sm:$0xff]  ;;  %410 = vst [vmem:[%s1589_s8 + $0x120] sm:$0xff] %v409_v36  ;;  %412 = vst [vmem:[%s1589_s8 + $0x128] sm:$0xff] %v411_v37  ;;  %v415_v39 = vld [vmem:[%s1584_s7 + $0x270] sm:$0xff] }
  0x2a   : > { %414 = vst [vmem:[%s1589_s8 + $0x130] sm:$0xff] %v413_v38  ;;  %v417_v40 = vld [vmem:[%s1584_s7 + $0x280] sm:$0xff]  ;;  %v419_v41 = vld [vmem:[%s1584_s7 + $0x290] sm:$0xff]  ;;  %416 = vst [vmem:[%s1589_s8 + $0x138] sm:$0xff] %v415_v39 }
  0x2b   : > { %418 = vst [vmem:[%s1589_s8 + $0x140] sm:$0xff] %v417_v40  ;;  %420 = vst [vmem:[%s1589_s8 + $0x148] sm:$0xff] %v419_v41  ;;  %v421_v42 = vld [vmem:[%s1584_s7 + $0x2a0] sm:$0xff]  ;;  %v423_v43 = vld [vmem:[%s1584_s7 + $0x2b0] sm:$0xff] }
  0x2c   : > { %v425_v44 = vld [vmem:[%s1584_s7 + $0x2c0] sm:$0xff]  ;;  %422 = vst [vmem:[%s1589_s8 + $0x150] sm:$0xff] %v421_v42  ;;  %424 = vst [vmem:[%s1589_s8 + $0x158] sm:$0xff] %v423_v43  ;;  %v427_v45 = vld [vmem:[%s1584_s7 + $0x2d0] sm:$0xff] }
  0x2d   : > { %426 = vst [vmem:[%s1589_s8 + $0x160] sm:$0xff] %v425_v44  ;;  %v429_v46 = vld [vmem:[%s1584_s7 + $0x2e0] sm:$0xff]  ;;  %v431_v47 = vld [vmem:[%s1584_s7 + $0x2f0] sm:$0xff]  ;;  %428 = vst [vmem:[%s1589_s8 + $0x168] sm:$0xff] %v427_v45 }
  0x2e   : > { %430 = vst [vmem:[%s1589_s8 + $0x170] sm:$0xff] %v429_v46  ;;  %432 = vst [vmem:[%s1589_s8 + $0x178] sm:$0xff] %v431_v47  ;;  %v433_v48 = vld [vmem:[%s1584_s7 + $0x300] sm:$0xff]  ;;  %v435_v49 = vld [vmem:[%s1584_s7 + $0x310] sm:$0xff] }
  0x2f   : > { %v437_v50 = vld [vmem:[%s1584_s7 + $0x320] sm:$0xff]  ;;  %434 = vst [vmem:[%s1589_s8 + $0x180] sm:$0xff] %v433_v48  ;;  %436 = vst [vmem:[%s1589_s8 + $0x188] sm:$0xff] %v435_v49  ;;  %v439_v51 = vld [vmem:[%s1584_s7 + $0x330] sm:$0xff] }
  0x30   : > { %438 = vst [vmem:[%s1589_s8 + $0x190] sm:$0xff] %v437_v50  ;;  %v441_v52 = vld [vmem:[%s1584_s7 + $0x340] sm:$0xff]  ;;  %v443_v53 = vld [vmem:[%s1584_s7 + $0x350] sm:$0xff]  ;;  %440 = vst [vmem:[%s1589_s8 + $0x198] sm:$0xff] %v439_v51 }
  0x31   : > { %442 = vst [vmem:[%s1589_s8 + $0x1a0] sm:$0xff] %v441_v52  ;;  %444 = vst [vmem:[%s1589_s8 + $0x1a8] sm:$0xff] %v443_v53  ;;  %v445_v54 = vld [vmem:[%s1584_s7 + $0x360] sm:$0xff]  ;;  %v447_v55 = vld [vmem:[%s1584_s7 + $0x370] sm:$0xff] }
  0x32   : > { %v449_v56 = vld [vmem:[%s1584_s7 + $0x380] sm:$0xff]  ;;  %446 = vst [vmem:[%s1589_s8 + $0x1b0] sm:$0xff] %v445_v54  ;;  %448 = vst [vmem:[%s1589_s8 + $0x1b8] sm:$0xff] %v447_v55  ;;  %v451_v57 = vld [vmem:[%s1584_s7 + $0x390] sm:$0xff] }
  0x33   : > { %450 = vst [vmem:[%s1589_s8 + $0x1c0] sm:$0xff] %v449_v56  ;;  %v453_v58 = vld [vmem:[%s1584_s7 + $0x3a0] sm:$0xff]  ;;  %v455_v59 = vld [vmem:[%s1584_s7 + $0x3b0] sm:$0xff]  ;;  %452 = vst [vmem:[%s1589_s8 + $0x1c8] sm:$0xff] %v451_v57 }
  0x34   : > { %454 = vst [vmem:[%s1589_s8 + $0x1d0] sm:$0xff] %v453_v58  ;;  %456 = vst [vmem:[%s1589_s8 + $0x1d8] sm:$0xff] %v455_v59  ;;  %v457_v60 = vld [vmem:[%s1584_s7 + $0x3c0] sm:$0xff]  ;;  %v459_v61 = vld [vmem:[%s1584_s7 + $0x3d0] sm:$0xff] }
  0x35   : > { %v461_v62 = vld [vmem:[%s1584_s7 + $0x3e0] sm:$0xff]  ;;  %458 = vst [vmem:[%s1589_s8 + $0x1e0] sm:$0xff] %v457_v60  ;;  %460 = vst [vmem:[%s1589_s8 + $0x1e8] sm:$0xff] %v459_v61  ;;  %v463_v63 = vld [vmem:[%s1584_s7 + $0x3f0] sm:$0xff] }
  0x36   : > { %462 = vst [vmem:[%s1589_s8 + $0x1f0] sm:$0xff] %v461_v62  ;;  %464 = vst [vmem:[%s1589_s8 + $0x1f8] sm:$0xff] %v463_v63 }
  0x37 PF: > { %p1208_p7 = scmp.ge.s32.totalorder %s1501_s18, 1  ;;  %p477_p8 = scmp.lt.s32.totalorder %s1501_s18, 19 }
  0x39   : > { %p478_p9 = pnand %p1208_p7, %p477_p8 }
  0x3a   : > { %s484_s9 = sand.u32 (!%p478_p9), 1, %s1477_s12   ;;  %s1210_s10 = sshll.u32 (!%p478_p9), %s1485_s14, 2 }
  0x3b   : > { %481 = sbr.rel (%p478_p9) target bundleno = 355 (0x163), region = 66  ;;  %s1209_s11 = sshll.u32 (!%p478_p9), %s484_s9, 9 }
  0x3c   : > { %p527_p10 = scmp.lt.s32.totalorder (!%p478_p9), %s1210_s10, 35  ;;  %s1212_s21 = sshll.u32 (!%p478_p9), %s1489_s15, 1 }
  0x3d   : > { %p537_p11 = scmp.lt.s32.totalorder (!%p478_p9), %s1212_s21, 3  ;;  %s1738_s5 = scalar_lea.vmem (!%p478_p9), [#allocation3], %s1209_s11 }
  0x3e   : > { %p1215_p12 = scmp.ne.s32.totalorder (!%p478_p9), %s1485_s14, 0 }
  0x40   : > { %s1852_s10 = smov (!%p527_p10, %s1210_s10), 35  ;;  %s1854_s21 = smov (!%p537_p11, %s1212_s21), 3 }
  0x41   : > { %s1211_s22 = sshll.u32 %s1852_s10, 2  ;;  %s539_s12 = scalar_lea.vmem %s1837_s2, %s1854_s21 }
  0x42   : > { %s1724_s26 = scalar_lea.vmem %s1835_s0, %s1211_s22  ;;  %s1214_s29 = sshll.u32 %s1854_s21, 2 }
  0x43   : > { %s1736_s15 = scalar_lea.vmem %s1838_s3, %s1214_s29  ;;  %554 = sbr.rel (%p1215_p12) target bundleno = 74 (0x4a), region = 74 }
  0x48   : > { %v1503_v0 = vmov 0.0  }
  0x49   : > { %555 = vst [vmem:[#allocation2] sm:$0xff] %v1503_v0  ;;  %556 = vst [vmem:[#allocation2 + $0x8] sm:$0xff] %v1503_v0 }
  0x4a PF: > { %v1347_v1 = vld [vmem:[%s1738_s5 + $0x74] ss:$8 sps:$4 sm:$0xff]   ;;  %v1351_v3 = vld [vmem:[%s1738_s5 + $0x70] ss:$8 sps:$4 sm:$0xff]   ;;  %v1353_v5 = vld [vmem:[%s1738_s5 + $0x64] ss:$8 sps:$4 sm:$0xff]  }
  0x4b   : > { %v1349_v2 = vld [vmem:[%s1738_s5 + $0x174] ss:$8 sps:$4 sm:$0xff]   ;;  %959 = vmatprep.subr.bf16.mxu0 %v1347_v1  ;;  %v1352_v4 = vld [vmem:[%s1738_s5 + $0x170] ss:$8 sps:$4 sm:$0xff]   ;;  %v1355_v6 = vld [vmem:[%s1738_s5 + $0x164] ss:$8 sps:$4 sm:$0xff]  }
  0x4c   : > { %1000 = vmatprep.subr.bf16.mxu1 %v1349_v2  ;;  %960 = vmatpush1.bf16.msra.mxu0 %v1351_v3  ;;  %v1357_v7 = vld [vmem:[%s1738_s5 + $0x60] ss:$8 sps:$4 sm:$0xff]   ;;  %v1359_v9 = vld [vmem:[%s1738_s5 + $0x54] ss:$8 sps:$4 sm:$0xff]   ;;  %v1363_v11 = vld [vmem:[%s1738_s5 + $0x50] ss:$8 sps:$4 sm:$0xff]  }
  0x4d   : > { %1001 = vmatpush1.bf16.msra.mxu1 %v1352_v4  ;;  %961 = vmatprep.subr.bf16.mxu0 %v1353_v5  ;;  %v1358_v8 = vld [vmem:[%s1738_s5 + $0x160] ss:$8 sps:$4 sm:$0xff]   ;;  %v1361_v10 = vld [vmem:[%s1738_s5 + $0x154] ss:$8 sps:$4 sm:$0xff]   ;;  %v1364_v12 = vld [vmem:[%s1738_s5 + $0x150] ss:$8 sps:$4 sm:$0xff]  }
  0x4e   : > { %1002 = vmatprep.subr.bf16.mxu1 %v1355_v6  ;;  %v1365_v13 = vld [vmem:[%s1738_s5 + $0x44] ss:$8 sps:$4 sm:$0xff]   ;;  %v1369_v15 = vld [vmem:[%s1738_s5 + $0x40] ss:$8 sps:$4 sm:$0xff]   ;;  %v1371_v17 = vld [vmem:[%s1738_s5 + $0x34] ss:$8 sps:$4 sm:$0xff]  }
  0x4f   : > { %v1367_v14 = vld [vmem:[%s1738_s5 + $0x144] ss:$8 sps:$4 sm:$0xff]   ;;  %v1370_v16 = vld [vmem:[%s1738_s5 + $0x140] ss:$8 sps:$4 sm:$0xff]   ;;  %v1373_v18 = vld [vmem:[%s1738_s5 + $0x134] ss:$8 sps:$4 sm:$0xff]  }
  0x50   : > { %962 = vmatpush1.bf16.msra.mxu0 %v1357_v7  ;;  %v1375_v19 = vld [vmem:[%s1738_s5 + $0x30] ss:$8 sps:$4 sm:$0xff]   ;;  %v1377_v21 = vld [vmem:[%s1738_s5 + $0x24] ss:$8 sps:$4 sm:$0xff]   ;;  %v1381_v23 = vld [vmem:[%s1738_s5 + $0x20] ss:$8 sps:$4 sm:$0xff]  }
  0x51   : > { %1003 = vmatpush1.bf16.msra.mxu1 %v1358_v8  ;;  %963 = vmatprep.subr.bf16.mxu0 %v1359_v9  ;;  %v1376_v20 = vld [vmem:[%s1738_s5 + $0x130] ss:$8 sps:$4 sm:$0xff]   ;;  %v1379_v22 = vld [vmem:[%s1738_s5 + $0x124] ss:$8 sps:$4 sm:$0xff]   ;;  %v1382_v24 = vld [vmem:[%s1738_s5 + $0x120] ss:$8 sps:$4 sm:$0xff]  }
  0x52   : > { %1004 = vmatprep.subr.bf16.mxu1 %v1361_v10  ;;  %v1383_v25 = vld [vmem:[%s1738_s5 + $0x14] ss:$8 sps:$4 sm:$0xff]   ;;  %v1387_v27 = vld [vmem:[%s1738_s5 + $0x10] ss:$8 sps:$4 sm:$0xff]   ;;  %v1389_v29 = vld [vmem:[%s1738_s5 + $0x4] ss:$8 sps:$4 sm:$0xff]  }
  0x53   : > { %v1385_v26 = vld [vmem:[%s1738_s5 + $0x114] ss:$8 sps:$4 sm:$0xff]   ;;  %v1388_v28 = vld [vmem:[%s1738_s5 + $0x110] ss:$8 sps:$4 sm:$0xff]   ;;  %v1391_v30 = vld [vmem:[%s1738_s5 + $0x104] ss:$8 sps:$4 sm:$0xff]  }
  0x54   : > { %964 = vmatpush1.bf16.msra.mxu0 %v1363_v11  ;;  %v1393_v31 = vld [vmem:[%s1738_s5] ss:$8 sps:$4 sm:$0xff]   ;;  %v1395_v33 = vld [vmem:[%s1738_s5 + $0xf4] ss:$8 sps:$4 sm:$0xff]   ;;  %v1399_v35 = vld [vmem:[%s1738_s5 + $0xf0] ss:$8 sps:$4 sm:$0xff]  }
  0x55   : > { %1005 = vmatpush1.bf16.msra.mxu1 %v1364_v12  ;;  %965 = vmatprep.subr.bf16.mxu0 %v1365_v13  ;;  %v1394_v32 = vld [vmem:[%s1738_s5 + $0x100] ss:$8 sps:$4 sm:$0xff]   ;;  %v1397_v34 = vld [vmem:[%s1738_s5 + $0x1f4] ss:$8 sps:$4 sm:$0xff]   ;;  %v1400_v36 = vld [vmem:[%s1738_s5 + $0x1f0] ss:$8 sps:$4 sm:$0xff]  }
  0x56   : > { %1006 = vmatprep.subr.bf16.mxu1 %v1367_v14  ;;  %v1401_v37 = vld [vmem:[%s1738_s5 + $0xe4] ss:$8 sps:$4 sm:$0xff]   ;;  %v1405_v39 = vld [vmem:[%s1738_s5 + $0xe0] ss:$8 sps:$4 sm:$0xff]   ;;  %v1407_v41 = vld [vmem:[%s1738_s5 + $0xd4] ss:$8 sps:$4 sm:$0xff]  }
  0x57   : > { %v1403_v38 = vld [vmem:[%s1738_s5 + $0x1e4] ss:$8 sps:$4 sm:$0xff]   ;;  %v1406_v40 = vld [vmem:[%s1738_s5 + $0x1e0] ss:$8 sps:$4 sm:$0xff]   ;;  %v1409_v42 = vld [vmem:[%s1738_s5 + $0x1d4] ss:$8 sps:$4 sm:$0xff]  }
  0x58   : > { %966 = vmatpush1.bf16.msra.mxu0 %v1369_v15  ;;  %v1411_v43 = vld [vmem:[%s1738_s5 + $0xd0] ss:$8 sps:$4 sm:$0xff]   ;;  %v1413_v45 = vld [vmem:[%s1738_s5 + $0xc4] ss:$8 sps:$4 sm:$0xff]   ;;  %v1417_v50 = vld [vmem:[%s1738_s5 + $0xc0] ss:$8 sps:$4 sm:$0xff]  }
  0x59   : > { %1007 = vmatpush1.bf16.msra.mxu1 %v1370_v16  ;;  %967 = vmatprep.subr.bf16.mxu0 %v1371_v17  ;;  %v1412_v44 = vld [vmem:[%s1738_s5 + $0x1d0] ss:$8 sps:$4 sm:$0xff]   ;;  %v1415_v46 = vld [vmem:[%s1738_s5 + $0x1c4] ss:$8 sps:$4 sm:$0xff]   ;;  %v1418_v51 = vld [vmem:[%s1738_s5 + $0x1c0] ss:$8 sps:$4 sm:$0xff]  }
  0x5a   : > { %1008 = vmatprep.subr.bf16.mxu1 %v1373_v18  ;;  %v559_v47 = vld [vmem:[%s1724_s26] sm:$0xff]  ;;  %v560_v49 = vld [vmem:[%s1724_s26 + $0x8] sm:$0xff]  ;;  %v1425_v57 = vld [vmem:[%s1738_s5 + $0xa4] ss:$8 sps:$4 sm:$0xff]   ;;  %p1284_p13 = scmp.ne.s32.totalorder %s1485_s14, 8 }
  0x5b   : > { %v1217_v48 = vcombine.high %v559_v47, %v559_v47  ;;  %v1219_v52 = vcombine.high %v560_v49, %v560_v49  ;;  %v1419_v53 = vld [vmem:[%s1738_s5 + $0xb4] ss:$8 sps:$4 sm:$0xff]   ;;  %v1423_v55 = vld [vmem:[%s1738_s5 + $0xb0] ss:$8 sps:$4 sm:$0xff]   ;;  %v1427_v58 = vld [vmem:[%s1738_s5 + $0x1a4] ss:$8 sps:$4 sm:$0xff]   ;;  %v1216_v5 = vcombine.low %v559_v47, %v559_v47  ;;  %v1218_v6 = vcombine.low %v560_v49, %v560_v49 }
  0x5c   : > { %968 = vmatpush1.bf16.msra.mxu0 %v1375_v19  ;;  %v1421_v54 = vld [vmem:[%s1738_s5 + $0x1b4] ss:$8 sps:$4 sm:$0xff]   ;;  %v1424_v56 = vld [vmem:[%s1738_s5 + $0x1b0] ss:$8 sps:$4 sm:$0xff]   ;;  %v1429_v59 = vld [vmem:[%s1738_s5 + $0xa0] ss:$8 sps:$4 sm:$0xff]  }
  0x5d   : > { %1009 = vmatpush1.bf16.msra.mxu1 %v1376_v20  ;;  %969 = vmatprep.subr.bf16.mxu0 %v1377_v21  ;;  %v1430_v60 = vld [vmem:[%s1738_s5 + $0x1a0] ss:$8 sps:$4 sm:$0xff]   ;;  %v1431_v61 = vld [vmem:[%s1738_s5 + $0x94] ss:$8 sps:$4 sm:$0xff]   ;;  %v1435_v63 = vld [vmem:[%s1738_s5 + $0x90] ss:$8 sps:$4 sm:$0xff]  }
  0x5e   : > { %1010 = vmatprep.subr.bf16.mxu1 %v1379_v22  ;;  %991 = vmatprep.mubr.bf16.mxu0 %v1217_v48  ;;  %v1433_v62 = vld [vmem:[%s1738_s5 + $0x194] ss:$8 sps:$4 sm:$0xff]   ;;  %v1436_v0 = vld [vmem:[%s1738_s5 + $0x190] ss:$8 sps:$4 sm:$0xff]   ;;  %v1437_v1 = vld [vmem:[%s1738_s5 + $0x84] ss:$8 sps:$4 sm:$0xff]  }
  0x5f   : > { %1032 = vmatprep.mubr.bf16.mxu1 %v1219_v52  ;;  %v1439_v2 = vld [vmem:[%s1738_s5 + $0x184] ss:$8 sps:$4 sm:$0xff]   ;;  %v1441_v3 = vld [vmem:[%s1738_s5 + $0x80] ss:$8 sps:$4 sm:$0xff]   ;;  %v557_v8 = vld [vmem:[#allocation2] sm:$0xff] }
  0x60   : > { %970 = vmatpush1.bf16.msra.mxu0 %v1381_v23  ;;  %v1442_v4 = vld [vmem:[%s1738_s5 + $0x180] ss:$8 sps:$4 sm:$0xff]   ;;  %v558_v12 = vld [vmem:[#allocation2 + $0x8] sm:$0xff] }
  0x61   : > { %1011 = vmatpush1.bf16.msra.mxu1 %v1382_v24  ;;  %971 = vmatprep.subr.bf16.mxu0 %v1383_v25 }
  0x62   : > { %1012 = vmatprep.subr.bf16.mxu1 %v1385_v26 }
  0x64   : > { %972 = vmatpush1.bf16.msra.mxu0 %v1387_v27 }
  0x65   : > { %1013 = vmatpush1.bf16.msra.mxu1 %v1388_v28  ;;  %973 = vmatprep.subr.bf16.mxu0 %v1389_v29 }
  0x66   : > { %1014 = vmatprep.subr.bf16.mxu1 %v1391_v30 }
  0x68   : > { %974 = vmatpush1.bf16.msra.mxu0 %v1393_v31 }
  0x69   : > { %1015 = vmatpush1.bf16.msra.mxu1 %v1394_v32  ;;  %975 = vmatprep.subr.bf16.mxu0 %v1395_v33 }
  0x6a   : > { %1016 = vmatprep.subr.bf16.mxu1 %v1397_v34 }
  0x6c   : > { %976 = vmatpush2.bf16.msra.mxu0 %v1399_v35 }
  0x6d   : > { %1017 = vmatpush2.bf16.msra.mxu1 %v1400_v36  ;;  %977 = vmatprep.subr.bf16.mxu0 %v1401_v37 }
  0x6e   : > { %1018 = vmatprep.subr.bf16.mxu1 %v1403_v38 }
  0x70   : > { %978 = vmatpush2.bf16.msra.mxu0 %v1405_v39 }
  0x71   : > { %1019 = vmatpush2.bf16.msra.mxu1 %v1406_v40  ;;  %979 = vmatprep.subr.bf16.mxu0 %v1407_v41 }
  0x72   : > { %1020 = vmatprep.subr.bf16.mxu1 %v1409_v42 }
  0x74   : > { %980 = vmatpush2.bf16.msra.mxu0 %v1411_v43 }
  0x75   : > { %1021 = vmatpush2.bf16.msra.mxu1 %v1412_v44  ;;  %981 = vmatprep.subr.bf16.mxu0 %v1413_v45 }
  0x76   : > { %1022 = vmatprep.subr.bf16.mxu1 %v1415_v46 }
  0x78   : > { %982 = vmatpush2.bf16.msra.mxu0 %v1417_v50 }
  0x79   : > { %1023 = vmatpush2.bf16.msra.mxu1 %v1418_v51  ;;  %983 = vmatprep.subr.bf16.mxu0 %v1419_v53 }
  0x7a   : > { %1024 = vmatprep.subr.bf16.mxu1 %v1421_v54 }
  0x7c   : > { %984 = vmatpush2.bf16.msra.mxu0 %v1423_v55 }
  0x7d   : > { %1025 = vmatpush2.bf16.msra.mxu1 %v1424_v56  ;;  %985 = vmatprep.subr.bf16.mxu0 %v1425_v57 }
  0x7e   : > { %1026 = vmatprep.subr.bf16.mxu1 %v1427_v58 }
  0x80   : > { %986 = vmatpush2.bf16.msra.mxu0 %v1429_v59 }
  0x81   : > { %1027 = vmatpush2.bf16.msra.mxu1 %v1430_v60  ;;  %987 = vmatprep.subr.bf16.mxu0 %v1431_v61 }
  0x82   : > { %1028 = vmatprep.subr.bf16.mxu1 %v1433_v62 }
  0x84   : > { %988 = vmatpush2.bf16.msra.mxu0 %v1435_v63 }
  0x85   : > { %1029 = vmatpush2.bf16.msra.mxu1 %v1436_v0  ;;  %989 = vmatprep.subr.bf16.mxu0 %v1437_v1 }
  0x86   : > { %1030 = vmatprep.subr.bf16.mxu1 %v1439_v2 }
  0x88   : > { %990 = vmatpush2.bf16.msra.mxu0 %v1441_v3 }
  0x89   : > { %1031 = vmatpush2.bf16.msra.mxu1 %v1442_v4 }
  0x8b   : > { %992 = vmatmul.mubr.bf16.vlgmr.msra.gmra.mxu0 %v1216_v5 }
  0x8c   : > { %1033 = vmatmul.mubr.bf16.vlgmr.msra.gmra.mxu1 %v1218_v6 }
 0x14b   : > { %v993_v7 = vpop.f32.mrf.mxu0 }
 0x14c   : > { %v1034_v9 = vpop.f32.mrf.mxu1 }
 0x14d   : > { %v1035_v10 = vadd.f32 %v1034_v9, %v993_v7  ;;  %v995_v11 = vpop.f32.mrf.mxu0 }
 0x14e   : > { %v1036_v13 = vpop.f32.mrf.mxu1 }
 0x14f   : > { %v1041_v14 = vadd.f32 %v1035_v10, %v557_v8  ;;  %v1037_v15 = vadd.f32 %v1036_v13, %v995_v11  ;;  %v997_v16 = vpop.f32.mrf.mxu0  ;;  %1048 = sbr.rel (%p1284_p13) target bundleno = 355 (0x163), region = 78 }
 0x150   : > { %v1038_v17 = vpop.f32.mrf.mxu1 }
 0x151   : > { %1043 = vst [vmem:[#allocation2] sm:$0xff] %v1041_v14  ;;  %v1042_v18 = vadd.f32 %v1037_v15, %v558_v12  ;;  %v998_v19 = vpop.f32.mrf.mxu0 }
 0x152   : > { %v1039_v20 = vpop.f32.mrf.mxu1 }
 0x153   : > { %1044 = vst [vmem:[#allocation2 + $0x8] sm:$0xff] %v1042_v18 }
 0x154   : > { %v1053_v21 = vlaneseq  ;;  %v1051_v23 = vld [vmem:[%s539_s12] sm:$0x3] }
 0x156   : > { %v1054_v22 = vshrl.u32 %v1053_v21, 7 }
 0x158   : > { %v1055_v24 = vsub.s32 0, %v1054_v22  ;;  %v1059_v25 = vsub.s32 1, %v1054_v22  ;;  %v1049_v26 = vld [vmem:[#allocation2] sm:$0xff] }
 0x15a   : > { %v1050_v27 = vld [vmem:[#allocation2 + $0x8] sm:$0xff]  ;;  %v1056_v28 = vrot.slane %v1051_v23, %v1055_v24  ;;  %v1060_v29 = vrot.slane %v1051_v23, %v1059_v25 }
 0x15c   : > { %v1063_v30 = vadd.f32 %v1056_v28, %v1049_v26  ;;  %v1064_v31 = vadd.f32 %v1060_v29, %v1050_v27 }
 0x15e   : > { %v1065_v32 = vmax.f32 %v1063_v30, 0.0  ;;  %v1066_v33 = vmax.f32 %v1064_v31, 0.0 }
 0x160   : > { %v1289_v34 = vpack.c.bf16 %v1066_v33, %v1065_v32 }
 0x162   : > { %1075 = vst [vmem:[%s1736_s15] sm:$0xff] %v1289_v34 }
 0x163 PF: > { %s13_s18 = sadd.s32 1, %s1501_s18   ;;  %s1839_s12 = smov %s1481_s13 }
 0x164   : > { %p10_p0 = scmp.ge.s32.totalorder %s13_s18, 20   ;;  %s1840_s13 = smov %s1575_s25 }
 0x165   : > { %s1841_s14 = smov %s1493_s16  ;;  %s1842_s15 = smov %s1497_s17 }
 0x166   : > { %s1843_s16 = smov %s1846_s19  ;;  %s1844_s17 = smov %s1850_s20 }
 0x167   :  { %12 = sbr.rel (!%p10_p0) target bundleno = 4 (0x4), region = 119 }

</bundles_post_ra>
